<compile_context>
chip_gen: v5e
topology: v5e:2x2
jax: 0.10.0
libtpu: 0.0.40
codegen_flags: <defaults>
</compile_context>

<pallas_src>
import functools
import math

import jax
import jax.numpy as jnp
from jax.experimental import pallas as pl
from jax.experimental.pallas import tpu as pltpu

OUT_CHANNELS = 256
DILATIONS = (12, 24, 36)
BN_EPS = 1e-5
LANE = 128


def _pick_row_tile(h):
    # Row-strip height: small enough that per-strip (TH*W, 256) f32 values stay a
    # modest fraction of the vreg file; large enough to amortize grid-step cost.
    for t in (4, 2, 1):
        if h % t == 0:
            return t
    return 1


# ---------------- Kernel A: fused ASPP (1x1 + dilated 3x3 x3 + pooling) + projection ----------


def _aspp_proj_kernel(xp_ref, b0w_ref, b0s_ref, b0o_ref,
                      dilw_ref, dils_ref, dilo_ref,
                      poolw_ref, pools_ref, poolo_ref,
                      projw_ref, projs_ref, projo_ref,
                      o_ref,
                      pool_scr, pacc_scr, conv_scr,
                      *, H, W, TH, P, dilations):
    cin = xp_ref.shape[-1]
    cout = projw_ref.shape[-1]
    t = pl.program_id(1)
    r0 = pl.multiple_of(t * TH, TH)

    # Pooling branch folded into a per-image projection bias: mean(x) -> 1x1 conv
    # -> BN -> ReLU -> @ proj_w[4].  Computed once per image (strip 0), reused via
    # persistent VMEM scratch for the remaining strips of the same image.
    @pl.when(t == 0)
    def _():
        interior = xp_ref[0, P:P + H, P:P + W, :].reshape(H * W, cin)
        mean = jnp.mean(interior, axis=0, keepdims=True)                 # (1, cin)
        pooled = jnp.dot(mean, poolw_ref[...],
                         preferred_element_type=jnp.float32)             # (1, 256)
        pooled = jnp.maximum(pooled * pools_ref[...] + poolo_ref[...], 0.0)
        pool_scr[...] = jnp.dot(pooled, projw_ref[4],
                                preferred_element_type=jnp.float32)      # (1, 256)

    # Branch 0: 1x1 conv + BN + ReLU, immediately projected into the accumulator.
    xs = xp_ref[0, pl.ds(P + r0, TH), P:P + W, :].reshape(TH * W, cin)
    b0 = jnp.dot(xs, b0w_ref[...], preferred_element_type=jnp.float32)
    b0 = jnp.maximum(b0 * b0s_ref[...] + b0o_ref[...], 0.0)
    pacc_scr[...] = (jnp.dot(b0, projw_ref[0],
                             preferred_element_type=jnp.float32)
                     + pool_scr[...])

    # Dilated 3x3 branches.  Taps whose receptive field lies entirely in the zero
    # padding are skipped at trace time (for dilation >= H/W only the center tap
    # contributes), so no DMA / MXU work on pure zeros.
    for i, d in enumerate(dilations):
        first = True
        for kh in range(3):
            dh = (kh - 1) * d
            if dh <= -H or dh >= H:
                continue
            for kw in range(3):
                dw = (kw - 1) * d
                if dw <= -W or dw >= W:
                    continue
                patch = xp_ref[0, pl.ds(P + r0 + dh, TH),
                               P + dw:P + dw + W, :].reshape(TH * W, cin)
                contrib = jnp.dot(patch, dilw_ref[i * 9 + kh * 3 + kw],
                                  preferred_element_type=jnp.float32)
                if first:
                    conv_scr[...] = contrib
                    first = False
                else:
                    conv_scr[...] += contrib
        bi = jnp.maximum(conv_scr[...] * dils_ref[i] + dilo_ref[i], 0.0)
        pacc_scr[...] += jnp.dot(bi, projw_ref[i + 1],
                                 preferred_element_type=jnp.float32)

    # Projection BN + ReLU epilogue (Dropout(0.1) is identity in eval mode).
    proj = jnp.maximum(pacc_scr[...] * projs_ref[...] + projo_ref[...], 0.0)
    o_ref[...] = proj.reshape(1, TH, W, cout)


def aspp_project(x_nhwc, params):
    N, H, W, cin = x_nhwc.shape
    C = OUT_CHANNELS
    P = max(DILATIONS)
    TH = _pick_row_tile(H)
    # Single zero-pad with the maximum dilation (one padded copy instead of three).
    xp = jnp.pad(x_nhwc, ((0, 0), (P, P), (P, P), (0, 0)))
    Hp, Wp = H + 2 * P, W + 2 * P
    dil_w = params["dil_w"].reshape(len(DILATIONS) * 9, cin, C)

    def const(*shape):
        nd = len(shape)
        return pl.BlockSpec(shape, lambda n, t, _nd=nd: (0,) * _nd)

    return pl.pallas_call(
        functools.partial(_aspp_proj_kernel, H=H, W=W, TH=TH, P=P,
                          dilations=DILATIONS),
        out_shape=jax.ShapeDtypeStruct((N, H, W, C), jnp.float32),
        grid_spec=pltpu.PrefetchScalarGridSpec(
            num_scalar_prefetch=0,
            grid=(N, H // TH),
            in_specs=[
                pl.BlockSpec((1, Hp, Wp, cin), lambda n, t: (n, 0, 0, 0)),
                const(cin, C), const(1, C), const(1, C),
                const(len(DILATIONS) * 9, cin, C),
                const(len(DILATIONS), 1, C), const(len(DILATIONS), 1, C),
                const(cin, C), const(1, C), const(1, C),
                const(5, C, C), const(1, C), const(1, C),
            ],
            out_specs=pl.BlockSpec((1, TH, W, C), lambda n, t: (n, t, 0, 0)),
            scratch_shapes=[
                pltpu.VMEM((1, C), jnp.float32),        # pooled projection bias
                pltpu.VMEM((TH * W, C), jnp.float32),   # projection accumulator
                pltpu.VMEM((TH * W, C), jnp.float32),   # dilated-conv accumulator
            ]),
        compiler_params=pltpu.CompilerParams(
            dimension_semantics=("parallel", "arbitrary"),
            vmem_limit_bytes=64 * 1024 * 1024),
    )(xp, params["b0_w"], params["b0_scale"], params["b0_offset"],
      dil_w, params["dil_scale"], params["dil_offset"],
      params["pool_w"], params["pool_scale"], params["pool_offset"],
      params["proj_w"], params["proj_scale"], params["proj_offset"])


# ---------------- Kernel B: fused head 3x3 conv + BN + ReLU + 1x1 classifier ----------------


def _head_cls_kernel(p_ref, hw_ref, hs_ref, ho_ref, cw_ref, cb_ref, o_ref,
                     hacc_scr, *, W, TH):
    C = hw_ref.shape[-1]
    cp = cw_ref.shape[-1]
    t = pl.program_id(1)
    r0 = pl.multiple_of(t * TH, TH)

    for kh in range(3):
        for kw in range(3):
            patch = p_ref[0, pl.ds(r0 + kh, TH), kw:kw + W, :].reshape(TH * W, C)
            contrib = jnp.dot(patch, hw_ref[kh * 3 + kw],
                              preferred_element_type=jnp.float32)
            if kh == 0 and kw == 0:
                hacc_scr[...] = contrib
            else:
                hacc_scr[...] += contrib

    h = jnp.maximum(hacc_scr[...] * hs_ref[...] + ho_ref[...], 0.0)
    # Lane-dense classifier (num_classes padded to a multiple of 128 lanes).
    logits = jnp.dot(h, cw_ref[...], preferred_element_type=jnp.float32) + cb_ref[...]
    o_ref[...] = logits.reshape(1, TH, W, cp)


def head_classify(proj_nhwc, params):
    N, H, W, C = proj_nhwc.shape
    TH = _pick_row_tile(H)
    nc = params["cls_w"].shape[1]
    cp = max(LANE, ((nc + LANE - 1) // LANE) * LANE)
    cls_w = jnp.pad(params["cls_w"], ((0, 0), (0, cp - nc)))
    cls_b = jnp.pad(params["cls_b"], ((0, 0), (0, cp - nc)))
    pp = jnp.pad(proj_nhwc, ((0, 0), (1, 1), (1, 1), (0, 0)))   # padding=1 for 3x3
    head_w = params["head_w"].reshape(9, C, C)

    out = pl.pallas_call(
        functools.partial(_head_cls_kernel, W=W, TH=TH),
        out_shape=jax.ShapeDtypeStruct((N, H, W, cp), jnp.float32),
        grid_spec=pltpu.PrefetchScalarGridSpec(
            num_scalar_prefetch=0,
            grid=(N, H // TH),
            in_specs=[
                pl.BlockSpec((1, H + 2, W + 2, C), lambda n, t: (n, 0, 0, 0)),
                pl.BlockSpec((9, C, C), lambda n, t: (0, 0, 0)),
                pl.BlockSpec((1, C), lambda n, t: (0, 0)),
                pl.BlockSpec((1, C), lambda n, t: (0, 0)),
                pl.BlockSpec((C, cp), lambda n, t: (0, 0)),
                pl.BlockSpec((1, cp), lambda n, t: (0, 0)),
            ],
            out_specs=pl.BlockSpec((1, TH, W, cp), lambda n, t: (n, t, 0, 0)),
            scratch_shapes=[pltpu.VMEM((TH * W, C), jnp.float32)]),
        compiler_params=pltpu.CompilerParams(
            dimension_semantics=("parallel", "parallel"),
            vmem_limit_bytes=64 * 1024 * 1024),
    )(pp, head_w, params["head_scale"], params["head_offset"], cls_w, cls_b)
    return out[..., :nc]


# --------------------------------- forward ---------------------------------


def deeplab_head_forward(params, x_nchw):
    x = jnp.transpose(x_nchw, (0, 2, 3, 1)).astype(jnp.float32)   # NHWC
    proj = aspp_project(x, params)                                 # (N, H, W, 256)
    # TODO(synk): Dropout(0.1) modeled as identity (inference-mode semantics).
    logits = head_classify(proj, params)                           # (N, H, W, nc)
    return jnp.transpose(logits, (0, 3, 1, 2))                     # back to NCHW


# ----------------------------- parameter creation ---------------------------


def _kaiming(key, shape, fan_in):
    std = math.sqrt(2.0 / fan_in)
    return jax.random.normal(key, shape, jnp.float32) * std


def _bn_fold(c):
    gamma = jnp.ones((1, c), jnp.float32)
    beta = jnp.zeros((1, c), jnp.float32)
    mean = jnp.zeros((1, c), jnp.float32)
    var = jnp.ones((1, c), jnp.float32)
    scale = gamma / jnp.sqrt(var + BN_EPS)
    offset = beta - mean * scale
    return scale, offset


def init_params(key, in_channels, num_classes):
    ks = jax.random.split(key, 9)
    C = OUT_CHANNELS
    p = {}
    p["b0_w"] = _kaiming(ks[0], (in_channels, C), in_channels)
    p["b0_scale"], p["b0_offset"] = _bn_fold(C)

    dw, dscale, doffset = [], [], []
    for i in range(len(DILATIONS)):
        dw.append(_kaiming(ks[1 + i], (3, 3, in_channels, C), 9 * in_channels))
        s, o = _bn_fold(C)
        dscale.append(s.reshape(1, 1, C))
        doffset.append(o.reshape(1, 1, C))
    p["dil_w"] = jnp.stack(dw)                         # (3, 3, 3, cin, 256)  HWIO per branch
    p["dil_scale"] = jnp.concatenate(dscale, axis=0)   # (3, 1, 256)
    p["dil_offset"] = jnp.concatenate(doffset, axis=0)

    p["pool_w"] = _kaiming(ks[4], (in_channels, C), in_channels)
    p["pool_scale"], p["pool_offset"] = _bn_fold(C)

    # Projection weight grouped per branch: (5, 256, 256), rows match torch.cat order.
    p["proj_w"] = _kaiming(ks[5], (5, C, C), 5 * C)
    p["proj_scale"], p["proj_offset"] = _bn_fold(C)

    p["head_w"] = _kaiming(ks[6], (3, 3, C, C), 9 * C)
    p["head_scale"], p["head_offset"] = _bn_fold(C)

    p["cls_w"] = _kaiming(ks[7], (C, num_classes), C)
    bound = 1.0 / math.sqrt(C)
    p["cls_b"] = jax.random.uniform(ks[8], (1, num_classes), jnp.float32, -bound, bound)
    return p


# --------------------------------- reference --------------------------------


def reference_forward(params, x_nchw):
    x = jnp.transpose(x_nchw, (0, 2, 3, 1)).astype(jnp.float32)
    N, H, W, _ = x.shape
    C = OUT_CHANNELS

    def bn_act(y, s, o, relu=True):
        y = y * s.reshape(1, 1, 1, -1) + o.reshape(1, 1, 1, -1)
        return jnp.maximum(y, 0.0) if relu else y

    branches = [bn_act(jnp.einsum("nhwc,co->nhwo", x, params["b0_w"]),
                       params["b0_scale"], params["b0_offset"])]
    for i, d in enumerate(DILATIONS):
        y = jax.lax.conv_general_dilated(
            x, params["dil_w"][i], (1, 1), ((d, d), (d, d)),
            rhs_dilation=(d, d), dimension_numbers=("NHWC", "HWIO", "NHWC"))
        branches.append(bn_act(y, params["dil_scale"][i], params["dil_offset"][i]))
    mean = x.mean(axis=(1, 2))
    pooled = jnp.maximum(mean @ params["pool_w"] * params["pool_scale"]
                         + params["pool_offset"], 0.0)
    branches.append(jnp.broadcast_to(pooled[:, None, None, :], (N, H, W, C)))
    cat = jnp.concatenate(branches, axis=-1)
    proj = bn_act(jnp.einsum("nhwc,co->nhwo", cat, params["proj_w"].reshape(5 * C, C)),
                  params["proj_scale"], params["proj_offset"])
    h = jax.lax.conv_general_dilated(
        proj, params["head_w"], (1, 1), ((1, 1), (1, 1)),
        rhs_dilation=(1, 1), dimension_numbers=("NHWC", "HWIO", "NHWC"))
    h = bn_act(h, params["head_scale"], params["head_offset"])
    logits = (jnp.einsum("nhwc,co->nhwo", h, params["cls_w"])
              + params["cls_b"].reshape(1, 1, 1, -1))
    return jnp.transpose(logits, (0, 3, 1, 2))


# ----------------------------------- main ------------------------------------


if __name__ == "__main__":
    in_channels, num_classes = 8, 3
    N, H, W = 2, 16, 16

    root = jax.random.PRNGKey(0)
    k_params, k_x = jax.random.split(root)
    params = init_params(k_params, in_channels, num_classes)
    x = jax.random.normal(k_x, (N, in_channels, H, W), jnp.float32)  # NCHW input

    out = jax.block_until_ready(jax.jit(deeplab_head_forward)(params, x))
    assert out.shape == (N, num_classes, H, W)

    ref = jax.block_until_ready(reference_forward(params, x))
    err = float(jnp.max(jnp.abs(out - ref)))
    scale = float(jnp.max(jnp.abs(ref))) + 1e-6
    assert err <= 5e-3 * scale + 1e-4, f"mismatch vs reference: {err}"

    print("KERNEL_OK")
</pallas_src>

<mosaic_0001>
module attributes {stable_mosaic.version = 11 : i64} {
  func.func @_aspp_proj_kernel(%arg0: i32, %arg1: i32, %arg2: memref<1x88x88x8xf32, #tpu.memory_space<vmem>>, %arg3: memref<8x256xf32, #tpu.memory_space<vmem>>, %arg4: memref<1x256xf32, #tpu.memory_space<vmem>>, %arg5: memref<1x256xf32, #tpu.memory_space<vmem>>, %arg6: memref<27x8x256xf32, #tpu.memory_space<vmem>>, %arg7: memref<3x1x256xf32, #tpu.memory_space<vmem>>, %arg8: memref<3x1x256xf32, #tpu.memory_space<vmem>>, %arg9: memref<8x256xf32, #tpu.memory_space<vmem>>, %arg10: memref<1x256xf32, #tpu.memory_space<vmem>>, %arg11: memref<1x256xf32, #tpu.memory_space<vmem>>, %arg12: memref<5x256x256xf32, #tpu.memory_space<vmem>>, %arg13: memref<1x256xf32, #tpu.memory_space<vmem>>, %arg14: memref<1x256xf32, #tpu.memory_space<vmem>>, %arg15: memref<1x4x16x256xf32, #tpu.memory_space<vmem>>, %arg16: memref<1x256xf32, #tpu.memory_space<vmem>>, %arg17: memref<64x256xf32, #tpu.memory_space<vmem>>, %arg18: memref<64x256xf32, #tpu.memory_space<vmem>>) attributes {dimension_semantics = [#tpu.dimension_semantics<parallel>, #tpu.dimension_semantics<arbitrary>], iteration_bounds = array<i64: 2, 4>, scalar_prefetch = 0 : i64, scratch_operands = 3 : i64, tpu.core_type = #tpu.core_type<tc>, window_params = [{transform_indices = @transform_0, window_bounds = array<i64: 1, 88, 88, 8>}, {pipeline_mode = #tpu.pipeline_mode<synchronous>, transform_indices = @transform_1, window_bounds = array<i64: 8, 256>}, {pipeline_mode = #tpu.pipeline_mode<synchronous>, transform_indices = @transform_2, window_bounds = array<i64: 1, 256>}, {pipeline_mode = #tpu.pipeline_mode<synchronous>, transform_indices = @transform_3, window_bounds = array<i64: 1, 256>}, {pipeline_mode = #tpu.pipeline_mode<synchronous>, transform_indices = @transform_4, window_bounds = array<i64: 27, 8, 256>}, {pipeline_mode = #tpu.pipeline_mode<synchronous>, transform_indices = @transform_5, window_bounds = array<i64: 3, 1, 256>}, {pipeline_mode = #tpu.pipeline_mode<synchronous>, transform_indices = @transform_6, window_bounds = array<i64: 3, 1, 256>}, {pipeline_mode = #tpu.pipeline_mode<synchronous>, transform_indices = @transform_7, window_bounds = array<i64: 8, 256>}, {pipeline_mode = #tpu.pipeline_mode<synchronous>, transform_indices = @transform_8, window_bounds = array<i64: 1, 256>}, {pipeline_mode = #tpu.pipeline_mode<synchronous>, transform_indices = @transform_9, window_bounds = array<i64: 1, 256>}, {pipeline_mode = #tpu.pipeline_mode<synchronous>, transform_indices = @transform_10, window_bounds = array<i64: 5, 256, 256>}, {pipeline_mode = #tpu.pipeline_mode<synchronous>, transform_indices = @transform_11, window_bounds = array<i64: 1, 256>}, {pipeline_mode = #tpu.pipeline_mode<synchronous>, transform_indices = @transform_12, window_bounds = array<i64: 1, 256>}, {transform_indices = @transform_13, window_bounds = array<i64: 1, 4, 16, 256>}]} {
    %c4_i32 = arith.constant 4 : i32
    %0 = arith.muli %arg1, %c4_i32 : i32
    %1 = tpu.assume_multiple %0, 4 : i32
    %c0_i32 = arith.constant 0 : i32
    %2 = arith.cmpi eq, %arg1, %c0_i32 : i32
    %3 = arith.extui %2 : i1 to i32
    %c0_i32_0 = arith.constant 0 : i32
    %4 = arith.cmpi ne, %3, %c0_i32_0 : i32
    scf.if %4 {
      %c0_202 = arith.constant 0 : index
      %c36_203 = arith.constant 36 : index
      %c36_204 = arith.constant 36 : index
      %c0_205 = arith.constant 0 : index
      %215 = vector.load %arg2[%c0_202, %c36_203, %c36_204, %c0_205] : memref<1x88x88x8xf32, #tpu.memory_space<vmem>>, vector<1x16x16x8xf32>
      %216 = vector.shape_cast %215 : vector<1x16x16x8xf32> to vector<16x16x8xf32>
      %217 = vector.shape_cast %216 : vector<16x16x8xf32> to vector<256x8xf32>
      %cst_206 = arith.constant dense<0.000000e+00> : vector<8xf32>
      %218 = vector.multi_reduction <add>, %217, %cst_206 [0] : vector<256x8xf32> to vector<8xf32>
      %219 = vector.shape_cast %218 : vector<8xf32> to vector<1x8xf32>
      %cst_207 = arith.constant 2.560000e+02 : f32
      %220 = vector.broadcast %cst_207 : f32 to vector<1x8xf32>
      %221 = arith.divf %219, %220 : vector<1x8xf32>
      %c0_208 = arith.constant 0 : index
      %c0_209 = arith.constant 0 : index
      %222 = vector.load %arg9[%c0_208, %c0_209] : memref<8x256xf32, #tpu.memory_space<vmem>>, vector<8x256xf32>
      %cst_210 = arith.constant dense<0.000000e+00> : vector<1x256xf32>
      %223 = tpu.matmul %221, %222, %cst_210 {dimension_numbers = #tpu.dot_dimension_numbers<[1], [0], [0], [1], [0, 0, 1, 1], [], []>} : vector<1x8xf32>, vector<8x256xf32>, vector<1x256xf32> -> vector<1x256xf32>
      %c0_211 = arith.constant 0 : index
      %c0_212 = arith.constant 0 : index
      %224 = vector.load %arg10[%c0_211, %c0_212] : memref<1x256xf32, #tpu.memory_space<vmem>>, vector<1x256xf32>
      %225 = arith.mulf %223, %224 : vector<1x256xf32>
      %c0_213 = arith.constant 0 : index
      %c0_214 = arith.constant 0 : index
      %226 = vector.load %arg11[%c0_213, %c0_214] : memref<1x256xf32, #tpu.memory_space<vmem>>, vector<1x256xf32>
      %227 = arith.addf %225, %226 : vector<1x256xf32>
      %cst_215 = arith.constant 0.000000e+00 : f32
      %228 = vector.broadcast %cst_215 : f32 to vector<1x256xf32>
      %229 = arith.maximumf %227, %228 : vector<1x256xf32>
      %c4_216 = arith.constant 4 : index
      %c0_217 = arith.constant 0 : index
      %c0_218 = arith.constant 0 : index
      %230 = vector.load %arg12[%c4_216, %c0_217, %c0_218] : memref<5x256x256xf32, #tpu.memory_space<vmem>>, vector<1x256x256xf32>
      %231 = vector.shape_cast %230 : vector<1x256x256xf32> to vector<256x256xf32>
      %cst_219 = arith.constant dense<0.000000e+00> : vector<1x256xf32>
      %232 = tpu.matmul %229, %231, %cst_219 {dimension_numbers = #tpu.dot_dimension_numbers<[1], [0], [0], [1], [0, 0, 1, 1], [], []>} : vector<1x256xf32>, vector<256x256xf32>, vector<1x256xf32> -> vector<1x256xf32>
      %c0_220 = arith.constant 0 : index
      %c0_221 = arith.constant 0 : index
      %233 = vector.load %arg16[%c0_220, %c0_221] : memref<1x256xf32, #tpu.memory_space<vmem>>, vector<1x256xf32>
      tpu.vector_store %arg16[%c0_220, %c0_221], %232 {strides = array<i32>} : memref<1x256xf32, #tpu.memory_space<vmem>>, vector<1x256xf32>,
    } else {
    }
    %c36_i32 = arith.constant 36 : i32
    %5 = arith.addi %c36_i32, %1 : i32
    %c0 = arith.constant 0 : index
    %6 = arith.index_cast %5 : i32 to index
    %c36 = arith.constant 36 : index
    %c0_1 = arith.constant 0 : index
    %7 = vector.load %arg2[%c0, %6, %c36, %c0_1] : memref<1x88x88x8xf32, #tpu.memory_space<vmem>>, vector<1x4x16x8xf32>
    %8 = vector.shape_cast %7 : vector<1x4x16x8xf32> to vector<4x16x8xf32>
    %9 = vector.shape_cast %8 : vector<4x16x8xf32> to vector<64x8xf32>
    %c0_2 = arith.constant 0 : index
    %c0_3 = arith.constant 0 : index
    %10 = vector.load %arg3[%c0_2, %c0_3] : memref<8x256xf32, #tpu.memory_space<vmem>>, vector<8x256xf32>
    %cst = arith.constant dense<0.000000e+00> : vector<64x256xf32>
    %11 = tpu.matmul %9, %10, %cst {dimension_numbers = #tpu.dot_dimension_numbers<[1], [0], [0], [1], [0, 0, 1, 1], [], []>} : vector<64x8xf32>, vector<8x256xf32>, vector<64x256xf32> -> vector<64x256xf32>
    %c0_4 = arith.constant 0 : index
    %c0_5 = arith.constant 0 : index
    %12 = vector.load %arg4[%c0_4, %c0_5] : memref<1x256xf32, #tpu.memory_space<vmem>>, vector<1x256xf32>
    %13 = vector.broadcast %12 : vector<1x256xf32> to vector<64x256xf32>
    %14 = arith.mulf %11, %13 : vector<64x256xf32>
    %c0_6 = arith.constant 0 : index
    %c0_7 = arith.constant 0 : index
    %15 = vector.load %arg5[%c0_6, %c0_7] : memref<1x256xf32, #tpu.memory_space<vmem>>, vector<1x256xf32>
    %16 = vector.broadcast %15 : vector<1x256xf32> to vector<64x256xf32>
    %17 = arith.addf %14, %16 : vector<64x256xf32>
    %cst_8 = arith.constant 0.000000e+00 : f32
    %18 = vector.broadcast %cst_8 : f32 to vector<64x256xf32>
    %19 = arith.maximumf %17, %18 : vector<64x256xf32>
    %c0_9 = arith.constant 0 : index
    %c0_10 = arith.constant 0 : index
    %c0_11 = arith.constant 0 : index
    %20 = vector.load %arg12[%c0_9, %c0_10, %c0_11] : memref<5x256x256xf32, #tpu.memory_space<vmem>>, vector<1x256x256xf32>
    %21 = vector.shape_cast %20 : vector<1x256x256xf32> to vector<256x256xf32>
    %cst_12 = arith.constant dense<0.000000e+00> : vector<64x256xf32>
    %22 = tpu.matmul %19, %21, %cst_12 {dimension_numbers = #tpu.dot_dimension_numbers<[1], [0], [0], [1], [0, 0, 1, 1], [], []>} : vector<64x256xf32>, vector<256x256xf32>, vector<64x256xf32> -> vector<64x256xf32>
    %c0_13 = arith.constant 0 : index
    %c0_14 = arith.constant 0 : index
    %23 = vector.load %arg16[%c0_13, %c0_14] : memref<1x256xf32, #tpu.memory_space<vmem>>, vector<1x256xf32>
    %24 = vector.broadcast %23 : vector<1x256xf32> to vector<64x256xf32>
    %25 = arith.addf %22, %24 : vector<64x256xf32>
    %c0_15 = arith.constant 0 : index
    %c0_16 = arith.constant 0 : index
    %26 = vector.load %arg17[%c0_15, %c0_16] : memref<64x256xf32, #tpu.memory_space<vmem>>, vector<64x256xf32>
    tpu.vector_store %arg17[%c0_15, %c0_16], %25 {strides = array<i32>} : memref<64x256xf32, #tpu.memory_space<vmem>>, vector<64x256xf32>,
    %c36_i32_17 = arith.constant 36 : i32
    %27 = arith.addi %c36_i32_17, %1 : i32
    %c-12_i32 = arith.constant -12 : i32
    %28 = arith.addi %27, %c-12_i32 : i32
    %c0_18 = arith.constant 0 : index
    %29 = arith.index_cast %28 : i32 to index
    %c24 = arith.constant 24 : index
    %c0_19 = arith.constant 0 : index
    %30 = vector.load %arg2[%c0_18, %29, %c24, %c0_19] : memref<1x88x88x8xf32, #tpu.memory_space<vmem>>, vector<1x4x16x8xf32>
    %31 = vector.shape_cast %30 : vector<1x4x16x8xf32> to vector<4x16x8xf32>
    %32 = vector.shape_cast %31 : vector<4x16x8xf32> to vector<64x8xf32>
    %c0_20 = arith.constant 0 : index
    %c0_21 = arith.constant 0 : index
    %c0_22 = arith.constant 0 : index
    %33 = vector.load %arg6[%c0_20, %c0_21, %c0_22] : memref<27x8x256xf32, #tpu.memory_space<vmem>>, vector<1x8x256xf32>
    %34 = vector.shape_cast %33 : vector<1x8x256xf32> to vector<8x256xf32>
    %cst_23 = arith.constant dense<0.000000e+00> : vector<64x256xf32>
    %35 = tpu.matmul %32, %34, %cst_23 {dimension_numbers = #tpu.dot_dimension_numbers<[1], [0], [0], [1], [0, 0, 1, 1], [], []>} : vector<64x8xf32>, vector<8x256xf32>, vector<64x256xf32> -> vector<64x256xf32>
    %c0_24 = arith.constant 0 : index
    %c0_25 = arith.constant 0 : index
    %36 = vector.load %arg18[%c0_24, %c0_25] : memref<64x256xf32, #tpu.memory_space<vmem>>, vector<64x256xf32>
    tpu.vector_store %arg18[%c0_24, %c0_25], %35 {strides = array<i32>} : memref<64x256xf32, #tpu.memory_space<vmem>>, vector<64x256xf32>,
    %c36_i32_26 = arith.constant 36 : i32
    %37 = arith.addi %c36_i32_26, %1 : i32
    %c-12_i32_27 = arith.constant -12 : i32
    %38 = arith.addi %37, %c-12_i32_27 : i32
    %c0_28 = arith.constant 0 : index
    %39 = arith.index_cast %38 : i32 to index
    %c36_29 = arith.constant 36 : index
    %c0_30 = arith.constant 0 : index
    %40 = vector.load %arg2[%c0_28, %39, %c36_29, %c0_30] : memref<1x88x88x8xf32, #tpu.memory_space<vmem>>, vector<1x4x16x8xf32>
    %41 = vector.shape_cast %40 : vector<1x4x16x8xf32> to vector<4x16x8xf32>
    %42 = vector.shape_cast %41 : vector<4x16x8xf32> to vector<64x8xf32>
    %c1 = arith.constant 1 : index
    %c0_31 = arith.constant 0 : index
    %c0_32 = arith.constant 0 : index
    %43 = vector.load %arg6[%c1, %c0_31, %c0_32] : memref<27x8x256xf32, #tpu.memory_space<vmem>>, vector<1x8x256xf32>
    %44 = vector.shape_cast %43 : vector<1x8x256xf32> to vector<8x256xf32>
    %cst_33 = arith.constant dense<0.000000e+00> : vector<64x256xf32>
    %45 = tpu.matmul %42, %44, %cst_33 {dimension_numbers = #tpu.dot_dimension_numbers<[1], [0], [0], [1], [0, 0, 1, 1], [], []>} : vector<64x8xf32>, vector<8x256xf32>, vector<64x256xf32> -> vector<64x256xf32>
    %c0_34 = arith.constant 0 : index
    %c0_35 = arith.constant 0 : index
    %46 = vector.load %arg18[%c0_34, %c0_35] : memref<64x256xf32, #tpu.memory_space<vmem>>, vector<64x256xf32>
    %47 = arith.addf %46, %45 : vector<64x256xf32>
    %c0_36 = arith.constant 0 : index
    %c0_37 = arith.constant 0 : index
    %48 = vector.load %arg18[%c0_36, %c0_37] : memref<64x256xf32, #tpu.memory_space<vmem>>, vector<64x256xf32>
    tpu.vector_store %arg18[%c0_36, %c0_37], %47 {strides = array<i32>} : memref<64x256xf32, #tpu.memory_space<vmem>>, vector<64x256xf32>,
    %c36_i32_38 = arith.constant 36 : i32
    %49 = arith.addi %c36_i32_38, %1 : i32
    %c-12_i32_39 = arith.constant -12 : i32
    %50 = arith.addi %49, %c-12_i32_39 : i32
    %c0_40 = arith.constant 0 : index
    %51 = arith.index_cast %50 : i32 to index
    %c48 = arith.constant 48 : index
    %c0_41 = arith.constant 0 : index
    %52 = vector.load %arg2[%c0_40, %51, %c48, %c0_41] : memref<1x88x88x8xf32, #tpu.memory_space<vmem>>, vector<1x4x16x8xf32>
    %53 = vector.shape_cast %52 : vector<1x4x16x8xf32> to vector<4x16x8xf32>
    %54 = vector.shape_cast %53 : vector<4x16x8xf32> to vector<64x8xf32>
    %c2 = arith.constant 2 : index
    %c0_42 = arith.constant 0 : index
    %c0_43 = arith.constant 0 : index
    %55 = vector.load %arg6[%c2, %c0_42, %c0_43] : memref<27x8x256xf32, #tpu.memory_space<vmem>>, vector<1x8x256xf32>
    %56 = vector.shape_cast %55 : vector<1x8x256xf32> to vector<8x256xf32>
    %cst_44 = arith.constant dense<0.000000e+00> : vector<64x256xf32>
    %57 = tpu.matmul %54, %56, %cst_44 {dimension_numbers = #tpu.dot_dimension_numbers<[1], [0], [0], [1], [0, 0, 1, 1], [], []>} : vector<64x8xf32>, vector<8x256xf32>, vector<64x256xf32> -> vector<64x256xf32>
    %c0_45 = arith.constant 0 : index
    %c0_46 = arith.constant 0 : index
    %58 = vector.load %arg18[%c0_45, %c0_46] : memref<64x256xf32, #tpu.memory_space<vmem>>, vector<64x256xf32>
    %59 = arith.addf %58, %57 : vector<64x256xf32>
    %c0_47 = arith.constant 0 : index
    %c0_48 = arith.constant 0 : index
    %60 = vector.load %arg18[%c0_47, %c0_48] : memref<64x256xf32, #tpu.memory_space<vmem>>, vector<64x256xf32>
    tpu.vector_store %arg18[%c0_47, %c0_48], %59 {strides = array<i32>} : memref<64x256xf32, #tpu.memory_space<vmem>>, vector<64x256xf32>,
    %c36_i32_49 = arith.constant 36 : i32
    %61 = arith.addi %c36_i32_49, %1 : i32
    %c0_i32_50 = arith.constant 0 : i32
    %62 = arith.addi %61, %c0_i32_50 : i32
    %c0_51 = arith.constant 0 : index
    %63 = arith.index_cast %62 : i32 to index
    %c24_52 = arith.constant 24 : index
    %c0_53 = arith.constant 0 : index
    %64 = vector.load %arg2[%c0_51, %63, %c24_52, %c0_53] : memref<1x88x88x8xf32, #tpu.memory_space<vmem>>, vector<1x4x16x8xf32>
    %65 = vector.shape_cast %64 : vector<1x4x16x8xf32> to vector<4x16x8xf32>
    %66 = vector.shape_cast %65 : vector<4x16x8xf32> to vector<64x8xf32>
    %c3 = arith.constant 3 : index
    %c0_54 = arith.constant 0 : index
    %c0_55 = arith.constant 0 : index
    %67 = vector.load %arg6[%c3, %c0_54, %c0_55] : memref<27x8x256xf32, #tpu.memory_space<vmem>>, vector<1x8x256xf32>
    %68 = vector.shape_cast %67 : vector<1x8x256xf32> to vector<8x256xf32>
    %cst_56 = arith.constant dense<0.000000e+00> : vector<64x256xf32>
    %69 = tpu.matmul %66, %68, %cst_56 {dimension_numbers = #tpu.dot_dimension_numbers<[1], [0], [0], [1], [0, 0, 1, 1], [], []>} : vector<64x8xf32>, vector<8x256xf32>, vector<64x256xf32> -> vector<64x256xf32>
    %c0_57 = arith.constant 0 : index
    %c0_58 = arith.constant 0 : index
    %70 = vector.load %arg18[%c0_57, %c0_58] : memref<64x256xf32, #tpu.memory_space<vmem>>, vector<64x256xf32>
    %71 = arith.addf %70, %69 : vector<64x256xf32>
    %c0_59 = arith.constant 0 : index
    %c0_60 = arith.constant 0 : index
    %72 = vector.load %arg18[%c0_59, %c0_60] : memref<64x256xf32, #tpu.memory_space<vmem>>, vector<64x256xf32>
    tpu.vector_store %arg18[%c0_59, %c0_60], %71 {strides = array<i32>} : memref<64x256xf32, #tpu.memory_space<vmem>>, vector<64x256xf32>,
    %c36_i32_61 = arith.constant 36 : i32
    %73 = arith.addi %c36_i32_61, %1 : i32
    %c0_i32_62 = arith.constant 0 : i32
    %74 = arith.addi %73, %c0_i32_62 : i32
    %c0_63 = arith.constant 0 : index
    %75 = arith.index_cast %74 : i32 to index
    %c36_64 = arith.constant 36 : index
    %c0_65 = arith.constant 0 : index
    %76 = vector.load %arg2[%c0_63, %75, %c36_64, %c0_65] : memref<1x88x88x8xf32, #tpu.memory_space<vmem>>, vector<1x4x16x8xf32>
    %77 = vector.shape_cast %76 : vector<1x4x16x8xf32> to vector<4x16x8xf32>
    %78 = vector.shape_cast %77 : vector<4x16x8xf32> to vector<64x8xf32>
    %c4 = arith.constant 4 : index
    %c0_66 = arith.constant 0 : index
    %c0_67 = arith.constant 0 : index
    %79 = vector.load %arg6[%c4, %c0_66, %c0_67] : memref<27x8x256xf32, #tpu.memory_space<vmem>>, vector<1x8x256xf32>
    %80 = vector.shape_cast %79 : vector<1x8x256xf32> to vector<8x256xf32>
    %cst_68 = arith.constant dense<0.000000e+00> : vector<64x256xf32>
    %81 = tpu.matmul %78, %80, %cst_68 {dimension_numbers = #tpu.dot_dimension_numbers<[1], [0], [0], [1], [0, 0, 1, 1], [], []>} : vector<64x8xf32>, vector<8x256xf32>, vector<64x256xf32> -> vector<64x256xf32>
    %c0_69 = arith.constant 0 : index
    %c0_70 = arith.constant 0 : index
    %82 = vector.load %arg18[%c0_69, %c0_70] : memref<64x256xf32, #tpu.memory_space<vmem>>, vector<64x256xf32>
    %83 = arith.addf %82, %81 : vector<64x256xf32>
    %c0_71 = arith.constant 0 : index
    %c0_72 = arith.constant 0 : index
    %84 = vector.load %arg18[%c0_71, %c0_72] : memref<64x256xf32, #tpu.memory_space<vmem>>, vector<64x256xf32>
    tpu.vector_store %arg18[%c0_71, %c0_72], %83 {strides = array<i32>} : memref<64x256xf32, #tpu.memory_space<vmem>>, vector<64x256xf32>,
    %c36_i32_73 = arith.constant 36 : i32
    %85 = arith.addi %c36_i32_73, %1 : i32
    %c0_i32_74 = arith.constant 0 : i32
    %86 = arith.addi %85, %c0_i32_74 : i32
    %c0_75 = arith.constant 0 : index
    %87 = arith.index_cast %86 : i32 to index
    %c48_76 = arith.constant 48 : index
    %c0_77 = arith.constant 0 : index
    %88 = vector.load %arg2[%c0_75, %87, %c48_76, %c0_77] : memref<1x88x88x8xf32, #tpu.memory_space<vmem>>, vector<1x4x16x8xf32>
    %89 = vector.shape_cast %88 : vector<1x4x16x8xf32> to vector<4x16x8xf32>
    %90 = vector.shape_cast %89 : vector<4x16x8xf32> to vector<64x8xf32>
    %c5 = arith.constant 5 : index
    %c0_78 = arith.constant 0 : index
    %c0_79 = arith.constant 0 : index
    %91 = vector.load %arg6[%c5, %c0_78, %c0_79] : memref<27x8x256xf32, #tpu.memory_space<vmem>>, vector<1x8x256xf32>
    %92 = vector.shape_cast %91 : vector<1x8x256xf32> to vector<8x256xf32>
    %cst_80 = arith.constant dense<0.000000e+00> : vector<64x256xf32>
    %93 = tpu.matmul %90, %92, %cst_80 {dimension_numbers = #tpu.dot_dimension_numbers<[1], [0], [0], [1], [0, 0, 1, 1], [], []>} : vector<64x8xf32>, vector<8x256xf32>, vector<64x256xf32> -> vector<64x256xf32>
    %c0_81 = arith.constant 0 : index
    %c0_82 = arith.constant 0 : index
    %94 = vector.load %arg18[%c0_81, %c0_82] : memref<64x256xf32, #tpu.memory_space<vmem>>, vector<64x256xf32>
    %95 = arith.addf %94, %93 : vector<64x256xf32>
    %c0_83 = arith.constant 0 : index
    %c0_84 = arith.constant 0 : index
    %96 = vector.load %arg18[%c0_83, %c0_84] : memref<64x256xf32, #tpu.memory_space<vmem>>, vector<64x256xf32>
    tpu.vector_store %arg18[%c0_83, %c0_84], %95 {strides = array<i32>} : memref<64x256xf32, #tpu.memory_space<vmem>>, vector<64x256xf32>,
    %c36_i32_85 = arith.constant 36 : i32
    %97 = arith.addi %c36_i32_85, %1 : i32
    %c12_i32 = arith.constant 12 : i32
    %98 = arith.addi %97, %c12_i32 : i32
    %c0_86 = arith.constant 0 : index
    %99 = arith.index_cast %98 : i32 to index
    %c24_87 = arith.constant 24 : index
    %c0_88 = arith.constant 0 : index
    %100 = vector.load %arg2[%c0_86, %99, %c24_87, %c0_88] : memref<1x88x88x8xf32, #tpu.memory_space<vmem>>, vector<1x4x16x8xf32>
    %101 = vector.shape_cast %100 : vector<1x4x16x8xf32> to vector<4x16x8xf32>
    %102 = vector.shape_cast %101 : vector<4x16x8xf32> to vector<64x8xf32>
    %c6 = arith.constant 6 : index
    %c0_89 = arith.constant 0 : index
    %c0_90 = arith.constant 0 : index
    %103 = vector.load %arg6[%c6, %c0_89, %c0_90] : memref<27x8x256xf32, #tpu.memory_space<vmem>>, vector<1x8x256xf32>
    %104 = vector.shape_cast %103 : vector<1x8x256xf32> to vector<8x256xf32>
    %cst_91 = arith.constant dense<0.000000e+00> : vector<64x256xf32>
    %105 = tpu.matmul %102, %104, %cst_91 {dimension_numbers = #tpu.dot_dimension_numbers<[1], [0], [0], [1], [0, 0, 1, 1], [], []>} : vector<64x8xf32>, vector<8x256xf32>, vector<64x256xf32> -> vector<64x256xf32>
    %c0_92 = arith.constant 0 : index
    %c0_93 = arith.constant 0 : index
    %106 = vector.load %arg18[%c0_92, %c0_93] : memref<64x256xf32, #tpu.memory_space<vmem>>, vector<64x256xf32>
    %107 = arith.addf %106, %105 : vector<64x256xf32>
    %c0_94 = arith.constant 0 : index
    %c0_95 = arith.constant 0 : index
    %108 = vector.load %arg18[%c0_94, %c0_95] : memref<64x256xf32, #tpu.memory_space<vmem>>, vector<64x256xf32>
    tpu.vector_store %arg18[%c0_94, %c0_95], %107 {strides = array<i32>} : memref<64x256xf32, #tpu.memory_space<vmem>>, vector<64x256xf32>,
    %c36_i32_96 = arith.constant 36 : i32
    %109 = arith.addi %c36_i32_96, %1 : i32
    %c12_i32_97 = arith.constant 12 : i32
    %110 = arith.addi %109, %c12_i32_97 : i32
    %c0_98 = arith.constant 0 : index
    %111 = arith.index_cast %110 : i32 to index
    %c36_99 = arith.constant 36 : index
    %c0_100 = arith.constant 0 : index
    %112 = vector.load %arg2[%c0_98, %111, %c36_99, %c0_100] : memref<1x88x88x8xf32, #tpu.memory_space<vmem>>, vector<1x4x16x8xf32>
    %113 = vector.shape_cast %112 : vector<1x4x16x8xf32> to vector<4x16x8xf32>
    %114 = vector.shape_cast %113 : vector<4x16x8xf32> to vector<64x8xf32>
    %c7 = arith.constant 7 : index
    %c0_101 = arith.constant 0 : index
    %c0_102 = arith.constant 0 : index
    %115 = vector.load %arg6[%c7, %c0_101, %c0_102] : memref<27x8x256xf32, #tpu.memory_space<vmem>>, vector<1x8x256xf32>
    %116 = vector.shape_cast %115 : vector<1x8x256xf32> to vector<8x256xf32>
    %cst_103 = arith.constant dense<0.000000e+00> : vector<64x256xf32>
    %117 = tpu.matmul %114, %116, %cst_103 {dimension_numbers = #tpu.dot_dimension_numbers<[1], [0], [0], [1], [0, 0, 1, 1], [], []>} : vector<64x8xf32>, vector<8x256xf32>, vector<64x256xf32> -> vector<64x256xf32>
    %c0_104 = arith.constant 0 : index
    %c0_105 = arith.constant 0 : index
    %118 = vector.load %arg18[%c0_104, %c0_105] : memref<64x256xf32, #tpu.memory_space<vmem>>, vector<64x256xf32>
    %119 = arith.addf %118, %117 : vector<64x256xf32>
    %c0_106 = arith.constant 0 : index
    %c0_107 = arith.constant 0 : index
    %120 = vector.load %arg18[%c0_106, %c0_107] : memref<64x256xf32, #tpu.memory_space<vmem>>, vector<64x256xf32>
    tpu.vector_store %arg18[%c0_106, %c0_107], %119 {strides = array<i32>} : memref<64x256xf32, #tpu.memory_space<vmem>>, vector<64x256xf32>,
    %c36_i32_108 = arith.constant 36 : i32
    %121 = arith.addi %c36_i32_108, %1 : i32
    %c12_i32_109 = arith.constant 12 : i32
    %122 = arith.addi %121, %c12_i32_109 : i32
    %c0_110 = arith.constant 0 : index
    %123 = arith.index_cast %122 : i32 to index
    %c48_111 = arith.constant 48 : index
    %c0_112 = arith.constant 0 : index
    %124 = vector.load %arg2[%c0_110, %123, %c48_111, %c0_112] : memref<1x88x88x8xf32, #tpu.memory_space<vmem>>, vector<1x4x16x8xf32>
    %125 = vector.shape_cast %124 : vector<1x4x16x8xf32> to vector<4x16x8xf32>
    %126 = vector.shape_cast %125 : vector<4x16x8xf32> to vector<64x8xf32>
    %c8 = arith.constant 8 : index
    %c0_113 = arith.constant 0 : index
    %c0_114 = arith.constant 0 : index
    %127 = vector.load %arg6[%c8, %c0_113, %c0_114] : memref<27x8x256xf32, #tpu.memory_space<vmem>>, vector<1x8x256xf32>
    %128 = vector.shape_cast %127 : vector<1x8x256xf32> to vector<8x256xf32>
    %cst_115 = arith.constant dense<0.000000e+00> : vector<64x256xf32>
    %129 = tpu.matmul %126, %128, %cst_115 {dimension_numbers = #tpu.dot_dimension_numbers<[1], [0], [0], [1], [0, 0, 1, 1], [], []>} : vector<64x8xf32>, vector<8x256xf32>, vector<64x256xf32> -> vector<64x256xf32>
    %c0_116 = arith.constant 0 : index
    %c0_117 = arith.constant 0 : index
    %130 = vector.load %arg18[%c0_116, %c0_117] : memref<64x256xf32, #tpu.memory_space<vmem>>, vector<64x256xf32>
    %131 = arith.addf %130, %129 : vector<64x256xf32>
    %c0_118 = arith.constant 0 : index
    %c0_119 = arith.constant 0 : index
    %132 = vector.load %arg18[%c0_118, %c0_119] : memref<64x256xf32, #tpu.memory_space<vmem>>, vector<64x256xf32>
    tpu.vector_store %arg18[%c0_118, %c0_119], %131 {strides = array<i32>} : memref<64x256xf32, #tpu.memory_space<vmem>>, vector<64x256xf32>,
    %c0_120 = arith.constant 0 : index
    %c0_121 = arith.constant 0 : index
    %133 = vector.load %arg18[%c0_120, %c0_121] : memref<64x256xf32, #tpu.memory_space<vmem>>, vector<64x256xf32>
    %c0_122 = arith.constant 0 : index
    %c0_123 = arith.constant 0 : index
    %c0_124 = arith.constant 0 : index
    %134 = vector.load %arg7[%c0_122, %c0_123, %c0_124] : memref<3x1x256xf32, #tpu.memory_space<vmem>>, vector<1x1x256xf32>
    %135 = vector.shape_cast %134 : vector<1x1x256xf32> to vector<1x256xf32>
    %136 = vector.broadcast %135 : vector<1x256xf32> to vector<64x256xf32>
    %137 = arith.mulf %133, %136 : vector<64x256xf32>
    %c0_125 = arith.constant 0 : index
    %c0_126 = arith.constant 0 : index
    %c0_127 = arith.constant 0 : index
    %138 = vector.load %arg8[%c0_125, %c0_126, %c0_127] : memref<3x1x256xf32, #tpu.memory_space<vmem>>, vector<1x1x256xf32>
    %139 = vector.shape_cast %138 : vector<1x1x256xf32> to vector<1x256xf32>
    %140 = vector.broadcast %139 : vector<1x256xf32> to vector<64x256xf32>
    %141 = arith.addf %137, %140 : vector<64x256xf32>
    %cst_128 = arith.constant 0.000000e+00 : f32
    %142 = vector.broadcast %cst_128 : f32 to vector<64x256xf32>
    %143 = arith.maximumf %141, %142 : vector<64x256xf32>
    %c0_129 = arith.constant 0 : index
    %c0_130 = arith.constant 0 : index
    %144 = vector.load %arg17[%c0_129, %c0_130] : memref<64x256xf32, #tpu.memory_space<vmem>>, vector<64x256xf32>
    %c1_131 = arith.constant 1 : index
    %c0_132 = arith.constant 0 : index
    %c0_133 = arith.constant 0 : index
    %145 = vector.load %arg12[%c1_131, %c0_132, %c0_133] : memref<5x256x256xf32, #tpu.memory_space<vmem>>, vector<1x256x256xf32>
    %146 = vector.shape_cast %145 : vector<1x256x256xf32> to vector<256x256xf32>
    %cst_134 = arith.constant dense<0.000000e+00> : vector<64x256xf32>
    %147 = tpu.matmul %143, %146, %cst_134 {dimension_numbers = #tpu.dot_dimension_numbers<[1], [0], [0], [1], [0, 0, 1, 1], [], []>} : vector<64x256xf32>, vector<256x256xf32>, vector<64x256xf32> -> vector<64x256xf32>
    %148 = arith.addf %144, %147 : vector<64x256xf32>
    %c0_135 = arith.constant 0 : index
    %c0_136 = arith.constant 0 : index
    %149 = vector.load %arg17[%c0_135, %c0_136] : memref<64x256xf32, #tpu.memory_space<vmem>>, vector<64x256xf32>
    tpu.vector_store %arg17[%c0_135, %c0_136], %148 {strides = array<i32>} : memref<64x256xf32, #tpu.memory_space<vmem>>, vector<64x256xf32>,
    %c36_i32_137 = arith.constant 36 : i32
    %150 = arith.addi %c36_i32_137, %1 : i32
    %c0_i32_138 = arith.constant 0 : i32
    %151 = arith.addi %150, %c0_i32_138 : i32
    %c0_139 = arith.constant 0 : index
    %152 = arith.index_cast %151 : i32 to index
    %c36_140 = arith.constant 36 : index
    %c0_141 = arith.constant 0 : index
    %153 = vector.load %arg2[%c0_139, %152, %c36_140, %c0_141] : memref<1x88x88x8xf32, #tpu.memory_space<vmem>>, vector<1x4x16x8xf32>
    %154 = vector.shape_cast %153 : vector<1x4x16x8xf32> to vector<4x16x8xf32>
    %155 = vector.shape_cast %154 : vector<4x16x8xf32> to vector<64x8xf32>
    %c13 = arith.constant 13 : index
    %c0_142 = arith.constant 0 : index
    %c0_143 = arith.constant 0 : index
    %156 = vector.load %arg6[%c13, %c0_142, %c0_143] : memref<27x8x256xf32, #tpu.memory_space<vmem>>, vector<1x8x256xf32>
    %157 = vector.shape_cast %156 : vector<1x8x256xf32> to vector<8x256xf32>
    %cst_144 = arith.constant dense<0.000000e+00> : vector<64x256xf32>
    %158 = tpu.matmul %155, %157, %cst_144 {dimension_numbers = #tpu.dot_dimension_numbers<[1], [0], [0], [1], [0, 0, 1, 1], [], []>} : vector<64x8xf32>, vector<8x256xf32>, vector<64x256xf32> -> vector<64x256xf32>
    %c0_145 = arith.constant 0 : index
    %c0_146 = arith.constant 0 : index
    %159 = vector.load %arg18[%c0_145, %c0_146] : memref<64x256xf32, #tpu.memory_space<vmem>>, vector<64x256xf32>
    tpu.vector_store %arg18[%c0_145, %c0_146], %158 {strides = array<i32>} : memref<64x256xf32, #tpu.memory_space<vmem>>, vector<64x256xf32>,
    %c0_147 = arith.constant 0 : index
    %c0_148 = arith.constant 0 : index
    %160 = vector.load %arg18[%c0_147, %c0_148] : memref<64x256xf32, #tpu.memory_space<vmem>>, vector<64x256xf32>
    %c1_149 = arith.constant 1 : index
    %c0_150 = arith.constant 0 : index
    %c0_151 = arith.constant 0 : index
    %161 = vector.load %arg7[%c1_149, %c0_150, %c0_151] : memref<3x1x256xf32, #tpu.memory_space<vmem>>, vector<1x1x256xf32>
    %162 = vector.shape_cast %161 : vector<1x1x256xf32> to vector<1x256xf32>
    %163 = vector.broadcast %162 : vector<1x256xf32> to vector<64x256xf32>
    %164 = arith.mulf %160, %163 : vector<64x256xf32>
    %c1_152 = arith.constant 1 : index
    %c0_153 = arith.constant 0 : index
    %c0_154 = arith.constant 0 : index
    %165 = vector.load %arg8[%c1_152, %c0_153, %c0_154] : memref<3x1x256xf32, #tpu.memory_space<vmem>>, vector<1x1x256xf32>
    %166 = vector.shape_cast %165 : vector<1x1x256xf32> to vector<1x256xf32>
    %167 = vector.broadcast %166 : vector<1x256xf32> to vector<64x256xf32>
    %168 = arith.addf %164, %167 : vector<64x256xf32>
    %cst_155 = arith.constant 0.000000e+00 : f32
    %169 = vector.broadcast %cst_155 : f32 to vector<64x256xf32>
    %170 = arith.maximumf %168, %169 : vector<64x256xf32>
    %c0_156 = arith.constant 0 : index
    %c0_157 = arith.constant 0 : index
    %171 = vector.load %arg17[%c0_156, %c0_157] : memref<64x256xf32, #tpu.memory_space<vmem>>, vector<64x256xf32>
    %c2_158 = arith.constant 2 : index
    %c0_159 = arith.constant 0 : index
    %c0_160 = arith.constant 0 : index
    %172 = vector.load %arg12[%c2_158, %c0_159, %c0_160] : memref<5x256x256xf32, #tpu.memory_space<vmem>>, vector<1x256x256xf32>
    %173 = vector.shape_cast %172 : vector<1x256x256xf32> to vector<256x256xf32>
    %cst_161 = arith.constant dense<0.000000e+00> : vector<64x256xf32>
    %174 = tpu.matmul %170, %173, %cst_161 {dimension_numbers = #tpu.dot_dimension_numbers<[1], [0], [0], [1], [0, 0, 1, 1], [], []>} : vector<64x256xf32>, vector<256x256xf32>, vector<64x256xf32> -> vector<64x256xf32>
    %175 = arith.addf %171, %174 : vector<64x256xf32>
    %c0_162 = arith.constant 0 : index
    %c0_163 = arith.constant 0 : index
    %176 = vector.load %arg17[%c0_162, %c0_163] : memref<64x256xf32, #tpu.memory_space<vmem>>, vector<64x256xf32>
    tpu.vector_store %arg17[%c0_162, %c0_163], %175 {strides = array<i32>} : memref<64x256xf32, #tpu.memory_space<vmem>>, vector<64x256xf32>,
    %c36_i32_164 = arith.constant 36 : i32
    %177 = arith.addi %c36_i32_164, %1 : i32
    %c0_i32_165 = arith.constant 0 : i32
    %178 = arith.addi %177, %c0_i32_165 : i32
    %c0_166 = arith.constant 0 : index
    %179 = arith.index_cast %178 : i32 to index
    %c36_167 = arith.constant 36 : index
    %c0_168 = arith.constant 0 : index
    %180 = vector.load %arg2[%c0_166, %179, %c36_167, %c0_168] : memref<1x88x88x8xf32, #tpu.memory_space<vmem>>, vector<1x4x16x8xf32>
    %181 = vector.shape_cast %180 : vector<1x4x16x8xf32> to vector<4x16x8xf32>
    %182 = vector.shape_cast %181 : vector<4x16x8xf32> to vector<64x8xf32>
    %c22 = arith.constant 22 : index
    %c0_169 = arith.constant 0 : index
    %c0_170 = arith.constant 0 : index
    %183 = vector.load %arg6[%c22, %c0_169, %c0_170] : memref<27x8x256xf32, #tpu.memory_space<vmem>>, vector<1x8x256xf32>
    %184 = vector.shape_cast %183 : vector<1x8x256xf32> to vector<8x256xf32>
    %cst_171 = arith.constant dense<0.000000e+00> : vector<64x256xf32>
    %185 = tpu.matmul %182, %184, %cst_171 {dimension_numbers = #tpu.dot_dimension_numbers<[1], [0], [0], [1], [0, 0, 1, 1], [], []>} : vector<64x8xf32>, vector<8x256xf32>, vector<64x256xf32> -> vector<64x256xf32>
    %c0_172 = arith.constant 0 : index
    %c0_173 = arith.constant 0 : index
    %186 = vector.load %arg18[%c0_172, %c0_173] : memref<64x256xf32, #tpu.memory_space<vmem>>, vector<64x256xf32>
    tpu.vector_store %arg18[%c0_172, %c0_173], %185 {strides = array<i32>} : memref<64x256xf32, #tpu.memory_space<vmem>>, vector<64x256xf32>,
    %c0_174 = arith.constant 0 : index
    %c0_175 = arith.constant 0 : index
    %187 = vector.load %arg18[%c0_174, %c0_175] : memref<64x256xf32, #tpu.memory_space<vmem>>, vector<64x256xf32>
    %c2_176 = arith.constant 2 : index
    %c0_177 = arith.constant 0 : index
    %c0_178 = arith.constant 0 : index
    %188 = vector.load %arg7[%c2_176, %c0_177, %c0_178] : memref<3x1x256xf32, #tpu.memory_space<vmem>>, vector<1x1x256xf32>
    %189 = vector.shape_cast %188 : vector<1x1x256xf32> to vector<1x256xf32>
    %190 = vector.broadcast %189 : vector<1x256xf32> to vector<64x256xf32>
    %191 = arith.mulf %187, %190 : vector<64x256xf32>
    %c2_179 = arith.constant 2 : index
    %c0_180 = arith.constant 0 : index
    %c0_181 = arith.constant 0 : index
    %192 = vector.load %arg8[%c2_179, %c0_180, %c0_181] : memref<3x1x256xf32, #tpu.memory_space<vmem>>, vector<1x1x256xf32>
    %193 = vector.shape_cast %192 : vector<1x1x256xf32> to vector<1x256xf32>
    %194 = vector.broadcast %193 : vector<1x256xf32> to vector<64x256xf32>
    %195 = arith.addf %191, %194 : vector<64x256xf32>
    %cst_182 = arith.constant 0.000000e+00 : f32
    %196 = vector.broadcast %cst_182 : f32 to vector<64x256xf32>
    %197 = arith.maximumf %195, %196 : vector<64x256xf32>
    %c0_183 = arith.constant 0 : index
    %c0_184 = arith.constant 0 : index
    %198 = vector.load %arg17[%c0_183, %c0_184] : memref<64x256xf32, #tpu.memory_space<vmem>>, vector<64x256xf32>
    %c3_185 = arith.constant 3 : index
    %c0_186 = arith.constant 0 : index
    %c0_187 = arith.constant 0 : index
    %199 = vector.load %arg12[%c3_185, %c0_186, %c0_187] : memref<5x256x256xf32, #tpu.memory_space<vmem>>, vector<1x256x256xf32>
    %200 = vector.shape_cast %199 : vector<1x256x256xf32> to vector<256x256xf32>
    %cst_188 = arith.constant dense<0.000000e+00> : vector<64x256xf32>
    %201 = tpu.matmul %197, %200, %cst_188 {dimension_numbers = #tpu.dot_dimension_numbers<[1], [0], [0], [1], [0, 0, 1, 1], [], []>} : vector<64x256xf32>, vector<256x256xf32>, vector<64x256xf32> -> vector<64x256xf32>
    %202 = arith.addf %198, %201 : vector<64x256xf32>
    %c0_189 = arith.constant 0 : index
    %c0_190 = arith.constant 0 : index
    %203 = vector.load %arg17[%c0_189, %c0_190] : memref<64x256xf32, #tpu.memory_space<vmem>>, vector<64x256xf32>
    tpu.vector_store %arg17[%c0_189, %c0_190], %202 {strides = array<i32>} : memref<64x256xf32, #tpu.memory_space<vmem>>, vector<64x256xf32>,
    %c0_191 = arith.constant 0 : index
    %c0_192 = arith.constant 0 : index
    %204 = vector.load %arg17[%c0_191, %c0_192] : memref<64x256xf32, #tpu.memory_space<vmem>>, vector<64x256xf32>
    %c0_193 = arith.constant 0 : index
    %c0_194 = arith.constant 0 : index
    %205 = vector.load %arg13[%c0_193, %c0_194] : memref<1x256xf32, #tpu.memory_space<vmem>>, vector<1x256xf32>
    %206 = vector.broadcast %205 : vector<1x256xf32> to vector<64x256xf32>
    %207 = arith.mulf %204, %206 : vector<64x256xf32>
    %c0_195 = arith.constant 0 : index
    %c0_196 = arith.constant 0 : index
    %208 = vector.load %arg14[%c0_195, %c0_196] : memref<1x256xf32, #tpu.memory_space<vmem>>, vector<1x256xf32>
    %209 = vector.broadcast %208 : vector<1x256xf32> to vector<64x256xf32>
    %210 = arith.addf %207, %209 : vector<64x256xf32>
    %cst_197 = arith.constant 0.000000e+00 : f32
    %211 = vector.broadcast %cst_197 : f32 to vector<64x256xf32>
    %212 = arith.maximumf %210, %211 : vector<64x256xf32>
    %213 = vector.shape_cast %212 : vector<64x256xf32> to vector<1x4x16x256xf32>
    %c0_198 = arith.constant 0 : index
    %c0_199 = arith.constant 0 : index
    %c0_200 = arith.constant 0 : index
    %c0_201 = arith.constant 0 : index
    %214 = vector.load %arg15[%c0_198, %c0_199, %c0_200, %c0_201] : memref<1x4x16x256xf32, #tpu.memory_space<vmem>>, vector<1x4x16x256xf32>
    tpu.vector_store %arg15[%c0_198, %c0_199, %c0_200, %c0_201], %213 {strides = array<i32>} : memref<1x4x16x256xf32, #tpu.memory_space<vmem>>, vector<1x4x16x256xf32>,
    return
  }
  func.func @transform_0(%arg0: i32, %arg1: i32) -> (i32, i32, i32, i32) {
    %c0_i32 = arith.constant 0 : i32
    %c0_i32_0 = arith.constant 0 : i32
    %c0_i32_1 = arith.constant 0 : i32
    %c0_i32_2 = arith.constant 0 : i32
    return %arg0, %c0_i32, %c0_i32_0, %c0_i32_1 : i32, i32, i32, i32
  }
  func.func @transform_1(%arg0: i32, %arg1: i32) -> (i32, i32) {
    %c0_i32 = arith.constant 0 : i32
    %c0_i32_0 = arith.constant 0 : i32
    %c0_i32_1 = arith.constant 0 : i32
    return %c0_i32, %c0_i32_0 : i32, i32
  }
  func.func @transform_2(%arg0: i32, %arg1: i32) -> (i32, i32) {
    %c0_i32 = arith.constant 0 : i32
    %c0_i32_0 = arith.constant 0 : i32
    %c0_i32_1 = arith.constant 0 : i32
    return %c0_i32, %c0_i32_0 : i32, i32
  }
  func.func @transform_3(%arg0: i32, %arg1: i32) -> (i32, i32) {
    %c0_i32 = arith.constant 0 : i32
    %c0_i32_0 = arith.constant 0 : i32
    %c0_i32_1 = arith.constant 0 : i32
    return %c0_i32, %c0_i32_0 : i32, i32
  }
  func.func @transform_4(%arg0: i32, %arg1: i32) -> (i32, i32, i32) {
    %c0_i32 = arith.constant 0 : i32
    %c0_i32_0 = arith.constant 0 : i32
    %c0_i32_1 = arith.constant 0 : i32
    %c0_i32_2 = arith.constant 0 : i32
    return %c0_i32, %c0_i32_0, %c0_i32_1 : i32, i32, i32
  }
  func.func @transform_5(%arg0: i32, %arg1: i32) -> (i32, i32, i32) {
    %c0_i32 = arith.constant 0 : i32
    %c0_i32_0 = arith.constant 0 : i32
    %c0_i32_1 = arith.constant 0 : i32
    %c0_i32_2 = arith.constant 0 : i32
    return %c0_i32, %c0_i32_0, %c0_i32_1 : i32, i32, i32
  }
  func.func @transform_6(%arg0: i32, %arg1: i32) -> (i32, i32, i32) {
    %c0_i32 = arith.constant 0 : i32
    %c0_i32_0 = arith.constant 0 : i32
    %c0_i32_1 = arith.constant 0 : i32
    %c0_i32_2 = arith.constant 0 : i32
    return %c0_i32, %c0_i32_0, %c0_i32_1 : i32, i32, i32
  }
  func.func @transform_7(%arg0: i32, %arg1: i32) -> (i32, i32) {
    %c0_i32 = arith.constant 0 : i32
    %c0_i32_0 = arith.constant 0 : i32
    %c0_i32_1 = arith.constant 0 : i32
    return %c0_i32, %c0_i32_0 : i32, i32
  }
  func.func @transform_8(%arg0: i32, %arg1: i32) -> (i32, i32) {
    %c0_i32 = arith.constant 0 : i32
    %c0_i32_0 = arith.constant 0 : i32
    %c0_i32_1 = arith.constant 0 : i32
    return %c0_i32, %c0_i32_0 : i32, i32
  }
  func.func @transform_9(%arg0: i32, %arg1: i32) -> (i32, i32) {
    %c0_i32 = arith.constant 0 : i32
    %c0_i32_0 = arith.constant 0 : i32
    %c0_i32_1 = arith.constant 0 : i32
    return %c0_i32, %c0_i32_0 : i32, i32
  }
  func.func @transform_10(%arg0: i32, %arg1: i32) -> (i32, i32, i32) {
    %c0_i32 = arith.constant 0 : i32
    %c0_i32_0 = arith.constant 0 : i32
    %c0_i32_1 = arith.constant 0 : i32
    %c0_i32_2 = arith.constant 0 : i32
    return %c0_i32, %c0_i32_0, %c0_i32_1 : i32, i32, i32
  }
  func.func @transform_11(%arg0: i32, %arg1: i32) -> (i32, i32) {
    %c0_i32 = arith.constant 0 : i32
    %c0_i32_0 = arith.constant 0 : i32
    %c0_i32_1 = arith.constant 0 : i32
    return %c0_i32, %c0_i32_0 : i32, i32
  }
  func.func @transform_12(%arg0: i32, %arg1: i32) -> (i32, i32) {
    %c0_i32 = arith.constant 0 : i32
    %c0_i32_0 = arith.constant 0 : i32
    %c0_i32_1 = arith.constant 0 : i32
    return %c0_i32, %c0_i32_0 : i32, i32
  }
  func.func @transform_13(%arg0: i32, %arg1: i32) -> (i32, i32, i32, i32) {
    %c0_i32 = arith.constant 0 : i32
    %c0_i32_0 = arith.constant 0 : i32
    %c0_i32_1 = arith.constant 0 : i32
    return %arg0, %arg1, %c0_i32, %c0_i32_0 : i32, i32, i32, i32
  }
}

module attributes {stable_mosaic.version = 11 : i64} {
  func.func @_head_cls_kernel(%arg0: i32, %arg1: i32, %arg2: memref<1x18x18x256xf32, #tpu.memory_space<vmem>>, %arg3: memref<9x256x256xf32, #tpu.memory_space<vmem>>, %arg4: memref<1x256xf32, #tpu.memory_space<vmem>>, %arg5: memref<1x256xf32, #tpu.memory_space<vmem>>, %arg6: memref<256x128xf32, #tpu.memory_space<vmem>>, %arg7: memref<1x128xf32, #tpu.memory_space<vmem>>, %arg8: memref<1x4x16x128xf32, #tpu.memory_space<vmem>>, %arg9: memref<64x256xf32, #tpu.memory_space<vmem>>) attributes {dimension_semantics = [#tpu.dimension_semantics<parallel>, #tpu.dimension_semantics<parallel>], iteration_bounds = array<i64: 2, 4>, scalar_prefetch = 0 : i64, scratch_operands = 1 : i64, tpu.core_type = #tpu.core_type<tc>, window_params = [{transform_indices = @transform_0, window_bounds = array<i64: 1, 18, 18, 256>}, {pipeline_mode = #tpu.pipeline_mode<synchronous>, transform_indices = @transform_1, window_bounds = array<i64: 9, 256, 256>}, {pipeline_mode = #tpu.pipeline_mode<synchronous>, transform_indices = @transform_2, window_bounds = array<i64: 1, 256>}, {pipeline_mode = #tpu.pipeline_mode<synchronous>, transform_indices = @transform_3, window_bounds = array<i64: 1, 256>}, {pipeline_mode = #tpu.pipeline_mode<synchronous>, transform_indices = @transform_4, window_bounds = array<i64: 256, 128>}, {pipeline_mode = #tpu.pipeline_mode<synchronous>, transform_indices = @transform_5, window_bounds = array<i64: 1, 128>}, {transform_indices = @transform_6, window_bounds = array<i64: 1, 4, 16, 128>}]} {
    %c4_i32 = arith.constant 4 : i32
    %0 = arith.muli %arg1, %c4_i32 : i32
    %1 = tpu.assume_multiple %0, 4 : i32
    %c0_i32 = arith.constant 0 : i32
    %2 = arith.addi %1, %c0_i32 : i32
    %c0 = arith.constant 0 : index
    %3 = arith.index_cast %2 : i32 to index
    %c0_0 = arith.constant 0 : index
    %c0_1 = arith.constant 0 : index
    %4 = vector.load %arg2[%c0, %3, %c0_0, %c0_1] : memref<1x18x18x256xf32, #tpu.memory_space<vmem>>, vector<1x4x16x256xf32>
    %5 = vector.shape_cast %4 : vector<1x4x16x256xf32> to vector<4x16x256xf32>
    %6 = vector.shape_cast %5 : vector<4x16x256xf32> to vector<64x256xf32>
    %c0_2 = arith.constant 0 : index
    %c0_3 = arith.constant 0 : index
    %c0_4 = arith.constant 0 : index
    %7 = vector.load %arg3[%c0_2, %c0_3, %c0_4] : memref<9x256x256xf32, #tpu.memory_space<vmem>>, vector<1x256x256xf32>
    %8 = vector.shape_cast %7 : vector<1x256x256xf32> to vector<256x256xf32>
    %cst = arith.constant dense<0.000000e+00> : vector<64x256xf32>
    %9 = tpu.matmul %6, %8, %cst {dimension_numbers = #tpu.dot_dimension_numbers<[1], [0], [0], [1], [0, 0, 1, 1], [], []>} : vector<64x256xf32>, vector<256x256xf32>, vector<64x256xf32> -> vector<64x256xf32>
    %c0_5 = arith.constant 0 : index
    %c0_6 = arith.constant 0 : index
    %10 = vector.load %arg9[%c0_5, %c0_6] : memref<64x256xf32, #tpu.memory_space<vmem>>, vector<64x256xf32>
    tpu.vector_store %arg9[%c0_5, %c0_6], %9 {strides = array<i32>} : memref<64x256xf32, #tpu.memory_space<vmem>>, vector<64x256xf32>,
    %c0_i32_7 = arith.constant 0 : i32
    %11 = arith.addi %1, %c0_i32_7 : i32
    %c0_8 = arith.constant 0 : index
    %12 = arith.index_cast %11 : i32 to index
    %c1 = arith.constant 1 : index
    %c0_9 = arith.constant 0 : index
    %13 = vector.load %arg2[%c0_8, %12, %c1, %c0_9] : memref<1x18x18x256xf32, #tpu.memory_space<vmem>>, vector<1x4x16x256xf32>
    %14 = vector.shape_cast %13 : vector<1x4x16x256xf32> to vector<4x16x256xf32>
    %15 = vector.shape_cast %14 : vector<4x16x256xf32> to vector<64x256xf32>
    %c1_10 = arith.constant 1 : index
    %c0_11 = arith.constant 0 : index
    %c0_12 = arith.constant 0 : index
    %16 = vector.load %arg3[%c1_10, %c0_11, %c0_12] : memref<9x256x256xf32, #tpu.memory_space<vmem>>, vector<1x256x256xf32>
    %17 = vector.shape_cast %16 : vector<1x256x256xf32> to vector<256x256xf32>
    %cst_13 = arith.constant dense<0.000000e+00> : vector<64x256xf32>
    %18 = tpu.matmul %15, %17, %cst_13 {dimension_numbers = #tpu.dot_dimension_numbers<[1], [0], [0], [1], [0, 0, 1, 1], [], []>} : vector<64x256xf32>, vector<256x256xf32>, vector<64x256xf32> -> vector<64x256xf32>
    %c0_14 = arith.constant 0 : index
    %c0_15 = arith.constant 0 : index
    %19 = vector.load %arg9[%c0_14, %c0_15] : memref<64x256xf32, #tpu.memory_space<vmem>>, vector<64x256xf32>
    %20 = arith.addf %19, %18 : vector<64x256xf32>
    %c0_16 = arith.constant 0 : index
    %c0_17 = arith.constant 0 : index
    %21 = vector.load %arg9[%c0_16, %c0_17] : memref<64x256xf32, #tpu.memory_space<vmem>>, vector<64x256xf32>
    tpu.vector_store %arg9[%c0_16, %c0_17], %20 {strides = array<i32>} : memref<64x256xf32, #tpu.memory_space<vmem>>, vector<64x256xf32>,
    %c0_i32_18 = arith.constant 0 : i32
    %22 = arith.addi %1, %c0_i32_18 : i32
    %c0_19 = arith.constant 0 : index
    %23 = arith.index_cast %22 : i32 to index
    %c2 = arith.constant 2 : index
    %c0_20 = arith.constant 0 : index
    %24 = vector.load %arg2[%c0_19, %23, %c2, %c0_20] : memref<1x18x18x256xf32, #tpu.memory_space<vmem>>, vector<1x4x16x256xf32>
    %25 = vector.shape_cast %24 : vector<1x4x16x256xf32> to vector<4x16x256xf32>
    %26 = vector.shape_cast %25 : vector<4x16x256xf32> to vector<64x256xf32>
    %c2_21 = arith.constant 2 : index
    %c0_22 = arith.constant 0 : index
    %c0_23 = arith.constant 0 : index
    %27 = vector.load %arg3[%c2_21, %c0_22, %c0_23] : memref<9x256x256xf32, #tpu.memory_space<vmem>>, vector<1x256x256xf32>
    %28 = vector.shape_cast %27 : vector<1x256x256xf32> to vector<256x256xf32>
    %cst_24 = arith.constant dense<0.000000e+00> : vector<64x256xf32>
    %29 = tpu.matmul %26, %28, %cst_24 {dimension_numbers = #tpu.dot_dimension_numbers<[1], [0], [0], [1], [0, 0, 1, 1], [], []>} : vector<64x256xf32>, vector<256x256xf32>, vector<64x256xf32> -> vector<64x256xf32>
    %c0_25 = arith.constant 0 : index
    %c0_26 = arith.constant 0 : index
    %30 = vector.load %arg9[%c0_25, %c0_26] : memref<64x256xf32, #tpu.memory_space<vmem>>, vector<64x256xf32>
    %31 = arith.addf %30, %29 : vector<64x256xf32>
    %c0_27 = arith.constant 0 : index
    %c0_28 = arith.constant 0 : index
    %32 = vector.load %arg9[%c0_27, %c0_28] : memref<64x256xf32, #tpu.memory_space<vmem>>, vector<64x256xf32>
    tpu.vector_store %arg9[%c0_27, %c0_28], %31 {strides = array<i32>} : memref<64x256xf32, #tpu.memory_space<vmem>>, vector<64x256xf32>,
    %c1_i32 = arith.constant 1 : i32
    %33 = arith.addi %1, %c1_i32 : i32
    %c0_29 = arith.constant 0 : index
    %34 = arith.index_cast %33 : i32 to index
    %c0_30 = arith.constant 0 : index
    %c0_31 = arith.constant 0 : index
    %35 = vector.load %arg2[%c0_29, %34, %c0_30, %c0_31] : memref<1x18x18x256xf32, #tpu.memory_space<vmem>>, vector<1x4x16x256xf32>
    %36 = vector.shape_cast %35 : vector<1x4x16x256xf32> to vector<4x16x256xf32>
    %37 = vector.shape_cast %36 : vector<4x16x256xf32> to vector<64x256xf32>
    %c3 = arith.constant 3 : index
    %c0_32 = arith.constant 0 : index
    %c0_33 = arith.constant 0 : index
    %38 = vector.load %arg3[%c3, %c0_32, %c0_33] : memref<9x256x256xf32, #tpu.memory_space<vmem>>, vector<1x256x256xf32>
    %39 = vector.shape_cast %38 : vector<1x256x256xf32> to vector<256x256xf32>
    %cst_34 = arith.constant dense<0.000000e+00> : vector<64x256xf32>
    %40 = tpu.matmul %37, %39, %cst_34 {dimension_numbers = #tpu.dot_dimension_numbers<[1], [0], [0], [1], [0, 0, 1, 1], [], []>} : vector<64x256xf32>, vector<256x256xf32>, vector<64x256xf32> -> vector<64x256xf32>
    %c0_35 = arith.constant 0 : index
    %c0_36 = arith.constant 0 : index
    %41 = vector.load %arg9[%c0_35, %c0_36] : memref<64x256xf32, #tpu.memory_space<vmem>>, vector<64x256xf32>
    %42 = arith.addf %41, %40 : vector<64x256xf32>
    %c0_37 = arith.constant 0 : index
    %c0_38 = arith.constant 0 : index
    %43 = vector.load %arg9[%c0_37, %c0_38] : memref<64x256xf32, #tpu.memory_space<vmem>>, vector<64x256xf32>
    tpu.vector_store %arg9[%c0_37, %c0_38], %42 {strides = array<i32>} : memref<64x256xf32, #tpu.memory_space<vmem>>, vector<64x256xf32>,
    %c1_i32_39 = arith.constant 1 : i32
    %44 = arith.addi %1, %c1_i32_39 : i32
    %c0_40 = arith.constant 0 : index
    %45 = arith.index_cast %44 : i32 to index
    %c1_41 = arith.constant 1 : index
    %c0_42 = arith.constant 0 : index
    %46 = vector.load %arg2[%c0_40, %45, %c1_41, %c0_42] : memref<1x18x18x256xf32, #tpu.memory_space<vmem>>, vector<1x4x16x256xf32>
    %47 = vector.shape_cast %46 : vector<1x4x16x256xf32> to vector<4x16x256xf32>
    %48 = vector.shape_cast %47 : vector<4x16x256xf32> to vector<64x256xf32>
    %c4 = arith.constant 4 : index
    %c0_43 = arith.constant 0 : index
    %c0_44 = arith.constant 0 : index
    %49 = vector.load %arg3[%c4, %c0_43, %c0_44] : memref<9x256x256xf32, #tpu.memory_space<vmem>>, vector<1x256x256xf32>
    %50 = vector.shape_cast %49 : vector<1x256x256xf32> to vector<256x256xf32>
    %cst_45 = arith.constant dense<0.000000e+00> : vector<64x256xf32>
    %51 = tpu.matmul %48, %50, %cst_45 {dimension_numbers = #tpu.dot_dimension_numbers<[1], [0], [0], [1], [0, 0, 1, 1], [], []>} : vector<64x256xf32>, vector<256x256xf32>, vector<64x256xf32> -> vector<64x256xf32>
    %c0_46 = arith.constant 0 : index
    %c0_47 = arith.constant 0 : index
    %52 = vector.load %arg9[%c0_46, %c0_47] : memref<64x256xf32, #tpu.memory_space<vmem>>, vector<64x256xf32>
    %53 = arith.addf %52, %51 : vector<64x256xf32>
    %c0_48 = arith.constant 0 : index
    %c0_49 = arith.constant 0 : index
    %54 = vector.load %arg9[%c0_48, %c0_49] : memref<64x256xf32, #tpu.memory_space<vmem>>, vector<64x256xf32>
    tpu.vector_store %arg9[%c0_48, %c0_49], %53 {strides = array<i32>} : memref<64x256xf32, #tpu.memory_space<vmem>>, vector<64x256xf32>,
    %c1_i32_50 = arith.constant 1 : i32
    %55 = arith.addi %1, %c1_i32_50 : i32
    %c0_51 = arith.constant 0 : index
    %56 = arith.index_cast %55 : i32 to index
    %c2_52 = arith.constant 2 : index
    %c0_53 = arith.constant 0 : index
    %57 = vector.load %arg2[%c0_51, %56, %c2_52, %c0_53] : memref<1x18x18x256xf32, #tpu.memory_space<vmem>>, vector<1x4x16x256xf32>
    %58 = vector.shape_cast %57 : vector<1x4x16x256xf32> to vector<4x16x256xf32>
    %59 = vector.shape_cast %58 : vector<4x16x256xf32> to vector<64x256xf32>
    %c5 = arith.constant 5 : index
    %c0_54 = arith.constant 0 : index
    %c0_55 = arith.constant 0 : index
    %60 = vector.load %arg3[%c5, %c0_54, %c0_55] : memref<9x256x256xf32, #tpu.memory_space<vmem>>, vector<1x256x256xf32>
    %61 = vector.shape_cast %60 : vector<1x256x256xf32> to vector<256x256xf32>
    %cst_56 = arith.constant dense<0.000000e+00> : vector<64x256xf32>
    %62 = tpu.matmul %59, %61, %cst_56 {dimension_numbers = #tpu.dot_dimension_numbers<[1], [0], [0], [1], [0, 0, 1, 1], [], []>} : vector<64x256xf32>, vector<256x256xf32>, vector<64x256xf32> -> vector<64x256xf32>
    %c0_57 = arith.constant 0 : index
    %c0_58 = arith.constant 0 : index
    %63 = vector.load %arg9[%c0_57, %c0_58] : memref<64x256xf32, #tpu.memory_space<vmem>>, vector<64x256xf32>
    %64 = arith.addf %63, %62 : vector<64x256xf32>
    %c0_59 = arith.constant 0 : index
    %c0_60 = arith.constant 0 : index
    %65 = vector.load %arg9[%c0_59, %c0_60] : memref<64x256xf32, #tpu.memory_space<vmem>>, vector<64x256xf32>
    tpu.vector_store %arg9[%c0_59, %c0_60], %64 {strides = array<i32>} : memref<64x256xf32, #tpu.memory_space<vmem>>, vector<64x256xf32>,
    %c2_i32 = arith.constant 2 : i32
    %66 = arith.addi %1, %c2_i32 : i32
    %c0_61 = arith.constant 0 : index
    %67 = arith.index_cast %66 : i32 to index
    %c0_62 = arith.constant 0 : index
    %c0_63 = arith.constant 0 : index
    %68 = vector.load %arg2[%c0_61, %67, %c0_62, %c0_63] : memref<1x18x18x256xf32, #tpu.memory_space<vmem>>, vector<1x4x16x256xf32>
    %69 = vector.shape_cast %68 : vector<1x4x16x256xf32> to vector<4x16x256xf32>
    %70 = vector.shape_cast %69 : vector<4x16x256xf32> to vector<64x256xf32>
    %c6 = arith.constant 6 : index
    %c0_64 = arith.constant 0 : index
    %c0_65 = arith.constant 0 : index
    %71 = vector.load %arg3[%c6, %c0_64, %c0_65] : memref<9x256x256xf32, #tpu.memory_space<vmem>>, vector<1x256x256xf32>
    %72 = vector.shape_cast %71 : vector<1x256x256xf32> to vector<256x256xf32>
    %cst_66 = arith.constant dense<0.000000e+00> : vector<64x256xf32>
    %73 = tpu.matmul %70, %72, %cst_66 {dimension_numbers = #tpu.dot_dimension_numbers<[1], [0], [0], [1], [0, 0, 1, 1], [], []>} : vector<64x256xf32>, vector<256x256xf32>, vector<64x256xf32> -> vector<64x256xf32>
    %c0_67 = arith.constant 0 : index
    %c0_68 = arith.constant 0 : index
    %74 = vector.load %arg9[%c0_67, %c0_68] : memref<64x256xf32, #tpu.memory_space<vmem>>, vector<64x256xf32>
    %75 = arith.addf %74, %73 : vector<64x256xf32>
    %c0_69 = arith.constant 0 : index
    %c0_70 = arith.constant 0 : index
    %76 = vector.load %arg9[%c0_69, %c0_70] : memref<64x256xf32, #tpu.memory_space<vmem>>, vector<64x256xf32>
    tpu.vector_store %arg9[%c0_69, %c0_70], %75 {strides = array<i32>} : memref<64x256xf32, #tpu.memory_space<vmem>>, vector<64x256xf32>,
    %c2_i32_71 = arith.constant 2 : i32
    %77 = arith.addi %1, %c2_i32_71 : i32
    %c0_72 = arith.constant 0 : index
    %78 = arith.index_cast %77 : i32 to index
    %c1_73 = arith.constant 1 : index
    %c0_74 = arith.constant 0 : index
    %79 = vector.load %arg2[%c0_72, %78, %c1_73, %c0_74] : memref<1x18x18x256xf32, #tpu.memory_space<vmem>>, vector<1x4x16x256xf32>
    %80 = vector.shape_cast %79 : vector<1x4x16x256xf32> to vector<4x16x256xf32>
    %81 = vector.shape_cast %80 : vector<4x16x256xf32> to vector<64x256xf32>
    %c7 = arith.constant 7 : index
    %c0_75 = arith.constant 0 : index
    %c0_76 = arith.constant 0 : index
    %82 = vector.load %arg3[%c7, %c0_75, %c0_76] : memref<9x256x256xf32, #tpu.memory_space<vmem>>, vector<1x256x256xf32>
    %83 = vector.shape_cast %82 : vector<1x256x256xf32> to vector<256x256xf32>
    %cst_77 = arith.constant dense<0.000000e+00> : vector<64x256xf32>
    %84 = tpu.matmul %81, %83, %cst_77 {dimension_numbers = #tpu.dot_dimension_numbers<[1], [0], [0], [1], [0, 0, 1, 1], [], []>} : vector<64x256xf32>, vector<256x256xf32>, vector<64x256xf32> -> vector<64x256xf32>
    %c0_78 = arith.constant 0 : index
    %c0_79 = arith.constant 0 : index
    %85 = vector.load %arg9[%c0_78, %c0_79] : memref<64x256xf32, #tpu.memory_space<vmem>>, vector<64x256xf32>
    %86 = arith.addf %85, %84 : vector<64x256xf32>
    %c0_80 = arith.constant 0 : index
    %c0_81 = arith.constant 0 : index
    %87 = vector.load %arg9[%c0_80, %c0_81] : memref<64x256xf32, #tpu.memory_space<vmem>>, vector<64x256xf32>
    tpu.vector_store %arg9[%c0_80, %c0_81], %86 {strides = array<i32>} : memref<64x256xf32, #tpu.memory_space<vmem>>, vector<64x256xf32>,
    %c2_i32_82 = arith.constant 2 : i32
    %88 = arith.addi %1, %c2_i32_82 : i32
    %c0_83 = arith.constant 0 : index
    %89 = arith.index_cast %88 : i32 to index
    %c2_84 = arith.constant 2 : index
    %c0_85 = arith.constant 0 : index
    %90 = vector.load %arg2[%c0_83, %89, %c2_84, %c0_85] : memref<1x18x18x256xf32, #tpu.memory_space<vmem>>, vector<1x4x16x256xf32>
    %91 = vector.shape_cast %90 : vector<1x4x16x256xf32> to vector<4x16x256xf32>
    %92 = vector.shape_cast %91 : vector<4x16x256xf32> to vector<64x256xf32>
    %c8 = arith.constant 8 : index
    %c0_86 = arith.constant 0 : index
    %c0_87 = arith.constant 0 : index
    %93 = vector.load %arg3[%c8, %c0_86, %c0_87] : memref<9x256x256xf32, #tpu.memory_space<vmem>>, vector<1x256x256xf32>
    %94 = vector.shape_cast %93 : vector<1x256x256xf32> to vector<256x256xf32>
    %cst_88 = arith.constant dense<0.000000e+00> : vector<64x256xf32>
    %95 = tpu.matmul %92, %94, %cst_88 {dimension_numbers = #tpu.dot_dimension_numbers<[1], [0], [0], [1], [0, 0, 1, 1], [], []>} : vector<64x256xf32>, vector<256x256xf32>, vector<64x256xf32> -> vector<64x256xf32>
    %c0_89 = arith.constant 0 : index
    %c0_90 = arith.constant 0 : index
    %96 = vector.load %arg9[%c0_89, %c0_90] : memref<64x256xf32, #tpu.memory_space<vmem>>, vector<64x256xf32>
    %97 = arith.addf %96, %95 : vector<64x256xf32>
    %c0_91 = arith.constant 0 : index
    %c0_92 = arith.constant 0 : index
    %98 = vector.load %arg9[%c0_91, %c0_92] : memref<64x256xf32, #tpu.memory_space<vmem>>, vector<64x256xf32>
    tpu.vector_store %arg9[%c0_91, %c0_92], %97 {strides = array<i32>} : memref<64x256xf32, #tpu.memory_space<vmem>>, vector<64x256xf32>,
    %c0_93 = arith.constant 0 : index
    %c0_94 = arith.constant 0 : index
    %99 = vector.load %arg9[%c0_93, %c0_94] : memref<64x256xf32, #tpu.memory_space<vmem>>, vector<64x256xf32>
    %c0_95 = arith.constant 0 : index
    %c0_96 = arith.constant 0 : index
    %100 = vector.load %arg4[%c0_95, %c0_96] : memref<1x256xf32, #tpu.memory_space<vmem>>, vector<1x256xf32>
    %101 = vector.broadcast %100 : vector<1x256xf32> to vector<64x256xf32>
    %102 = arith.mulf %99, %101 : vector<64x256xf32>
    %c0_97 = arith.constant 0 : index
    %c0_98 = arith.constant 0 : index
    %103 = vector.load %arg5[%c0_97, %c0_98] : memref<1x256xf32, #tpu.memory_space<vmem>>, vector<1x256xf32>
    %104 = vector.broadcast %103 : vector<1x256xf32> to vector<64x256xf32>
    %105 = arith.addf %102, %104 : vector<64x256xf32>
    %cst_99 = arith.constant 0.000000e+00 : f32
    %106 = vector.broadcast %cst_99 : f32 to vector<64x256xf32>
    %107 = arith.maximumf %105, %106 : vector<64x256xf32>
    %c0_100 = arith.constant 0 : index
    %c0_101 = arith.constant 0 : index
    %108 = vector.load %arg6[%c0_100, %c0_101] : memref<256x128xf32, #tpu.memory_space<vmem>>, vector<256x128xf32>
    %cst_102 = arith.constant dense<0.000000e+00> : vector<64x128xf32>
    %109 = tpu.matmul %107, %108, %cst_102 {dimension_numbers = #tpu.dot_dimension_numbers<[1], [0], [0], [1], [0, 0, 1, 1], [], []>} : vector<64x256xf32>, vector<256x128xf32>, vector<64x128xf32> -> vector<64x128xf32>
    %c0_103 = arith.constant 0 : index
    %c0_104 = arith.constant 0 : index
    %110 = vector.load %arg7[%c0_103, %c0_104] : memref<1x128xf32, #tpu.memory_space<vmem>>, vector<1x128xf32>
    %111 = vector.broadcast %110 : vector<1x128xf32> to vector<64x128xf32>
    %112 = arith.addf %109, %111 : vector<64x128xf32>
    %113 = vector.shape_cast %112 : vector<64x128xf32> to vector<1x4x16x128xf32>
    %c0_105 = arith.constant 0 : index
    %c0_106 = arith.constant 0 : index
    %c0_107 = arith.constant 0 : index
    %c0_108 = arith.constant 0 : index
    %114 = vector.load %arg8[%c0_105, %c0_106, %c0_107, %c0_108] : memref<1x4x16x128xf32, #tpu.memory_space<vmem>>, vector<1x4x16x128xf32>
    tpu.vector_store %arg8[%c0_105, %c0_106, %c0_107, %c0_108], %113 {strides = array<i32>} : memref<1x4x16x128xf32, #tpu.memory_space<vmem>>, vector<1x4x16x128xf32>,
    return
  }
  func.func @transform_0(%arg0: i32, %arg1: i32) -> (i32, i32, i32, i32) {
    %c0_i32 = arith.constant 0 : i32
    %c0_i32_0 = arith.constant 0 : i32
    %c0_i32_1 = arith.constant 0 : i32
    %c0_i32_2 = arith.constant 0 : i32
    return %arg0, %c0_i32, %c0_i32_0, %c0_i32_1 : i32, i32, i32, i32
  }
  func.func @transform_1(%arg0: i32, %arg1: i32) -> (i32, i32, i32) {
    %c0_i32 = arith.constant 0 : i32
    %c0_i32_0 = arith.constant 0 : i32
    %c0_i32_1 = arith.constant 0 : i32
    %c0_i32_2 = arith.constant 0 : i32
    return %c0_i32, %c0_i32_0, %c0_i32_1 : i32, i32, i32
  }
  func.func @transform_2(%arg0: i32, %arg1: i32) -> (i32, i32) {
    %c0_i32 = arith.constant 0 : i32
    %c0_i32_0 = arith.constant 0 : i32
    %c0_i32_1 = arith.constant 0 : i32
    return %c0_i32, %c0_i32_0 : i32, i32
  }
  func.func @transform_3(%arg0: i32, %arg1: i32) -> (i32, i32) {
    %c0_i32 = arith.constant 0 : i32
    %c0_i32_0 = arith.constant 0 : i32
    %c0_i32_1 = arith.constant 0 : i32
    return %c0_i32, %c0_i32_0 : i32, i32
  }
  func.func @transform_4(%arg0: i32, %arg1: i32) -> (i32, i32) {
    %c0_i32 = arith.constant 0 : i32
    %c0_i32_0 = arith.constant 0 : i32
    %c0_i32_1 = arith.constant 0 : i32
    return %c0_i32, %c0_i32_0 : i32, i32
  }
  func.func @transform_5(%arg0: i32, %arg1: i32) -> (i32, i32) {
    %c0_i32 = arith.constant 0 : i32
    %c0_i32_0 = arith.constant 0 : i32
    %c0_i32_1 = arith.constant 0 : i32
    return %c0_i32, %c0_i32_0 : i32, i32
  }
  func.func @transform_6(%arg0: i32, %arg1: i32) -> (i32, i32, i32, i32) {
    %c0_i32 = arith.constant 0 : i32
    %c0_i32_0 = arith.constant 0 : i32
    %c0_i32_1 = arith.constant 0 : i32
    return %arg0, %arg1, %c0_i32, %c0_i32_0 : i32, i32, i32, i32
  }
}

</mosaic_0001>

<bundles_post_ra>
// kernel: deeplab_head_forward.2
= control target key start
LH: loop header
LB: loop body
LE: loop exit
PB: predicated region body
PF: predicated region fallthrough
CT: control target
= control target key end

     0   :  { %s4991_s25 = smov 0   ;;  %s4993_s26 = smov 0   ;;  %s7357_s0 = inlined_call_operand.vmem [shape: f32[2,88,88,8], index: 0, kind: input, shape index: {}]   ;;  %s7358_s1 = inlined_call_operand.vmem [shape: f32[8,256], index: 1, kind: input, shape index: {}]   ;;  %s7359_s2 = inlined_call_operand.vmem [shape: f32[1,256], index: 2, kind: input, shape index: {}]   ;;  %s7360_s3 = inlined_call_operand.vmem [shape: f32[1,256], index: 3, kind: input, shape index: {}]   ;;  %s7361_s4 = inlined_call_operand.vmem [shape: f32[27,8,256], index: 4, kind: input, shape index: {}]   ;;  %s7362_s5 = inlined_call_operand.vmem [shape: f32[3,1,256], index: 5, kind: input, shape index: {}]   ;;  %s7363_s6 = inlined_call_operand.vmem [shape: f32[3,1,256], index: 6, kind: input, shape index: {}]   ;;  %s7364_s7 = inlined_call_operand.vmem [shape: f32[8,256], index: 7, kind: input, shape index: {}]   ;;  %s7365_s8 = inlined_call_operand.vmem [shape: f32[1,256], index: 8, kind: input, shape index: {}]   ;;  %s7366_s9 = inlined_call_operand.vmem [shape: f32[1,256], index: 9, kind: input, shape index: {}]   ;;  %s7367_s10 = inlined_call_operand.vmem [shape: f32[5,256,256], index: 10, kind: input, shape index: {}]   ;;  %s7368_s11 = inlined_call_operand.vmem [shape: f32[1,256], index: 11, kind: input, shape index: {}]   ;;  %s7369_s12 = inlined_call_operand.vmem [shape: f32[1,256], index: 12, kind: input, shape index: {}]   ;;  %s7370_s13 = inlined_call_operand.vmem [shape: f32[2,16,16,256], index: 13, kind: output, shape index: {}]  }
   0x1   :  { %s4995_s27 = smov 0   ;;  %s4997_s28 = smov 0  }
   0x2   :  { %s4999_s29 = smov 0  }
   0x3 LB: > { %7373 = sst [smem:[#allocation5_spill]] %s4910_s27  ;;  %s32_s30 = sadd.s32 1, %s4910_s27  ;;  %s4918_s29 = sphi %s4999_s29, %s23_s29   ;;  %s4914_s28 = sphi %s4997_s28, %s7480_s28   ;;  %s4910_s27 = sphi %s4995_s27, %s7479_s27   ;;  %s4906_s26 = sphi %s4993_s26, %s7478_s26   ;;  %s4902_s25 = sphi %s4991_s25, %s7477_s25  }
   0x4   : > { %7374 = sst [smem:[#allocation6_spill]] %s4914_s28  ;;  %s35_s14 = sadd.s32 1, %s4914_s28 }
   0x5   : > { %p33_p0 = scmp.ge.s32.totalorder %s32_s30, 4  ;;  %p4216_p1 = scmp.ge.s32.totalorder %s4918_s29, 1 }
   0x6   : > { %p401_p2 = scmp.lt.s32.totalorder %s4918_s29, 9 }
   0x7   : > { %s7482_s30 = smov (%p33_p0, %s32_s30), 0  ;;  %s7484_s14 = smov (!%p33_p0, %s35_s14), %s4914_s28 }
   0x8   : > { %7375 = sst [smem:[#allocation7_spill]] %s7482_s30  ;;  %p402_p3 = pnand %p4216_p1, %p401_p2 }
   0x9   : > { %p37_p4 = scmp.ge.s32.totalorder %s7484_s14, 2 }
   0xa   : > { %405 = sbr.rel (%p402_p3) target bundleno = 1559 (0x617), region = 72 }
   0xb   : > { %s7486_s14 = smov (%p37_p4, %s7484_s14), 0 }
   0xc   : > { %7376 = sst [smem:[#allocation8_spill]] %s7486_s14 }
   0xf   : > { %p450_p5 = scmp.lt.s32.totalorder %s4906_s26, 1  ;;  %s4218_s15 = sshll.u32 %s4902_s25, 2 }
  0x10   : > { %p458_p6 = scmp.lt.s32.totalorder %s4218_s15, 15  ;;  %p4222_p7 = scmp.ne.s32.totalorder %s4902_s25, 0 }
  0x11   : > { %s7488_s26 = smov (!%p450_p5, %s4906_s26), 1 }
  0x12   : > { %s7490_s15 = smov (!%p458_p6, %s4218_s15), 15  ;;  %s4835_s16 = smul.u32 7744, %s7488_s26 }
  0x13   : > { %s4220_s17 = sshll.u32 %s7488_s26, 6  ;;  %s4219_s18 = sshll.u32 %s7490_s15, 2 }
  0x14   : > { %s5027_s21 = scalar_lea.vmem %s7357_s0, %s4835_s16  ;;  %s462_s22 = sadd.s32 %s4220_s17, %s4219_s18 }
  0x15   : > { %s4221_s23 = sshll.u32 %s462_s22, 3  ;;  %470 = sbr.rel (%p4222_p7) target bundleno = 373 (0x175), region = 76 }
  0x16   : > { %s5032_s14 = scalar_lea.vmem %s7370_s13, %s4221_s23 }
  0x1a   : > { %v582_v0 = vld [vmem:[%s7364_s7] sm:$0xff]  ;;  %v583_v1 = vld [vmem:[%s7364_s7 + $0x8] sm:$0xff]  ;;  %vm504_vm0 = vcmask 64512   ;;  %v4227_v9 = vld [vmem:[%s5027_s21 + $0xd34] sm:$0xff]  ;;  %vm793_vm2 = vcmask 1040384  }
  0x1b   : > { %v4223_v2 = vld [vmem:[%s5027_s21 + $0xc84] sm:$0xff]  ;;  %602 = vmatpush.msra.mxu0 %v582_v0  ;;  %622 = vmatpush.msra.mxu1 %v583_v1  ;;  %v4224_v3 = vld [vmem:[%s5027_s21 + $0xc8c] sm:$0xff]  ;;  %v4225_v4 = vld [vmem:[%s5027_s21 + $0xcdc] sm:$0xff]  ;;  %v512_v14 = vsel %vm504_vm0, %v4227_v9, 0.0 }
  0x1c   : > { %v4226_v5 = vld [vmem:[%s5027_s21 + $0xce4] sm:$0xff]  ;;  %v505_v6 = vsel %vm504_vm0, %v4223_v2, 0.0  ;;  %v506_v7 = vsel %vm504_vm0, %v4224_v3, 0.0  ;;  %v508_v8 = vsel %vm504_vm0, %v4225_v4, 0.0  ;;  %v4228_v12 = vld [vmem:[%s5027_s21 + $0xd3c] sm:$0xff]  ;;  %v4229_v15 = vld [vmem:[%s5027_s21 + $0xd8c] sm:$0xff] }
  0x1d   : > { %v507_v10 = vadd.f32 %v506_v7, %v505_v6  ;;  %v510_v11 = vsel %vm504_vm0, %v4226_v5, 0.0  ;;  %v514_v17 = vsel %vm504_vm0, %v4228_v12, 0.0  ;;  %v4230_v18 = vld [vmem:[%s5027_s21 + $0xd94] sm:$0xff]  ;;  %v516_v20 = vsel %vm504_vm0, %v4229_v15, 0.0  ;;  %v4231_v21 = vld [vmem:[%s5027_s21 + $0xde4] sm:$0xff]  ;;  %v4232_v24 = vld [vmem:[%s5027_s21 + $0xdec] sm:$0xff] }
  0x1e   : > { %v518_v23 = vsel %vm504_vm0, %v4230_v18, 0.0  ;;  %v520_v26 = vsel %vm504_vm0, %v4231_v21, 0.0  ;;  %v4233_v27 = vld [vmem:[%s5027_s21 + $0xe3c] sm:$0xff]  ;;  %v522_v29 = vsel %vm504_vm0, %v4232_v24, 0.0  ;;  %v4234_v30 = vld [vmem:[%s5027_s21 + $0xe44] sm:$0xff]  ;;  %v4235_v33 = vld [vmem:[%s5027_s21 + $0xe94] sm:$0xff] }
  0x1f   : > { %v509_v13 = vadd.f32 %v508_v8, %v507_v10  ;;  %v524_v32 = vsel %vm504_vm0, %v4233_v27, 0.0  ;;  %v526_v35 = vsel %vm504_vm0, %v4234_v30, 0.0  ;;  %v4236_v36 = vld [vmem:[%s5027_s21 + $0xe9c] sm:$0xff]  ;;  %v528_v38 = vsel %vm504_vm0, %v4235_v33, 0.0  ;;  %v4237_v39 = vld [vmem:[%s5027_s21 + $0xeec] sm:$0xff]  ;;  %v4238_v42 = vld [vmem:[%s5027_s21 + $0xef4] sm:$0xff] }
  0x20   : > { %v530_v41 = vsel %vm504_vm0, %v4236_v36, 0.0  ;;  %v532_v44 = vsel %vm504_vm0, %v4237_v39, 0.0  ;;  %v4239_v45 = vld [vmem:[%s5027_s21 + $0xf44] sm:$0xff]  ;;  %v534_v47 = vsel %vm504_vm0, %v4238_v42, 0.0  ;;  %v4240_v48 = vld [vmem:[%s5027_s21 + $0xf4c] sm:$0xff]  ;;  %v4241_v51 = vld [vmem:[%s5027_s21 + $0xf9c] sm:$0xff] }
  0x21   : > { %v511_v16 = vadd.f32 %v510_v11, %v509_v13  ;;  %v536_v50 = vsel %vm504_vm0, %v4239_v45, 0.0  ;;  %v538_v53 = vsel %vm504_vm0, %v4240_v48, 0.0  ;;  %v4242_v54 = vld [vmem:[%s5027_s21 + $0xfa4] sm:$0xff]  ;;  %v540_v56 = vsel %vm504_vm0, %v4241_v51, 0.0  ;;  %v4243_v57 = vld [vmem:[%s5027_s21 + $0xff4] sm:$0xff]  ;;  %v4244_v60 = vld [vmem:[%s5027_s21 + $0xffc] sm:$0xff] }
  0x22   : > { %v542_v59 = vsel %vm504_vm0, %v4242_v54, 0.0  ;;  %v544_v62 = vsel %vm504_vm0, %v4243_v57, 0.0  ;;  %v4245_v63 = vld [vmem:[%s5027_s21 + $0x104c] sm:$0xff]  ;;  %v546_v1 = vsel %vm504_vm0, %v4244_v60, 0.0  ;;  %v4246_v2 = vld [vmem:[%s5027_s21 + $0x1054] sm:$0xff]  ;;  %v4247_v5 = vld [vmem:[%s5027_s21 + $0x10a4] sm:$0xff] }
  0x23   : > { %v513_v19 = vadd.f32 %v512_v14, %v511_v16  ;;  %v548_v4 = vsel %vm504_vm0, %v4245_v63, 0.0  ;;  %v550_v7 = vsel %vm504_vm0, %v4246_v2, 0.0  ;;  %v4248_v8 = vld [vmem:[%s5027_s21 + $0x10ac] sm:$0xff]  ;;  %v4249_v10 = vld [vmem:[%s5027_s21 + $0x10fc] sm:$0xff]  ;;  %v552_v11 = vsel %vm504_vm0, %v4247_v5, 0.0  ;;  %v4250_v12 = vld [vmem:[%s5027_s21 + $0x1104] sm:$0xff] }
  0x24   : > { %v4287_v14 = vld [vmem:[%s7367_s10 + $0x8f0] sm:$0xff]  ;;  %v4288_v16 = vld [vmem:[%s7367_s10 + $0x8f8] sm:$0xff]  ;;  %v4318_v24 = vld [vmem:[%s7367_s10 + $0x9e8] sm:$0xff] }
  0x25   : > { %v515_v22 = vadd.f32 %v514_v17, %v513_v19  ;;  %v4319_v15 = vld [vmem:[%s7367_s10 + $0x9f0] sm:$0xff]  ;;  %v554_v17 = vsel %vm504_vm0, %v4248_v8, 0.0  ;;  %710 = vmatpush.msra.mxu2 %v4287_v14  ;;  %v4320_v18 = vld [vmem:[%s7367_s10 + $0x9f8] sm:$0xff]  ;;  %v4285_v19 = vld [vmem:[%s7367_s10 + $0x8e0] sm:$0xff]  ;;  %750 = vmatpush.msrb.mxu0 %v4288_v16 }
  0x26   : > { %730 = vmatpush.msra.mxu3 %v4319_v15  ;;  %770 = vmatpush.msrb.mxu1 %v4320_v18  ;;  %v4315_v27 = vld [vmem:[%s7367_s10 + $0x9d0] sm:$0xff]  ;;  %v4313_v33 = vld [vmem:[%s7367_s10 + $0x9c0] sm:$0xff]  ;;  %v4314_v36 = vld [vmem:[%s7367_s10 + $0x9c8] sm:$0xff] }
  0x27   : > { %v517_v25 = vadd.f32 %v516_v20, %v515_v22  ;;  %v4317_v20 = vld [vmem:[%s7367_s10 + $0x9e0] sm:$0xff]  ;;  %v4920_v22 = vmov 256.0   ;;  %711 = vmatpush.msra.mxu2 %v4285_v19  ;;  %v4251_v30 = vld [vmem:[%s5027_s21 + $0x1154] sm:$0xff]  ;;  %v4253_v45 = vld [vmem:[%s5027_s21 + $0x11ac] sm:$0xff] }
  0x28   : > { %4877 = vrcp.f32 %v4920_v22  ;;  %731 = vmatpush.msra.mxu3 %v4317_v20  ;;  %771 = vmatpush.msrb.mxu1 %v4318_v24  ;;  %v4279_v39 = vld [vmem:[%s7367_s10 + $0x8b0] sm:$0xff]  ;;  %v4280_v42 = vld [vmem:[%s7367_s10 + $0x8b8] sm:$0xff]  ;;  %v4309_v48 = vld [vmem:[%s7367_s10 + $0x9a0] sm:$0xff] }
  0x29   : > { %v519_v28 = vadd.f32 %v518_v23, %v517_v25  ;;  %v4286_v23 = vld [vmem:[%s7367_s10 + $0x8e8] sm:$0xff]  ;;  %v4283_v25 = vld [vmem:[%s7367_s10 + $0x8d0] sm:$0xff]  ;;  %v4300_v18 = vld [vmem:[%s7367_s10 + $0x958] sm:$0xff] }
  0x2a   : > { %751 = vmatpush.msrb.mxu0 %v4286_v23  ;;  %712 = vmatpush.msra.mxu2 %v4283_v25  ;;  %v4310_v51 = vld [vmem:[%s7367_s10 + $0x9a8] sm:$0xff]  ;;  %v4275_v54 = vld [vmem:[%s7367_s10 + $0x890] sm:$0xff]  ;;  %v4265_v20 = vld [vmem:[%s7367_s10 + $0x840] sm:$0xff] }
  0x2b   : > { %v521_v31 = vadd.f32 %v520_v26, %v519_v28  ;;  %v556_v26 = vsel %vm504_vm0, %v4249_v10, 0.0  ;;  %v4284_v28 = vld [vmem:[%s7367_s10 + $0x8d8] sm:$0xff]  ;;  %732 = vmatpush.msra.mxu3 %v4315_v27  ;;  %v4301_v10 = vld [vmem:[%s7367_s10 + $0x960] sm:$0xff]  ;;  %v4267_v14 = vld [vmem:[%s7367_s10 + $0x850] sm:$0xff] }
  0x2c   : > { %752 = vmatpush.msrb.mxu0 %v4284_v28  ;;  %v4299_v15 = vld [vmem:[%s7367_s10 + $0x950] sm:$0xff]  ;;  %v4266_v22 = vld [vmem:[%s7367_s10 + $0x848] sm:$0xff] }
  0x2d   : > { %v523_v34 = vadd.f32 %v522_v29, %v521_v31  ;;  %v4316_v29 = vld [vmem:[%s7367_s10 + $0x9d8] sm:$0xff]  ;;  %733 = vmatpush.msra.mxu3 %v4313_v33  ;;  %v4298_v23 = vld [vmem:[%s7367_s10 + $0x948] sm:$0xff] }
  0x2e   : > { %772 = vmatpush.msrb.mxu1 %v4316_v29  ;;  %v4264_v33 = vld [vmem:[%s7367_s10 + $0x838] sm:$0xff] }
  0x2f   : > { %v525_v37 = vadd.f32 %v524_v32, %v523_v34  ;;  %v4281_v32 = vld [vmem:[%s7367_s10 + $0x8c0] sm:$0xff]  ;;  %v558_v34 = vsel %vm504_vm0, %v4250_v12, 0.0  ;;  %v4302_v12 = vld [vmem:[%s7367_s10 + $0x968] sm:$0xff] }
  0x30   : > { %713 = vmatpush.msra.mxu2 %v4281_v32  ;;  %773 = vmatpush.msrb.mxu1 %v4314_v36  ;;  %v4295_v32 = vld [vmem:[%s7367_s10 + $0x930] sm:$0xff]  ;;  %v4293_v36 = vld [vmem:[%s7367_s10 + $0x920] sm:$0xff] }
  0x31   : > { %v527_v40 = vadd.f32 %v526_v35, %v525_v37  ;;  %v4282_v35 = vld [vmem:[%s7367_s10 + $0x8c8] sm:$0xff]  ;;  %v4252_v37 = vld [vmem:[%s5027_s21 + $0x115c] sm:$0xff] }
  0x32   : > { %753 = vmatpush.msrb.mxu0 %v4282_v35  ;;  %714 = vmatpush.msra.mxu2 %v4279_v39  ;;  %v4261_v35 = vld [vmem:[%s7367_s10 + $0x820] sm:$0xff]  ;;  %v4259_v39 = vld [vmem:[%s7367_s10 + $0x810] sm:$0xff] }
  0x33   : > { %v529_v43 = vadd.f32 %v528_v38, %v527_v40  ;;  %v4311_v40 = vld [vmem:[%s7367_s10 + $0x9b0] sm:$0xff] }
  0x34   : > { %734 = vmatpush.msra.mxu3 %v4311_v40  ;;  %754 = vmatpush.msrb.mxu0 %v4280_v42  ;;  %v4291_v40 = vld [vmem:[%s7367_s10 + $0x910] sm:$0xff]  ;;  %v4292_v42 = vld [vmem:[%s7367_s10 + $0x918] sm:$0xff] }
  0x35   : > { %v531_v46 = vadd.f32 %v530_v41, %v529_v43  ;;  %v560_v41 = vsel %vm504_vm0, %v4251_v30, 0.0  ;;  %v4312_v43 = vld [vmem:[%s7367_s10 + $0x9b8] sm:$0xff] }
  0x36   : > { %774 = vmatpush.msrb.mxu1 %v4312_v43  ;;  %735 = vmatpush.msra.mxu3 %v4309_v48  ;;  %v4257_v43 = vld [vmem:[%s7367_s10 + $0x800] sm:$0xff] }
  0x37   : > { %v533_v49 = vadd.f32 %v532_v44, %v531_v46  ;;  %v5160_v44 = vpop.eup %4877  ;;  %v635_v48 = vld [vmem:[%s7366_s9] sm:$0x3] }
  0x38   : > { %v575_v57 = vmul.f32 256.0, %v5160_v44  ;;  %775 = vmatpush.msrb.mxu1 %v4310_v51  ;;  %vm579_vm1 = vweird.f32 %v5160_v44  ;;  %v637_v51 = vperm.slane %v635_v48, 0 }
  0x39   : > { %v535_v52 = vadd.f32 %v534_v47, %v533_v49  ;;  %v4277_v47 = vld [vmem:[%s7367_s10 + $0x8a0] sm:$0xff]  ;;  %v562_v49 = vsel %vm504_vm0, %v4252_v37, 0.0  ;;  %v4262_v37 = vld [vmem:[%s7367_s10 + $0x828] sm:$0xff] }
  0x3a   : > { %715 = vmatpush.msra.mxu2 %v4277_v47  ;;  %v576_v5 = vsub.f32 1.0, %v575_v57  ;;  %v627_v47 = vld [vmem:[%s7365_s8] sm:$0x3] }
  0x3b   : > { %v537_v55 = vadd.f32 %v536_v50, %v535_v52  ;;  %v4278_v50 = vld [vmem:[%s7367_s10 + $0x8a8] sm:$0xff]  ;;  %v4254_v52 = vld [vmem:[%s5027_s21 + $0x11b4] sm:$0xff] }
  0x3c   : > { %755 = vmatpush.msrb.mxu0 %v4278_v50  ;;  %v566_v63 = vsel %vm504_vm0, %v4254_v52, 0.0  ;;  %716 = vmatpush.msra.mxu2 %v4275_v54  ;;  %v577_v16 = vmul.f32 %v5160_v44, %v576_v5  ;;  %v630_v50 = vperm.slane %v627_v47, 1  ;;  %v638_v52 = vperm.slane %v635_v48, 1 }
  0x3d   : > { %v539_v58 = vadd.f32 %v538_v53, %v537_v55  ;;  %v4307_v55 = vld [vmem:[%s7367_s10 + $0x990] sm:$0xff] }
  0x3e   : > { %736 = vmatpush.msra.mxu3 %v4307_v55  ;;  %v578_v25 = vadd.f32 %v5160_v44, %v577_v16 }
  0x3f   : > { %v541_v61 = vadd.f32 %v540_v56, %v539_v58  ;;  %v564_v56 = vsel %vm504_vm0, %v4253_v45, 0.0  ;;  %v4276_v58 = vld [vmem:[%s7367_s10 + $0x898] sm:$0xff]  ;;  %v4258_v45 = vld [vmem:[%s7367_s10 + $0x808] sm:$0xff] }
  0x40   : > { %756 = vmatpush.msrb.mxu0 %v4276_v58  ;;  %v580_v28 = vsel %vm579_vm1, %v5160_v44, %v578_v25  ;;  %v4289_v44 = vld [vmem:[%s7367_s10 + $0x900] sm:$0xff] }
  0x41   : > { %v543_v0 = vadd.f32 %v542_v59, %v541_v61  ;;  %v4308_v59 = vld [vmem:[%s7367_s10 + $0x998] sm:$0xff]  ;;  %v4273_v61 = vld [vmem:[%s7367_s10 + $0x880] sm:$0xff] }
  0x42   : > { %776 = vmatpush.msrb.mxu1 %v4308_v59  ;;  %717 = vmatpush.msra.mxu2 %v4273_v61 }
  0x43   : > { %v545_v3 = vadd.f32 %v544_v62, %v543_v0  ;;  %v4305_v62 = vld [vmem:[%s7367_s10 + $0x980] sm:$0xff]  ;;  %v4274_v0 = vld [vmem:[%s7367_s10 + $0x888] sm:$0xff] }
  0x44   : > { %737 = vmatpush.msra.mxu3 %v4305_v62  ;;  %757 = vmatpush.msrb.mxu0 %v4274_v0  ;;  %v796_v0 = vlaneseq }
  0x45   : > { %v547_v6 = vadd.f32 %v546_v1, %v545_v3  ;;  %v4306_v1 = vld [vmem:[%s7367_s10 + $0x988] sm:$0xff]  ;;  %v4271_v3 = vld [vmem:[%s7367_s10 + $0x870] sm:$0xff] }
  0x46   : > { %777 = vmatpush.msrb.mxu1 %v4306_v1  ;;  %718 = vmatpush.msra.mxu2 %v4271_v3  ;;  %vm798_vm3 = vcmp.lt.s32.totalorder %v796_v0, 256 }
  0x47   : > { %v549_v9 = vadd.f32 %v548_v4, %v547_v6  ;;  %v4303_v4 = vld [vmem:[%s7367_s10 + $0x970] sm:$0xff]  ;;  %v4272_v6 = vld [vmem:[%s7367_s10 + $0x878] sm:$0xff] }
  0x48   : > { %738 = vmatpush.msra.mxu3 %v4303_v4  ;;  %758 = vmatpush.msrb.mxu0 %v4272_v6 }
  0x49   : > { %v551_v13 = vadd.f32 %v550_v7, %v549_v9  ;;  %v4304_v7 = vld [vmem:[%s7367_s10 + $0x978] sm:$0xff]  ;;  %v4269_v9 = vld [vmem:[%s7367_s10 + $0x860] sm:$0xff] }
  0x4a   : > { %778 = vmatpush.msrb.mxu1 %v4304_v7  ;;  %719 = vmatpush.msra.mxu2 %v4269_v9 }
  0x4b   : > { %v553_v21 = vadd.f32 %v552_v11, %v551_v13  ;;  %v4270_v11 = vld [vmem:[%s7367_s10 + $0x868] sm:$0xff]  ;;  %739 = vmatpush.msra.mxu3 %v4301_v10 }
  0x4c   : > { %759 = vmatpush.msrb.mxu0 %v4270_v11  ;;  %779 = vmatpush.msrb.mxu1 %v4302_v12 }
  0x4d   : > { %v555_v31 = vadd.f32 %v554_v17, %v553_v21  ;;  %v4268_v17 = vld [vmem:[%s7367_s10 + $0x858] sm:$0xff]  ;;  %v4297_v21 = vld [vmem:[%s7367_s10 + $0x940] sm:$0xff]  ;;  %720 = vmatpush.msra.mxu2 %v4267_v14  ;;  %740 = vmatpush.msra.mxu3 %v4299_v15 }
  0x4e   : > { %760 = vmatpush.msrb.mxu0 %v4268_v17  ;;  %780 = vmatpush.msrb.mxu1 %v4300_v18 }
  0x4f   : > { %v557_v38 = vadd.f32 %v556_v26, %v555_v31  ;;  %721 = vmatpush.msra.mxu2 %v4265_v20  ;;  %741 = vmatpush.msra.mxu3 %v4297_v21  ;;  %v4263_v31 = vld [vmem:[%s7367_s10 + $0x830] sm:$0xff] }
  0x50   : > { %761 = vmatpush.msrb.mxu0 %v4266_v22  ;;  %781 = vmatpush.msrb.mxu1 %v4298_v23 }
  0x51   : > { %v559_v46 = vadd.f32 %v558_v34, %v557_v38  ;;  %722 = vmatpush.msra.mxu2 %v4263_v31  ;;  %742 = vmatpush.msra.mxu3 %v4295_v32  ;;  %v4296_v34 = vld [vmem:[%s7367_s10 + $0x938] sm:$0xff]  ;;  %v4294_v38 = vld [vmem:[%s7367_s10 + $0x928] sm:$0xff] }
  0x52   : > { %762 = vmatpush.msrb.mxu0 %v4264_v33  ;;  %782 = vmatpush.msrb.mxu1 %v4296_v34 }
  0x53   : > { %v561_v53 = vadd.f32 %v560_v41, %v559_v46  ;;  %723 = vmatpush.msra.mxu2 %v4261_v35  ;;  %743 = vmatpush.msra.mxu3 %v4293_v36  ;;  %v4260_v41 = vld [vmem:[%s7367_s10 + $0x818] sm:$0xff]  ;;  %v4290_v46 = vld [vmem:[%s7367_s10 + $0x908] sm:$0xff] }
  0x54   : > { %763 = vmatpush.msrb.mxu0 %v4262_v37  ;;  %783 = vmatpush.msrb.mxu1 %v4294_v38 }
  0x55   : > { %v563_v60 = vadd.f32 %v562_v49, %v561_v53  ;;  %724 = vmatpush.msra.mxu2 %v4259_v39  ;;  %744 = vmatpush.msra.mxu3 %v4291_v40  ;;  %v629_v49 = vperm.slane %v627_v47, 0 }
  0x56   : > { %764 = vmatpush.msrb.mxu0 %v4260_v41  ;;  %784 = vmatpush.msrb.mxu1 %v4292_v42 }
  0x57   : > { %v565_v2 = vadd.f32 %v564_v56, %v563_v60  ;;  %725 = vmatpush.msra.mxu2 %v4257_v43  ;;  %745 = vmatpush.msra.mxu3 %v4289_v44 }
  0x58   : > { %765 = vmatpush.msrb.mxu0 %v4258_v45  ;;  %785 = vmatpush.msrb.mxu1 %v4290_v46 }
  0x59   : > { %v567_v8 = vadd.f32 %v566_v63, %v565_v2 }
  0x5b   : > { %v568_v13 = vrot.slane %v567_v8, 4 }
  0x5d   : > { %v569_v19 = vadd.f32 %v568_v13, %v567_v8 }
  0x5f   : > { %v570_v24 = vrot.slane %v569_v19, 2 }
  0x61   : > { %v571_v26 = vadd.f32 %v570_v24, %v569_v19 }
  0x63   : > { %v572_v27 = vrot.slane %v571_v26, 1 }
  0x65   : > { %v573_v29 = vadd.f32 %v572_v27, %v571_v26 }
  0x67   : > { %v581_v30 = vmul.f32 %v580_v28, %v573_v29 }
  0x69   : > { %4255 = vmatmul.msk.f32.vlgmr.msra.gmra.mxu0 %vm504_vm0, %v581_v30  ;;  %4256 = vmatmul.msk.f32.vlgmr.msra.gmra.mxu1 %vm504_vm0, %v581_v30 }
  0xe6   : > { %v604_v53 = vpop.f32.mrf.mxu0  ;;  %v624_v54 = vpop.f32.mrf.mxu1 }
  0xe7   : > { %v633_v55 = vmul.f32 %v629_v49, %v604_v53  ;;  %v634_v56 = vmul.f32 %v630_v50, %v624_v54 }
  0xe9   : > { %v641_v57 = vadd.f32 %v637_v51, %v633_v55  ;;  %v642_v58 = vadd.f32 %v638_v52, %v634_v56 }
  0xeb   : > { %v643_v59 = vmax.f32 %v641_v57, 0.0  ;;  %v644_v60 = vmax.f32 %v642_v58, 0.0 }
  0xed   : > { %726 = vmatmul.f32.vlgmr.msra.gmra.mxu2 %v643_v59  ;;  %746 = vmatmul.f32.vlgmr.msra.gmra.mxu3 %v644_v60 }
  0xee   : > { %766 = vmatmul.f32.vlgmr.msrb.gmra.mxu0 %v643_v59  ;;  %786 = vmatmul.f32.vlgmr.msrb.gmra.mxu1 %v644_v60 }
 0x16b   : > { %v767_v61 = vpop.f32.mrf.mxu0  ;;  %v787_v62 = vpop.f32.mrf.mxu1 }
 0x16c   : > { %v788_v63 = vadd.f32 %v787_v62, %v767_v61 }
 0x16e   : > { %v792_v3 = vrot.slane %v788_v63, 7 }
 0x170   : > { %v727_v1 = vpop.f32.mrf.mxu2  ;;  %v747_v2 = vpop.f32.mrf.mxu3 }
 0x171   : > { %v748_v4 = vadd.f32 %v747_v2, %v727_v1 }
 0x173   : > { %v794_v5 = vsel %vm793_vm2, %v748_v4, %v792_v3 }
 0x174   : > { %800 = vst.msk [vmem:[#allocation2] sm:$0x3] %vm798_vm3, %v794_v5 }
 0x175 PF: > { %v812_v6 = vld [vmem:[%s7358_s1] sm:$0xff]  ;;  %v813_v7 = vld [vmem:[%s7358_s1 + $0x8] sm:$0xff]  ;;  %s4322_s19 = smul.u32 352, %s4902_s25  ;;  %vm814_vm4 = vcmask 64512   ;;  %v1011_v12 = vld [vmem:[%s7367_s10 + $0xf0] sm:$0xff] }
 0x176   : > { %854 = vmatpush.msra.mxu0 %v812_v6  ;;  %895 = vmatpush.msra.mxu1 %v813_v7  ;;  %v1043_v13 = vld [vmem:[%s7367_s10 + $0x1f0] sm:$0xff]  ;;  %v1012_v14 = vld [vmem:[%s7367_s10 + $0xf8] sm:$0xff]  ;;  %v1009_v16 = vld [vmem:[%s7367_s10 + $0xe0] sm:$0xff] }
 0x177   : > { %s5320_s20 = scalar_lea.vmem %s5027_s21, %s4322_s19  ;;  %1051 = vmatpush.msra.mxu2 %v1011_v12  ;;  %1092 = vmatpush.msra.mxu3 %v1043_v13  ;;  %v1044_v15 = vld [vmem:[%s7367_s10 + $0x1f8] sm:$0xff]  ;;  %v1041_v17 = vld [vmem:[%s7367_s10 + $0x1e0] sm:$0xff]  ;;  %v1010_v18 = vld [vmem:[%s7367_s10 + $0xe8] sm:$0xff] }
 0x178   : > { %v5323_v8 = vld [vmem:[%s5320_s20 + $0xc84] sm:$0xff]  ;;  %v5330_v9 = vld [vmem:[%s5320_s20 + $0xc8c] sm:$0xff]  ;;  %v5337_v10 = vld [vmem:[%s5320_s20 + $0xcdc] sm:$0xff]  ;;  %1133 = vmatpush.msrb.mxu0 %v1012_v14  ;;  %1174 = vmatpush.msrb.mxu1 %v1044_v15 }
 0x179   : > { %4331 = vmatmul.msk.f32.vlgmr.msra.gmra.mxu0 %vm814_vm4, %v5323_v8  ;;  %4339 = vmatmul.msk.f32.vlgmr.msra.gmra.mxu1 %vm814_vm4, %v5323_v8  ;;  %v5344_v11 = vld [vmem:[%s5320_s20 + $0xce4] sm:$0xff]  ;;  %v1007_v20 = vld [vmem:[%s7367_s10 + $0xd0] sm:$0xff]  ;;  %v1008_v22 = vld [vmem:[%s7367_s10 + $0xd8] sm:$0xff] }
 0x17a   : > { %v1042_v19 = vld [vmem:[%s7367_s10 + $0x1e8] sm:$0xff]  ;;  %1052 = vmatpush.msra.mxu2 %v1009_v16  ;;  %1093 = vmatpush.msra.mxu3 %v1041_v17  ;;  %v1039_v21 = vld [vmem:[%s7367_s10 + $0x1d0] sm:$0xff]  ;;  %v1040_v23 = vld [vmem:[%s7367_s10 + $0x1d8] sm:$0xff] }
 0x17b   : > { %1134 = vmatpush.msrb.mxu0 %v1010_v18  ;;  %1175 = vmatpush.msrb.mxu1 %v1042_v19  ;;  %v1005_v24 = vld [vmem:[%s7367_s10 + $0xc0] sm:$0xff]  ;;  %v5393_v26 = vld [vmem:[%s5320_s20 + $0xd34] sm:$0xff]  ;;  %v1006_v27 = vld [vmem:[%s7367_s10 + $0xc8] sm:$0xff] }
 0x17c   : > { %v1037_v25 = vld [vmem:[%s7367_s10 + $0x1c0] sm:$0xff]  ;;  %1053 = vmatpush.msra.mxu2 %v1007_v20  ;;  %1094 = vmatpush.msra.mxu3 %v1039_v21  ;;  %v1038_v28 = vld [vmem:[%s7367_s10 + $0x1c8] sm:$0xff]  ;;  %v1003_v29 = vld [vmem:[%s7367_s10 + $0xb0] sm:$0xff] }
 0x17d   : > { %1135 = vmatpush.msrb.mxu0 %v1008_v22  ;;  %1176 = vmatpush.msrb.mxu1 %v1040_v23  ;;  %v1035_v30 = vld [vmem:[%s7367_s10 + $0x1b0] sm:$0xff]  ;;  %v1004_v31 = vld [vmem:[%s7367_s10 + $0xb8] sm:$0xff]  ;;  %v1001_v33 = vld [vmem:[%s7367_s10 + $0xa0] sm:$0xff] }
 0x17e   : > { %1054 = vmatpush.msra.mxu2 %v1005_v24  ;;  %1095 = vmatpush.msra.mxu3 %v1037_v25  ;;  %v1036_v32 = vld [vmem:[%s7367_s10 + $0x1b8] sm:$0xff]  ;;  %v1033_v34 = vld [vmem:[%s7367_s10 + $0x1a0] sm:$0xff]  ;;  %v1002_v35 = vld [vmem:[%s7367_s10 + $0xa8] sm:$0xff] }
 0x17f   : > { %1136 = vmatpush.msrb.mxu0 %v1006_v27  ;;  %1177 = vmatpush.msrb.mxu1 %v1038_v28  ;;  %v1034_v36 = vld [vmem:[%s7367_s10 + $0x1a8] sm:$0xff]  ;;  %v999_v37 = vld [vmem:[%s7367_s10 + $0x90] sm:$0xff]  ;;  %v1000_v39 = vld [vmem:[%s7367_s10 + $0x98] sm:$0xff] }
 0x180   : > { %1055 = vmatpush.msra.mxu2 %v1003_v29  ;;  %1096 = vmatpush.msra.mxu3 %v1035_v30  ;;  %v1031_v38 = vld [vmem:[%s7367_s10 + $0x190] sm:$0xff]  ;;  %v1032_v40 = vld [vmem:[%s7367_s10 + $0x198] sm:$0xff]  ;;  %v997_v42 = vld [vmem:[%s7367_s10 + $0x80] sm:$0xff] }
 0x181   : > { %4332 = vmatmul.msk.f32.gmra.mxu0 %vm814_vm4, %v5330_v9  ;;  %4340 = vmatmul.msk.f32.gmra.mxu1 %vm814_vm4, %v5330_v9  ;;  %v5442_v41 = vld [vmem:[%s5320_s20 + $0xd3c] sm:$0xff]  ;;  %v998_v44 = vld [vmem:[%s7367_s10 + $0x88] sm:$0xff]  ;;  %v995_v46 = vld [vmem:[%s7367_s10 + $0x70] sm:$0xff] }
 0x182   : > { %1137 = vmatpush.msrb.mxu0 %v1004_v31  ;;  %1178 = vmatpush.msrb.mxu1 %v1036_v32  ;;  %v1029_v43 = vld [vmem:[%s7367_s10 + $0x180] sm:$0xff]  ;;  %v1030_v45 = vld [vmem:[%s7367_s10 + $0x188] sm:$0xff]  ;;  %v1027_v47 = vld [vmem:[%s7367_s10 + $0x170] sm:$0xff] }
 0x183   : > { %1056 = vmatpush.msra.mxu2 %v1001_v33  ;;  %1097 = vmatpush.msra.mxu3 %v1033_v34  ;;  %v996_v48 = vld [vmem:[%s7367_s10 + $0x78] sm:$0xff]  ;;  %v993_v50 = vld [vmem:[%s7367_s10 + $0x60] sm:$0xff]  ;;  %v994_v52 = vld [vmem:[%s7367_s10 + $0x68] sm:$0xff] }
 0x184   : > { %1138 = vmatpush.msrb.mxu0 %v1002_v35  ;;  %1179 = vmatpush.msrb.mxu1 %v1034_v36  ;;  %v1028_v49 = vld [vmem:[%s7367_s10 + $0x178] sm:$0xff]  ;;  %v1025_v51 = vld [vmem:[%s7367_s10 + $0x160] sm:$0xff]  ;;  %v1026_v53 = vld [vmem:[%s7367_s10 + $0x168] sm:$0xff] }
 0x185   : > { %1057 = vmatpush.msra.mxu2 %v999_v37  ;;  %1098 = vmatpush.msra.mxu3 %v1031_v38  ;;  %v991_v54 = vld [vmem:[%s7367_s10 + $0x50] sm:$0xff]  ;;  %v992_v57 = vld [vmem:[%s7367_s10 + $0x58] sm:$0xff]  ;;  %v989_v59 = vld [vmem:[%s7367_s10 + $0x40] sm:$0xff] }
 0x186   : > { %1139 = vmatpush.msrb.mxu0 %v1000_v39  ;;  %1180 = vmatpush.msrb.mxu1 %v1032_v40  ;;  %v1023_v55 = vld [vmem:[%s7367_s10 + $0x150] sm:$0xff]  ;;  %v1024_v58 = vld [vmem:[%s7367_s10 + $0x158] sm:$0xff]  ;;  %v1021_v60 = vld [vmem:[%s7367_s10 + $0x140] sm:$0xff] }
 0x187   : > { %1058 = vmatpush.msra.mxu2 %v997_v42  ;;  %1099 = vmatpush.msra.mxu3 %v1029_v43  ;;  %v5491_v56 = vld [vmem:[%s5320_s20 + $0xd8c] sm:$0xff]  ;;  %v5516_v63 = vld [vmem:[%s5320_s20 + $0xd94] sm:$0xff]  ;;  %v985_v4 = vld [vmem:[%s7367_s10 + $0x20] sm:$0xff] }
 0x188   : > { %1140 = vmatpush.msrb.mxu0 %v998_v44  ;;  %1181 = vmatpush.msrb.mxu1 %v1030_v45  ;;  %v990_v61 = vld [vmem:[%s7367_s10 + $0x48] sm:$0xff]  ;;  %v987_v0 = vld [vmem:[%s7367_s10 + $0x30] sm:$0xff]  ;;  %v988_v2 = vld [vmem:[%s7367_s10 + $0x38] sm:$0xff] }
 0x189   : > { %4333 = vmatmul.msk.f32.gmra.mxu0 %vm814_vm4, %v5337_v10  ;;  %4341 = vmatmul.msk.f32.gmra.mxu1 %vm814_vm4, %v5337_v10  ;;  %v1022_v62 = vld [vmem:[%s7367_s10 + $0x148] sm:$0xff]  ;;  %v1019_v1 = vld [vmem:[%s7367_s10 + $0x130] sm:$0xff]  ;;  %v1020_v3 = vld [vmem:[%s7367_s10 + $0x138] sm:$0xff] }
 0x18a   : > { %1059 = vmatpush.msra.mxu2 %v995_v46  ;;  %1100 = vmatpush.msra.mxu3 %v1027_v47  ;;  %v1017_v5 = vld [vmem:[%s7367_s10 + $0x120] sm:$0xff]  ;;  %v986_v6 = vld [vmem:[%s7367_s10 + $0x28] sm:$0xff]  ;;  %v983_v12 = vld [vmem:[%s7367_s10 + $0x10] sm:$0xff] }
 0x18b   : > { %1141 = vmatpush.msrb.mxu0 %v996_v48  ;;  %1182 = vmatpush.msrb.mxu1 %v1028_v49  ;;  %v1018_v7 = vld [vmem:[%s7367_s10 + $0x128] sm:$0xff]  ;;  %v1015_v13 = vld [vmem:[%s7367_s10 + $0x110] sm:$0xff]  ;;  %v984_v14 = vld [vmem:[%s7367_s10 + $0x18] sm:$0xff] }
 0x18c   : > { %1060 = vmatpush.msra.mxu2 %v993_v50  ;;  %1101 = vmatpush.msra.mxu3 %v1025_v51  ;;  %v1016_v15 = vld [vmem:[%s7367_s10 + $0x118] sm:$0xff]  ;;  %v981_v16 = vld [vmem:[%s7367_s10] sm:$0xff]  ;;  %v982_v18 = vld [vmem:[%s7367_s10 + $0x8] sm:$0xff] }
 0x18d   : > { %1142 = vmatpush.msrb.mxu0 %v994_v52  ;;  %1183 = vmatpush.msrb.mxu1 %v1026_v53  ;;  %v1013_v17 = vld [vmem:[%s7367_s10 + $0x100] sm:$0xff]  ;;  %v1014_v19 = vld [vmem:[%s7367_s10 + $0x108] sm:$0xff] }
 0x18e   : > { %1061 = vmatpush.msra.mxu2 %v991_v54  ;;  %1102 = vmatpush.msra.mxu3 %v1023_v55  ;;  %v1242_v20 = vld [vmem:[%s7361_s4] sm:$0xff]  ;;  %v1243_v21 = vld [vmem:[%s7361_s4 + $0x8] sm:$0xff] }
 0x18f   : > { %1143 = vmatpush.msrb.mxu0 %v992_v57  ;;  %1184 = vmatpush.msrb.mxu1 %v1024_v58  ;;  %v921_v22 = vld [vmem:[%s7359_s2] sm:$0x3] }
 0x190   : > { %1062 = vmatpush.msra.mxu2 %v989_v59  ;;  %1103 = vmatpush.msra.mxu3 %v1021_v60  ;;  %v943_v23 = vld [vmem:[%s7360_s3] sm:$0x3]  ;;  %v5582_v24 = vperm.slane %v921_v22, 0  ;;  %v5584_v25 = vperm.slane %v921_v22, 1 }
 0x191   : > { %4334 = vmatmul.msk.f32.gmra.mxu0 %vm814_vm4, %v5344_v11  ;;  %4342 = vmatmul.msk.f32.gmra.mxu1 %vm814_vm4, %v5344_v11  ;;  %v5586_v27 = vperm.slane %v943_v23, 0  ;;  %v5588_v28 = vperm.slane %v943_v23, 1 }
 0x192   : > { %1144 = vmatpush.msrb.mxu0 %v990_v61  ;;  %1185 = vmatpush.msrb.mxu1 %v1022_v62 }
 0x193   : > { %1063 = vmatpush.msra.mxu2 %v987_v0  ;;  %1104 = vmatpush.msra.mxu3 %v1019_v1 }
 0x194   : > { %1145 = vmatpush.msrb.mxu0 %v988_v2  ;;  %1186 = vmatpush.msrb.mxu1 %v1020_v3 }
 0x195   : > { %1064 = vmatpush.msra.mxu2 %v985_v4  ;;  %1105 = vmatpush.msra.mxu3 %v1017_v5 }
 0x196   : > { %1146 = vmatpush.msrb.mxu0 %v986_v6  ;;  %1187 = vmatpush.msrb.mxu1 %v1018_v7 }
 0x197   : > { %1065 = vmatpush.msra.mxu2 %v983_v12  ;;  %1106 = vmatpush.msra.mxu3 %v1015_v13 }
 0x198   : > { %1147 = vmatpush.msrb.mxu0 %v984_v14  ;;  %1188 = vmatpush.msrb.mxu1 %v1016_v15  ;;  %v4407_v14 = vld [vmem:[%s7361_s4 + $0x20] sm:$0xff]  ;;  %v4408_v15 = vld [vmem:[%s7361_s4 + $0x28] sm:$0xff] }
 0x199   : > { %4335 = vmatmul.msk.f32.gmra.mxu0 %vm814_vm4, %v5393_v26  ;;  %4343 = vmatmul.msk.f32.gmra.mxu1 %vm814_vm4, %v5393_v26 }
 0x19a   : > { %1066 = vmatpush.msra.mxu2 %v981_v16  ;;  %1107 = vmatpush.msra.mxu3 %v1013_v17  ;;  %v4381_v16 = vld [vmem:[%s7361_s4 + $0x10] sm:$0xff] }
 0x19b   : > { %1148 = vmatpush.msrb.mxu0 %v982_v18  ;;  %1189 = vmatpush.msrb.mxu1 %v1014_v19  ;;  %v4382_v19 = vld [vmem:[%s7361_s4 + $0x18] sm:$0xff] }
 0x19c   : > { %4833 = vmatpush.msrb.mxu2 %v1242_v20  ;;  %4834 = vmatpush.msrb.mxu3 %v1243_v21 }
 0x19d   : > { %1283 = vmatpush.msra.mxu0 %v1242_v20  ;;  %1324 = vmatpush.msra.mxu1 %v1243_v21 }
 0x1a1   : > { %4336 = vmatmul.msk.f32.gmra.mxu0 %vm814_vm4, %v5442_v41  ;;  %4344 = vmatmul.msk.f32.gmra.mxu1 %vm814_vm4, %v5442_v41 }
 0x1a9   : > { %4337 = vmatmul.msk.f32.gmra.mxu0 %vm814_vm4, %v5491_v56  ;;  %4345 = vmatmul.msk.f32.gmra.mxu1 %vm814_vm4, %v5491_v56 }
 0x1b1   : > { %4338 = vmatmul.msk.f32.gmra.mxu0 %vm814_vm4, %v5516_v63  ;;  %4346 = vmatmul.msk.f32.gmra.mxu1 %vm814_vm4, %v5516_v63 }
 0x1f6   : > { %v856_v29 = vpop.f32.mrf.mxu0  ;;  %v897_v30 = vpop.f32.mrf.mxu1 }
 0x1f7   : > { %v927_v31 = vmul.f32 %v5582_v24, %v856_v29  ;;  %v928_v32 = vmul.f32 %v5584_v25, %v897_v30 }
 0x1f9   : > { %v949_v33 = vadd.f32 %v5586_v27, %v927_v31  ;;  %v950_v34 = vadd.f32 %v5588_v28, %v928_v32 }
 0x1fb   : > { %v965_v35 = vmax.f32 %v949_v33, 0.0  ;;  %v966_v36 = vmax.f32 %v950_v34, 0.0 }
 0x1fd   : > { %1067 = vmatmul.f32.vlgmr.msra.gmra.mxu2 %v965_v35  ;;  %1108 = vmatmul.f32.vlgmr.msra.gmra.mxu3 %v966_v36 }
 0x1fe   : > { %1149 = vmatmul.f32.vlgmr.msrb.gmra.mxu0 %v965_v35  ;;  %1190 = vmatmul.f32.vlgmr.msrb.gmra.mxu1 %v966_v36  ;;  %v859_v37 = vpop.f32.mrf.mxu0  ;;  %v900_v38 = vpop.f32.mrf.mxu1 }
 0x1ff   : > { %v929_v39 = vmul.f32 %v5582_v24, %v859_v37  ;;  %v930_v40 = vmul.f32 %v5584_v25, %v900_v38  ;;  %1581 = vmatpush.msra.mxu2 %v4407_v14  ;;  %1622 = vmatpush.msra.mxu3 %v4408_v15 }
 0x200   : > { %1416 = vmatpush.msrb.mxu0 %v4381_v16  ;;  %1457 = vmatpush.msrb.mxu1 %v4382_v19 }
 0x201   : > { %v951_v42 = vadd.f32 %v5586_v27, %v929_v39  ;;  %v952_v43 = vadd.f32 %v5588_v28, %v930_v40 }
 0x203   : > { %v967_v44 = vmax.f32 %v951_v42, 0.0  ;;  %v968_v45 = vmax.f32 %v952_v43, 0.0 }
 0x205   : > { %1070 = vmatmul.f32.gmra.mxu2 %v967_v44  ;;  %1111 = vmatmul.f32.gmra.mxu3 %v968_v45 }
 0x206   : > { %1152 = vmatmul.f32.gmra.mxu0 %v967_v44  ;;  %1193 = vmatmul.f32.gmra.mxu1 %v968_v45  ;;  %v862_v46 = vpop.f32.mrf.mxu0  ;;  %v903_v47 = vpop.f32.mrf.mxu1 }
 0x207   : > { %v931_v48 = vmul.f32 %v5582_v24, %v862_v46  ;;  %v932_v49 = vmul.f32 %v5584_v25, %v903_v47  ;;  %v4350_v46 = vld [vmem:[%s5320_s20 + $0x860] sm:$0xff]  ;;  %v4349_v47 = vld [vmem:[%s5320_s20 + $0x858] sm:$0xff] }
 0x209   : > { %v953_v50 = vadd.f32 %v5586_v27, %v931_v48  ;;  %v954_v51 = vadd.f32 %v5588_v28, %v932_v49  ;;  %v4353_v48 = vld [vmem:[%s5320_s20 + $0x908] sm:$0xff]  ;;  %v4375_v49 = vld [vmem:[%s5320_s20 + $0x8bc] sm:$0xff] }
 0x20b   : > { %v969_v52 = vmax.f32 %v953_v50, 0.0  ;;  %v970_v53 = vmax.f32 %v954_v51, 0.0  ;;  %v4459_v50 = vld [vmem:[%s7361_s4 + $0x40] sm:$0xff]  ;;  %v4460_v51 = vld [vmem:[%s7361_s4 + $0x48] sm:$0xff] }
 0x20d   : > { %1073 = vmatmul.f32.gmra.mxu2 %v969_v52  ;;  %1114 = vmatmul.f32.gmra.mxu3 %v970_v53 }
 0x20e   : > { %1155 = vmatmul.f32.gmra.mxu0 %v969_v52  ;;  %1196 = vmatmul.f32.gmra.mxu1 %v970_v53  ;;  %v865_v54 = vpop.f32.mrf.mxu0  ;;  %v906_v55 = vpop.f32.mrf.mxu1  ;;  %v4433_v52 = vld [vmem:[%s7361_s4 + $0x30] sm:$0xff]  ;;  %v4434_v53 = vld [vmem:[%s7361_s4 + $0x38] sm:$0xff] }
 0x20f   : > { %v933_v57 = vmul.f32 %v5582_v24, %v865_v54  ;;  %v934_v58 = vmul.f32 %v5584_v25, %v906_v55  ;;  %v4354_v54 = vld [vmem:[%s5320_s20 + $0x910] sm:$0xff]  ;;  %v4376_v55 = vld [vmem:[%s5320_s20 + $0x8c4] sm:$0xff] }
 0x211   : > { %v955_v59 = vadd.f32 %v5586_v27, %v933_v57  ;;  %v956_v60 = vadd.f32 %v5588_v28, %v934_v58  ;;  %v4355_v57 = vld [vmem:[%s5320_s20 + $0x960] sm:$0xff]  ;;  %v4377_v58 = vld [vmem:[%s5320_s20 + $0x914] sm:$0xff] }
 0x213   : > { %v971_v61 = vmax.f32 %v955_v59, 0.0  ;;  %v972_v62 = vmax.f32 %v956_v60, 0.0  ;;  %v4356_v59 = vld [vmem:[%s5320_s20 + $0x968] sm:$0xff]  ;;  %v4378_v60 = vld [vmem:[%s5320_s20 + $0x91c] sm:$0xff] }
 0x215   : > { %1076 = vmatmul.f32.gmra.mxu2 %v971_v61  ;;  %1117 = vmatmul.f32.gmra.mxu3 %v972_v62 }
 0x216   : > { %1158 = vmatmul.f32.gmra.mxu0 %v971_v61  ;;  %1199 = vmatmul.f32.gmra.mxu1 %v972_v62  ;;  %v868_v0 = vpop.f32.mrf.mxu0  ;;  %v909_v1 = vpop.f32.mrf.mxu1  ;;  %v4399_v61 = vld [vmem:[%s5320_s20 + $0x870] sm:$0xff] }
 0x217   : > { %v935_v2 = vmul.f32 %v5582_v24, %v868_v0  ;;  %v936_v3 = vmul.f32 %v5584_v25, %v909_v1  ;;  %v4379_v62 = vld [vmem:[%s5320_s20 + $0x96c] sm:$0xff]  ;;  %v4400_v0 = vld [vmem:[%s5320_s20 + $0x878] sm:$0xff] }
 0x219   : > { %v957_v4 = vadd.f32 %v5586_v27, %v935_v2  ;;  %v958_v5 = vadd.f32 %v5588_v28, %v936_v3  ;;  %v4380_v3 = vld [vmem:[%s5320_s20 + $0x974] sm:$0xff] }
 0x21b   : > { %v973_v6 = vmax.f32 %v957_v4, 0.0  ;;  %v974_v7 = vmax.f32 %v958_v5, 0.0  ;;  %v1045_v4 = vld [vmem:[#allocation2] sm:$0x3] }
 0x21c   : > { %v5702_v5 = vperm.slane %v1045_v4, 0 }
 0x21d   : > { %1079 = vmatmul.f32.gmra.mxu2 %v973_v6  ;;  %1120 = vmatmul.f32.gmra.mxu3 %v974_v7 }
 0x21e   : > { %1161 = vmatmul.f32.gmra.mxu0 %v973_v6  ;;  %1202 = vmatmul.f32.gmra.mxu1 %v974_v7  ;;  %v871_v12 = vpop.f32.mrf.mxu0  ;;  %v912_v13 = vpop.f32.mrf.mxu1 }
 0x21f   : > { %v937_v17 = vmul.f32 %v5582_v24, %v871_v12  ;;  %v938_v18 = vmul.f32 %v5584_v25, %v912_v13  ;;  %v4401_v13 = vld [vmem:[%s5320_s20 + $0x8c8] sm:$0xff] }
 0x221   : > { %v959_v20 = vadd.f32 %v5586_v27, %v937_v17  ;;  %v960_v21 = vadd.f32 %v5588_v28, %v938_v18  ;;  %v4425_v17 = vld [vmem:[%s5320_s20 + $0xc78] sm:$0xff] }
 0x223   : > { %v975_v22 = vmax.f32 %v959_v20, 0.0  ;;  %v976_v23 = vmax.f32 %v960_v21, 0.0  ;;  %v4402_v21 = vld [vmem:[%s5320_s20 + $0x8d0] sm:$0xff] }
 0x225   : > { %1082 = vmatmul.f32.gmra.mxu2 %v975_v22  ;;  %1123 = vmatmul.f32.gmra.mxu3 %v976_v23 }
 0x226   : > { %1164 = vmatmul.f32.gmra.mxu0 %v975_v22  ;;  %1205 = vmatmul.f32.gmra.mxu1 %v976_v23  ;;  %v874_v29 = vpop.f32.mrf.mxu0  ;;  %v915_v30 = vpop.f32.mrf.mxu1 }
 0x227   : > { %v939_v31 = vmul.f32 %v5582_v24, %v874_v29  ;;  %v940_v32 = vmul.f32 %v5584_v25, %v915_v30  ;;  %v4426_v30 = vld [vmem:[%s5320_s20 + $0xc80] sm:$0xff] }
 0x229   : > { %v961_v33 = vadd.f32 %v5586_v27, %v939_v31  ;;  %v962_v34 = vadd.f32 %v5588_v28, %v940_v32 }
 0x22b   : > { %v977_v35 = vmax.f32 %v961_v33, 0.0  ;;  %v978_v36 = vmax.f32 %v962_v34, 0.0  ;;  %v4403_v34 = vld [vmem:[%s5320_s20 + $0x920] sm:$0xff] }
 0x22d   : > { %1085 = vmatmul.f32.gmra.mxu2 %v977_v35  ;;  %1126 = vmatmul.f32.gmra.mxu3 %v978_v36 }
 0x22e   : > { %1167 = vmatmul.f32.gmra.mxu0 %v977_v35  ;;  %1208 = vmatmul.f32.gmra.mxu1 %v978_v36  ;;  %v877_v37 = vpop.f32.mrf.mxu0  ;;  %v918_v38 = vpop.f32.mrf.mxu1 }
 0x22f   : > { %v941_v39 = vmul.f32 %v5582_v24, %v877_v37  ;;  %v942_v40 = vmul.f32 %v5584_v25, %v918_v38  ;;  %v4351_v24 = vld [vmem:[%s5320_s20 + $0x8b0] sm:$0xff]  ;;  %v4373_v25 = vld [vmem:[%s5320_s20 + $0x864] sm:$0xff] }
 0x230   : > { %v4427_v38 = vld [vmem:[%s5320_s20 + $0xcd0] sm:$0xff] }
 0x231   : > { %v963_v42 = vadd.f32 %v5586_v27, %v941_v39  ;;  %v964_v43 = vadd.f32 %v5588_v28, %v942_v40  ;;  %v4352_v27 = vld [vmem:[%s5320_s20 + $0x8b8] sm:$0xff]  ;;  %v4374_v28 = vld [vmem:[%s5320_s20 + $0x86c] sm:$0xff]  ;;  %v4513_v39 = vld [vmem:[%s7361_s4 + $0x60] sm:$0xff] }
 0x232   : > { %v4514_v40 = vld [vmem:[%s7361_s4 + $0x68] sm:$0xff] }
 0x233   : > { %v979_v44 = vmax.f32 %v963_v42, 0.0  ;;  %v980_v45 = vmax.f32 %v964_v43, 0.0 }
 0x235   : > { %1088 = vmatmul.f32.gmra.mxu2 %v979_v44  ;;  %1129 = vmatmul.f32.gmra.mxu3 %v980_v45 }
 0x236   : > { %1170 = vmatmul.f32.gmra.mxu0 %v979_v44  ;;  %1211 = vmatmul.f32.gmra.mxu1 %v980_v45  ;;  %v4404_v45 = vld [vmem:[%s5320_s20 + $0x928] sm:$0xff] }
 0x23d   : > { %4358 = vmatmul.msk.f32.vlgmr.msrb.gmra.mxu2 %vm814_vm4, %v4350_v46  ;;  %4366 = vmatmul.msk.f32.vlgmr.msrb.gmra.mxu3 %vm814_vm4, %v4350_v46 }
 0x23e   : > { %4357 = vmatmul.msk.f32.vlgmr.msra.gmra.mxu0 %vm814_vm4, %v4349_v47  ;;  %4365 = vmatmul.msk.f32.vlgmr.msra.gmra.mxu1 %vm814_vm4, %v4349_v47 }
 0x23f   : > { %1911 = vmatpush.msrb.mxu2 %v4459_v50  ;;  %1952 = vmatpush.msrb.mxu3 %v4460_v51  ;;  %v4405_v51 = vld [vmem:[%s5320_s20 + $0x978] sm:$0xff] }
 0x240   : > { %1746 = vmatpush.msra.mxu0 %v4433_v52  ;;  %1787 = vmatpush.msra.mxu1 %v4434_v53 }
 0x245   : > { %4359 = vmatmul.msk.f32.gmra.mxu2 %vm814_vm4, %v4351_v24  ;;  %4367 = vmatmul.msk.f32.gmra.mxu3 %vm814_vm4, %v4351_v24 }
 0x246   : > { %4383 = vmatmul.msk.f32.vlgmr.msrb.gmra.mxu0 %vm814_vm4, %v4373_v25  ;;  %4391 = vmatmul.msk.f32.vlgmr.msrb.gmra.mxu1 %vm814_vm4, %v4373_v25  ;;  %v4428_v25 = vld [vmem:[%s5320_s20 + $0xcd8] sm:$0xff] }
 0x24d   : > { %4360 = vmatmul.msk.f32.gmra.mxu2 %vm814_vm4, %v4352_v27  ;;  %4368 = vmatmul.msk.f32.gmra.mxu3 %vm814_vm4, %v4352_v27  ;;  %v4485_v27 = vld [vmem:[%s7361_s4 + $0x50] sm:$0xff] }
 0x24e   : > { %4384 = vmatmul.msk.f32.gmra.mxu0 %vm814_vm4, %v4374_v28  ;;  %4392 = vmatmul.msk.f32.gmra.mxu1 %vm814_vm4, %v4374_v28  ;;  %v4486_v28 = vld [vmem:[%s7361_s4 + $0x58] sm:$0xff] }
 0x24f   : > { %2076 = vmatpush.msrb.mxu0 %v4485_v27  ;;  %2117 = vmatpush.msrb.mxu1 %v4486_v28  ;;  %v4479_v28 = vld [vmem:[%s5320_s20 + $0xce8] sm:$0xff] }
 0x255   : > { %4361 = vmatmul.msk.f32.gmra.mxu2 %vm814_vm4, %v4353_v48  ;;  %4369 = vmatmul.msk.f32.gmra.mxu3 %vm814_vm4, %v4353_v48 }
 0x256   : > { %4385 = vmatmul.msk.f32.gmra.mxu0 %vm814_vm4, %v4375_v49  ;;  %4393 = vmatmul.msk.f32.gmra.mxu1 %vm814_vm4, %v4375_v49 }
 0x25d   : > { %4362 = vmatmul.msk.f32.gmra.mxu2 %vm814_vm4, %v4354_v54  ;;  %4370 = vmatmul.msk.f32.gmra.mxu3 %vm814_vm4, %v4354_v54 }
 0x25e   : > { %4386 = vmatmul.msk.f32.gmra.mxu0 %vm814_vm4, %v4376_v55  ;;  %4394 = vmatmul.msk.f32.gmra.mxu1 %vm814_vm4, %v4376_v55  ;;  %v4429_v55 = vld [vmem:[%s5320_s20 + $0xd28] sm:$0xff] }
 0x265   : > { %4363 = vmatmul.msk.f32.gmra.mxu2 %vm814_vm4, %v4355_v57  ;;  %4371 = vmatmul.msk.f32.gmra.mxu3 %vm814_vm4, %v4355_v57 }
 0x266   : > { %4387 = vmatmul.msk.f32.gmra.mxu0 %vm814_vm4, %v4377_v58  ;;  %4395 = vmatmul.msk.f32.gmra.mxu1 %vm814_vm4, %v4377_v58 }
 0x26d   : > { %4364 = vmatmul.msk.f32.gmra.mxu2 %vm814_vm4, %v4356_v59  ;;  %4372 = vmatmul.msk.f32.gmra.mxu3 %vm814_vm4, %v4356_v59 }
 0x26e   : > { %4388 = vmatmul.msk.f32.gmra.mxu0 %vm814_vm4, %v4378_v60  ;;  %4396 = vmatmul.msk.f32.gmra.mxu1 %vm814_vm4, %v4378_v60  ;;  %v4406_v60 = vld [vmem:[%s5320_s20 + $0x980] sm:$0xff] }
 0x275   : > { %4409 = vmatmul.msk.f32.vlgmr.msra.gmra.mxu2 %vm814_vm4, %v4399_v61  ;;  %4417 = vmatmul.msk.f32.vlgmr.msra.gmra.mxu3 %vm814_vm4, %v4399_v61 }
 0x276   : > { %4389 = vmatmul.msk.f32.gmra.mxu0 %vm814_vm4, %v4379_v62  ;;  %4397 = vmatmul.msk.f32.gmra.mxu1 %vm814_vm4, %v4379_v62 }
 0x277   : > { %2244 = vmatpush.msra.mxu2 %v4513_v39  ;;  %2285 = vmatpush.msra.mxu3 %v4514_v40  ;;  %v4477_v39 = vld [vmem:[%s5320_s20 + $0xc90] sm:$0xff] }
 0x27b   : > { %v5695_v1 = vpop.f32.mrf.mxu0  ;;  %v5697_v2 = vpop.f32.mrf.mxu1 }
 0x27c   : > { %7377 = vst [vmem:[#allocation9_spill] sm:$0xff] %v5695_v1 }
 0x27d   : > { %7378 = vst [vmem:[#allocation10_spill] sm:$0xff] %v5697_v2  ;;  %4410 = vmatmul.msk.f32.gmra.mxu2 %vm814_vm4, %v4400_v0  ;;  %4418 = vmatmul.msk.f32.gmra.mxu3 %vm814_vm4, %v4400_v0  ;;  %v4599_v2 = vld [vmem:[%s7367_s10 + $0x280] sm:$0xff] }
 0x27e   : > { %4390 = vmatmul.msk.f32.gmra.mxu0 %vm814_vm4, %v4380_v3  ;;  %4398 = vmatmul.msk.f32.gmra.mxu1 %vm814_vm4, %v4380_v3  ;;  %v4430_v3 = vld [vmem:[%s5320_s20 + $0xd30] sm:$0xff] }
 0x280   : > { %v1068_v6 = vpop.f32.mrf.mxu2  ;;  %v1109_v7 = vpop.f32.mrf.mxu3 }
 0x281   : > { %v1069_v12 = vadd.f32 %v1068_v6, %v5702_v5 }
 0x283   : > { %v5708_v14 = vadd.f32 %v1109_v7, %v1069_v12  ;;  %v5710_v15 = vpop.f32.mrf.mxu0  ;;  %v5712_v16 = vpop.f32.mrf.mxu1 }
 0x284   : > { %7380 = vst [vmem:[#allocation12_spill] sm:$0xff] %v5710_v15 }
 0x285   : > { %7379 = vst [vmem:[#allocation11_spill] sm:$0xff] %v5708_v14  ;;  %4411 = vmatmul.msk.f32.gmra.mxu2 %vm814_vm4, %v4401_v13  ;;  %4419 = vmatmul.msk.f32.gmra.mxu3 %vm814_vm4, %v4401_v13 }
 0x286   : > { %7381 = vst [vmem:[#allocation13_spill] sm:$0xff] %v5712_v16  ;;  %4435 = vmatmul.msk.f32.vlgmr.msra.gmra.mxu0 %vm814_vm4, %v4425_v17  ;;  %4443 = vmatmul.msk.f32.vlgmr.msra.gmra.mxu1 %vm814_vm4, %v4425_v17 }
 0x288   : > { %v1071_v18 = vpop.f32.mrf.mxu2  ;;  %v1112_v19 = vpop.f32.mrf.mxu3 }
 0x289   : > { %v1072_v20 = vadd.f32 %v1071_v18, %v5702_v5  ;;  %v4431_v18 = vld [vmem:[%s5320_s20 + $0xd80] sm:$0xff] }
 0x28b   : > { %v5721_v22 = vadd.f32 %v1112_v19, %v1072_v20  ;;  %v5723_v23 = vpop.f32.mrf.mxu0  ;;  %v5725_v29 = vpop.f32.mrf.mxu1 }
 0x28c   : > { %7383 = vst [vmem:[#allocation15_spill] sm:$0xff] %v5723_v23 }
 0x28d   : > { %7382 = vst [vmem:[#allocation14_spill] sm:$0xff] %v5721_v22  ;;  %4412 = vmatmul.msk.f32.gmra.mxu2 %vm814_vm4, %v4402_v21  ;;  %4420 = vmatmul.msk.f32.gmra.mxu3 %vm814_vm4, %v4402_v21  ;;  %v4564_v22 = vld [vmem:[%s5320_s20 + $0x11c0] sm:$0xff] }
 0x28e   : > { %7384 = vst [vmem:[#allocation16_spill] sm:$0xff] %v5725_v29  ;;  %4436 = vmatmul.msk.f32.gmra.mxu0 %vm814_vm4, %v4426_v30  ;;  %4444 = vmatmul.msk.f32.gmra.mxu1 %vm814_vm4, %v4426_v30  ;;  %v4641_v29 = vld [vmem:[%s7367_s10 + $0x3d0] sm:$0xff] }
 0x290   : > { %v1074_v31 = vpop.f32.mrf.mxu2  ;;  %v1115_v32 = vpop.f32.mrf.mxu3 }
 0x291   : > { %v1075_v33 = vadd.f32 %v1074_v31, %v5702_v5 }
 0x293   : > { %v5734_v35 = vadd.f32 %v1115_v32, %v1075_v33  ;;  %v5736_v36 = vpop.f32.mrf.mxu0  ;;  %v5738_v37 = vpop.f32.mrf.mxu1  ;;  %v4432_v33 = vld [vmem:[%s5320_s20 + $0xd88] sm:$0xff] }
 0x294   : > { %7386 = vst [vmem:[#allocation18_spill] sm:$0xff] %v5736_v36  ;;  %v4609_v36 = vld [vmem:[%s7367_s10 + $0x2d0] sm:$0xff] }
 0x295   : > { %7385 = vst [vmem:[#allocation17_spill] sm:$0xff] %v5734_v35  ;;  %4413 = vmatmul.msk.f32.gmra.mxu2 %vm814_vm4, %v4403_v34  ;;  %4421 = vmatmul.msk.f32.gmra.mxu3 %vm814_vm4, %v4403_v34 }
 0x296   : > { %7387 = vst [vmem:[#allocation19_spill] sm:$0xff] %v5738_v37  ;;  %4437 = vmatmul.msk.f32.gmra.mxu0 %vm814_vm4, %v4427_v38  ;;  %4445 = vmatmul.msk.f32.gmra.mxu1 %vm814_vm4, %v4427_v38 }
 0x298   : > { %v1077_v42 = vpop.f32.mrf.mxu2  ;;  %v1118_v43 = vpop.f32.mrf.mxu3 }
 0x299   : > { %v1078_v44 = vadd.f32 %v1077_v42, %v5702_v5 }
 0x29b   : > { %v5753_v46 = vadd.f32 %v1118_v43, %v1078_v44  ;;  %v5755_v47 = vpop.f32.mrf.mxu0  ;;  %v5757_v24 = vpop.f32.mrf.mxu1  ;;  %v4478_v44 = vld [vmem:[%s5320_s20 + $0xc98] sm:$0xff] }
 0x29c   : > { %7389 = vst [vmem:[#allocation21_spill] sm:$0xff] %v5755_v47  ;;  %v4643_v47 = vld [vmem:[%s7367_s10 + $0x3e0] sm:$0xff] }
 0x29d   : > { %7388 = vst [vmem:[#allocation20_spill] sm:$0xff] %v5753_v46  ;;  %4414 = vmatmul.msk.f32.gmra.mxu2 %vm814_vm4, %v4404_v45  ;;  %4422 = vmatmul.msk.f32.gmra.mxu3 %vm814_vm4, %v4404_v45  ;;  %v4563_v46 = vld [vmem:[%s5320_s20 + $0x11b8] sm:$0xff] }
 0x29e   : > { %7390 = vst [vmem:[#allocation22_spill] sm:$0xff] %v5757_v24  ;;  %4438 = vmatmul.msk.f32.gmra.mxu0 %vm814_vm4, %v4428_v25  ;;  %4446 = vmatmul.msk.f32.gmra.mxu1 %vm814_vm4, %v4428_v25  ;;  %v4645_v24 = vld [vmem:[%s7367_s10 + $0x3f0] sm:$0xff] }
 0x2a0   : > { %v1080_v48 = vpop.f32.mrf.mxu2  ;;  %v1121_v49 = vpop.f32.mrf.mxu3 }
 0x2a1   : > { %v1081_v50 = vadd.f32 %v1080_v48, %v5702_v5  ;;  %v4566_v48 = vld [vmem:[%s7361_s4 + $0x88] sm:$0xff] }
 0x2a3   : > { %v5772_v52 = vadd.f32 %v1121_v49, %v1081_v50  ;;  %v5774_v53 = vpop.f32.mrf.mxu0  ;;  %v5776_v54 = vpop.f32.mrf.mxu1 }
 0x2a4   : > { %7392 = vst [vmem:[#allocation24_spill] sm:$0xff] %v5774_v53 }
 0x2a5   : > { %7391 = vst [vmem:[#allocation23_spill] sm:$0xff] %v5772_v52  ;;  %4415 = vmatmul.msk.f32.gmra.mxu2 %vm814_vm4, %v4405_v51  ;;  %4423 = vmatmul.msk.f32.gmra.mxu3 %vm814_vm4, %v4405_v51  ;;  %v4540_v51 = vld [vmem:[%s7361_s4 + $0x78] sm:$0xff] }
 0x2a6   : > { %7393 = vst [vmem:[#allocation25_spill] sm:$0xff] %v5776_v54  ;;  %4439 = vmatmul.msk.f32.gmra.mxu0 %vm814_vm4, %v4429_v55  ;;  %4447 = vmatmul.msk.f32.gmra.mxu1 %vm814_vm4, %v4429_v55 }
 0x2a7   : > { %2450 = vmatpush.msra.mxu1 %v4540_v51 }
 0x2a8   : > { %v1083_v57 = vpop.f32.mrf.mxu2  ;;  %v1124_v58 = vpop.f32.mrf.mxu3 }
 0x2a9   : > { %v1084_v59 = vadd.f32 %v1083_v57, %v5702_v5 }
 0x2ab   : > { %v5785_v61 = vadd.f32 %v1124_v58, %v1084_v59  ;;  %v5787_v62 = vpop.f32.mrf.mxu0  ;;  %v5789_v0 = vpop.f32.mrf.mxu1  ;;  %v4480_v58 = vld [vmem:[%s5320_s20 + $0xcf0] sm:$0xff] }
 0x2ac   : > { %7395 = vst [vmem:[#allocation27_spill] sm:$0xff] %v5787_v62  ;;  %v4562_v62 = vld [vmem:[%s5320_s20 + $0x1168] sm:$0xff] }
 0x2ad   : > { %7394 = vst [vmem:[#allocation26_spill] sm:$0xff] %v5785_v61  ;;  %4416 = vmatmul.msk.f32.gmra.mxu2 %vm814_vm4, %v4406_v60  ;;  %4424 = vmatmul.msk.f32.gmra.mxu3 %vm814_vm4, %v4406_v60 }
 0x2ae   : > { %7396 = vst [vmem:[#allocation28_spill] sm:$0xff] %v5789_v0  ;;  %4440 = vmatmul.msk.f32.gmra.mxu0 %vm814_vm4, %v4430_v3  ;;  %4448 = vmatmul.msk.f32.gmra.mxu1 %vm814_vm4, %v4430_v3 }
 0x2b0   : > { %v1086_v4 = vpop.f32.mrf.mxu2  ;;  %v1127_v6 = vpop.f32.mrf.mxu3 }
 0x2b1   : > { %v1087_v7 = vadd.f32 %v1086_v4, %v5702_v5 }
 0x2b3   : > { %v5797_v12 = vadd.f32 %v1127_v6, %v1087_v7  ;;  %v5799_v13 = vpop.f32.mrf.mxu0  ;;  %v5801_v17 = vpop.f32.mrf.mxu1  ;;  %v4481_v6 = vld [vmem:[%s5320_s20 + $0xd40] sm:$0xff] }
 0x2b4   : > { %7398 = vst [vmem:[#allocation30_spill] sm:$0xff] %v5799_v13 }
 0x2b5   : > { %7397 = vst [vmem:[#allocation29_spill] sm:$0xff] %v5797_v12  ;;  %4461 = vmatmul.msk.f32.vlgmr.msrb.gmra.mxu2 %vm814_vm4, %v5323_v8  ;;  %4469 = vmatmul.msk.f32.vlgmr.msrb.gmra.mxu3 %vm814_vm4, %v5323_v8  ;;  %v4561_v12 = vld [vmem:[%s5320_s20 + $0x1160] sm:$0xff] }
 0x2b6   : > { %7399 = vst [vmem:[#allocation31_spill] sm:$0xff] %v5801_v17  ;;  %4441 = vmatmul.msk.f32.gmra.mxu0 %vm814_vm4, %v4431_v18  ;;  %4449 = vmatmul.msk.f32.gmra.mxu1 %vm814_vm4, %v4431_v18 }
 0x2b7   : > { %2615 = vmatpush.msrb.mxu3 %v4566_v48 }
 0x2b8   : > { %v1089_v19 = vpop.f32.mrf.mxu2  ;;  %v1130_v20 = vpop.f32.mrf.mxu3 }
 0x2b9   : > { %v1090_v21 = vadd.f32 %v1089_v19, %v5702_v5 }
 0x2bb   : > { %v5811_v30 = vadd.f32 %v1130_v20, %v1090_v21  ;;  %v5813_v31 = vpop.f32.mrf.mxu0  ;;  %v5815_v32 = vpop.f32.mrf.mxu1  ;;  %v4482_v20 = vld [vmem:[%s5320_s20 + $0xd48] sm:$0xff] }
 0x2bd   : > { %7400 = vst [vmem:[#allocation32_spill] sm:$0xff] %v5811_v30  ;;  %4462 = vmatmul.msk.f32.gmra.mxu2 %vm814_vm4, %v5330_v9  ;;  %4470 = vmatmul.msk.f32.gmra.mxu3 %vm814_vm4, %v5330_v9 }
 0x2be   : > { %4442 = vmatmul.msk.f32.gmra.mxu0 %vm814_vm4, %v4432_v33  ;;  %4450 = vmatmul.msk.f32.gmra.mxu1 %vm814_vm4, %v4432_v33  ;;  %v4505_v33 = vld [vmem:[%s5320_s20 + $0x1098] sm:$0xff] }
 0x2c0   : > { %v5824_v8 = vpop.f32.mrf.mxu2  ;;  %v5826_v5 = vpop.f32.mrf.mxu3 }
 0x2c3   : > { %v5828_v34 = vpop.f32.mrf.mxu0  ;;  %v5830_v38 = vpop.f32.mrf.mxu1 }
 0x2c5   : > { %4463 = vmatmul.msk.f32.gmra.mxu2 %vm814_vm4, %v5337_v10  ;;  %4471 = vmatmul.msk.f32.gmra.mxu3 %vm814_vm4, %v5337_v10 }
 0x2c6   : > { %4487 = vmatmul.msk.f32.vlgmr.msrb.gmra.mxu0 %vm814_vm4, %v4477_v39  ;;  %4495 = vmatmul.msk.f32.vlgmr.msrb.gmra.mxu1 %vm814_vm4, %v4477_v39 }
 0x2c7   : > { %2887 = vmatpush.msrb.mxu1 %v4645_v24 }
 0x2c8   : > { %v5839_v9 = vpop.f32.mrf.mxu2  ;;  %v5841_v40 = vpop.f32.mrf.mxu3 }
 0x2c9   : > { %2888 = vmatpush.msrb.mxu1 %v4643_v47  ;;  %v4639_v47 = vld [vmem:[%s7367_s10 + $0x3c0] sm:$0xff] }
 0x2cb   : > { %v5843_v42 = vpop.f32.mrf.mxu0  ;;  %v5845_v43 = vpop.f32.mrf.mxu1  ;;  %2889 = vmatpush.msrb.mxu1 %v4641_v29  ;;  %v4605_v29 = vld [vmem:[%s7367_s10 + $0x2b0] sm:$0xff] }
 0x2cd   : > { %4464 = vmatmul.msk.f32.gmra.mxu2 %vm814_vm4, %v5344_v11  ;;  %4472 = vmatmul.msk.f32.gmra.mxu3 %vm814_vm4, %v5344_v11  ;;  %v4565_v11 = vld [vmem:[%s7361_s4 + $0x80] sm:$0xff] }
 0x2ce   : > { %4488 = vmatmul.msk.f32.gmra.mxu0 %vm814_vm4, %v4478_v44  ;;  %4496 = vmatmul.msk.f32.gmra.mxu1 %vm814_vm4, %v4478_v44 }
 0x2cf   : > { %2574 = vmatpush.msrb.mxu2 %v4565_v11  ;;  %v1500_v11 = vadd.f32 %v5830_v38, %v5815_v32  ;;  %v1502_v32 = vadd.f32 %v5845_v43, %v5826_v5  ;;  %2890 = vmatpush.msrb.mxu1 %v4639_v47 }
 0x2d0   : > { %v5854_v10 = vpop.f32.mrf.mxu2  ;;  %v5856_v45 = vpop.f32.mrf.mxu3 }
 0x2d3   : > { %v5858_v25 = vpop.f32.mrf.mxu0  ;;  %v5860_v27 = vpop.f32.mrf.mxu1 }
 0x2d4   : > { %v1504_v5 = vadd.f32 %v5860_v27, %v5841_v40 }
 0x2d5   : > { %4465 = vmatmul.msk.f32.gmra.mxu2 %vm814_vm4, %v5393_v26  ;;  %4473 = vmatmul.msk.f32.gmra.mxu3 %vm814_vm4, %v5393_v26  ;;  %v4539_v26 = vld [vmem:[%s7361_s4 + $0x70] sm:$0xff] }
 0x2d6   : > { %4489 = vmatmul.msk.f32.gmra.mxu0 %vm814_vm4, %v4479_v28  ;;  %4497 = vmatmul.msk.f32.gmra.mxu1 %vm814_vm4, %v4479_v28  ;;  %v4483_v28 = vld [vmem:[%s5320_s20 + $0xd98] sm:$0xff] }
 0x2d7   : > { %2409 = vmatpush.msra.mxu0 %v4539_v26 }
 0x2d8   : > { %v5875_v49 = vpop.f32.mrf.mxu2  ;;  %v5877_v50 = vpop.f32.mrf.mxu3 }
 0x2db   : > { %v5885_v55 = vpop.f32.mrf.mxu0  ;;  %v5887_v57 = vpop.f32.mrf.mxu1 }
 0x2dc   : > { %v1506_v40 = vadd.f32 %v5887_v57, %v5856_v45 }
 0x2dd   : > { %4466 = vmatmul.msk.f32.gmra.mxu2 %vm814_vm4, %v5442_v41  ;;  %4474 = vmatmul.msk.f32.gmra.mxu3 %vm814_vm4, %v5442_v41 }
 0x2de   : > { %4490 = vmatmul.msk.f32.gmra.mxu0 %vm814_vm4, %v4480_v58  ;;  %4498 = vmatmul.msk.f32.gmra.mxu1 %vm814_vm4, %v4480_v58 }
 0x2e0   : > { %v5896_v59 = vpop.f32.mrf.mxu2  ;;  %v5898_v60 = vpop.f32.mrf.mxu3 }
 0x2e3   : > { %v5900_v3 = vpop.f32.mrf.mxu0  ;;  %v5902_v4 = vpop.f32.mrf.mxu1 }
 0x2e4   : > { %v1508_v45 = vadd.f32 %v5902_v4, %v5877_v50 }
 0x2e5   : > { %4467 = vmatmul.msk.f32.gmra.mxu2 %vm814_vm4, %v5491_v56  ;;  %4475 = vmatmul.msk.f32.gmra.mxu3 %vm814_vm4, %v5491_v56 }
 0x2e6   : > { %4491 = vmatmul.msk.f32.gmra.mxu0 %vm814_vm4, %v4481_v6  ;;  %4499 = vmatmul.msk.f32.gmra.mxu1 %vm814_vm4, %v4481_v6  ;;  %v4506_v6 = vld [vmem:[%s5320_s20 + $0x10a0] sm:$0xff] }
 0x2e8   : > { %v5911_v41 = vpop.f32.mrf.mxu2  ;;  %v5913_v7 = vpop.f32.mrf.mxu3 }
 0x2eb   : > { %v5915_v18 = vpop.f32.mrf.mxu0  ;;  %v5917_v19 = vpop.f32.mrf.mxu1 }
 0x2ec   : > { %v1510_v50 = vadd.f32 %v5917_v19, %v5898_v60 }
 0x2ed   : > { %4468 = vmatmul.msk.f32.gmra.mxu2 %vm814_vm4, %v5516_v63  ;;  %4476 = vmatmul.msk.f32.gmra.mxu3 %vm814_vm4, %v5516_v63  ;;  %v1499_v63 = vadd.f32 %v5828_v34, %v5813_v31  ;;  %v1501_v31 = vadd.f32 %v5843_v42, %v5824_v8  ;;  %v1503_v8 = vadd.f32 %v5858_v25, %v5839_v9 }
 0x2ee   : > { %4492 = vmatmul.msk.f32.gmra.mxu0 %vm814_vm4, %v4482_v20  ;;  %4500 = vmatmul.msk.f32.gmra.mxu1 %vm814_vm4, %v4482_v20  ;;  %v1505_v9 = vadd.f32 %v5885_v55, %v5854_v10  ;;  %v1507_v10 = vadd.f32 %v5900_v3, %v5875_v49  ;;  %v1509_v49 = vadd.f32 %v5915_v18, %v5896_v59 }
 0x2f0   : > { %v5926_v56 = vpop.f32.mrf.mxu2  ;;  %v5928_v21 = vpop.f32.mrf.mxu3 }
 0x2f3   : > { %v5931_v39 = vpop.f32.mrf.mxu0  ;;  %v5933_v44 = vpop.f32.mrf.mxu1 }
 0x2f4   : > { %v1511_v59 = vadd.f32 %v5931_v39, %v5911_v41  ;;  %v1512_v60 = vadd.f32 %v5933_v44, %v5913_v7 }
 0x2f5   : > { %4515 = vmatmul.msk.f32.vlgmr.msra.gmra.mxu2 %vm814_vm4, %v4505_v33  ;;  %4523 = vmatmul.msk.f32.vlgmr.msra.gmra.mxu3 %vm814_vm4, %v4505_v33 }
 0x2f6   : > { %4493 = vmatmul.msk.f32.gmra.mxu0 %vm814_vm4, %v4483_v28  ;;  %4501 = vmatmul.msk.f32.gmra.mxu1 %vm814_vm4, %v4483_v28  ;;  %v4484_v28 = vld [vmem:[%s5320_s20 + $0xda0] sm:$0xff] }
 0x2f8   : > { %v1583_v48 = vpop.f32.mrf.mxu2  ;;  %v1624_v26 = vpop.f32.mrf.mxu3 }
 0x2f9   : > { %v5944_v51 = vadd.f32 %v1583_v48, %v1499_v63  ;;  %v5946_v58 = vadd.f32 %v1624_v26, %v1500_v11  ;;  %v4507_v48 = vld [vmem:[%s5320_s20 + $0x10f0] sm:$0xff]  ;;  %v4531_v26 = vld [vmem:[%s5320_s20 + $0x10a4] sm:$0xff] }
 0x2fb   : > { %v5949_v20 = vpop.f32.mrf.mxu0  ;;  %v5951_v33 = vpop.f32.mrf.mxu1 }
 0x2fc   : > { %v1513_v41 = vadd.f32 %v5949_v20, %v5926_v56  ;;  %v1514_v7 = vadd.f32 %v5951_v33, %v5928_v21 }
 0x2fd   : > { %4516 = vmatmul.msk.f32.gmra.mxu2 %vm814_vm4, %v4506_v6  ;;  %4524 = vmatmul.msk.f32.gmra.mxu3 %vm814_vm4, %v4506_v6 }
 0x2fe   : > { %4494 = vmatmul.msk.f32.gmra.mxu0 %vm814_vm4, %v4484_v28  ;;  %4502 = vmatmul.msk.f32.gmra.mxu1 %vm814_vm4, %v4484_v28 }
 0x300   : > { %v1586_v34 = vpop.f32.mrf.mxu2  ;;  %v1627_v38 = vpop.f32.mrf.mxu3 }
 0x301   : > { %v5962_v63 = vadd.f32 %v1586_v34, %v1501_v31  ;;  %v5964_v11 = vadd.f32 %v1627_v38, %v1502_v32  ;;  %v4508_v32 = vld [vmem:[%s5320_s20 + $0x10f8] sm:$0xff]  ;;  %v4532_v34 = vld [vmem:[%s5320_s20 + $0x10ac] sm:$0xff] }
 0x303   : > { %v5968_v6 = vpop.f32.mrf.mxu0  ;;  %v5970_v30 = vpop.f32.mrf.mxu1 }
 0x305   : > { %4517 = vmatmul.msk.f32.gmra.mxu2 %vm814_vm4, %v4507_v48  ;;  %4525 = vmatmul.msk.f32.gmra.mxu3 %vm814_vm4, %v4507_v48 }
 0x306   : > { %4541 = vmatmul.msk.f32.vlgmr.msra.gmra.mxu0 %vm814_vm4, %v4531_v26  ;;  %4549 = vmatmul.msk.f32.vlgmr.msra.gmra.mxu1 %vm814_vm4, %v4531_v26 }
 0x308   : > { %v1589_v42 = vpop.f32.mrf.mxu2  ;;  %v1630_v43 = vpop.f32.mrf.mxu3 }
 0x309   : > { %v5980_v28 = vadd.f32 %v1589_v42, %v1503_v8  ;;  %v5982_v31 = vadd.f32 %v1630_v43, %v1504_v5  ;;  %v4509_v5 = vld [vmem:[%s5320_s20 + $0x1148] sm:$0xff]  ;;  %v4533_v42 = vld [vmem:[%s5320_s20 + $0x10fc] sm:$0xff] }
 0x30b   : > { %v5994_v25 = vpop.f32.mrf.mxu0  ;;  %v5996_v27 = vpop.f32.mrf.mxu1 }
 0x30d   : > { %4518 = vmatmul.msk.f32.gmra.mxu2 %vm814_vm4, %v4508_v32  ;;  %4526 = vmatmul.msk.f32.gmra.mxu3 %vm814_vm4, %v4508_v32 }
 0x30e   : > { %4542 = vmatmul.msk.f32.gmra.mxu0 %vm814_vm4, %v4532_v34  ;;  %4550 = vmatmul.msk.f32.gmra.mxu1 %vm814_vm4, %v4532_v34 }
 0x310   : > { %v1592_v38 = vpop.f32.mrf.mxu2  ;;  %v1633_v48 = vpop.f32.mrf.mxu3 }
 0x311   : > { %v5998_v26 = vadd.f32 %v1592_v38, %v1505_v9  ;;  %v6000_v8 = vadd.f32 %v1633_v48, %v1506_v40  ;;  %v4510_v40 = vld [vmem:[%s5320_s20 + $0x1150] sm:$0xff]  ;;  %v4534_v38 = vld [vmem:[%s5320_s20 + $0x1104] sm:$0xff] }
 0x313   : > { %v6012_v43 = vpop.f32.mrf.mxu0  ;;  %v6014_v32 = vpop.f32.mrf.mxu1 }
 0x315   : > { %4519 = vmatmul.msk.f32.gmra.mxu2 %vm814_vm4, %v4509_v5  ;;  %4527 = vmatmul.msk.f32.gmra.mxu3 %vm814_vm4, %v4509_v5 }
 0x316   : > { %4543 = vmatmul.msk.f32.gmra.mxu0 %vm814_vm4, %v4533_v42  ;;  %4551 = vmatmul.msk.f32.gmra.mxu1 %vm814_vm4, %v4533_v42  ;;  %v4511_v42 = vld [vmem:[%s5320_s20 + $0x11a0] sm:$0xff] }
 0x318   : > { %v1595_v55 = vpop.f32.mrf.mxu2  ;;  %v1636_v57 = vpop.f32.mrf.mxu3 }
 0x319   : > { %v6016_v34 = vadd.f32 %v1595_v55, %v1507_v10  ;;  %v6018_v9 = vadd.f32 %v1636_v57, %v1508_v45  ;;  %v4535_v55 = vld [vmem:[%s5320_s20 + $0x1154] sm:$0xff] }
 0x31b   : > { %v6035_v10 = vpop.f32.mrf.mxu0  ;;  %v6037_v45 = vpop.f32.mrf.mxu1 }
 0x31d   : > { %4520 = vmatmul.msk.f32.gmra.mxu2 %vm814_vm4, %v4510_v40  ;;  %4528 = vmatmul.msk.f32.gmra.mxu3 %vm814_vm4, %v4510_v40 }
 0x31e   : > { %4544 = vmatmul.msk.f32.gmra.mxu0 %vm814_vm4, %v4534_v38  ;;  %4552 = vmatmul.msk.f32.gmra.mxu1 %vm814_vm4, %v4534_v38  ;;  %v4512_v38 = vld [vmem:[%s5320_s20 + $0x11a8] sm:$0xff] }
 0x320   : > { %v1598_v3 = vpop.f32.mrf.mxu2  ;;  %v1639_v4 = vpop.f32.mrf.mxu3 }
 0x321   : > { %v6030_v48 = vadd.f32 %v1598_v3, %v1509_v49  ;;  %v6032_v5 = vadd.f32 %v1639_v4, %v1510_v50  ;;  %v4536_v49 = vld [vmem:[%s5320_s20 + $0x115c] sm:$0xff] }
 0x323   : > { %7401 = vst [vmem:[#allocation33_spill] sm:$0xff] %v6032_v5  ;;  %v6054_v50 = vpop.f32.mrf.mxu0  ;;  %v6056_v3 = vpop.f32.mrf.mxu1 }
 0x325   : > { %4521 = vmatmul.msk.f32.gmra.mxu2 %vm814_vm4, %v4511_v42  ;;  %4529 = vmatmul.msk.f32.gmra.mxu3 %vm814_vm4, %v4511_v42 }
 0x326   : > { %4545 = vmatmul.msk.f32.gmra.mxu0 %vm814_vm4, %v4535_v55  ;;  %4553 = vmatmul.msk.f32.gmra.mxu1 %vm814_vm4, %v4535_v55  ;;  %v4557_v55 = vld [vmem:[%s5320_s20 + $0x10b0] sm:$0xff] }
 0x328   : > { %v1601_v18 = vpop.f32.mrf.mxu2  ;;  %v1642_v19 = vpop.f32.mrf.mxu3 }
 0x329   : > { %v6048_v57 = vadd.f32 %v1601_v18, %v1511_v59  ;;  %v6050_v40 = vadd.f32 %v1642_v19, %v1512_v60  ;;  %v4537_v59 = vld [vmem:[%s5320_s20 + $0x11ac] sm:$0xff]  ;;  %v4558_v60 = vld [vmem:[%s5320_s20 + $0x10b8] sm:$0xff] }
 0x32a   : > { %v4538_v18 = vld [vmem:[%s5320_s20 + $0x11b4] sm:$0xff] }
 0x32b   : > { %7402 = vst [vmem:[#allocation34_spill] sm:$0xff] %v6048_v57  ;;  %v6076_v56 = vpop.f32.mrf.mxu0  ;;  %v6078_v21 = vpop.f32.mrf.mxu1 }
 0x32c   : > { %7403 = vst [vmem:[#allocation35_spill] sm:$0xff] %v6050_v40  ;;  %v4632_v40 = vld [vmem:[%s7367_s10 + $0x388] sm:$0xff] }
 0x32d   : > { %4522 = vmatmul.msk.f32.gmra.mxu2 %vm814_vm4, %v4512_v38  ;;  %4530 = vmatmul.msk.f32.gmra.mxu3 %vm814_vm4, %v4512_v38  ;;  %7406 = vst [vmem:[#allocation38_spill] sm:$0xff] %v6078_v21 }
 0x32e   : > { %4546 = vmatmul.msk.f32.gmra.mxu0 %vm814_vm4, %v4536_v49  ;;  %4554 = vmatmul.msk.f32.gmra.mxu1 %vm814_vm4, %v4536_v49 }
 0x330   : > { %v1604_v39 = vpop.f32.mrf.mxu2  ;;  %v1645_v44 = vpop.f32.mrf.mxu3 }
 0x331   : > { %v6066_v4 = vadd.f32 %v1604_v39, %v1513_v41  ;;  %v6068_v42 = vadd.f32 %v1645_v44, %v1514_v7  ;;  %v4559_v7 = vld [vmem:[%s5320_s20 + $0x1108] sm:$0xff] }
 0x333   : > { %7404 = vst [vmem:[#allocation36_spill] sm:$0xff] %v6066_v4  ;;  %v6094_v49 = vpop.f32.mrf.mxu0  ;;  %v6096_v41 = vpop.f32.mrf.mxu1 }
 0x334   : > { %7405 = vst [vmem:[#allocation37_spill] sm:$0xff] %v6068_v42  ;;  %v4644_v42 = vld [vmem:[%s7367_s10 + $0x3e8] sm:$0xff] }
 0x335   : > { %4567 = vmatmul.msk.f32.vlgmr.msrb.gmra.mxu2 %vm814_vm4, %v4557_v55  ;;  %4575 = vmatmul.msk.f32.vlgmr.msrb.gmra.mxu3 %vm814_vm4, %v4557_v55  ;;  %7407 = vst [vmem:[#allocation39_spill] sm:$0xff] %v6094_v49  ;;  %v4560_v55 = vld [vmem:[%s5320_s20 + $0x1110] sm:$0xff] }
 0x336   : > { %4547 = vmatmul.msk.f32.gmra.mxu0 %vm814_vm4, %v4537_v59  ;;  %4555 = vmatmul.msk.f32.gmra.mxu1 %vm814_vm4, %v4537_v59  ;;  %7408 = vst [vmem:[#allocation40_spill] sm:$0xff] %v6096_v41 }
 0x338   : > { %v6080_v20 = vpop.f32.mrf.mxu2  ;;  %v6082_v33 = vpop.f32.mrf.mxu3 }
 0x33b   : > { %v6106_v59 = vpop.f32.mrf.mxu0 }
 0x33c   : > { %7409 = vst [vmem:[#allocation41_spill] sm:$0xff] %v6106_v59 }
 0x33d   : > { %4568 = vmatmul.msk.f32.gmra.mxu2 %vm814_vm4, %v4558_v60  ;;  %4576 = vmatmul.msk.f32.gmra.mxu3 %vm814_vm4, %v4558_v60  ;;  %v6108_v60 = vpop.f32.mrf.mxu1 }
 0x33e   : > { %4548 = vmatmul.msk.f32.gmra.mxu0 %vm814_vm4, %v4538_v18  ;;  %4556 = vmatmul.msk.f32.gmra.mxu1 %vm814_vm4, %v4538_v18  ;;  %7410 = vst [vmem:[#allocation42_spill] sm:$0xff] %v6108_v60  ;;  %v4614_v60 = vld [vmem:[%s7367_s10 + $0x2f8] sm:$0xff] }
 0x33f   : > { %2928 = vmatpush.msra.mxu2 %v4614_v60  ;;  %v4610_v60 = vld [vmem:[%s7367_s10 + $0x2d8] sm:$0xff] }
 0x340   : > { %v6090_v19 = vpop.f32.mrf.mxu2  ;;  %v6092_v38 = vpop.f32.mrf.mxu3 }
 0x345   : > { %4569 = vmatmul.msk.f32.gmra.mxu2 %vm814_vm4, %v4559_v7  ;;  %4577 = vmatmul.msk.f32.gmra.mxu3 %vm814_vm4, %v4559_v7  ;;  %v6117_v7 = vpop.f32.mrf.mxu0  ;;  %v6119_v13 = vpop.f32.mrf.mxu1 }
 0x348   : > { %v6101_v39 = vpop.f32.mrf.mxu2  ;;  %v6103_v44 = vpop.f32.mrf.mxu3 }
 0x34d   : > { %4570 = vmatmul.msk.f32.gmra.mxu2 %vm814_vm4, %v4560_v55  ;;  %4578 = vmatmul.msk.f32.gmra.mxu3 %vm814_vm4, %v4560_v55  ;;  %v6130_v55 = vpop.f32.mrf.mxu0  ;;  %v6132_v54 = vpop.f32.mrf.mxu1 }
 0x350   : > { %v6112_v18 = vpop.f32.mrf.mxu2  ;;  %v6114_v17 = vpop.f32.mrf.mxu3 }
 0x355   : > { %4571 = vmatmul.msk.f32.gmra.mxu2 %vm814_vm4, %v4561_v12  ;;  %4579 = vmatmul.msk.f32.gmra.mxu3 %vm814_vm4, %v4561_v12  ;;  %v4613_v12 = vld [vmem:[%s7367_s10 + $0x2f0] sm:$0xff]  ;;  %v6159_v24 = vpop.f32.mrf.mxu1 }
 0x356   : > { %2846 = vmatpush.msrb.mxu0 %v4613_v12  ;;  %v6157_v12 = vpop.f32.mrf.mxu0 }
 0x358   : > { %v6123_v0 = vpop.f32.mrf.mxu2  ;;  %v6125_v61 = vpop.f32.mrf.mxu3 }
 0x35d   : > { %4572 = vmatmul.msk.f32.gmra.mxu2 %vm814_vm4, %v4562_v62  ;;  %4580 = vmatmul.msk.f32.gmra.mxu3 %vm814_vm4, %v4562_v62  ;;  %v4611_v62 = vld [vmem:[%s7367_s10 + $0x2e0] sm:$0xff]  ;;  %v6188_v14 = vpop.f32.mrf.mxu1 }
 0x35e   : > { %2847 = vmatpush.msrb.mxu0 %v4611_v62  ;;  %v6186_v16 = vpop.f32.mrf.mxu0 }
 0x360   : > { %v6134_v52 = vpop.f32.mrf.mxu2  ;;  %v6136_v53 = vpop.f32.mrf.mxu3  ;;  %2848 = vmatpush.msrb.mxu0 %v4609_v36  ;;  %v4637_v36 = vld [vmem:[%s7367_s10 + $0x3b0] sm:$0xff] }
 0x361   : > { %7411 = vst [vmem:[#allocation43_spill] sm:$0xff] %v6134_v52  ;;  %2891 = vmatpush.msrb.mxu1 %v4637_v36  ;;  %v4633_v36 = vld [vmem:[%s7367_s10 + $0x390] sm:$0xff] }
 0x362   : > { %7412 = vst [vmem:[#allocation44_spill] sm:$0xff] %v6136_v53 }
 0x365   : > { %4573 = vmatmul.msk.f32.gmra.mxu2 %vm814_vm4, %v4563_v46  ;;  %4581 = vmatmul.msk.f32.gmra.mxu3 %vm814_vm4, %v4563_v46  ;;  %v4607_v46 = vld [vmem:[%s7367_s10 + $0x2c0] sm:$0xff]  ;;  %v6214_v1 = vpop.f32.mrf.mxu1 }
 0x366   : > { %2849 = vmatpush.msrb.mxu0 %v4607_v46  ;;  %v4635_v46 = vld [vmem:[%s7367_s10 + $0x3a0] sm:$0xff] }
 0x367   : > { %2892 = vmatpush.msrb.mxu1 %v4635_v46  ;;  %v6212_v46 = vpop.f32.mrf.mxu0 }
 0x368   : > { %v6153_v37 = vpop.f32.mrf.mxu2  ;;  %v6155_v35 = vpop.f32.mrf.mxu3  ;;  %2850 = vmatpush.msrb.mxu0 %v4605_v29  ;;  %v4601_v29 = vld [vmem:[%s7367_s10 + $0x290] sm:$0xff] }
 0x369   : > { %7413 = vst [vmem:[#allocation45_spill] sm:$0xff] %v6153_v37  ;;  %2893 = vmatpush.msrb.mxu1 %v4633_v36  ;;  %v4629_v36 = vld [vmem:[%s7367_s10 + $0x370] sm:$0xff]  ;;  %v4640_v37 = vld [vmem:[%s7367_s10 + $0x3c8] sm:$0xff] }
 0x36a   : > { %7414 = vst [vmem:[#allocation46_spill] sm:$0xff] %v6155_v35  ;;  %v4608_v35 = vld [vmem:[%s7367_s10 + $0x2c8] sm:$0xff] }
 0x36d   : > { %4574 = vmatmul.msk.f32.gmra.mxu2 %vm814_vm4, %v4564_v22  ;;  %4582 = vmatmul.msk.f32.gmra.mxu3 %vm814_vm4, %v4564_v22  ;;  %v4603_v22 = vld [vmem:[%s7367_s10 + $0x2a0] sm:$0xff]  ;;  %v6252_v4 = vpop.f32.mrf.mxu1 }
 0x36e   : > { %2851 = vmatpush.msrb.mxu0 %v4603_v22  ;;  %v4631_v22 = vld [vmem:[%s7367_s10 + $0x380] sm:$0xff]  ;;  %7418 = vst [vmem:[#allocation50_spill] sm:$0xff] %v6252_v4  ;;  %v4588_v4 = vld [vmem:[%s7367_s10 + $0x228] sm:$0xff] }
 0x36f   : > { %2894 = vmatpush.msrb.mxu1 %v4631_v22  ;;  %v4612_v22 = vld [vmem:[%s7367_s10 + $0x2e8] sm:$0xff]  ;;  %v6250_v59 = vpop.f32.mrf.mxu0 }
 0x370   : > { %v6176_v62 = vpop.f32.mrf.mxu2  ;;  %v6178_v23 = vpop.f32.mrf.mxu3  ;;  %2852 = vmatpush.msrb.mxu0 %v4601_v29  ;;  %v4597_v29 = vld [vmem:[%s7367_s10 + $0x270] sm:$0xff]  ;;  %2929 = vmatpush.msra.mxu2 %v4612_v22  ;;  %7417 = vst [vmem:[#allocation49_spill] sm:$0xff] %v6250_v59 }
 0x371   : > { %7415 = vst [vmem:[#allocation47_spill] sm:$0xff] %v6176_v62  ;;  %2895 = vmatpush.msrb.mxu1 %v4629_v36  ;;  %v4627_v36 = vld [vmem:[%s7367_s10 + $0x360] sm:$0xff] }
 0x372   : > { %7416 = vst [vmem:[#allocation48_spill] sm:$0xff] %v6178_v23  ;;  %2853 = vmatpush.msrb.mxu0 %v4599_v2  ;;  %v4646_v2 = vld [vmem:[%s7367_s10 + $0x3f8] sm:$0xff]  ;;  %2930 = vmatpush.msra.mxu2 %v4610_v60 }
 0x373   : > { %2969 = vmatpush.msra.mxu3 %v4646_v2  ;;  %v4642_v2 = vld [vmem:[%s7367_s10 + $0x3d8] sm:$0xff]  ;;  %2896 = vmatpush.msrb.mxu1 %v4627_v36  ;;  %v4625_v36 = vld [vmem:[%s7367_s10 + $0x350] sm:$0xff] }
 0x374   : > { %2854 = vmatpush.msrb.mxu0 %v4597_v29  ;;  %v4595_v29 = vld [vmem:[%s7367_s10 + $0x260] sm:$0xff]  ;;  %2931 = vmatpush.msra.mxu2 %v4608_v35  ;;  %v4606_v60 = vld [vmem:[%s7367_s10 + $0x2b8] sm:$0xff]  ;;  %v4604_v35 = vld [vmem:[%s7367_s10 + $0x2a8] sm:$0xff] }
 0x375   : > { %2970 = vmatpush.msra.mxu3 %v4644_v42  ;;  %2897 = vmatpush.msrb.mxu1 %v4625_v36  ;;  %v4623_v36 = vld [vmem:[%s7367_s10 + $0x340] sm:$0xff]  ;;  %v6306_v57 = vpop.f32.mrf.mxu1 }
 0x376   : > { %2855 = vmatpush.msrb.mxu0 %v4595_v29  ;;  %v4593_v29 = vld [vmem:[%s7367_s10 + $0x250] sm:$0xff]  ;;  %2932 = vmatpush.msra.mxu2 %v4606_v60  ;;  %v4602_v60 = vld [vmem:[%s7367_s10 + $0x298] sm:$0xff]  ;;  %7420 = vst [vmem:[#allocation52_spill] sm:$0xff] %v6306_v57 }
 0x377   : > { %2971 = vmatpush.msra.mxu3 %v4642_v2  ;;  %v4638_v2 = vld [vmem:[%s7367_s10 + $0x3b8] sm:$0xff]  ;;  %2898 = vmatpush.msrb.mxu1 %v4623_v36  ;;  %v6304_v49 = vpop.f32.mrf.mxu0  ;;  %v4621_v36 = vld [vmem:[%s7367_s10 + $0x330] sm:$0xff] }
 0x378   : > { %v6196_v47 = vpop.f32.mrf.mxu2  ;;  %v6198_v15 = vpop.f32.mrf.mxu3  ;;  %2856 = vmatpush.msrb.mxu0 %v4593_v29  ;;  %v4591_v29 = vld [vmem:[%s7367_s10 + $0x240] sm:$0xff]  ;;  %2933 = vmatpush.msra.mxu2 %v4604_v35  ;;  %7419 = vst [vmem:[#allocation51_spill] sm:$0xff] %v6304_v49  ;;  %v4624_v49 = vld [vmem:[%s7367_s10 + $0x348] sm:$0xff] }
 0x379   : > { %2972 = vmatpush.msra.mxu3 %v4640_v37  ;;  %v4636_v37 = vld [vmem:[%s7367_s10 + $0x3a8] sm:$0xff]  ;;  %2899 = vmatpush.msrb.mxu1 %v4621_v36  ;;  %v4619_v36 = vld [vmem:[%s7367_s10 + $0x320] sm:$0xff] }
 0x37a   : > { %2857 = vmatpush.msrb.mxu0 %v4591_v29  ;;  %2934 = vmatpush.msra.mxu2 %v4602_v60  ;;  %v4589_v29 = vld [vmem:[%s7367_s10 + $0x230] sm:$0xff]  ;;  %v4598_v60 = vld [vmem:[%s7367_s10 + $0x278] sm:$0xff] }
 0x37b   : > { %2973 = vmatpush.msra.mxu3 %v4638_v2  ;;  %v4634_v2 = vld [vmem:[%s7367_s10 + $0x398] sm:$0xff]  ;;  %2900 = vmatpush.msrb.mxu1 %v4619_v36 }
 0x37c   : > { %2858 = vmatpush.msrb.mxu0 %v4589_v29  ;;  %v4587_v29 = vld [vmem:[%s7367_s10 + $0x220] sm:$0xff]  ;;  %v4622_v36 = vld [vmem:[%s7367_s10 + $0x338] sm:$0xff] }
 0x37d   : > { %2974 = vmatpush.msra.mxu3 %v4636_v37  ;;  %v4600_v37 = vld [vmem:[%s7367_s10 + $0x288] sm:$0xff] }
 0x37e   : > { %2935 = vmatpush.msra.mxu2 %v4600_v37  ;;  %v4628_v37 = vld [vmem:[%s7367_s10 + $0x368] sm:$0xff]  ;;  %2859 = vmatpush.msrb.mxu0 %v4587_v29  ;;  %v4590_v29 = vld [vmem:[%s7367_s10 + $0x238] sm:$0xff] }
 0x37f   : > { %2975 = vmatpush.msra.mxu3 %v4634_v2  ;;  %v4630_v2 = vld [vmem:[%s7367_s10 + $0x378] sm:$0xff] }
 0x380   : > { %v6216_v23 = vpop.f32.mrf.mxu2  ;;  %v6218_v62 = vpop.f32.mrf.mxu3  ;;  %2936 = vmatpush.msra.mxu2 %v4598_v60  ;;  %v4594_v60 = vld [vmem:[%s7367_s10 + $0x258] sm:$0xff] }
 0x381   : > { %2976 = vmatpush.msra.mxu3 %v4632_v40  ;;  %v4596_v40 = vld [vmem:[%s7367_s10 + $0x268] sm:$0xff] }
 0x382   : > { %2937 = vmatpush.msra.mxu2 %v4596_v40 }
 0x383   : > { %2977 = vmatpush.msra.mxu3 %v4630_v2  ;;  %v4626_v2 = vld [vmem:[%s7367_s10 + $0x358] sm:$0xff] }
 0x384   : > { %2938 = vmatpush.msra.mxu2 %v4594_v60  ;;  %v6354_v60 = vpop.f32.mrf.mxu0 }
 0x385   : > { %2978 = vmatpush.msra.mxu3 %v4628_v37  ;;  %v4592_v37 = vld [vmem:[%s7367_s10 + $0x248] sm:$0xff]  ;;  %7421 = vst [vmem:[#allocation53_spill] sm:$0xff] %v6354_v60 }
 0x386   : > { %2939 = vmatpush.msra.mxu2 %v4592_v37  ;;  %v4585_v37 = vld [vmem:[%s7367_s10 + $0x210] sm:$0xff] }
 0x387   : > { %2979 = vmatpush.msra.mxu3 %v4626_v2  ;;  %v6356_v2 = vpop.f32.mrf.mxu1  ;;  %2860 = vmatpush.msrb.mxu0 %v4585_v37  ;;  %v4616_v37 = vld [vmem:[%s7367_s10 + $0x308] sm:$0xff] }
 0x388   : > { %v6254_v42 = vpop.f32.mrf.mxu2  ;;  %v6256_v22 = vpop.f32.mrf.mxu3  ;;  %7422 = vst [vmem:[#allocation54_spill] sm:$0xff] %v6356_v2  ;;  %2940 = vmatpush.msra.mxu2 %v4590_v29  ;;  %v4617_v2 = vld [vmem:[%s7367_s10 + $0x310] sm:$0xff]  ;;  %v4586_v29 = vld [vmem:[%s7367_s10 + $0x218] sm:$0xff] }
 0x389   : > { %2980 = vmatpush.msra.mxu3 %v4624_v49  ;;  %v4620_v49 = vld [vmem:[%s7367_s10 + $0x328] sm:$0xff]  ;;  %2901 = vmatpush.msrb.mxu1 %v4617_v2 }
 0x38a   : > { %2941 = vmatpush.msra.mxu2 %v4588_v4  ;;  %v4615_v4 = vld [vmem:[%s7367_s10 + $0x300] sm:$0xff]  ;;  %v4584_v2 = vld [vmem:[%s7367_s10 + $0x208] sm:$0xff] }
 0x38b   : > { %2981 = vmatpush.msra.mxu3 %v4622_v36  ;;  %v4583_v36 = vld [vmem:[%s7367_s10 + $0x200] sm:$0xff]  ;;  %2902 = vmatpush.msrb.mxu1 %v4615_v4  ;;  %v1830_v4 = vadd.f32 %v5970_v30, %v5946_v58 }
 0x38c   : > { %2942 = vmatpush.msra.mxu2 %v4586_v29  ;;  %2861 = vmatpush.msrb.mxu0 %v4583_v36  ;;  %v4656_v29 = vld [vmem:[%s7361_s4 + $0xd8] sm:$0xff]  ;;  %v1829_v36 = vadd.f32 %v5968_v6, %v5944_v51  ;;  %v2705_v51 = vld [vmem:[%s7362_s5] sm:$0x3]  ;;  %v1831_v6 = vadd.f32 %v5994_v25, %v5962_v63 }
 0x38d   : > { %2982 = vmatpush.msra.mxu3 %v4620_v49  ;;  %v4618_v49 = vld [vmem:[%s7367_s10 + $0x318] sm:$0xff]  ;;  %3133 = vmatpush.msra.mxu1 %v4656_v29  ;;  %v1995_v29 = vadd.f32 %v6082_v33, %v1830_v4  ;;  %v2727_v33 = vld [vmem:[%s7363_s6] sm:$0x3]  ;;  %v6428_v4 = vperm.slane %v2705_v51, 1 }
 0x38e   : > { %2943 = vmatpush.msra.mxu2 %v4584_v2 }
 0x38f   : > { %2983 = vmatpush.msra.mxu3 %v4618_v49  ;;  %v2411_v49 = vpop.f32.mrf.mxu0 }
 0x390   : > { %v6294_v41 = vpop.f32.mrf.mxu2  ;;  %v6296_v35 = vpop.f32.mrf.mxu3 }
 0x391   : > { %2984 = vmatpush.msra.mxu3 %v4616_v37 }
 0x397   : > { %v2414_v2 = vpop.f32.mrf.mxu0 }
 0x398   : > { %v6338_v57 = vpop.f32.mrf.mxu2  ;;  %v6340_v40 = vpop.f32.mrf.mxu3 }
 0x39f   : > { %v2417_v63 = vpop.f32.mrf.mxu0 }
 0x3a0   : > { %v6382_v60 = vpop.f32.mrf.mxu2  ;;  %v6384_v59 = vpop.f32.mrf.mxu3 }
 0x3a1   : > { %7423 = vst [vmem:[#allocation55_spill] sm:$0xff] %v6382_v60  ;;  %v4655_v60 = vld [vmem:[%s7361_s4 + $0xd0] sm:$0xff] }
 0x3a2   : > { %7424 = vst [vmem:[#allocation56_spill] sm:$0xff] %v6384_v59  ;;  %3092 = vmatpush.msra.mxu0 %v4655_v60  ;;  %v2452_v59 = vpop.f32.mrf.mxu1  ;;  %v1994_v60 = vadd.f32 %v6080_v20, %v1829_v36  ;;  %v1832_v20 = vadd.f32 %v5996_v27, %v5964_v11  ;;  %v6426_v36 = vperm.slane %v2705_v51, 0  ;;  %v6432_v11 = vperm.slane %v2727_v33, 0 }
 0x3a8   : > { %v6398_v53 = vpop.f32.mrf.mxu2  ;;  %v6400_v52 = vpop.f32.mrf.mxu3 }
 0x3a9   : > { %7425 = vst [vmem:[#allocation57_spill] sm:$0xff] %v6398_v53  ;;  %v2159_v53 = vadd.f32 %v6117_v7, %v1994_v60 }
 0x3aa   : > { %7426 = vst [vmem:[#allocation58_spill] sm:$0xff] %v6400_v52  ;;  %v2455_v37 = vpop.f32.mrf.mxu1  ;;  %v2160_v52 = vadd.f32 %v6119_v13, %v1995_v29  ;;  %v6434_v29 = vperm.slane %v2727_v33, 1 }
 0x3ab   : > { %v2327_v30 = vadd.f32 %v6196_v47, %v2159_v53  ;;  %v1996_v53 = vadd.f32 %v6090_v19, %v1831_v6 }
 0x3ac   : > { %v2328_v58 = vadd.f32 %v6198_v15, %v2160_v52  ;;  %v1997_v15 = vadd.f32 %v6092_v38, %v1832_v20  ;;  %v1833_v20 = vadd.f32 %v6012_v43, %v5980_v28  ;;  %v2420_v43 = vpop.f32.mrf.mxu0 }
 0x3ad   : > { %v2492_v7 = vadd.f32 %v2411_v49, %v2327_v30 }
 0x3ae   : > { %v2493_v13 = vadd.f32 %v2452_v59, %v2328_v58  ;;  %v2161_v59 = vadd.f32 %v6130_v55, %v1996_v53  ;;  %v2162_v49 = vadd.f32 %v6132_v54, %v1997_v15  ;;  %v1834_v55 = vadd.f32 %v6014_v32, %v5982_v31 }
 0x3af   : > { %v1998_v53 = vadd.f32 %v6101_v39, %v1833_v20 }
 0x3b0   : > { %v6406_v21 = vpop.f32.mrf.mxu2  ;;  %v6408_v5 = vpop.f32.mrf.mxu3  ;;  %v2329_v38 = vadd.f32 %v6216_v23, %v2161_v59  ;;  %v2330_v30 = vadd.f32 %v6218_v62, %v2162_v49  ;;  %v1999_v62 = vadd.f32 %v6103_v44, %v1834_v55  ;;  %v1835_v59 = vadd.f32 %v6035_v10, %v5998_v26 }
 0x3b1   : > { %v2163_v28 = vadd.f32 %v6157_v12, %v1998_v53  ;;  %v1836_v12 = vadd.f32 %v6037_v45, %v6000_v8 }
 0x3b2   : > { %v2458_v25 = vpop.f32.mrf.mxu1  ;;  %v2494_v33 = vadd.f32 %v2414_v2, %v2329_v38  ;;  %v2495_v54 = vadd.f32 %v2455_v37, %v2330_v30  ;;  %v2164_v31 = vadd.f32 %v6159_v24, %v1999_v62  ;;  %v2000_v38 = vadd.f32 %v6112_v18, %v1835_v59  ;;  %v7430_v59 = vld [vmem:[#allocation44_spill] sm:$0xff] }
 0x3b3   : > { %v2331_v37 = vadd.f32 %v6254_v42, %v2163_v28  ;;  %v1839_v28 = vadd.f32 %v6076_v56, %v6030_v48  ;;  %v7431_v48 = vld [vmem:[#allocation49_spill] sm:$0xff] }
 0x3b4   : > { %v2332_v44 = vadd.f32 %v6256_v22, %v2164_v31  ;;  %v2001_v22 = vadd.f32 %v6114_v17, %v1836_v12  ;;  %v2165_v26 = vadd.f32 %v6186_v16, %v2000_v38  ;;  %v7427_v31 = vld [vmem:[#allocation33_spill] sm:$0xff] }
 0x3b5   : > { %v2496_v24 = vadd.f32 %v2417_v63, %v2331_v37 }
 0x3b6   : > { %v2497_v49 = vadd.f32 %v2458_v25, %v2332_v44  ;;  %v2166_v8 = vadd.f32 %v6188_v14, %v2001_v22  ;;  %v2333_v18 = vadd.f32 %v6294_v41, %v2165_v26  ;;  %v2423_v25 = vpop.f32.mrf.mxu0  ;;  %v1838_v14 = vadd.f32 %v6056_v3, %v6018_v9 }
 0x3b8   : > { %v2576_v52 = vpop.f32.mrf.mxu2  ;;  %v2617_v47 = vpop.f32.mrf.mxu3  ;;  %v2334_v63 = vadd.f32 %v6296_v35, %v2166_v8  ;;  %v2498_v16 = vadd.f32 %v2420_v43, %v2333_v18  ;;  %v7428_v43 = vld [vmem:[#allocation38_spill] sm:$0xff] }
 0x3b9   : > { %v2657_v60 = vadd.f32 %v2576_v52, %v2492_v7  ;;  %v2658_v27 = vadd.f32 %v2617_v47, %v2493_v13 }
 0x3ba   : > { %v2461_v32 = vpop.f32.mrf.mxu1 }
 0x3bb   : > { %v2711_v51 = vmul.f32 %v6426_v36, %v2657_v60  ;;  %v2712_v19 = vmul.f32 %v6428_v4, %v2658_v27 }
 0x3bd   : > { %v2733_v58 = vadd.f32 %v6432_v11, %v2711_v51  ;;  %v2734_v6 = vadd.f32 %v6434_v29, %v2712_v19 }
 0x3bf   : > { %v2749_v7 = vmax.f32 %v2733_v58, 0.0  ;;  %v2750_v13 = vmax.f32 %v2734_v6, 0.0 }
 0x3c0   : > { %v2579_v15 = vpop.f32.mrf.mxu2  ;;  %v2620_v23 = vpop.f32.mrf.mxu3 }
 0x3c1   : > { %v2659_v52 = vadd.f32 %v2579_v15, %v2494_v33  ;;  %v2660_v47 = vadd.f32 %v2620_v23, %v2495_v54  ;;  %2862 = vmatmul.f32.vlgmr.msrb.gmra.mxu0 %v2749_v7  ;;  %2903 = vmatmul.f32.vlgmr.msrb.gmra.mxu1 %v2750_v13  ;;  %v1837_v33 = vadd.f32 %v6054_v50, %v6016_v34 }
 0x3c2   : > { %2944 = vmatmul.f32.vlgmr.msra.gmra.mxu2 %v2749_v7  ;;  %2985 = vmatmul.f32.vlgmr.msra.gmra.mxu3 %v2750_v13  ;;  %v2464_v17 = vpop.f32.mrf.mxu1  ;;  %v2499_v54 = vadd.f32 %v2461_v32, %v2334_v63  ;;  %v2003_v15 = vadd.f32 %v6125_v61, %v1838_v14  ;;  %v7437_v63 = vld [vmem:[#allocation35_spill] sm:$0xff] }
 0x3c3   : > { %v2713_v2 = vmul.f32 %v6426_v36, %v2659_v52  ;;  %v2714_v39 = vmul.f32 %v6428_v4, %v2660_v47  ;;  %v2002_v41 = vadd.f32 %v6123_v0, %v1837_v33 }
 0x3c4   : > { %v2168_v9 = vadd.f32 %v6214_v1, %v2003_v15 }
 0x3c5   : > { %v2735_v60 = vadd.f32 %v6432_v11, %v2713_v2  ;;  %v2736_v27 = vadd.f32 %v6434_v29, %v2714_v39  ;;  %v2167_v34 = vadd.f32 %v6212_v46, %v2002_v41  ;;  %v1840_v46 = vadd.f32 %v7428_v43, %v7427_v31  ;;  %v2426_v2 = vpop.f32.mrf.mxu0  ;;  %v7440_v41 = vld [vmem:[#allocation46_spill] sm:$0xff] }
 0x3c6   : > { %v2336_v52 = vadd.f32 %v6340_v40, %v2168_v9 }
 0x3c7   : > { %v2751_v51 = vmax.f32 %v2735_v60, 0.0  ;;  %v2752_v19 = vmax.f32 %v2736_v27, 0.0  ;;  %v2335_v0 = vadd.f32 %v6338_v57, %v2167_v34  ;;  %v7429_v60 = vld [vmem:[#allocation43_spill] sm:$0xff]  ;;  %v2005_v12 = vadd.f32 %v7430_v59, %v1840_v46 }
 0x3c8   : > { %v2582_v30 = vpop.f32.mrf.mxu2  ;;  %v2623_v42 = vpop.f32.mrf.mxu3  ;;  %v2501_v1 = vadd.f32 %v2464_v17, %v2336_v52  ;;  %v2004_v57 = vadd.f32 %v7429_v60, %v1839_v28  ;;  %v7441_v34 = vld [vmem:[#allocation51_spill] sm:$0xff]  ;;  %v7444_v28 = vld [vmem:[#allocation58_spill] sm:$0xff] }
 0x3c9   : > { %v2661_v58 = vadd.f32 %v2582_v30, %v2496_v24  ;;  %v2662_v6 = vadd.f32 %v2623_v42, %v2497_v49  ;;  %2865 = vmatmul.f32.gmra.mxu0 %v2751_v51  ;;  %2906 = vmatmul.f32.gmra.mxu1 %v2752_v19  ;;  %v2500_v32 = vadd.f32 %v2423_v25, %v2335_v0  ;;  %v7433_v42 = vld [vmem:[#allocation55_spill] sm:$0xff]  ;;  %v7438_v25 = vld [vmem:[#allocation40_spill] sm:$0xff] }
 0x3ca   : > { %2947 = vmatmul.f32.gmra.mxu2 %v2751_v51  ;;  %2988 = vmatmul.f32.gmra.mxu3 %v2752_v19  ;;  %v2467_v39 = vpop.f32.mrf.mxu1  ;;  %v2169_v56 = vadd.f32 %v7431_v48, %v2004_v57  ;;  %v7432_v51 = vld [vmem:[#allocation50_spill] sm:$0xff]  ;;  %v1842_v17 = vadd.f32 %v7438_v25, %v7437_v63  ;;  %v7449_v59 = vld [vmem:[#allocation47_spill] sm:$0xff]  ;;  %v7450_v48 = vld [vmem:[#allocation48_spill] sm:$0xff] }
 0x3cb   : > { %v2715_v10 = vmul.f32 %v6426_v36, %v2661_v58  ;;  %v2716_v45 = vmul.f32 %v6428_v4, %v2662_v6  ;;  %v2170_v19 = vadd.f32 %v7432_v51, %v2005_v12  ;;  %v7434_v58 = vld [vmem:[#allocation56_spill] sm:$0xff] }
 0x3cc   : > { %v2337_v22 = vadd.f32 %v7433_v42, %v2169_v56  ;;  %v7452_v42 = vld [vmem:[#allocation54_spill] sm:$0xff] }
 0x3cd   : > { %v2737_v20 = vadd.f32 %v6432_v11, %v2715_v10  ;;  %v2738_v55 = vadd.f32 %v6434_v29, %v2716_v45  ;;  %v2338_v6 = vadd.f32 %v7434_v58, %v2170_v19  ;;  %v7435_v10 = vld [vmem:[#allocation34_spill] sm:$0xff]  ;;  %v7436_v45 = vld [vmem:[#allocation39_spill] sm:$0xff] }
 0x3ce   : > { %v1841_v18 = vadd.f32 %v7436_v45, %v7435_v10 }
 0x3cf   : > { %v2753_v7 = vmax.f32 %v2737_v20, 0.0  ;;  %v2754_v13 = vmax.f32 %v2738_v55, 0.0  ;;  %v2502_v20 = vadd.f32 %v2426_v2, %v2337_v22  ;;  %v2503_v55 = vadd.f32 %v2467_v39, %v2338_v6  ;;  %v7447_v39 = vld [vmem:[#allocation37_spill] sm:$0xff] }
 0x3d0   : > { %v2585_v53 = vpop.f32.mrf.mxu2  ;;  %v2626_v35 = vpop.f32.mrf.mxu3 }
 0x3d1   : > { %v2663_v23 = vadd.f32 %v2585_v53, %v2498_v16  ;;  %v2664_v62 = vadd.f32 %v2626_v35, %v2499_v54  ;;  %2868 = vmatmul.f32.gmra.mxu0 %v2753_v7  ;;  %2909 = vmatmul.f32.gmra.mxu1 %v2754_v13  ;;  %v7439_v16 = vld [vmem:[#allocation45_spill] sm:$0xff]  ;;  %v2007_v53 = vadd.f32 %v7440_v41, %v1842_v17 }
 0x3d2   : > { %2950 = vmatmul.f32.gmra.mxu2 %v2753_v7  ;;  %2991 = vmatmul.f32.gmra.mxu3 %v2754_v13  ;;  %v2006_v54 = vadd.f32 %v7439_v16, %v1841_v18 }
 0x3d3   : > { %v2717_v50 = vmul.f32 %v6426_v36, %v2663_v23  ;;  %v2718_v3 = vmul.f32 %v6428_v4, %v2664_v62  ;;  %v2429_v23 = vpop.f32.mrf.mxu0  ;;  %v2470_v62 = vpop.f32.mrf.mxu1 }
 0x3d4   : > { %v2171_v9 = vadd.f32 %v7441_v34, %v2006_v54  ;;  %v4703_v34 = vld [vmem:[%s7367_s10 + $0x4e0] sm:$0xff] }
 0x3d5   : > { %v2739_v61 = vadd.f32 %v6432_v11, %v2717_v50  ;;  %v2740_v47 = vadd.f32 %v6434_v29, %v2718_v3  ;;  %v7442_v50 = vld [vmem:[#allocation52_spill] sm:$0xff] }
 0x3d6   : > { %v2172_v3 = vadd.f32 %v7442_v50, %v2007_v53  ;;  %v6587_v50 = vld [vmem:[%s5320_s20 + $0xd8c] sm:$0xff] }
 0x3d7   : > { %v2755_v37 = vmax.f32 %v2739_v61, 0.0  ;;  %v2756_v44 = vmax.f32 %v2740_v47, 0.0  ;;  %v7443_v61 = vld [vmem:[#allocation57_spill] sm:$0xff] }
 0x3d8   : > { %v2588_v27 = vpop.f32.mrf.mxu2  ;;  %v2629_v40 = vpop.f32.mrf.mxu3  ;;  %v2339_v47 = vadd.f32 %v7443_v61, %v2171_v9  ;;  %v2340_v31 = vadd.f32 %v7444_v28, %v2172_v3  ;;  %v4735_v9 = vld [vmem:[%s7367_s10 + $0x5e0] sm:$0xff]  ;;  %v4701_v3 = vld [vmem:[%s7367_s10 + $0x4d0] sm:$0xff] }
 0x3d9   : > { %v2665_v24 = vadd.f32 %v2588_v27, %v2500_v32  ;;  %v2666_v49 = vadd.f32 %v2629_v40, %v2501_v1  ;;  %2871 = vmatmul.f32.gmra.mxu0 %v2755_v37  ;;  %2912 = vmatmul.f32.gmra.mxu1 %v2756_v44  ;;  %v7445_v32 = vld [vmem:[#allocation36_spill] sm:$0xff]  ;;  %v7446_v1 = vld [vmem:[#allocation41_spill] sm:$0xff]  ;;  %v4697_v28 = vld [vmem:[%s7367_s10 + $0x4b0] sm:$0xff] }
 0x3da   : > { %2953 = vmatmul.f32.gmra.mxu2 %v2755_v37  ;;  %2994 = vmatmul.f32.gmra.mxu3 %v2756_v44  ;;  %v1843_v2 = vadd.f32 %v7446_v1, %v7445_v32  ;;  %v7448_v37 = vld [vmem:[#allocation42_spill] sm:$0xff]  ;;  %v2504_v60 = vadd.f32 %v2429_v23, %v2339_v47  ;;  %v2505_v57 = vadd.f32 %v2470_v62, %v2340_v31  ;;  %v4731_v61 = vld [vmem:[%s7367_s10 + $0x5c0] sm:$0xff]  ;;  %v6606_v47 = vld [vmem:[%s5320_s20 + $0xd94] sm:$0xff] }
 0x3db   : > { %v2719_v38 = vmul.f32 %v6426_v36, %v2665_v24  ;;  %v2720_v30 = vmul.f32 %v6428_v4, %v2666_v49  ;;  %v1844_v44 = vadd.f32 %v7448_v37, %v7447_v39  ;;  %v4705_v23 = vld [vmem:[%s7367_s10 + $0x4f0] sm:$0xff]  ;;  %v4691_v37 = vld [vmem:[%s7367_s10 + $0x480] sm:$0xff] }
 0x3dc   : > { %v2008_v12 = vadd.f32 %v7449_v59, %v1843_v2  ;;  %v4737_v62 = vld [vmem:[%s7367_s10 + $0x5f0] sm:$0xff]  ;;  %3334 = vmatpush.msrb.mxu2 %v4705_v23  ;;  %v4686_v23 = vld [vmem:[%s7367_s10 + $0x458] sm:$0xff] }
 0x3dd   : > { %v2741_v26 = vadd.f32 %v6432_v11, %v2719_v38  ;;  %v2742_v8 = vadd.f32 %v6434_v29, %v2720_v30  ;;  %v2009_v56 = vadd.f32 %v7450_v48, %v1844_v44  ;;  %v7451_v38 = vld [vmem:[#allocation53_spill] sm:$0xff]  ;;  %3375 = vmatpush.msrb.mxu3 %v4737_v62  ;;  %v4729_v31 = vld [vmem:[%s7367_s10 + $0x5b0] sm:$0xff]  ;;  %v4718_v62 = vld [vmem:[%s7367_s10 + $0x558] sm:$0xff] }
 0x3de   : > { %v2173_v30 = vadd.f32 %v7451_v38, %v2008_v12  ;;  %3335 = vmatpush.msrb.mxu2 %v4703_v34  ;;  %v4693_v2 = vld [vmem:[%s7367_s10 + $0x490] sm:$0xff]  ;;  %v4723_v44 = vld [vmem:[%s7367_s10 + $0x580] sm:$0xff]  ;;  %v4700_v38 = vld [vmem:[%s7367_s10 + $0x4c8] sm:$0xff] }
 0x3df   : > { %v2757_v33 = vmax.f32 %v2741_v26, 0.0  ;;  %v2758_v14 = vmax.f32 %v2742_v8, 0.0  ;;  %v2174_v22 = vadd.f32 %v7452_v42, %v2009_v56  ;;  %v2432_v26 = vpop.f32.mrf.mxu0  ;;  %v2473_v8 = vpop.f32.mrf.mxu1  ;;  %3376 = vmatpush.msrb.mxu3 %v4735_v9  ;;  %v4725_v39 = vld [vmem:[%s7367_s10 + $0x590] sm:$0xff]  ;;  %v4687_v48 = vld [vmem:[%s7367_s10 + $0x460] sm:$0xff]  ;;  %v4684_v34 = vld [vmem:[%s7367_s10 + $0x448] sm:$0xff] }
 0x3e0   : > { %v2591_v7 = vpop.f32.mrf.mxu2  ;;  %v2632_v13 = vpop.f32.mrf.mxu3  ;;  %v2341_v10 = vadd.f32 %v6406_v21, %v2173_v30  ;;  %3336 = vmatpush.msrb.mxu2 %v4701_v3  ;;  %v4689_v59 = vld [vmem:[%s7367_s10 + $0x470] sm:$0xff]  ;;  %v4719_v56 = vld [vmem:[%s7367_s10 + $0x560] sm:$0xff]  ;;  %v4732_v30 = vld [vmem:[%s7367_s10 + $0x5c8] sm:$0xff] }
 0x3e1   : > { %v2667_v35 = vadd.f32 %v2591_v7, %v2502_v20  ;;  %v2668_v15 = vadd.f32 %v2632_v13, %v2503_v55  ;;  %2874 = vmatmul.f32.gmra.mxu0 %v2757_v33  ;;  %2915 = vmatmul.f32.gmra.mxu1 %v2758_v14  ;;  %v2342_v45 = vadd.f32 %v6408_v5, %v2174_v22  ;;  %v4721_v12 = vld [vmem:[%s7367_s10 + $0x570] sm:$0xff]  ;;  %v4716_v9 = vld [vmem:[%s7367_s10 + $0x548] sm:$0xff] }
 0x3e2   : > { %2956 = vmatmul.f32.gmra.mxu2 %v2757_v33  ;;  %2997 = vmatmul.f32.gmra.mxu3 %v2758_v14  ;;  %v2506_v25 = vadd.f32 %v2432_v26, %v2341_v10  ;;  %v4685_v26 = vld [vmem:[%s7367_s10 + $0x450] sm:$0xff]  ;;  %v4696_v10 = vld [vmem:[%s7367_s10 + $0x4a8] sm:$0xff] }
 0x3e3   : > { %v2721_v0 = vmul.f32 %v6426_v36, %v2667_v35  ;;  %v2722_v52 = vmul.f32 %v6428_v4, %v2668_v15  ;;  %v2507_v17 = vadd.f32 %v2473_v8, %v2342_v45  ;;  %v6533_v35 = vld [vmem:[%s5320_s20 + $0xc84] sm:$0xff]  ;;  %v6568_v15 = vld [vmem:[%s5320_s20 + $0xd3c] sm:$0xff]  ;;  %v4717_v8 = vld [vmem:[%s7367_s10 + $0x550] sm:$0xff] }
 0x3e4   : > { %v4728_v45 = vld [vmem:[%s7367_s10 + $0x5a8] sm:$0xff] }
 0x3e5   : > { %v2743_v43 = vadd.f32 %v6432_v11, %v2721_v0  ;;  %v2744_v46 = vadd.f32 %v6434_v29, %v2722_v52  ;;  %v4733_v0 = vld [vmem:[%s7367_s10 + $0x5d0] sm:$0xff]  ;;  %v4699_v52 = vld [vmem:[%s7367_s10 + $0x4c0] sm:$0xff] }
 0x3e6   : > { %3377 = vmatpush.msrb.mxu3 %v4733_v0  ;;  %3337 = vmatpush.msrb.mxu2 %v4699_v52  ;;  %v4682_v52 = vld [vmem:[%s7367_s10 + $0x438] sm:$0xff] }
 0x3e7   : > { %v2759_v27 = vmax.f32 %v2743_v43, 0.0  ;;  %v2760_v40 = vmax.f32 %v2744_v46, 0.0  ;;  %v4695_v43 = vld [vmem:[%s7367_s10 + $0x4a0] sm:$0xff] }
 0x3e8   : > { %v2594_v24 = vpop.f32.mrf.mxu2  ;;  %v2635_v49 = vpop.f32.mrf.mxu3  ;;  %3378 = vmatpush.msrb.mxu3 %v4731_v61  ;;  %v4727_v46 = vld [vmem:[%s7367_s10 + $0x5a0] sm:$0xff]  ;;  %3338 = vmatpush.msrb.mxu2 %v4697_v28  ;;  %v4714_v61 = vld [vmem:[%s7367_s10 + $0x538] sm:$0xff]  ;;  %v4677_v28 = vld [vmem:[%s7367_s10 + $0x410] sm:$0xff] }
 0x3e9   : > { %v2669_v51 = vadd.f32 %v2594_v24, %v2504_v60  ;;  %v2670_v19 = vadd.f32 %v2635_v49, %v2505_v57  ;;  %2877 = vmatmul.f32.gmra.mxu0 %v2759_v27  ;;  %2918 = vmatmul.f32.gmra.mxu1 %v2760_v40  ;;  %v4704_v24 = vld [vmem:[%s7367_s10 + $0x4e8] sm:$0xff] }
 0x3ea   : > { %2959 = vmatmul.f32.gmra.mxu2 %v2759_v27  ;;  %3000 = vmatmul.f32.gmra.mxu3 %v2760_v40  ;;  %v4706_v27 = vld [vmem:[%s7367_s10 + $0x4f8] sm:$0xff]  ;;  %v4736_v49 = vld [vmem:[%s7367_s10 + $0x5e8] sm:$0xff] }
 0x3eb   : > { %v2723_v58 = vmul.f32 %v6426_v36, %v2669_v51  ;;  %v2724_v6 = vmul.f32 %v6428_v4, %v2670_v19  ;;  %3379 = vmatpush.msrb.mxu3 %v4729_v31  ;;  %3339 = vmatpush.msrb.mxu2 %v4695_v43  ;;  %v4738_v40 = vld [vmem:[%s7367_s10 + $0x5f8] sm:$0xff]  ;;  %v4709_v31 = vld [vmem:[%s7367_s10 + $0x510] sm:$0xff]  ;;  %v4680_v43 = vld [vmem:[%s7367_s10 + $0x428] sm:$0xff] }
 0x3ec   : > { %3416 = vmatpush.msrb.mxu0 %v4706_v27  ;;  %3457 = vmatpush.msrb.mxu1 %v4738_v40  ;;  %v4702_v51 = vld [vmem:[%s7367_s10 + $0x4d8] sm:$0xff]  ;;  %v4676_v27 = vld [vmem:[%s7367_s10 + $0x408] sm:$0xff] }
 0x3ed   : > { %v2745_v18 = vadd.f32 %v6432_v11, %v2723_v58  ;;  %v2746_v63 = vadd.f32 %v6434_v29, %v2724_v6  ;;  %3380 = vmatpush.msrb.mxu3 %v4727_v46  ;;  %3340 = vmatpush.msrb.mxu2 %v4693_v2  ;;  %v4734_v19 = vld [vmem:[%s7367_s10 + $0x5d8] sm:$0xff]  ;;  %v4712_v46 = vld [vmem:[%s7367_s10 + $0x528] sm:$0xff] }
 0x3ee   : > { %3417 = vmatpush.msrb.mxu0 %v4704_v24  ;;  %3458 = vmatpush.msrb.mxu1 %v4736_v49  ;;  %v4698_v58 = vld [vmem:[%s7367_s10 + $0x4b8] sm:$0xff]  ;;  %v4708_v40 = vld [vmem:[%s7367_s10 + $0x508] sm:$0xff]  ;;  %v4747_v24 = vld [vmem:[%s7361_s4 + $0x160] sm:$0xff] }
 0x3ef   : > { %v2761_v20 = vmax.f32 %v2745_v18, 0.0  ;;  %v2762_v55 = vmax.f32 %v2746_v63, 0.0  ;;  %3381 = vmatpush.msrb.mxu3 %v4725_v39  ;;  %3341 = vmatpush.msrb.mxu2 %v4691_v37  ;;  %v4730_v6 = vld [vmem:[%s7367_s10 + $0x5b8] sm:$0xff]  ;;  %v4683_v18 = vld [vmem:[%s7367_s10 + $0x440] sm:$0xff]  ;;  %v4748_v49 = vld [vmem:[%s7361_s4 + $0x168] sm:$0xff] }
 0x3f0   : > { %v2597_v33 = vpop.f32.mrf.mxu2  ;;  %v2638_v14 = vpop.f32.mrf.mxu3  ;;  %3418 = vmatpush.msrb.mxu0 %v4702_v51  ;;  %3459 = vmatpush.msrb.mxu1 %v4734_v19  ;;  %v4715_v63 = vld [vmem:[%s7367_s10 + $0x540] sm:$0xff]  ;;  %v4678_v2 = vld [vmem:[%s7367_s10 + $0x418] sm:$0xff] }
 0x3f1   : > { %v2671_v16 = vadd.f32 %v2597_v33, %v2506_v25  ;;  %v2672_v54 = vadd.f32 %v2638_v14, %v2507_v17  ;;  %2880 = vmatmul.f32.gmra.mxu0 %v2761_v20  ;;  %2921 = vmatmul.f32.gmra.mxu1 %v2762_v55  ;;  %v4694_v25 = vld [vmem:[%s7367_s10 + $0x498] sm:$0xff]  ;;  %v4675_v37 = vld [vmem:[%s7367_s10 + $0x400] sm:$0xff] }
 0x3f2   : > { %2962 = vmatmul.f32.gmra.mxu2 %v2761_v20  ;;  %3003 = vmatmul.f32.gmra.mxu3 %v2762_v55  ;;  %v4726_v17 = vld [vmem:[%s7367_s10 + $0x598] sm:$0xff]  ;;  %v4692_v20 = vld [vmem:[%s7367_s10 + $0x488] sm:$0xff] }
 0x3f3   : > { %v2725_v5 = vmul.f32 %v6426_v36, %v2671_v16  ;;  %v2726_v21 = vmul.f32 %v6428_v4, %v2672_v54  ;;  %v6540_v36 = vld [vmem:[%s5320_s20 + $0xc8c] sm:$0xff]  ;;  %v6547_v4 = vld [vmem:[%s5320_s20 + $0xcdc] sm:$0xff]  ;;  %3382 = vmatpush.msrb.mxu3 %v4723_v44  ;;  %3342 = vmatpush.msrb.mxu2 %v4689_v59 }
 0x3f4   : > { %3419 = vmatpush.msrb.mxu0 %v4700_v38  ;;  %3460 = vmatpush.msrb.mxu1 %v4732_v30  ;;  %v4724_v55 = vld [vmem:[%s7367_s10 + $0x588] sm:$0xff]  ;;  %v4690_v16 = vld [vmem:[%s7367_s10 + $0x478] sm:$0xff]  ;;  %v4707_v44 = vld [vmem:[%s7367_s10 + $0x500] sm:$0xff] }
 0x3f5   : > { %v2747_v7 = vadd.f32 %v6432_v11, %v2725_v5  ;;  %v2748_v13 = vadd.f32 %v6434_v29, %v2726_v21  ;;  %v6554_v11 = vld [vmem:[%s5320_s20 + $0xce4] sm:$0xff]  ;;  %v6561_v29 = vld [vmem:[%s5320_s20 + $0xd34] sm:$0xff]  ;;  %3383 = vmatpush.msrb.mxu3 %v4721_v12  ;;  %3343 = vmatpush.msrb.mxu2 %v4687_v48  ;;  %v4673_v38 = vld [vmem:[%s7362_s5 + $0x2] sm:$0x3] }
 0x3f6   : > { %3420 = vmatpush.msrb.mxu0 %v4698_v58  ;;  %3461 = vmatpush.msrb.mxu1 %v4730_v6  ;;  %v4722_v54 = vld [vmem:[%s7367_s10 + $0x578] sm:$0xff]  ;;  %v4681_v5 = vld [vmem:[%s7367_s10 + $0x430] sm:$0xff]  ;;  %v4674_v30 = vld [vmem:[%s7363_s6 + $0x2] sm:$0x3]  ;;  %v6824_v58 = vperm.slane %v4673_v38, 0  ;;  %v6826_v6 = vperm.slane %v4673_v38, 1 }
 0x3f7   : > { %v2763_v41 = vmax.f32 %v2747_v7, 0.0  ;;  %v2764_v53 = vmax.f32 %v2748_v13, 0.0  ;;  %3384 = vmatpush.msrb.mxu3 %v4719_v56  ;;  %3344 = vmatpush.msrb.mxu2 %v4685_v26  ;;  %v4713_v21 = vld [vmem:[%s7367_s10 + $0x530] sm:$0xff]  ;;  %v4688_v7 = vld [vmem:[%s7367_s10 + $0x468] sm:$0xff]  ;;  %v4710_v39 = vld [vmem:[%s7367_s10 + $0x518] sm:$0xff]  ;;  %v6828_v26 = vperm.slane %v4674_v30, 0 }
 0x3f8   : > { %3421 = vmatpush.msrb.mxu0 %v4696_v10  ;;  %3462 = vmatpush.msrb.mxu1 %v4728_v45  ;;  %v4720_v13 = vld [vmem:[%s7367_s10 + $0x568] sm:$0xff] }
 0x3f9   : > { %2883 = vmatmul.f32.gmra.mxu0 %v2763_v41  ;;  %2924 = vmatmul.f32.gmra.mxu1 %v2764_v53 }
 0x3fa   : > { %2965 = vmatmul.f32.gmra.mxu2 %v2763_v41  ;;  %3006 = vmatmul.f32.gmra.mxu3 %v2764_v53  ;;  %v4679_v41 = vld [vmem:[%s7367_s10 + $0x420] sm:$0xff] }
 0x3fb   : > { %3385 = vmatpush.msrb.mxu3 %v4717_v8  ;;  %3345 = vmatpush.msrb.mxu2 %v4683_v18  ;;  %v4711_v53 = vld [vmem:[%s7367_s10 + $0x520] sm:$0xff]  ;;  %v6830_v8 = vperm.slane %v4674_v30, 1 }
 0x3fc   : > { %3422 = vmatpush.msrb.mxu0 %v4694_v25  ;;  %3463 = vmatpush.msrb.mxu1 %v4726_v17 }
 0x3fd   : > { %3386 = vmatpush.msrb.mxu3 %v4715_v63  ;;  %3346 = vmatpush.msrb.mxu2 %v4681_v5 }
 0x3fe   : > { %3423 = vmatpush.msrb.mxu0 %v4692_v20  ;;  %3464 = vmatpush.msrb.mxu1 %v4724_v55 }
 0x3ff   : > { %3387 = vmatpush.msrb.mxu3 %v4713_v21  ;;  %3347 = vmatpush.msrb.mxu2 %v4679_v41 }
 0x400   : > { %3424 = vmatpush.msrb.mxu0 %v4690_v16  ;;  %3465 = vmatpush.msrb.mxu1 %v4722_v54 }
 0x401   : > { %4657 = vmatmul.msk.f32.vlgmr.msra.gmra.mxu0 %vm814_vm4, %v6533_v35  ;;  %4665 = vmatmul.msk.f32.vlgmr.msra.gmra.mxu1 %vm814_vm4, %v6533_v35 }
 0x402   : > { %3425 = vmatpush.msrb.mxu0 %v4688_v7  ;;  %3466 = vmatpush.msrb.mxu1 %v4720_v13 }
 0x403   : > { %3388 = vmatpush.msrb.mxu3 %v4711_v53  ;;  %3348 = vmatpush.msrb.mxu2 %v4677_v28 }
 0x404   : > { %3426 = vmatpush.msrb.mxu0 %v4686_v23  ;;  %3467 = vmatpush.msrb.mxu1 %v4718_v62 }
 0x405   : > { %3389 = vmatpush.msrb.mxu3 %v4709_v31  ;;  %3349 = vmatpush.msrb.mxu2 %v4675_v37 }
 0x406   : > { %3427 = vmatpush.msrb.mxu0 %v4684_v34  ;;  %3468 = vmatpush.msrb.mxu1 %v4716_v9 }
 0x407   : > { %3390 = vmatpush.msrb.mxu3 %v4707_v44  ;;  %3580 = vmatpush.msra.mxu2 %v4747_v24 }
 0x408   : > { %3428 = vmatpush.msrb.mxu0 %v4682_v52  ;;  %3469 = vmatpush.msrb.mxu1 %v4714_v61 }
 0x409   : > { %4658 = vmatmul.msk.f32.gmra.mxu0 %vm814_vm4, %v6540_v36  ;;  %4666 = vmatmul.msk.f32.gmra.mxu1 %vm814_vm4, %v6540_v36 }
 0x40a   : > { %3429 = vmatpush.msrb.mxu0 %v4680_v43  ;;  %3470 = vmatpush.msrb.mxu1 %v4712_v46 }
 0x40b   : > { %3621 = vmatpush.msra.mxu3 %v4748_v49 }
 0x40c   : > { %3430 = vmatpush.msrb.mxu0 %v4678_v2  ;;  %3471 = vmatpush.msrb.mxu1 %v4710_v39 }
 0x40e   : > { %3431 = vmatpush.msrb.mxu0 %v4676_v27  ;;  %3472 = vmatpush.msrb.mxu1 %v4708_v40 }
 0x411   : > { %4659 = vmatmul.msk.f32.gmra.mxu0 %vm814_vm4, %v6547_v4  ;;  %4667 = vmatmul.msk.f32.gmra.mxu1 %vm814_vm4, %v6547_v4 }
 0x419   : > { %4660 = vmatmul.msk.f32.gmra.mxu0 %vm814_vm4, %v6554_v11  ;;  %4668 = vmatmul.msk.f32.gmra.mxu1 %vm814_vm4, %v6554_v11 }
 0x421   : > { %4661 = vmatmul.msk.f32.gmra.mxu0 %vm814_vm4, %v6561_v29  ;;  %4669 = vmatmul.msk.f32.gmra.mxu1 %vm814_vm4, %v6561_v29 }
 0x429   : > { %4662 = vmatmul.msk.f32.gmra.mxu0 %vm814_vm4, %v6568_v15  ;;  %4670 = vmatmul.msk.f32.gmra.mxu1 %vm814_vm4, %v6568_v15 }
 0x431   : > { %4663 = vmatmul.msk.f32.gmra.mxu0 %vm814_vm4, %v6587_v50  ;;  %4671 = vmatmul.msk.f32.gmra.mxu1 %vm814_vm4, %v6587_v50 }
 0x439   : > { %4664 = vmatmul.msk.f32.gmra.mxu0 %vm814_vm4, %v6606_v47  ;;  %4672 = vmatmul.msk.f32.gmra.mxu1 %vm814_vm4, %v6606_v47 }
 0x43e   : > { %v6624_v32 = vpop.f32.mrf.mxu0  ;;  %v6626_v1 = vpop.f32.mrf.mxu1 }
 0x446   : > { %v6640_v60 = vpop.f32.mrf.mxu0  ;;  %v6642_v57 = vpop.f32.mrf.mxu1 }
 0x44e   : > { %v6680_v42 = vpop.f32.mrf.mxu0  ;;  %v6682_v22 = vpop.f32.mrf.mxu1 }
 0x456   : > { %v6720_v33 = vpop.f32.mrf.mxu0  ;;  %v6722_v14 = vpop.f32.mrf.mxu1 }
 0x45e   : > { %v6760_v3 = vpop.f32.mrf.mxu0  ;;  %v6762_v0 = vpop.f32.mrf.mxu1 }
 0x466   : > { %v6800_v59 = vpop.f32.mrf.mxu0  ;;  %v6802_v12 = vpop.f32.mrf.mxu1 }
 0x46e   : > { %v6810_v48 = vpop.f32.mrf.mxu0  ;;  %v6812_v56 = vpop.f32.mrf.mxu1 }
 0x476   : > { %v6814_v51 = vpop.f32.mrf.mxu0  ;;  %v6816_v19 = vpop.f32.mrf.mxu1 }
 0x47e   : > { %v3094_v10 = vpop.f32.mrf.mxu0  ;;  %v3135_v45 = vpop.f32.mrf.mxu1 }
 0x47f   : > { %v3198_v18 = vmul.f32 %v6824_v58, %v3094_v10  ;;  %v3199_v63 = vmul.f32 %v6826_v6, %v3135_v45 }
 0x481   : > { %v3221_v25 = vadd.f32 %v6828_v26, %v3198_v18  ;;  %v3222_v17 = vadd.f32 %v6830_v8, %v3199_v63 }
 0x483   : > { %v3237_v20 = vmax.f32 %v3221_v25, 0.0  ;;  %v3238_v55 = vmax.f32 %v3222_v17, 0.0 }
 0x485   : > { %3350 = vmatmul.f32.vlgmr.msrb.gmra.mxu2 %v3237_v20  ;;  %3391 = vmatmul.f32.vlgmr.msrb.gmra.mxu3 %v3238_v55 }
 0x486   : > { %3432 = vmatmul.f32.vlgmr.msrb.gmra.mxu0 %v3237_v20  ;;  %3473 = vmatmul.f32.vlgmr.msrb.gmra.mxu1 %v3238_v55  ;;  %v3097_v16 = vpop.f32.mrf.mxu0  ;;  %v3138_v54 = vpop.f32.mrf.mxu1 }
 0x487   : > { %v3200_v5 = vmul.f32 %v6824_v58, %v3097_v16  ;;  %v3201_v21 = vmul.f32 %v6826_v6, %v3138_v54 }
 0x489   : > { %v3223_v7 = vadd.f32 %v6828_v26, %v3200_v5  ;;  %v3224_v13 = vadd.f32 %v6830_v8, %v3201_v21 }
 0x48b   : > { %v3239_v41 = vmax.f32 %v3223_v7, 0.0  ;;  %v3240_v53 = vmax.f32 %v3224_v13, 0.0 }
 0x48d   : > { %3353 = vmatmul.f32.gmra.mxu2 %v3239_v41  ;;  %3394 = vmatmul.f32.gmra.mxu3 %v3240_v53 }
 0x48e   : > { %3435 = vmatmul.f32.gmra.mxu0 %v3239_v41  ;;  %3476 = vmatmul.f32.gmra.mxu1 %v3240_v53  ;;  %v3100_v23 = vpop.f32.mrf.mxu0  ;;  %v3141_v62 = vpop.f32.mrf.mxu1 }
 0x48f   : > { %v3202_v34 = vmul.f32 %v6824_v58, %v3100_v23  ;;  %v3203_v9 = vmul.f32 %v6826_v6, %v3141_v62 }
 0x491   : > { %v3225_v52 = vadd.f32 %v6828_v26, %v3202_v34  ;;  %v3226_v61 = vadd.f32 %v6830_v8, %v3203_v9 }
 0x493   : > { %v3241_v28 = vmax.f32 %v3225_v52, 0.0  ;;  %v3242_v31 = vmax.f32 %v3226_v61, 0.0 }
 0x495   : > { %3356 = vmatmul.f32.gmra.mxu2 %v3241_v28  ;;  %3397 = vmatmul.f32.gmra.mxu3 %v3242_v31 }
 0x496   : > { %3438 = vmatmul.f32.gmra.mxu0 %v3241_v28  ;;  %3479 = vmatmul.f32.gmra.mxu1 %v3242_v31  ;;  %v3103_v43 = vpop.f32.mrf.mxu0  ;;  %v3144_v46 = vpop.f32.mrf.mxu1 }
 0x497   : > { %v3204_v2 = vmul.f32 %v6824_v58, %v3103_v43  ;;  %v3205_v39 = vmul.f32 %v6826_v6, %v3144_v46 }
 0x499   : > { %v3227_v37 = vadd.f32 %v6828_v26, %v3204_v2  ;;  %v3228_v44 = vadd.f32 %v6830_v8, %v3205_v39  ;;  %v6864_v2 = vpop.f32.mrf.mxu2  ;;  %v6866_v39 = vpop.f32.mrf.mxu3 }
 0x49b   : > { %v3243_v27 = vmax.f32 %v3227_v37, 0.0  ;;  %v3244_v40 = vmax.f32 %v3228_v44, 0.0 }
 0x49d   : > { %3359 = vmatmul.f32.gmra.mxu2 %v3243_v27  ;;  %3400 = vmatmul.f32.gmra.mxu3 %v3244_v40 }
 0x49e   : > { %3441 = vmatmul.f32.gmra.mxu0 %v3243_v27  ;;  %3482 = vmatmul.f32.gmra.mxu1 %v3244_v40  ;;  %v3106_v24 = vpop.f32.mrf.mxu0  ;;  %v3147_v49 = vpop.f32.mrf.mxu1 }
 0x49f   : > { %v3206_v38 = vmul.f32 %v6824_v58, %v3106_v24  ;;  %v3207_v30 = vmul.f32 %v6826_v6, %v3147_v49  ;;  %v4830_v49 = vld [vmem:[%s7367_s10 + $0x7f8] sm:$0xff] }
 0x4a0   : > { %3945 = vmatpush.msrb.mxu3 %v4830_v49  ;;  %v4789_v49 = vld [vmem:[%s7367_s10 + $0x6b0] sm:$0xff] }
 0x4a1   : > { %v3229_v10 = vadd.f32 %v6828_v26, %v3206_v38  ;;  %v3230_v45 = vadd.f32 %v6830_v8, %v3207_v30  ;;  %v6868_v27 = vpop.f32.mrf.mxu2  ;;  %v6870_v40 = vpop.f32.mrf.mxu3  ;;  %v4828_v30 = vld [vmem:[%s7367_s10 + $0x7e8] sm:$0xff] }
 0x4a2   : > { %3946 = vmatpush.msrb.mxu3 %v4828_v30  ;;  %v2990_v30 = vadd.f32 %v6870_v40, %v6868_v27  ;;  %v4819_v27 = vld [vmem:[%s7367_s10 + $0x7a0] sm:$0xff] }
 0x4a3   : > { %v3245_v18 = vmax.f32 %v3229_v10, 0.0  ;;  %v3246_v63 = vmax.f32 %v3230_v45, 0.0  ;;  %v4797_v10 = vld [vmem:[%s7367_s10 + $0x6f0] sm:$0xff]  ;;  %v4794_v45 = vld [vmem:[%s7367_s10 + $0x6d8] sm:$0xff] }
 0x4a4   : > { %3822 = vmatpush.msra.mxu0 %v4797_v10 }
 0x4a5   : > { %3362 = vmatmul.f32.gmra.mxu2 %v3245_v18  ;;  %3403 = vmatmul.f32.gmra.mxu3 %v3246_v63 }
 0x4a6   : > { %3444 = vmatmul.f32.gmra.mxu0 %v3245_v18  ;;  %3485 = vmatmul.f32.gmra.mxu1 %v3246_v63  ;;  %v3109_v25 = vpop.f32.mrf.mxu0  ;;  %v3150_v17 = vpop.f32.mrf.mxu1  ;;  %v4826_v18 = vld [vmem:[%s7367_s10 + $0x7d8] sm:$0xff]  ;;  %v4879_v63 = vld [vmem:[#allocation2] sm:$0x3] }
 0x4a7   : > { %v3208_v20 = vmul.f32 %v6824_v58, %v3109_v25  ;;  %v3209_v55 = vmul.f32 %v6826_v6, %v3150_v17  ;;  %3947 = vmatpush.msrb.mxu3 %v4826_v18  ;;  %v6944_v25 = vperm.slane %v4879_v63, 1  ;;  %v4795_v17 = vld [vmem:[%s7367_s10 + $0x6e0] sm:$0xff] }
 0x4a8   : > { %3823 = vmatpush.msra.mxu0 %v4795_v17  ;;  %v7457_v17 = vld [vmem:[#allocation13_spill] sm:$0xff] }
 0x4a9   : > { %v3231_v16 = vadd.f32 %v6828_v26, %v3208_v20  ;;  %v3232_v54 = vadd.f32 %v6830_v8, %v3209_v55  ;;  %v4827_v20 = vld [vmem:[%s7367_s10 + $0x7e0] sm:$0xff] }
 0x4aa   : > { %v7453_v55 = vld [vmem:[#allocation9_spill] sm:$0xff] }
 0x4ab   : > { %v3247_v5 = vmax.f32 %v3231_v16, 0.0  ;;  %v3248_v21 = vmax.f32 %v3232_v54, 0.0  ;;  %v1151_v16 = vadd.f32 %v7453_v55, %v6944_v25  ;;  %v4792_v54 = vld [vmem:[%s7367_s10 + $0x6c8] sm:$0xff] }
 0x4ad   : > { %3365 = vmatmul.f32.gmra.mxu2 %v3247_v5  ;;  %3406 = vmatmul.f32.gmra.mxu3 %v3248_v21 }
 0x4ae   : > { %3447 = vmatmul.f32.gmra.mxu0 %v3247_v5  ;;  %3488 = vmatmul.f32.gmra.mxu1 %v3248_v21  ;;  %v3112_v7 = vpop.f32.mrf.mxu0  ;;  %v3153_v13 = vpop.f32.mrf.mxu1  ;;  %v4824_v5 = vld [vmem:[%s7367_s10 + $0x7c8] sm:$0xff]  ;;  %v4793_v21 = vld [vmem:[%s7367_s10 + $0x6d0] sm:$0xff] }
 0x4af   : > { %v3210_v41 = vmul.f32 %v6824_v58, %v3112_v7  ;;  %v3211_v53 = vmul.f32 %v6826_v6, %v3153_v13  ;;  %3948 = vmatpush.msrb.mxu3 %v4824_v5  ;;  %v4790_v7 = vld [vmem:[%s7367_s10 + $0x6b8] sm:$0xff]  ;;  %3824 = vmatpush.msra.mxu0 %v4793_v21  ;;  %v4787_v5 = vld [vmem:[%s7367_s10 + $0x6a0] sm:$0xff] }
 0x4b0   : > { %v4822_v13 = vld [vmem:[%s7367_s10 + $0x7b8] sm:$0xff] }
 0x4b1   : > { %v3233_v23 = vadd.f32 %v6828_v26, %v3210_v41  ;;  %v3234_v62 = vadd.f32 %v6830_v8, %v3211_v53  ;;  %v2987_v41 = vadd.f32 %v6866_v39, %v6864_v2  ;;  %3949 = vmatpush.msrb.mxu3 %v4822_v13  ;;  %v7455_v2 = vld [vmem:[#allocation12_spill] sm:$0xff] }
 0x4b2   : > { %v1154_v39 = vadd.f32 %v7455_v2, %v6944_v25 }
 0x4b3   : > { %v3249_v34 = vmax.f32 %v3233_v23, 0.0  ;;  %v3250_v9 = vmax.f32 %v3234_v62, 0.0  ;;  %v7454_v62 = vld [vmem:[#allocation10_spill] sm:$0xff] }
 0x4b5   : > { %3368 = vmatmul.f32.gmra.mxu2 %v3249_v34  ;;  %3409 = vmatmul.f32.gmra.mxu3 %v3250_v9 }
 0x4b6   : > { %3450 = vmatmul.f32.gmra.mxu0 %v3249_v34  ;;  %3491 = vmatmul.f32.gmra.mxu1 %v3250_v9  ;;  %v3115_v52 = vpop.f32.mrf.mxu0  ;;  %v3156_v61 = vpop.f32.mrf.mxu1  ;;  %v1192_v34 = vadd.f32 %v7454_v62, %v1151_v16  ;;  %v4784_v62 = vld [vmem:[%s7367_s10 + $0x688] sm:$0xff] }
 0x4b7   : > { %v3212_v28 = vmul.f32 %v6824_v58, %v3115_v52  ;;  %v3213_v31 = vmul.f32 %v6826_v6, %v3156_v61  ;;  %v6880_v58 = vpop.f32.mrf.mxu2  ;;  %v6882_v6 = vpop.f32.mrf.mxu3  ;;  %v4791_v61 = vld [vmem:[%s7367_s10 + $0x6c0] sm:$0xff] }
 0x4b8   : > { %3825 = vmatpush.msra.mxu0 %v4791_v61  ;;  %v2993_v61 = vadd.f32 %v6882_v6, %v6880_v58  ;;  %v4815_v58 = vld [vmem:[%s7367_s10 + $0x780] sm:$0xff] }
 0x4b9   : > { %v3235_v43 = vadd.f32 %v6828_v26, %v3212_v28  ;;  %v3236_v46 = vadd.f32 %v6830_v8, %v3213_v31  ;;  %v4823_v28 = vld [vmem:[%s7367_s10 + $0x7c0] sm:$0xff]  ;;  %v3011_v31 = vadd.f32 %v2987_v41, %v1192_v34  ;;  %v4816_v34 = vld [vmem:[%s7367_s10 + $0x788] sm:$0xff] }
 0x4ba   : > { %3826 = vmatpush.msra.mxu0 %v4789_v49 }
 0x4bb   : > { %v3251_v37 = vmax.f32 %v3235_v43, 0.0  ;;  %v3252_v44 = vmax.f32 %v3236_v46, 0.0  ;;  %v2905_v46 = vadd.f32 %v6626_v1, %v6624_v32  ;;  %v4821_v32 = vld [vmem:[%s7367_s10 + $0x7b0] sm:$0xff]  ;;  %v4786_v1 = vld [vmem:[%s7367_s10 + $0x698] sm:$0xff] }
 0x4bc   : > { %3827 = vmatpush.msra.mxu0 %v4787_v5 }
 0x4bd   : > { %3371 = vmatmul.f32.gmra.mxu2 %v3251_v37  ;;  %3412 = vmatmul.f32.gmra.mxu3 %v3252_v44 }
 0x4be   : > { %3453 = vmatmul.f32.gmra.mxu0 %v3251_v37  ;;  %3494 = vmatmul.f32.gmra.mxu1 %v3252_v44  ;;  %v4788_v44 = vld [vmem:[%s7367_s10 + $0x6a8] sm:$0xff] }
 0x4bf   : > { %v6888_v26 = vpop.f32.mrf.mxu2  ;;  %v6890_v8 = vpop.f32.mrf.mxu3 }
 0x4c5   : > { %4749 = vmatmul.msk.f32.vlgmr.msra.gmra.mxu2 %vm814_vm4, %v6533_v35  ;;  %4757 = vmatmul.msk.f32.vlgmr.msra.gmra.mxu3 %vm814_vm4, %v6533_v35 }
 0x4c7   : > { %v6896_v35 = vpop.f32.mrf.mxu2 }
 0x4cd   : > { %4750 = vmatmul.msk.f32.gmra.mxu2 %vm814_vm4, %v6540_v36  ;;  %4758 = vmatmul.msk.f32.gmra.mxu3 %vm814_vm4, %v6540_v36  ;;  %v6898_v36 = vpop.f32.mrf.mxu3 }
 0x4d5   : > { %4751 = vmatmul.msk.f32.gmra.mxu2 %vm814_vm4, %v6547_v4  ;;  %4759 = vmatmul.msk.f32.gmra.mxu3 %vm814_vm4, %v6547_v4  ;;  %v6904_v4 = vpop.f32.mrf.mxu2  ;;  %v6906_v24 = vpop.f32.mrf.mxu3 }
 0x4dd   : > { %4752 = vmatmul.msk.f32.gmra.mxu2 %vm814_vm4, %v6554_v11  ;;  %4760 = vmatmul.msk.f32.gmra.mxu3 %vm814_vm4, %v6554_v11  ;;  %v4798_v11 = vld [vmem:[%s7367_s10 + $0x6f8] sm:$0xff]  ;;  %v6924_v38 = vpop.f32.mrf.mxu3 }
 0x4de   : > { %3904 = vmatpush.msrb.mxu2 %v4798_v11  ;;  %v4820_v11 = vld [vmem:[%s7367_s10 + $0x7a8] sm:$0xff] }
 0x4df   : > { %3950 = vmatpush.msrb.mxu3 %v4820_v11 }
 0x4e5   : > { %4753 = vmatmul.msk.f32.gmra.mxu2 %vm814_vm4, %v6561_v29  ;;  %4761 = vmatmul.msk.f32.gmra.mxu3 %vm814_vm4, %v6561_v29  ;;  %v6922_v29 = vpop.f32.mrf.mxu2  ;;  %v6980_v23 = vpop.f32.mrf.mxu3 }
 0x4ed   : > { %4754 = vmatmul.msk.f32.gmra.mxu2 %vm814_vm4, %v6568_v15  ;;  %4762 = vmatmul.msk.f32.gmra.mxu3 %vm814_vm4, %v6568_v15  ;;  %v4796_v15 = vld [vmem:[%s7367_s10 + $0x6e8] sm:$0xff]  ;;  %v6978_v53 = vpop.f32.mrf.mxu2 }
 0x4ee   : > { %3905 = vmatpush.msrb.mxu2 %v4796_v15  ;;  %v4818_v15 = vld [vmem:[%s7367_s10 + $0x798] sm:$0xff] }
 0x4ef   : > { %3951 = vmatpush.msrb.mxu3 %v4818_v15 }
 0x4f0   : > { %3906 = vmatpush.msrb.mxu2 %v4794_v45  ;;  %v7456_v45 = vld [vmem:[#allocation11_spill] sm:$0xff] }
 0x4f1   : > { %v3010_v18 = vadd.f32 %v2905_v46, %v7456_v45  ;;  %3952 = vmatpush.msrb.mxu3 %v4816_v34 }
 0x4f2   : > { %3907 = vmatpush.msrb.mxu2 %v4792_v54 }
 0x4f4   : > { %3908 = vmatpush.msrb.mxu2 %v4790_v7  ;;  %v7458_v7 = vld [vmem:[#allocation15_spill] sm:$0xff] }
 0x4f5   : > { %4755 = vmatmul.msk.f32.gmra.mxu2 %vm814_vm4, %v6587_v50  ;;  %4763 = vmatmul.msk.f32.gmra.mxu3 %vm814_vm4, %v6587_v50  ;;  %v4829_v50 = vld [vmem:[%s7367_s10 + $0x7f0] sm:$0xff]  ;;  %v1157_v13 = vadd.f32 %v7458_v7, %v6944_v25 }
 0x4f6   : > { %3863 = vmatpush.msra.mxu1 %v4829_v50  ;;  %3909 = vmatpush.msrb.mxu2 %v4788_v44 }
 0x4f8   : > { %3864 = vmatpush.msra.mxu1 %v4827_v20  ;;  %3910 = vmatpush.msrb.mxu2 %v4786_v1  ;;  %v1195_v20 = vadd.f32 %v7457_v17, %v1154_v39  ;;  %v7460_v39 = vld [vmem:[#allocation16_spill] sm:$0xff]  ;;  %v4781_v17 = vld [vmem:[%s7367_s10 + $0x670] sm:$0xff] }
 0x4f9   : > { %v1198_v44 = vadd.f32 %v7460_v39, %v1157_v13  ;;  %v4783_v1 = vld [vmem:[%s7367_s10 + $0x680] sm:$0xff]  ;;  %v2999_v39 = vadd.f32 %v6898_v36, %v6896_v35  ;;  %v4772_v36 = vld [vmem:[%s7367_s10 + $0x628] sm:$0xff] }
 0x4fa   : > { %v3013_v40 = vadd.f32 %v2990_v30, %v1195_v20  ;;  %3911 = vmatpush.msrb.mxu2 %v4784_v62  ;;  %v2911_v30 = vadd.f32 %v6682_v22, %v6680_v42  ;;  %v4813_v42 = vld [vmem:[%s7367_s10 + $0x770] sm:$0xff]  ;;  %v4778_v22 = vld [vmem:[%s7367_s10 + $0x658] sm:$0xff]  ;;  %v4807_v35 = vld [vmem:[%s7367_s10 + $0x740] sm:$0xff] }
 0x4fb   : > { %v3015_v6 = vadd.f32 %v2993_v61, %v1198_v44  ;;  %v4810_v20 = vld [vmem:[%s7367_s10 + $0x758] sm:$0xff] }
 0x4fd   : > { %4756 = vmatmul.msk.f32.gmra.mxu2 %vm814_vm4, %v6606_v47  ;;  %4764 = vmatmul.msk.f32.gmra.mxu3 %vm814_vm4, %v6606_v47  ;;  %v4825_v47 = vld [vmem:[%s7367_s10 + $0x7d0] sm:$0xff] }
 0x4fe   : > { %3865 = vmatpush.msra.mxu1 %v4825_v47  ;;  %v2908_v47 = vadd.f32 %v6642_v57, %v6640_v60  ;;  %v4817_v60 = vld [vmem:[%s7367_s10 + $0x790] sm:$0xff]  ;;  %v4782_v57 = vld [vmem:[%s7367_s10 + $0x678] sm:$0xff] }
 0x4ff   : > { %3912 = vmatpush.msrb.mxu2 %v4782_v57  ;;  %v2914_v57 = vadd.f32 %v6722_v14, %v6720_v33  ;;  %v4809_v33 = vld [vmem:[%s7367_s10 + $0x750] sm:$0xff]  ;;  %v4774_v14 = vld [vmem:[%s7367_s10 + $0x638] sm:$0xff] }
 0x500   : > { %3866 = vmatpush.msra.mxu1 %v4823_v28 }
 0x502   : > { %3867 = vmatpush.msra.mxu1 %v4821_v32 }
 0x503   : > { %v3433_v9 = vpop.f32.mrf.mxu0  ;;  %v3474_v52 = vpop.f32.mrf.mxu1 }
 0x504   : > { %v3475_v43 = vadd.f32 %v3474_v52, %v3433_v9  ;;  %3868 = vmatpush.msra.mxu1 %v4819_v27  ;;  %v4785_v9 = vld [vmem:[%s7367_s10 + $0x690] sm:$0xff]  ;;  %v4814_v52 = vld [vmem:[%s7367_s10 + $0x778] sm:$0xff]  ;;  %v7462_v27 = vld [vmem:[#allocation17_spill] sm:$0xff] }
 0x505   : > { %3828 = vmatpush.msra.mxu0 %v4785_v9  ;;  %3953 = vmatpush.msrb.mxu3 %v4814_v52  ;;  %v4779_v9 = vld [vmem:[%s7367_s10 + $0x660] sm:$0xff] }
 0x506   : > { %v6993_v37 = vadd.f32 %v3475_v43, %v3011_v31  ;;  %3869 = vmatpush.msra.mxu1 %v4817_v60  ;;  %v7459_v43 = vld [vmem:[#allocation14_spill] sm:$0xff]  ;;  %v7464_v52 = vld [vmem:[#allocation21_spill] sm:$0xff] }
 0x507   : > { %v3012_v46 = vadd.f32 %v2908_v47, %v7459_v43  ;;  %3829 = vmatpush.msra.mxu0 %v4783_v1  ;;  %v7463_v47 = vld [vmem:[#allocation19_spill] sm:$0xff]  ;;  %v1163_v61 = vadd.f32 %v7464_v52, %v6944_v25  ;;  %v4808_v43 = vld [vmem:[%s7367_s10 + $0x748] sm:$0xff] }
 0x508   : > { %v3351_v10 = vpop.f32.mrf.mxu2  ;;  %v3392_v50 = vpop.f32.mrf.mxu3  ;;  %3870 = vmatpush.msra.mxu1 %v4815_v58 }
 0x509   : > { %v3393_v63 = vadd.f32 %v3392_v50, %v3351_v10  ;;  %v7461_v10 = vld [vmem:[#allocation18_spill] sm:$0xff]  ;;  %3830 = vmatpush.msra.mxu0 %v4781_v17 }
 0x50a   : > { %v1160_v50 = vadd.f32 %v7461_v10, %v6944_v25  ;;  %3871 = vmatpush.msra.mxu1 %v4813_v42  ;;  %v4804_v42 = vld [vmem:[%s7367_s10 + $0x728] sm:$0xff] }
 0x50b   : > { %v7017_v55 = vadd.f32 %v3393_v63, %v3010_v18  ;;  %v3436_v16 = vpop.f32.mrf.mxu0  ;;  %v3477_v54 = vpop.f32.mrf.mxu1  ;;  %v4780_v18 = vld [vmem:[%s7367_s10 + $0x668] sm:$0xff]  ;;  %3831 = vmatpush.msra.mxu0 %v4779_v9 }
 0x50c   : > { %v3478_v21 = vadd.f32 %v3477_v54, %v3436_v16  ;;  %v4812_v63 = vld [vmem:[%s7367_s10 + $0x768] sm:$0xff]  ;;  %3913 = vmatpush.msrb.mxu2 %v4780_v18  ;;  %v2996_v16 = vadd.f32 %v6890_v8, %v6888_v26  ;;  %v1201_v7 = vadd.f32 %v7463_v47, %v1160_v50  ;;  %v4811_v26 = vld [vmem:[%s7367_s10 + $0x760] sm:$0xff] }
 0x50d   : > { %3954 = vmatpush.msrb.mxu3 %v4812_v63  ;;  %3872 = vmatpush.msra.mxu1 %v4811_v26  ;;  %v4775_v18 = vld [vmem:[%s7367_s10 + $0x640] sm:$0xff] }
 0x50e   : > { %v7029_v41 = vadd.f32 %v3478_v21, %v3013_v40  ;;  %v3014_v40 = vadd.f32 %v2911_v30, %v7462_v27  ;;  %3914 = vmatpush.msrb.mxu2 %v4778_v22  ;;  %v3017_v8 = vadd.f32 %v2996_v16, %v1201_v7  ;;  %v4773_v22 = vld [vmem:[%s7367_s10 + $0x630] sm:$0xff]  ;;  %v2917_v16 = vadd.f32 %v6762_v0, %v6760_v3  ;;  %v7467_v27 = vld [vmem:[#allocation24_spill] sm:$0xff]  ;;  %v7469_v9 = vld [vmem:[#allocation25_spill] sm:$0xff] }
 0x50f   : > { %3955 = vmatpush.msrb.mxu3 %v4810_v20  ;;  %3873 = vmatpush.msra.mxu1 %v4809_v33  ;;  %v4805_v20 = vld [vmem:[%s7367_s10 + $0x730] sm:$0xff]  ;;  %v3002_v3 = vadd.f32 %v6906_v24, %v6904_v4  ;;  %v4768_v33 = vld [vmem:[%s7367_s10 + $0x608] sm:$0xff] }
 0x510   : > { %v3354_v28 = vpop.f32.mrf.mxu2  ;;  %v3395_v31 = vpop.f32.mrf.mxu3  ;;  %v7468_v7 = vld [vmem:[#allocation23_spill] sm:$0xff] }
 0x511   : > { %v3396_v2 = vadd.f32 %v3395_v31, %v3354_v28  ;;  %v4776_v31 = vld [vmem:[%s7367_s10 + $0x648] sm:$0xff]  ;;  %3956 = vmatpush.msrb.mxu3 %v4808_v43  ;;  %3874 = vmatpush.msra.mxu1 %v4807_v35  ;;  %v4801_v43 = vld [vmem:[%s7367_s10 + $0x710] sm:$0xff] }
 0x512   : > { %3915 = vmatpush.msrb.mxu2 %v4776_v31  ;;  %v4769_v31 = vld [vmem:[%s7367_s10 + $0x610] sm:$0xff] }
 0x513   : > { %v7053_v11 = vadd.f32 %v3396_v2, %v3012_v46  ;;  %v3439_v49 = vpop.f32.mrf.mxu0  ;;  %v3480_v32 = vpop.f32.mrf.mxu1  ;;  %v4777_v46 = vld [vmem:[%s7367_s10 + $0x650] sm:$0xff]  ;;  %v4806_v2 = vld [vmem:[%s7367_s10 + $0x738] sm:$0xff]  ;;  %3875 = vmatpush.msra.mxu1 %v4805_v20 }
 0x514   : > { %v3481_v15 = vadd.f32 %v3480_v32, %v3439_v49  ;;  %3832 = vmatpush.msra.mxu0 %v4777_v46  ;;  %v7465_v32 = vld [vmem:[#allocation20_spill] sm:$0xff]  ;;  %3916 = vmatpush.msrb.mxu2 %v4774_v14  ;;  %v2920_v46 = vadd.f32 %v6802_v12, %v6800_v59  ;;  %v4800_v14 = vld [vmem:[%s7367_s10 + $0x708] sm:$0xff]  ;;  %v3005_v12 = vadd.f32 %v6924_v38, %v6922_v29 }
 0x515   : > { %v3016_v1 = vadd.f32 %v2914_v57, %v7465_v32  ;;  %3957 = vmatpush.msrb.mxu3 %v4806_v2  ;;  %v4767_v2 = vld [vmem:[%s7367_s10 + $0x600] sm:$0xff]  ;;  %v3008_v38 = vadd.f32 %v6980_v23, %v6978_v53 }
 0x516   : > { %v7065_v45 = vadd.f32 %v3481_v15, %v3015_v6  ;;  %v7466_v6 = vld [vmem:[#allocation22_spill] sm:$0xff]  ;;  %3833 = vmatpush.msra.mxu0 %v4775_v18  ;;  %3917 = vmatpush.msrb.mxu2 %v4772_v36  ;;  %v4799_v59 = vld [vmem:[%s7367_s10 + $0x700] sm:$0xff] }
 0x517   : > { %v1204_v15 = vadd.f32 %v7466_v6, %v1163_v61  ;;  %3958 = vmatpush.msrb.mxu3 %v4804_v42  ;;  %v2923_v42 = vadd.f32 %v6812_v56, %v6810_v48  ;;  %v7476_v23 = vld [vmem:[#allocation32_spill] sm:$0xff] }
 0x518   : > { %v3357_v54 = vpop.f32.mrf.mxu2  ;;  %v3398_v5 = vpop.f32.mrf.mxu3  ;;  %3834 = vmatpush.msra.mxu0 %v4773_v22  ;;  %v7473_v22 = vld [vmem:[#allocation30_spill] sm:$0xff] }
 0x519   : > { %v3399_v21 = vadd.f32 %v3398_v5, %v3357_v54  ;;  %v3019_v63 = vadd.f32 %v2999_v39, %v1204_v15  ;;  %v4770_v54 = vld [vmem:[%s7367_s10 + $0x618] sm:$0xff]  ;;  %v1172_v20 = vadd.f32 %v7473_v22, %v6944_v25 }
 0x51a   : > { %v4802_v5 = vld [vmem:[%s7367_s10 + $0x718] sm:$0xff]  ;;  %3918 = vmatpush.msrb.mxu2 %v4770_v54 }
 0x51b   : > { %v7089_v13 = vadd.f32 %v3399_v21, %v3014_v40  ;;  %v3442_v62 = vpop.f32.mrf.mxu0  ;;  %v3483_v34 = vpop.f32.mrf.mxu1  ;;  %v1166_v40 = vadd.f32 %v7467_v27, %v6944_v25  ;;  %3959 = vmatpush.msrb.mxu3 %v4802_v5  ;;  %v7470_v39 = vld [vmem:[#allocation27_spill] sm:$0xff]  ;;  %v7474_v5 = vld [vmem:[#allocation29_spill] sm:$0xff] }
 0x51c   : > { %v3484_v60 = vadd.f32 %v3483_v34, %v3442_v62  ;;  %v3018_v62 = vadd.f32 %v2917_v16, %v7468_v7  ;;  %3919 = vmatpush.msrb.mxu2 %v4768_v33  ;;  %v3022_v27 = vadd.f32 %v2923_v42, %v7474_v5 }
 0x51d   : > { %v1207_v26 = vadd.f32 %v7469_v9, %v1166_v40  ;;  %3960 = vmatpush.msrb.mxu3 %v4800_v14 }
 0x51e   : > { %v7101_v28 = vadd.f32 %v3484_v60, %v3017_v8  ;;  %v4771_v8 = vld [vmem:[%s7367_s10 + $0x620] sm:$0xff] }
 0x51f   : > { %v4803_v60 = vld [vmem:[%s7367_s10 + $0x720] sm:$0xff]  ;;  %3835 = vmatpush.msra.mxu0 %v4771_v8  ;;  %v3021_v4 = vadd.f32 %v3002_v3, %v1207_v26  ;;  %v7475_v3 = vld [vmem:[#allocation31_spill] sm:$0xff] }
 0x520   : > { %v3360_v44 = vpop.f32.mrf.mxu2  ;;  %v3401_v49 = vpop.f32.mrf.mxu3  ;;  %3876 = vmatpush.msra.mxu1 %v4803_v60  ;;  %v4765_v60 = vld [vmem:[%s7362_s5 + $0x4] sm:$0x3] }
 0x521   : > { %v3402_v58 = vadd.f32 %v3401_v49, %v3360_v44  ;;  %3836 = vmatpush.msra.mxu0 %v4769_v31  ;;  %v1169_v44 = vadd.f32 %v7470_v39, %v6944_v25  ;;  %v2926_v25 = vadd.f32 %v6816_v19, %v6814_v51  ;;  %v7226_v51 = vperm.slane %v4765_v60, 1 }
 0x522   : > { %3877 = vmatpush.msra.mxu1 %v4801_v43 }
 0x523   : > { %v7125_v30 = vadd.f32 %v3402_v58, %v3016_v1  ;;  %v3445_v10 = vpop.f32.mrf.mxu0  ;;  %v3486_v50 = vpop.f32.mrf.mxu1  ;;  %3837 = vmatpush.msra.mxu0 %v4767_v2  ;;  %v7471_v58 = vld [vmem:[#allocation26_spill] sm:$0xff]  ;;  %v3024_v26 = vadd.f32 %v2926_v25, %v7476_v23 }
 0x524   : > { %v3487_v17 = vadd.f32 %v3486_v50, %v3445_v10  ;;  %3878 = vmatpush.msra.mxu1 %v4799_v59  ;;  %v3020_v6 = vadd.f32 %v2920_v46, %v7471_v58  ;;  %v7472_v10 = vld [vmem:[#allocation28_spill] sm:$0xff] }
 0x525   : > { %v1210_v50 = vadd.f32 %v7472_v10, %v1169_v44 }
 0x526   : > { %v7155_v21 = vadd.f32 %v3487_v17, %v3019_v63 }
 0x527   : > { %v3023_v63 = vadd.f32 %v3005_v12, %v1210_v50 }
 0x528   : > { %v3363_v0 = vpop.f32.mrf.mxu2  ;;  %v3404_v47 = vpop.f32.mrf.mxu3 }
 0x529   : > { %v3405_v34 = vadd.f32 %v3404_v47, %v3363_v0  ;;  %v1213_v0 = vadd.f32 %v7475_v3, %v1172_v20 }
 0x52b   : > { %v7167_v57 = vadd.f32 %v3405_v34, %v3018_v62  ;;  %v3448_v52 = vpop.f32.mrf.mxu0  ;;  %v3489_v61 = vpop.f32.mrf.mxu1  ;;  %v3025_v48 = vadd.f32 %v3008_v38, %v1213_v0 }
 0x52c   : > { %v3490_v24 = vadd.f32 %v3489_v61, %v3448_v52  ;;  %v4766_v61 = vld [vmem:[%s7363_s6 + $0x4] sm:$0x3] }
 0x52d   : > { %v7228_v19 = vperm.slane %v4766_v61, 0 }
 0x52e   : > { %v7188_v49 = vadd.f32 %v3490_v24, %v3021_v4  ;;  %v7224_v4 = vperm.slane %v4765_v60, 0  ;;  %v7230_v24 = vperm.slane %v4766_v61, 1 }
 0x530   : > { %v3366_v32 = vpop.f32.mrf.mxu2  ;;  %v3407_v1 = vpop.f32.mrf.mxu3 }
 0x531   : > { %v3408_v15 = vadd.f32 %v3407_v1, %v3366_v32 }
 0x533   : > { %v7197_v18 = vadd.f32 %v3408_v15, %v3020_v6  ;;  %v3451_v35 = vpop.f32.mrf.mxu0  ;;  %v3492_v36 = vpop.f32.mrf.mxu1 }
 0x534   : > { %v3493_v17 = vadd.f32 %v3492_v36, %v3451_v35 }
 0x536   : > { %v7203_v29 = vadd.f32 %v3493_v17, %v3023_v63 }
 0x538   : > { %v3369_v16 = vpop.f32.mrf.mxu2  ;;  %v3410_v54 = vpop.f32.mrf.mxu3 }
 0x539   : > { %v3411_v40 = vadd.f32 %v3410_v54, %v3369_v16 }
 0x53b   : > { %v7209_v47 = vadd.f32 %v3411_v40, %v3022_v27  ;;  %v3454_v7 = vpop.f32.mrf.mxu0  ;;  %v3495_v62 = vpop.f32.mrf.mxu1 }
 0x53c   : > { %v3496_v56 = vadd.f32 %v3495_v62, %v3454_v7 }
 0x53e   : > { %v7213_v34 = vadd.f32 %v3496_v56, %v3025_v48 }
 0x540   : > { %v3372_v9 = vpop.f32.mrf.mxu2  ;;  %v3413_v53 = vpop.f32.mrf.mxu3 }
 0x541   : > { %v3414_v8 = vadd.f32 %v3413_v53, %v3372_v9 }
 0x543   : > { %v7219_v52 = vadd.f32 %v3414_v8, %v3024_v26 }
 0x548   : > { %v3582_v31 = vpop.f32.mrf.mxu2  ;;  %v3623_v43 = vpop.f32.mrf.mxu3 }
 0x549   : > { %v3686_v46 = vmul.f32 %v7224_v4, %v3582_v31  ;;  %v3687_v33 = vmul.f32 %v7226_v51, %v3623_v43 }
 0x54b   : > { %v3709_v14 = vadd.f32 %v7228_v19, %v3686_v46  ;;  %v3710_v2 = vadd.f32 %v7230_v24, %v3687_v33 }
 0x54d   : > { %v3725_v39 = vmax.f32 %v3709_v14, 0.0  ;;  %v3726_v44 = vmax.f32 %v3710_v2, 0.0 }
 0x54f   : > { %3838 = vmatmul.f32.vlgmr.msra.gmra.mxu0 %v3725_v39  ;;  %3879 = vmatmul.f32.vlgmr.msra.gmra.mxu1 %v3726_v44 }
 0x550   : > { %3920 = vmatmul.f32.vlgmr.msrb.gmra.mxu2 %v3725_v39  ;;  %3961 = vmatmul.f32.vlgmr.msrb.gmra.mxu3 %v3726_v44  ;;  %v3585_v59 = vpop.f32.mrf.mxu2  ;;  %v3626_v12 = vpop.f32.mrf.mxu3 }
 0x551   : > { %v3688_v32 = vmul.f32 %v7224_v4, %v3585_v59  ;;  %v3689_v1 = vmul.f32 %v7226_v51, %v3626_v12 }
 0x553   : > { %v3711_v58 = vadd.f32 %v7228_v19, %v3688_v32  ;;  %v3712_v6 = vadd.f32 %v7230_v24, %v3689_v1 }
 0x555   : > { %v3727_v15 = vmax.f32 %v3711_v58, 0.0  ;;  %v3728_v10 = vmax.f32 %v3712_v6, 0.0 }
 0x557   : > { %3841 = vmatmul.f32.gmra.mxu0 %v3727_v15  ;;  %3882 = vmatmul.f32.gmra.mxu1 %v3728_v10 }
 0x558   : > { %3923 = vmatmul.f32.gmra.mxu2 %v3727_v15  ;;  %3964 = vmatmul.f32.gmra.mxu3 %v3728_v10  ;;  %v3588_v50 = vpop.f32.mrf.mxu2  ;;  %v3629_v35 = vpop.f32.mrf.mxu3 }
 0x559   : > { %v3690_v36 = vmul.f32 %v7224_v4, %v3588_v50  ;;  %v3691_v63 = vmul.f32 %v7226_v51, %v3629_v35 }
 0x55b   : > { %v3713_v17 = vadd.f32 %v7228_v19, %v3690_v36  ;;  %v3714_v42 = vadd.f32 %v7230_v24, %v3691_v63 }
 0x55d   : > { %v3729_v22 = vmax.f32 %v3713_v17, 0.0  ;;  %v3730_v20 = vmax.f32 %v3714_v42, 0.0  ;;  %v4034_v17 = vld [vmem:[%s7368_s11] sm:$0x3] }
 0x55f   : > { %3844 = vmatmul.f32.gmra.mxu0 %v3729_v22  ;;  %3885 = vmatmul.f32.gmra.mxu1 %v3730_v20 }
 0x560   : > { %3926 = vmatmul.f32.gmra.mxu2 %v3729_v22  ;;  %3967 = vmatmul.f32.gmra.mxu3 %v3730_v20  ;;  %v3591_v38 = vpop.f32.mrf.mxu2  ;;  %v3632_v16 = vpop.f32.mrf.mxu3 }
 0x561   : > { %v3692_v54 = vmul.f32 %v7224_v4, %v3591_v38  ;;  %v3693_v5 = vmul.f32 %v7226_v51, %v3632_v16 }
 0x563   : > { %v3715_v27 = vadd.f32 %v7228_v19, %v3692_v54  ;;  %v3716_v40 = vadd.f32 %v7230_v24, %v3693_v5 }
 0x565   : > { %v3731_v3 = vmax.f32 %v3715_v27, 0.0  ;;  %v3732_v0 = vmax.f32 %v3716_v40, 0.0  ;;  %v7277_v40 = vperm.slane %v4034_v17, 1 }
 0x567   : > { %3847 = vmatmul.f32.gmra.mxu0 %v3731_v3  ;;  %3888 = vmatmul.f32.gmra.mxu1 %v3732_v0 }
 0x568   : > { %3929 = vmatmul.f32.gmra.mxu2 %v3731_v3  ;;  %3970 = vmatmul.f32.gmra.mxu3 %v3732_v0  ;;  %v3594_v7 = vpop.f32.mrf.mxu2  ;;  %v3635_v62 = vpop.f32.mrf.mxu3 }
 0x569   : > { %v3694_v48 = vmul.f32 %v7224_v4, %v3594_v7  ;;  %v3695_v56 = vmul.f32 %v7226_v51, %v3635_v62 }
 0x56b   : > { %v3717_v25 = vadd.f32 %v7228_v19, %v3694_v48  ;;  %v3718_v9 = vadd.f32 %v7230_v24, %v3695_v56 }
 0x56d   : > { %v3733_v53 = vmax.f32 %v3717_v25, 0.0  ;;  %v3734_v23 = vmax.f32 %v3718_v9, 0.0 }
 0x56f   : > { %3850 = vmatmul.f32.gmra.mxu0 %v3733_v53  ;;  %3891 = vmatmul.f32.gmra.mxu1 %v3734_v23 }
 0x570   : > { %3932 = vmatmul.f32.gmra.mxu2 %v3733_v53  ;;  %3973 = vmatmul.f32.gmra.mxu3 %v3734_v23  ;;  %v3597_v26 = vpop.f32.mrf.mxu2  ;;  %v3638_v8 = vpop.f32.mrf.mxu3 }
 0x571   : > { %v3696_v60 = vmul.f32 %v7224_v4, %v3597_v26  ;;  %v3697_v61 = vmul.f32 %v7226_v51, %v3638_v8 }
 0x573   : > { %v3719_v31 = vadd.f32 %v7228_v19, %v3696_v60  ;;  %v3720_v43 = vadd.f32 %v7230_v24, %v3697_v61 }
 0x575   : > { %v3735_v46 = vmax.f32 %v3719_v31, 0.0  ;;  %v3736_v33 = vmax.f32 %v3720_v43, 0.0 }
 0x577   : > { %3853 = vmatmul.f32.gmra.mxu0 %v3735_v46  ;;  %3894 = vmatmul.f32.gmra.mxu1 %v3736_v33 }
 0x578   : > { %3935 = vmatmul.f32.gmra.mxu2 %v3735_v46  ;;  %3976 = vmatmul.f32.gmra.mxu3 %v3736_v33  ;;  %v3600_v14 = vpop.f32.mrf.mxu2  ;;  %v3641_v2 = vpop.f32.mrf.mxu3 }
 0x579   : > { %v3698_v39 = vmul.f32 %v7224_v4, %v3600_v14  ;;  %v3699_v44 = vmul.f32 %v7226_v51, %v3641_v2 }
 0x57b   : > { %v3721_v59 = vadd.f32 %v7228_v19, %v3698_v39  ;;  %v3722_v12 = vadd.f32 %v7230_v24, %v3699_v44 }
 0x57d   : > { %v3737_v32 = vmax.f32 %v3721_v59, 0.0  ;;  %v3738_v1 = vmax.f32 %v3722_v12, 0.0 }
 0x57f   : > { %3856 = vmatmul.f32.gmra.mxu0 %v3737_v32  ;;  %3897 = vmatmul.f32.gmra.mxu1 %v3738_v1 }
 0x580   : > { %3938 = vmatmul.f32.gmra.mxu2 %v3737_v32  ;;  %3979 = vmatmul.f32.gmra.mxu3 %v3738_v1  ;;  %v3603_v58 = vpop.f32.mrf.mxu2  ;;  %v3644_v6 = vpop.f32.mrf.mxu3 }
 0x581   : > { %v3700_v15 = vmul.f32 %v7224_v4, %v3603_v58  ;;  %v3701_v10 = vmul.f32 %v7226_v51, %v3644_v6  ;;  %v4056_v4 = vld [vmem:[%s7369_s12] sm:$0x3] }
 0x582   : > { %v7273_v20 = vperm.slane %v4056_v4, 0  ;;  %v7280_v56 = vperm.slane %v4056_v4, 1 }
 0x583   : > { %v3723_v50 = vadd.f32 %v7228_v19, %v3700_v15  ;;  %v3724_v35 = vadd.f32 %v7230_v24, %v3701_v10  ;;  %v7270_v19 = vperm.slane %v4034_v17, 0 }
 0x585   : > { %v3739_v36 = vmax.f32 %v3723_v50, 0.0  ;;  %v3740_v63 = vmax.f32 %v3724_v35, 0.0 }
 0x587   : > { %3859 = vmatmul.f32.gmra.mxu0 %v3739_v36  ;;  %3900 = vmatmul.f32.gmra.mxu1 %v3740_v63 }
 0x588   : > { %3941 = vmatmul.f32.gmra.mxu2 %v3739_v36  ;;  %3982 = vmatmul.f32.gmra.mxu3 %v3740_v63 }
 0x5cc   : > { %v3839_v42 = vpop.f32.mrf.mxu0  ;;  %v3880_v22 = vpop.f32.mrf.mxu1 }
 0x5cd   : > { %v3881_v51 = vadd.f32 %v3880_v22, %v3839_v42 }
 0x5cf   : > { %v3986_v24 = vadd.f32 %v3881_v51, %v7017_v55 }
 0x5d1   : > { %v4040_v38 = vmul.f32 %v7270_v19, %v3986_v24 }
 0x5d3   : > { %v4062_v16 = vadd.f32 %v7273_v20, %v4040_v38  ;;  %v3921_v54 = vpop.f32.mrf.mxu2  ;;  %v3962_v5 = vpop.f32.mrf.mxu3 }
 0x5d4   : > { %v3963_v27 = vadd.f32 %v3962_v5, %v3921_v54  ;;  %v3842_v3 = vpop.f32.mrf.mxu0  ;;  %v3883_v0 = vpop.f32.mrf.mxu1 }
 0x5d5   : > { %v4078_v7 = vmax.f32 %v4062_v16, 0.0  ;;  %v3884_v62 = vadd.f32 %v3883_v0, %v3842_v3 }
 0x5d6   : > { %v3987_v48 = vadd.f32 %v3963_v27, %v6993_v37 }
 0x5d7   : > { %4094 = vst [vmem:[%s5032_s14] sm:$0xff] %v4078_v7  ;;  %v3988_v55 = vadd.f32 %v3884_v62, %v7053_v11 }
 0x5d8   : > { %v4041_v25 = vmul.f32 %v7277_v40, %v3987_v48 }
 0x5d9   : > { %v4042_v9 = vmul.f32 %v7270_v19, %v3988_v55 }
 0x5da   : > { %v4063_v53 = vadd.f32 %v7280_v56, %v4041_v25 }
 0x5db   : > { %v4064_v23 = vadd.f32 %v7273_v20, %v4042_v9  ;;  %v3924_v26 = vpop.f32.mrf.mxu2  ;;  %v3965_v8 = vpop.f32.mrf.mxu3 }
 0x5dc   : > { %v4079_v60 = vmax.f32 %v4063_v53, 0.0  ;;  %v3966_v61 = vadd.f32 %v3965_v8, %v3924_v26  ;;  %v3845_v37 = vpop.f32.mrf.mxu0  ;;  %v3886_v31 = vpop.f32.mrf.mxu1 }
 0x5dd   : > { %v4080_v43 = vmax.f32 %v4064_v23, 0.0  ;;  %v3887_v46 = vadd.f32 %v3886_v31, %v3845_v37 }
 0x5de   : > { %4095 = vst [vmem:[%s5032_s14 + $0x8] sm:$0xff] %v4079_v60  ;;  %v3989_v11 = vadd.f32 %v3966_v61, %v7029_v41 }
 0x5df   : > { %4096 = vst [vmem:[%s5032_s14 + $0x10] sm:$0xff] %v4080_v43  ;;  %v3990_v33 = vadd.f32 %v3887_v46, %v7089_v13 }
 0x5e0   : > { %v4043_v14 = vmul.f32 %v7277_v40, %v3989_v11 }
 0x5e1   : > { %v4044_v2 = vmul.f32 %v7270_v19, %v3990_v33 }
 0x5e2   : > { %v4065_v39 = vadd.f32 %v7280_v56, %v4043_v14 }
 0x5e3   : > { %v4066_v44 = vadd.f32 %v7273_v20, %v4044_v2  ;;  %v3927_v59 = vpop.f32.mrf.mxu2  ;;  %v3968_v12 = vpop.f32.mrf.mxu3 }
 0x5e4   : > { %v4081_v32 = vmax.f32 %v4065_v39, 0.0  ;;  %v3969_v1 = vadd.f32 %v3968_v12, %v3927_v59  ;;  %v3848_v58 = vpop.f32.mrf.mxu0  ;;  %v3889_v6 = vpop.f32.mrf.mxu1 }
 0x5e5   : > { %v4082_v15 = vmax.f32 %v4066_v44, 0.0  ;;  %v3890_v41 = vadd.f32 %v3889_v6, %v3848_v58 }
 0x5e6   : > { %4097 = vst [vmem:[%s5032_s14 + $0x18] sm:$0xff] %v4081_v32  ;;  %v3991_v13 = vadd.f32 %v3969_v1, %v7065_v45 }
 0x5e7   : > { %4098 = vst [vmem:[%s5032_s14 + $0x20] sm:$0xff] %v4082_v15  ;;  %v3992_v10 = vadd.f32 %v3890_v41, %v7125_v30 }
 0x5e8   : > { %v4045_v50 = vmul.f32 %v7277_v40, %v3991_v13 }
 0x5e9   : > { %v4046_v35 = vmul.f32 %v7270_v19, %v3992_v10 }
 0x5ea   : > { %v4067_v36 = vadd.f32 %v7280_v56, %v4045_v50 }
 0x5eb   : > { %v4068_v63 = vadd.f32 %v7273_v20, %v4046_v35  ;;  %v3930_v17 = vpop.f32.mrf.mxu2  ;;  %v3971_v42 = vpop.f32.mrf.mxu3 }
 0x5ec   : > { %v4083_v22 = vmax.f32 %v4067_v36, 0.0  ;;  %v3972_v4 = vadd.f32 %v3971_v42, %v3930_v17  ;;  %v3851_v51 = vpop.f32.mrf.mxu0  ;;  %v3892_v24 = vpop.f32.mrf.mxu1 }
 0x5ed   : > { %v4084_v38 = vmax.f32 %v4068_v63, 0.0  ;;  %v3893_v45 = vadd.f32 %v3892_v24, %v3851_v51 }
 0x5ee   : > { %4099 = vst [vmem:[%s5032_s14 + $0x28] sm:$0xff] %v4083_v22  ;;  %v3993_v30 = vadd.f32 %v3972_v4, %v7101_v28 }
 0x5ef   : > { %4100 = vst [vmem:[%s5032_s14 + $0x30] sm:$0xff] %v4084_v38  ;;  %v3994_v16 = vadd.f32 %v3893_v45, %v7167_v57 }
 0x5f0   : > { %v4047_v54 = vmul.f32 %v7277_v40, %v3993_v30 }
 0x5f1   : > { %v4048_v5 = vmul.f32 %v7270_v19, %v3994_v16 }
 0x5f2   : > { %v4069_v27 = vadd.f32 %v7280_v56, %v4047_v54 }
 0x5f3   : > { %v4070_v3 = vadd.f32 %v7273_v20, %v4048_v5  ;;  %v3933_v0 = vpop.f32.mrf.mxu2  ;;  %v3974_v7 = vpop.f32.mrf.mxu3 }
 0x5f4   : > { %v4085_v62 = vmax.f32 %v4069_v27, 0.0  ;;  %v3975_v48 = vadd.f32 %v3974_v7, %v3933_v0  ;;  %v3854_v55 = vpop.f32.mrf.mxu0  ;;  %v3895_v25 = vpop.f32.mrf.mxu1 }
 0x5f5   : > { %v4086_v9 = vmax.f32 %v4070_v3, 0.0  ;;  %v3896_v28 = vadd.f32 %v3895_v25, %v3854_v55 }
 0x5f6   : > { %4101 = vst [vmem:[%s5032_s14 + $0x38] sm:$0xff] %v4085_v62  ;;  %v3995_v57 = vadd.f32 %v3975_v48, %v7155_v21 }
 0x5f7   : > { %4102 = vst [vmem:[%s5032_s14 + $0x40] sm:$0xff] %v4086_v9  ;;  %v3996_v53 = vadd.f32 %v3896_v28, %v7197_v18 }
 0x5f8   : > { %v4049_v23 = vmul.f32 %v7277_v40, %v3995_v57 }
 0x5f9   : > { %v4050_v26 = vmul.f32 %v7270_v19, %v3996_v53 }
 0x5fa   : > { %v4071_v8 = vadd.f32 %v7280_v56, %v4049_v23 }
 0x5fb   : > { %v4072_v60 = vadd.f32 %v7273_v20, %v4050_v26  ;;  %v3936_v61 = vpop.f32.mrf.mxu2  ;;  %v3977_v37 = vpop.f32.mrf.mxu3 }
 0x5fc   : > { %v4087_v31 = vmax.f32 %v4071_v8, 0.0  ;;  %v3978_v43 = vadd.f32 %v3977_v37, %v3936_v61  ;;  %v3857_v46 = vpop.f32.mrf.mxu0  ;;  %v3898_v11 = vpop.f32.mrf.mxu1 }
 0x5fd   : > { %v4088_v33 = vmax.f32 %v4072_v60, 0.0  ;;  %v3899_v21 = vadd.f32 %v3898_v11, %v3857_v46 }
 0x5fe   : > { %4103 = vst [vmem:[%s5032_s14 + $0x48] sm:$0xff] %v4087_v31  ;;  %v3997_v18 = vadd.f32 %v3978_v43, %v7188_v49 }
 0x5ff   : > { %4104 = vst [vmem:[%s5032_s14 + $0x50] sm:$0xff] %v4088_v33  ;;  %v3998_v14 = vadd.f32 %v3899_v21, %v7209_v47 }
 0x600   : > { %v4051_v2 = vmul.f32 %v7277_v40, %v3997_v18 }
 0x601   : > { %v4052_v39 = vmul.f32 %v7270_v19, %v3998_v14 }
 0x602   : > { %v4073_v44 = vadd.f32 %v7280_v56, %v4051_v2 }
 0x603   : > { %v4074_v59 = vadd.f32 %v7273_v20, %v4052_v39  ;;  %v3939_v12 = vpop.f32.mrf.mxu2  ;;  %v3980_v32 = vpop.f32.mrf.mxu3 }
 0x604   : > { %v4089_v1 = vmax.f32 %v4073_v44, 0.0  ;;  %v3981_v58 = vadd.f32 %v3980_v32, %v3939_v12  ;;  %v3860_v6 = vpop.f32.mrf.mxu0  ;;  %v3901_v15 = vpop.f32.mrf.mxu1 }
 0x605   : > { %v4090_v49 = vmax.f32 %v4074_v59, 0.0  ;;  %v3902_v41 = vadd.f32 %v3901_v15, %v3860_v6 }
 0x606   : > { %4105 = vst [vmem:[%s5032_s14 + $0x58] sm:$0xff] %v4089_v1  ;;  %v3999_v47 = vadd.f32 %v3981_v58, %v7203_v29 }
 0x607   : > { %4106 = vst [vmem:[%s5032_s14 + $0x60] sm:$0xff] %v4090_v49  ;;  %v4000_v13 = vadd.f32 %v3902_v41, %v7219_v52 }
 0x608   : > { %v4053_v10 = vmul.f32 %v7277_v40, %v3999_v47 }
 0x609   : > { %v4054_v50 = vmul.f32 %v7270_v19, %v4000_v13 }
 0x60a   : > { %v4075_v35 = vadd.f32 %v7280_v56, %v4053_v10 }
 0x60b   : > { %v4076_v36 = vadd.f32 %v7273_v20, %v4054_v50  ;;  %v3942_v63 = vpop.f32.mrf.mxu2  ;;  %v3983_v17 = vpop.f32.mrf.mxu3 }
 0x60c   : > { %v4091_v42 = vmax.f32 %v4075_v35, 0.0  ;;  %v3984_v22 = vadd.f32 %v3983_v17, %v3942_v63 }
 0x60d   : > { %v4092_v4 = vmax.f32 %v4076_v36, 0.0 }
 0x60e   : > { %4107 = vst [vmem:[%s5032_s14 + $0x68] sm:$0xff] %v4091_v42  ;;  %v4001_v29 = vadd.f32 %v3984_v22, %v7213_v34 }
 0x60f   : > { %4108 = vst [vmem:[%s5032_s14 + $0x70] sm:$0xff] %v4092_v4 }
 0x610   : > { %v4055_v52 = vmul.f32 %v7277_v40, %v4001_v29 }
 0x612   : > { %v4077_v51 = vadd.f32 %v7280_v56, %v4055_v52 }
 0x614   : > { %v4093_v24 = vmax.f32 %v4077_v51, 0.0 }
 0x616   : > { %4109 = vst [vmem:[%s5032_s14 + $0x78] sm:$0xff] %v4093_v24 }
 0x617 PF: > { %s23_s29 = sadd.s32 1, %s4918_s29   ;;  %s7477_s25 = sld [smem:[#allocation5_spill]] }
 0x618   : > { %p20_p8 = scmp.ge.s32.totalorder %s23_s29, 10   ;;  %s7478_s26 = sld [smem:[#allocation6_spill]] }
 0x619   : > { %s7479_s27 = sld [smem:[#allocation7_spill]] }
 0x61a   : > { %s7480_s28 = sld [smem:[#allocation8_spill]]  ;;  %22 = sbr.rel (!%p20_p8) target bundleno = 3 (0x3), region = 128 }

// kernel: deeplab_head_forward.3
= control target key start
LH: loop header
LB: loop body
LE: loop exit
PB: predicated region body
PF: predicated region fallthrough
CT: control target
= control target key end

     0   :  { %s4534_s21 = smov 0   ;;  %s4536_s22 = smov 0   ;;  %s7948_s0 = inlined_call_operand.vmem [shape: f32[2,18,18,256], index: 0, kind: input, shape index: {}]   ;;  %s7949_s1 = inlined_call_operand.vmem [shape: f32[9,256,256], index: 1, kind: input, shape index: {}]   ;;  %s7950_s2 = inlined_call_operand.vmem [shape: f32[1,256], index: 2, kind: input, shape index: {}]   ;;  %s7951_s3 = inlined_call_operand.vmem [shape: f32[1,256], index: 3, kind: input, shape index: {}]   ;;  %s7952_s4 = inlined_call_operand.vmem [shape: f32[256,128], index: 4, kind: input, shape index: {}]   ;;  %s7953_s5 = inlined_call_operand.vmem [shape: f32[1,128], index: 5, kind: input, shape index: {}]   ;;  %s7954_s6 = inlined_call_operand.vmem [shape: f32[2,16,16,128], index: 6, kind: output, shape index: {}]  }
   0x1   :  { %s4538_s23 = smov 0   ;;  %s4540_s24 = smov 0  }
   0x2   :  { %s4542_s25 = smov 0  }
   0x3 LB: > { %s25_s26 = sadd.s32 1, %s4489_s23  ;;  %s28_s27 = sadd.s32 1, %s4493_s24  ;;  %s4497_s25 = sphi %s4542_s25, %s16_s25   ;;  %s4493_s24 = sphi %s4540_s24, %s8122_s24   ;;  %s4489_s23 = sphi %s4538_s23, %s8121_s23   ;;  %s4485_s22 = sphi %s4536_s22, %s8120_s22   ;;  %s4481_s21 = sphi %s4534_s21, %s8119_s21  }
   0x4   : > { %p26_p0 = scmp.ge.s32.totalorder %s25_s26, 4  ;;  %p3729_p1 = scmp.ge.s32.totalorder %s4497_s25, 1 }
   0x5   : > { %p226_p2 = scmp.lt.s32.totalorder %s4497_s25, 9 }
   0x6   : > { %s8124_s26 = smov (%p26_p0, %s25_s26), 0  ;;  %s8126_s27 = smov (!%p26_p0, %s28_s27), %s4493_s24 }
   0x7   : > { %p227_p3 = pnand %p3729_p1, %p226_p2  ;;  %p30_p4 = scmp.ge.s32.totalorder %s8126_s27, 2 }
   0x9   : > { %s8128_s27 = smov (%p30_p4, %s8126_s27), 0  ;;  %230 = sbr.rel (%p227_p3) target bundleno = 926 (0x39e), region = 44 }
   0xe   : > { %v327_v0 = vld [vmem:[%s7949_s1 + $0xf0] sm:$0xff]  ;;  %v325_v2 = vld [vmem:[%s7949_s1 + $0xe0] sm:$0xff]  ;;  %p261_p5 = scmp.lt.s32.totalorder %s4485_s22, 1  ;;  %s4384_s30 = smul.u32 192, %s4481_s21  ;;  %v328_v36 = vld [vmem:[%s7949_s1 + $0xf8] sm:$0xff]  ;;  %vm589_vm0 = vcmask 1046528  }
   0xf   : > { %v359_v1 = vld [vmem:[%s7949_s1 + $0x1f0] sm:$0xff]  ;;  %361 = vmatpush.msra.mxu0 %v327_v0  ;;  %4385 = vmatpush.msra.mxu2 %v327_v0  ;;  %v357_v3 = vld [vmem:[%s7949_s1 + $0x1e0] sm:$0xff]  ;;  %v360_v37 = vld [vmem:[%s7949_s1 + $0x1f8] sm:$0xff]  ;;  %vm971_vm1 = vcmask 1045504  }
  0x10   : > { %402 = vmatpush.msra.mxu1 %v359_v1  ;;  %4401 = vmatpush.msra.mxu3 %v359_v1  ;;  %v323_v4 = vld [vmem:[%s7949_s1 + $0xd0] sm:$0xff]  ;;  %v321_v6 = vld [vmem:[%s7949_s1 + $0xc0] sm:$0xff]  ;;  %s8130_s22 = smov (!%p261_p5, %s4485_s22), 1  ;;  %v326_v40 = vld [vmem:[%s7949_s1 + $0xe8] sm:$0xff] }
  0x11   : > { %362 = vmatpush.msra.mxu0 %v325_v2  ;;  %4386 = vmatpush.msra.mxu2 %v325_v2  ;;  %v355_v5 = vld [vmem:[%s7949_s1 + $0x1d0] sm:$0xff]  ;;  %v353_v7 = vld [vmem:[%s7949_s1 + $0x1c0] sm:$0xff]  ;;  %s4417_s16 = smul.u32 864, %s8130_s22  ;;  %v358_v41 = vld [vmem:[%s7949_s1 + $0x1e8] sm:$0xff]  ;;  %s3733_s7 = sshll.u32 %s8130_s22, 5 }
  0x12   : > { %403 = vmatpush.msra.mxu1 %v357_v3  ;;  %4402 = vmatpush.msra.mxu3 %v357_v3  ;;  %v319_v8 = vld [vmem:[%s7949_s1 + $0xb0] sm:$0xff]  ;;  %v317_v10 = vld [vmem:[%s7949_s1 + $0xa0] sm:$0xff]  ;;  %v324_v44 = vld [vmem:[%s7949_s1 + $0xd8] sm:$0xff] }
  0x13   : > { %363 = vmatpush.msra.mxu0 %v323_v4  ;;  %4387 = vmatpush.msra.mxu2 %v323_v4  ;;  %v351_v9 = vld [vmem:[%s7949_s1 + $0x1b0] sm:$0xff]  ;;  %v349_v11 = vld [vmem:[%s7949_s1 + $0x1a0] sm:$0xff]  ;;  %s265_s11 = scalar_lea.vmem %s7948_s0, %s4417_s16  ;;  %v356_v45 = vld [vmem:[%s7949_s1 + $0x1d8] sm:$0xff] }
  0x14   : > { %404 = vmatpush.msra.mxu1 %v355_v5  ;;  %4403 = vmatpush.msra.mxu3 %v355_v5  ;;  %v315_v12 = vld [vmem:[%s7949_s1 + $0x90] sm:$0xff]  ;;  %v313_v14 = vld [vmem:[%s7949_s1 + $0x80] sm:$0xff]  ;;  %s4667_s19 = scalar_lea.vmem %s265_s11, %s4384_s30  ;;  %v322_v48 = vld [vmem:[%s7949_s1 + $0xc8] sm:$0xff] }
  0x15   : > { %364 = vmatpush.msra.mxu0 %v321_v6  ;;  %4388 = vmatpush.msra.mxu2 %v321_v6  ;;  %v347_v13 = vld [vmem:[%s7949_s1 + $0x190] sm:$0xff]  ;;  %v345_v15 = vld [vmem:[%s7949_s1 + $0x180] sm:$0xff]  ;;  %v4682_v34 = vld [vmem:[%s4667_s19 + $0x8] sm:$0xff] }
  0x16   : > { %405 = vmatpush.msra.mxu1 %v353_v7  ;;  %4404 = vmatpush.msra.mxu3 %v353_v7  ;;  %v311_v16 = vld [vmem:[%s7949_s1 + $0x70] sm:$0xff]  ;;  %v309_v18 = vld [vmem:[%s7949_s1 + $0x60] sm:$0xff]  ;;  %v4685_v35 = vld [vmem:[%s4667_s19 + $0x68] sm:$0xff] }
  0x17   : > { %365 = vmatpush.msra.mxu0 %v319_v8  ;;  %4389 = vmatpush.msra.mxu2 %v319_v8  ;;  %v343_v17 = vld [vmem:[%s7949_s1 + $0x170] sm:$0xff]  ;;  %v341_v19 = vld [vmem:[%s7949_s1 + $0x160] sm:$0xff]  ;;  %v354_v49 = vld [vmem:[%s7949_s1 + $0x1c8] sm:$0xff] }
  0x18   : > { %406 = vmatpush.msra.mxu1 %v351_v9  ;;  %4405 = vmatpush.msra.mxu3 %v351_v9  ;;  %v307_v20 = vld [vmem:[%s7949_s1 + $0x50] sm:$0xff]  ;;  %v305_v22 = vld [vmem:[%s7949_s1 + $0x40] sm:$0xff]  ;;  %v4746_v54 = vld [vmem:[%s4667_s19 + $0x18] sm:$0xff] }
  0x19   : > { %366 = vmatpush.msra.mxu0 %v317_v10  ;;  %4390 = vmatpush.msra.mxu2 %v317_v10  ;;  %v339_v21 = vld [vmem:[%s7949_s1 + $0x150] sm:$0xff]  ;;  %v337_v23 = vld [vmem:[%s7949_s1 + $0x140] sm:$0xff]  ;;  %v4749_v55 = vld [vmem:[%s4667_s19 + $0x78] sm:$0xff] }
  0x1a   : > { %407 = vmatpush.msra.mxu1 %v349_v11  ;;  %4406 = vmatpush.msra.mxu3 %v349_v11  ;;  %v303_v24 = vld [vmem:[%s7949_s1 + $0x30] sm:$0xff]  ;;  %v301_v26 = vld [vmem:[%s7949_s1 + $0x20] sm:$0xff]  ;;  %v320_v56 = vld [vmem:[%s7949_s1 + $0xb8] sm:$0xff] }
  0x1b   : > { %367 = vmatpush.msra.mxu0 %v315_v12  ;;  %4391 = vmatpush.msra.mxu2 %v315_v12  ;;  %v335_v25 = vld [vmem:[%s7949_s1 + $0x130] sm:$0xff]  ;;  %v333_v27 = vld [vmem:[%s7949_s1 + $0x120] sm:$0xff]  ;;  %v352_v57 = vld [vmem:[%s7949_s1 + $0x1b8] sm:$0xff] }
  0x1c   : > { %408 = vmatpush.msra.mxu1 %v347_v13  ;;  %4407 = vmatpush.msra.mxu3 %v347_v13  ;;  %v299_v28 = vld [vmem:[%s7949_s1 + $0x10] sm:$0xff]  ;;  %v297_v30 = vld [vmem:[%s7949_s1] sm:$0xff]  ;;  %v318_v60 = vld [vmem:[%s7949_s1 + $0xa8] sm:$0xff] }
  0x1d   : > { %368 = vmatpush.msra.mxu0 %v313_v14  ;;  %4392 = vmatpush.msra.mxu2 %v313_v14  ;;  %v331_v29 = vld [vmem:[%s7949_s1 + $0x110] sm:$0xff]  ;;  %v329_v31 = vld [vmem:[%s7949_s1 + $0x100] sm:$0xff]  ;;  %v350_v61 = vld [vmem:[%s7949_s1 + $0x1a8] sm:$0xff] }
  0x1e   : > { %409 = vmatpush.msra.mxu1 %v345_v15  ;;  %4408 = vmatpush.msra.mxu3 %v345_v15  ;;  %v4676_v32 = vld [vmem:[%s4667_s19] sm:$0xff]  ;;  %v3768_v38 = vld [vmem:[%s7949_s1 + $0x2f0] sm:$0xff]  ;;  %v316_v0 = vld [vmem:[%s7949_s1 + $0x98] sm:$0xff] }
  0x1f   : > { %369 = vmatpush.msra.mxu0 %v311_v16  ;;  %4393 = vmatpush.msra.mxu2 %v311_v16  ;;  %v4679_v33 = vld [vmem:[%s4667_s19 + $0x60] sm:$0xff]  ;;  %v3800_v39 = vld [vmem:[%s7949_s1 + $0x3f0] sm:$0xff]  ;;  %v348_v1 = vld [vmem:[%s7949_s1 + $0x198] sm:$0xff] }
  0x20   : > { %410 = vmatpush.msra.mxu1 %v343_v17  ;;  %4409 = vmatpush.msra.mxu3 %v343_v17  ;;  %v3766_v42 = vld [vmem:[%s7949_s1 + $0x2e0] sm:$0xff]  ;;  %v3764_v46 = vld [vmem:[%s7949_s1 + $0x2d0] sm:$0xff]  ;;  %v314_v4 = vld [vmem:[%s7949_s1 + $0x88] sm:$0xff] }
  0x21   : > { %370 = vmatpush.msra.mxu0 %v309_v18  ;;  %4394 = vmatpush.msra.mxu2 %v309_v18  ;;  %v3798_v43 = vld [vmem:[%s7949_s1 + $0x3e0] sm:$0xff]  ;;  %v3796_v47 = vld [vmem:[%s7949_s1 + $0x3d0] sm:$0xff]  ;;  %v346_v5 = vld [vmem:[%s7949_s1 + $0x188] sm:$0xff] }
  0x22   : > { %411 = vmatpush.msra.mxu1 %v341_v19  ;;  %4410 = vmatpush.msra.mxu3 %v341_v19  ;;  %v3762_v50 = vld [vmem:[%s7949_s1 + $0x2c0] sm:$0xff]  ;;  %v4740_v52 = vld [vmem:[%s4667_s19 + $0x10] sm:$0xff]  ;;  %v4810_v10 = vld [vmem:[%s4667_s19 + $0x38] sm:$0xff] }
  0x23   : > { %371 = vmatpush.msra.mxu0 %v307_v20  ;;  %4395 = vmatpush.msra.mxu2 %v307_v20  ;;  %v3794_v51 = vld [vmem:[%s7949_s1 + $0x3c0] sm:$0xff]  ;;  %v4743_v53 = vld [vmem:[%s4667_s19 + $0x70] sm:$0xff]  ;;  %v4813_v11 = vld [vmem:[%s4667_s19 + $0x98] sm:$0xff] }
  0x24   : > { %412 = vmatpush.msra.mxu1 %v339_v21  ;;  %4411 = vmatpush.msra.mxu3 %v339_v21  ;;  %v3760_v58 = vld [vmem:[%s7949_s1 + $0x2b0] sm:$0xff]  ;;  %v3758_v62 = vld [vmem:[%s7949_s1 + $0x2a0] sm:$0xff]  ;;  %v312_v12 = vld [vmem:[%s7949_s1 + $0x78] sm:$0xff] }
  0x25   : > { %372 = vmatpush.msra.mxu0 %v305_v22  ;;  %4396 = vmatpush.msra.mxu2 %v305_v22  ;;  %v3792_v59 = vld [vmem:[%s7949_s1 + $0x3b0] sm:$0xff]  ;;  %v3790_v63 = vld [vmem:[%s7949_s1 + $0x3a0] sm:$0xff]  ;;  %v344_v13 = vld [vmem:[%s7949_s1 + $0x178] sm:$0xff] }
  0x26   : > { %413 = vmatpush.msra.mxu1 %v337_v23  ;;  %4412 = vmatpush.msra.mxu3 %v337_v23  ;;  %v3756_v2 = vld [vmem:[%s7949_s1 + $0x290] sm:$0xff]  ;;  %v3754_v6 = vld [vmem:[%s7949_s1 + $0x280] sm:$0xff]  ;;  %v310_v16 = vld [vmem:[%s7949_s1 + $0x68] sm:$0xff] }
  0x27   : > { %373 = vmatpush.msra.mxu0 %v303_v24  ;;  %4397 = vmatpush.msra.mxu2 %v303_v24  ;;  %v3788_v3 = vld [vmem:[%s7949_s1 + $0x390] sm:$0xff]  ;;  %v3786_v7 = vld [vmem:[%s7949_s1 + $0x380] sm:$0xff]  ;;  %v342_v17 = vld [vmem:[%s7949_s1 + $0x168] sm:$0xff] }
  0x28   : > { %414 = vmatpush.msra.mxu1 %v335_v25  ;;  %4413 = vmatpush.msra.mxu3 %v335_v25  ;;  %v4804_v8 = vld [vmem:[%s4667_s19 + $0x30] sm:$0xff]  ;;  %v3750_v18 = vld [vmem:[%s7949_s1 + $0x260] sm:$0xff]  ;;  %v308_v20 = vld [vmem:[%s7949_s1 + $0x58] sm:$0xff] }
  0x29   : > { %374 = vmatpush.msra.mxu0 %v301_v26  ;;  %4398 = vmatpush.msra.mxu2 %v301_v26  ;;  %v4807_v9 = vld [vmem:[%s4667_s19 + $0x90] sm:$0xff]  ;;  %v3782_v19 = vld [vmem:[%s7949_s1 + $0x360] sm:$0xff]  ;;  %v340_v21 = vld [vmem:[%s7949_s1 + $0x158] sm:$0xff] }
  0x2a   : > { %415 = vmatpush.msra.mxu1 %v333_v27  ;;  %4414 = vmatpush.msra.mxu3 %v333_v27  ;;  %v3752_v14 = vld [vmem:[%s7949_s1 + $0x270] sm:$0xff]  ;;  %v306_v24 = vld [vmem:[%s7949_s1 + $0x48] sm:$0xff]  ;;  %v3746_v26 = vld [vmem:[%s7949_s1 + $0x240] sm:$0xff] }
  0x2b   : > { %375 = vmatpush.msra.mxu0 %v299_v28  ;;  %4399 = vmatpush.msra.mxu2 %v299_v28  ;;  %v3784_v15 = vld [vmem:[%s7949_s1 + $0x370] sm:$0xff]  ;;  %v338_v25 = vld [vmem:[%s7949_s1 + $0x148] sm:$0xff]  ;;  %v3778_v27 = vld [vmem:[%s7949_s1 + $0x340] sm:$0xff] }
  0x2c   : > { %416 = vmatpush.msra.mxu1 %v331_v29  ;;  %4415 = vmatpush.msra.mxu3 %v331_v29  ;;  %v3748_v22 = vld [vmem:[%s7949_s1 + $0x250] sm:$0xff]  ;;  %v4868_v28 = vld [vmem:[%s4667_s19 + $0x40] sm:$0xff] }
  0x2d   : > { %376 = vmatpush.msra.mxu0 %v297_v30  ;;  %4400 = vmatpush.msra.mxu2 %v297_v30  ;;  %v3780_v23 = vld [vmem:[%s7949_s1 + $0x350] sm:$0xff]  ;;  %v4871_v29 = vld [vmem:[%s4667_s19 + $0xa0] sm:$0xff]  ;;  %v4874_v30 = vld [vmem:[%s4667_s19 + $0x48] sm:$0xff] }
  0x2e   : > { %417 = vmatpush.msra.mxu1 %v329_v31  ;;  %4416 = vmatpush.msra.mxu3 %v329_v31  ;;  %v4877_v31 = vld [vmem:[%s4667_s19 + $0xa8] sm:$0xff] }
  0x2f   : > { %377 = vmatmul.f32.vlgmr.msra.gmra.mxu0 %v4676_v32  ;;  %389 = vmatmul.f32.vlgmr.msra.gmra.mxu2 %v4679_v33 }
  0x30   : > { %418 = vmatmul.f32.vlgmr.msra.gmra.mxu1 %v4682_v34  ;;  %430 = vmatmul.f32.vlgmr.msra.gmra.mxu3 %v4685_v35 }
  0x31   : > { %443 = vmatpush.msrb.mxu2 %v328_v36  ;;  %484 = vmatpush.msrb.mxu3 %v360_v37  ;;  %v304_v36 = vld [vmem:[%s7949_s1 + $0x38] sm:$0xff] }
  0x32   : > { %711 = vmatpush.msrb.mxu0 %v3768_v38  ;;  %752 = vmatpush.msrb.mxu1 %v3800_v39  ;;  %v336_v37 = vld [vmem:[%s7949_s1 + $0x138] sm:$0xff]  ;;  %v3744_v38 = vld [vmem:[%s7949_s1 + $0x230] sm:$0xff] }
  0x33   : > { %444 = vmatpush.msrb.mxu2 %v326_v40  ;;  %485 = vmatpush.msrb.mxu3 %v358_v41  ;;  %v3776_v39 = vld [vmem:[%s7949_s1 + $0x330] sm:$0xff]  ;;  %v302_v40 = vld [vmem:[%s7949_s1 + $0x28] sm:$0xff] }
  0x34   : > { %712 = vmatpush.msrb.mxu0 %v3766_v42  ;;  %753 = vmatpush.msrb.mxu1 %v3798_v43  ;;  %v334_v41 = vld [vmem:[%s7949_s1 + $0x128] sm:$0xff]  ;;  %v541_v42 = vld [vmem:[%s4667_s19] sm:$0xfe] }
  0x35   : > { %445 = vmatpush.msrb.mxu2 %v324_v44  ;;  %486 = vmatpush.msrb.mxu3 %v356_v45  ;;  %v542_v43 = vld [vmem:[%s4667_s19 + $0x8] sm:$0xfe]  ;;  %v3742_v44 = vld [vmem:[%s7949_s1 + $0x220] sm:$0xff] }
  0x36   : > { %713 = vmatpush.msrb.mxu0 %v3764_v46  ;;  %754 = vmatpush.msrb.mxu1 %v3796_v47  ;;  %v3774_v45 = vld [vmem:[%s7949_s1 + $0x320] sm:$0xff]  ;;  %v300_v46 = vld [vmem:[%s7949_s1 + $0x18] sm:$0xff] }
  0x37   : > { %446 = vmatpush.msrb.mxu2 %v322_v48  ;;  %487 = vmatpush.msrb.mxu3 %v354_v49  ;;  %v332_v47 = vld [vmem:[%s7949_s1 + $0x118] sm:$0xff]  ;;  %v3740_v48 = vld [vmem:[%s7949_s1 + $0x210] sm:$0xff] }
  0x38   : > { %714 = vmatpush.msrb.mxu0 %v3762_v50  ;;  %755 = vmatpush.msrb.mxu1 %v3794_v51  ;;  %v3772_v49 = vld [vmem:[%s7949_s1 + $0x310] sm:$0xff]  ;;  %v590_v50 = vrot.slane %v541_v42, 1  ;;  %v591_v51 = vrot.slane %v4740_v52, 1  ;;  %v3759_v42 = vld [vmem:[%s7949_s1 + $0x2a8] sm:$0xff] }
  0x39   : > { %380 = vmatmul.f32.gmra.mxu0 %v4740_v52  ;;  %392 = vmatmul.f32.gmra.mxu2 %v4743_v53 }
  0x3a   : > { %421 = vmatmul.f32.gmra.mxu1 %v4746_v54  ;;  %433 = vmatmul.f32.gmra.mxu3 %v4749_v55 }
  0x3b   : > { %447 = vmatpush.msrb.mxu2 %v320_v56  ;;  %488 = vmatpush.msrb.mxu3 %v352_v57  ;;  %v593_v56 = vrot.slane %v542_v43, 1  ;;  %v594_v57 = vrot.slane %v4746_v54, 1  ;;  %v3791_v43 = vld [vmem:[%s7949_s1 + $0x3a8] sm:$0xff] }
  0x3c   : > { %715 = vmatpush.msrb.mxu0 %v3760_v58  ;;  %756 = vmatpush.msrb.mxu1 %v3792_v59  ;;  %v298_v58 = vld [vmem:[%s7949_s1 + $0x8] sm:$0xff] }
  0x3d   : > { %448 = vmatpush.msrb.mxu2 %v318_v60  ;;  %489 = vmatpush.msrb.mxu3 %v350_v61  ;;  %v330_v59 = vld [vmem:[%s7949_s1 + $0x108] sm:$0xff]  ;;  %v3738_v60 = vld [vmem:[%s7949_s1 + $0x200] sm:$0xff] }
  0x3e   : > { %716 = vmatpush.msrb.mxu0 %v3758_v62  ;;  %757 = vmatpush.msrb.mxu1 %v3790_v63  ;;  %v3770_v61 = vld [vmem:[%s7949_s1 + $0x300] sm:$0xff]  ;;  %v4936_v62 = vsel %vm589_vm0, %v590_v50, %v591_v51  ;;  %v4939_v63 = vsel %vm589_vm0, %v593_v56, %v594_v57  ;;  %v3757_v50 = vld [vmem:[%s7949_s1 + $0x298] sm:$0xff]  ;;  %v3820_v56 = vld [vmem:[%s7949_s1 + $0x490] sm:$0xff] }
  0x3f   : > { %449 = vmatpush.msrb.mxu2 %v316_v0  ;;  %490 = vmatpush.msrb.mxu3 %v348_v1  ;;  %v3769_v0 = vld [vmem:[%s7949_s1 + $0x2f8] sm:$0xff] }
  0x40   : > { %717 = vmatpush.msrb.mxu0 %v3756_v2  ;;  %758 = vmatpush.msrb.mxu1 %v3788_v3  ;;  %v3801_v1 = vld [vmem:[%s7949_s1 + $0x3f8] sm:$0xff]  ;;  %v545_v2 = vld [vmem:[%s4667_s19 + $0x20] sm:$0x1]  ;;  %v546_v3 = vld [vmem:[%s4667_s19 + $0x28] sm:$0x1] }
  0x41   : > { %450 = vmatpush.msrb.mxu2 %v314_v4  ;;  %491 = vmatpush.msrb.mxu3 %v346_v5  ;;  %v3767_v4 = vld [vmem:[%s7949_s1 + $0x2e8] sm:$0xff] }
  0x42   : > { %718 = vmatpush.msrb.mxu0 %v3754_v6  ;;  %759 = vmatpush.msrb.mxu1 %v3786_v7  ;;  %v3799_v5 = vld [vmem:[%s7949_s1 + $0x3e8] sm:$0xff]  ;;  %v3832_v6 = vld [vmem:[%s7949_s1 + $0x4f0] sm:$0xff] }
  0x43   : > { %383 = vmatmul.f32.gmra.mxu0 %v4804_v8  ;;  %395 = vmatmul.f32.gmra.mxu2 %v4807_v9  ;;  %v3864_v7 = vld [vmem:[%s7949_s1 + $0x5f0] sm:$0xff] }
  0x44   : > { %424 = vmatmul.f32.gmra.mxu1 %v4810_v10  ;;  %436 = vmatmul.f32.gmra.mxu3 %v4813_v11 }
  0x45   : > { %451 = vmatpush.msrb.mxu2 %v312_v12  ;;  %492 = vmatpush.msrb.mxu3 %v344_v13  ;;  %v3830_v12 = vld [vmem:[%s7949_s1 + $0x4e0] sm:$0xff] }
  0x46   : > { %719 = vmatpush.msrb.mxu0 %v3752_v14  ;;  %760 = vmatpush.msrb.mxu1 %v3784_v15  ;;  %v3862_v13 = vld [vmem:[%s7949_s1 + $0x5e0] sm:$0xff]  ;;  %v3765_v14 = vld [vmem:[%s7949_s1 + $0x2d8] sm:$0xff] }
  0x47   : > { %452 = vmatpush.msrb.mxu2 %v310_v16  ;;  %493 = vmatpush.msrb.mxu3 %v342_v17  ;;  %v3797_v15 = vld [vmem:[%s7949_s1 + $0x3d8] sm:$0xff]  ;;  %v3828_v16 = vld [vmem:[%s7949_s1 + $0x4d0] sm:$0xff] }
  0x48   : > { %720 = vmatpush.msrb.mxu0 %v3750_v18  ;;  %761 = vmatpush.msrb.mxu1 %v3782_v19  ;;  %v3860_v17 = vld [vmem:[%s7949_s1 + $0x5d0] sm:$0xff] }
  0x49   : > { %453 = vmatpush.msrb.mxu2 %v308_v20  ;;  %494 = vmatpush.msrb.mxu3 %v340_v21  ;;  %v3763_v20 = vld [vmem:[%s7949_s1 + $0x2c8] sm:$0xff] }
  0x4a   : > { %721 = vmatpush.msrb.mxu0 %v3748_v22  ;;  %762 = vmatpush.msrb.mxu1 %v3780_v23  ;;  %v3795_v21 = vld [vmem:[%s7949_s1 + $0x3c8] sm:$0xff]  ;;  %v547_v22 = vld [vmem:[%s4667_s19 + $0x30] sm:$0xfe]  ;;  %v548_v23 = vld [vmem:[%s4667_s19 + $0x38] sm:$0xfe] }
  0x4b   : > { %454 = vmatpush.msrb.mxu2 %v306_v24  ;;  %495 = vmatpush.msrb.mxu3 %v338_v25  ;;  %v3826_v24 = vld [vmem:[%s7949_s1 + $0x4c0] sm:$0xff] }
  0x4c   : > { %722 = vmatpush.msrb.mxu0 %v3746_v26  ;;  %763 = vmatpush.msrb.mxu1 %v3778_v27  ;;  %v3858_v25 = vld [vmem:[%s7949_s1 + $0x5c0] sm:$0xff]  ;;  %v3761_v26 = vld [vmem:[%s7949_s1 + $0x2b8] sm:$0xff] }
  0x4d   : > { %386 = vmatmul.f32.gmra.mxu0 %v4868_v28  ;;  %398 = vmatmul.f32.gmra.mxu2 %v4871_v29  ;;  %v3793_v27 = vld [vmem:[%s7949_s1 + $0x3b8] sm:$0xff] }
  0x4e   : > { %427 = vmatmul.f32.gmra.mxu1 %v4874_v30  ;;  %439 = vmatmul.f32.gmra.mxu3 %v4877_v31 }
  0x4f   : > { %455 = vmatpush.msrb.mxu2 %v304_v36  ;;  %496 = vmatpush.msrb.mxu3 %v336_v37  ;;  %v600_v36 = vrot.slane %v547_v22, 1  ;;  %v601_v37 = vrot.slane %v4868_v28, 1  ;;  %v3812_v22 = vld [vmem:[%s7949_s1 + $0x450] sm:$0xff] }
  0x50   : > { %723 = vmatpush.msrb.mxu0 %v3744_v38  ;;  %764 = vmatpush.msrb.mxu1 %v3776_v39  ;;  %v603_v38 = vrot.slane %v548_v23, 1  ;;  %v604_v39 = vrot.slane %v4874_v30, 1  ;;  %v3844_v23 = vld [vmem:[%s7949_s1 + $0x550] sm:$0xff] }
  0x51   : > { %456 = vmatpush.msrb.mxu2 %v302_v40  ;;  %497 = vmatpush.msrb.mxu3 %v334_v41  ;;  %v3824_v40 = vld [vmem:[%s7949_s1 + $0x4b0] sm:$0xff] }
  0x52   : > { %724 = vmatpush.msrb.mxu0 %v3742_v44  ;;  %765 = vmatpush.msrb.mxu1 %v3774_v45  ;;  %v3856_v41 = vld [vmem:[%s7949_s1 + $0x5b0] sm:$0xff]  ;;  %v3822_v44 = vld [vmem:[%s7949_s1 + $0x4a0] sm:$0xff] }
  0x53   : > { %457 = vmatpush.msrb.mxu2 %v300_v46  ;;  %498 = vmatpush.msrb.mxu3 %v332_v47  ;;  %v3854_v45 = vld [vmem:[%s7949_s1 + $0x5a0] sm:$0xff]  ;;  %v5034_v46 = vsel %vm589_vm0, %v600_v36, %v601_v37  ;;  %v5037_v47 = vsel %vm589_vm0, %v603_v38, %v604_v39 }
  0x54   : > { %725 = vmatpush.msrb.mxu0 %v3740_v48  ;;  %766 = vmatpush.msrb.mxu1 %v3772_v49  ;;  %v551_v48 = vld [vmem:[%s4667_s19 + $0x50] sm:$0x1]  ;;  %v552_v49 = vld [vmem:[%s4667_s19 + $0x58] sm:$0x1]  ;;  %v557_v38 = vld [vmem:[%s4667_s19 + $0x80] sm:$0x1] }
  0x55   : > { %458 = vmatpush.msrb.mxu2 %v298_v58  ;;  %499 = vmatpush.msrb.mxu3 %v330_v59  ;;  %v3755_v58 = vld [vmem:[%s7949_s1 + $0x288] sm:$0xff]  ;;  %v608_v59 = vrot.slane %v552_v49, 1  ;;  %v3838_v49 = vld [vmem:[%s7949_s1 + $0x520] sm:$0xff] }
  0x56   : > { %726 = vmatpush.msrb.mxu0 %v3738_v60  ;;  %767 = vmatpush.msrb.mxu1 %v3770_v61  ;;  %v3818_v60 = vld [vmem:[%s7949_s1 + $0x480] sm:$0xff] }
  0x57   : > { %459 = vmatmul.f32.vlgmr.msrb.gmra.mxu2 %v4676_v32  ;;  %500 = vmatmul.f32.vlgmr.msrb.gmra.mxu3 %v4682_v34  ;;  %v596_v32 = vrot.slane %v545_v2, 1  ;;  %v598_v34 = vrot.slane %v546_v3, 1  ;;  %v3850_v61 = vld [vmem:[%s7949_s1 + $0x580] sm:$0xff]  ;;  %v3816_v2 = vld [vmem:[%s7949_s1 + $0x470] sm:$0xff] }
  0x58   : > { %727 = vmatmul.f32.vlgmr.msrb.gmra.mxu0 %v4936_v62  ;;  %768 = vmatmul.f32.vlgmr.msrb.gmra.mxu1 %v4939_v63  ;;  %v3848_v3 = vld [vmem:[%s7949_s1 + $0x570] sm:$0xff] }
  0x59   : > { %793 = vmatpush.msra.mxu2 %v3769_v0  ;;  %834 = vmatpush.msra.mxu3 %v3801_v1  ;;  %v4984_v18 = vsel %vm589_vm0, %v591_v51, %v596_v32  ;;  %v4987_v19 = vsel %vm589_vm0, %v594_v57, %v598_v34  ;;  %v3789_v51 = vld [vmem:[%s7949_s1 + $0x398] sm:$0xff]  ;;  %v3852_v57 = vld [vmem:[%s7949_s1 + $0x590] sm:$0xff]  ;;  %v554_v32 = vld [vmem:[%s4667_s19 + $0x68] sm:$0xfe] }
  0x5a   : > { %1093 = vmatpush.msra.mxu0 %v3832_v6  ;;  %1134 = vmatpush.msra.mxu1 %v3864_v7  ;;  %v3753_v0 = vld [vmem:[%s7949_s1 + $0x278] sm:$0xff]  ;;  %v553_v6 = vld [vmem:[%s4667_s19 + $0x60] sm:$0xfe]  ;;  %v3751_v34 = vld [vmem:[%s7949_s1 + $0x268] sm:$0xff] }
  0x5b   : > { %794 = vmatpush.msra.mxu2 %v3767_v4  ;;  %835 = vmatpush.msra.mxu3 %v3799_v5  ;;  %v3785_v1 = vld [vmem:[%s7949_s1 + $0x378] sm:$0xff]  ;;  %v5085_v5 = vsel %vm589_vm0, %v604_v39, %v608_v59  ;;  %v3783_v7 = vld [vmem:[%s7949_s1 + $0x368] sm:$0xff] }
  0x5c   : > { %1094 = vmatpush.msra.mxu0 %v3830_v12  ;;  %1135 = vmatpush.msra.mxu1 %v3862_v13  ;;  %v3814_v12 = vld [vmem:[%s7949_s1 + $0x460] sm:$0xff]  ;;  %v558_v39 = vld [vmem:[%s4667_s19 + $0x88] sm:$0x1]  ;;  %v560_v59 = vld [vmem:[%s4667_s19 + $0x98] sm:$0xfe] }
  0x5d   : > { %795 = vmatpush.msra.mxu2 %v3765_v14  ;;  %836 = vmatpush.msra.mxu3 %v3797_v15  ;;  %v3846_v13 = vld [vmem:[%s7949_s1 + $0x560] sm:$0xff]  ;;  %v3749_v14 = vld [vmem:[%s7949_s1 + $0x258] sm:$0xff] }
  0x5e   : > { %1095 = vmatpush.msra.mxu0 %v3828_v16  ;;  %1136 = vmatpush.msra.mxu1 %v3860_v17  ;;  %v3781_v15 = vld [vmem:[%s7949_s1 + $0x358] sm:$0xff]  ;;  %v610_v16 = vrot.slane %v553_v6, 1  ;;  %v611_v17 = vrot.slane %v4743_v53, 1 }
  0x5f   : > { %462 = vmatmul.f32.gmra.mxu2 %v4740_v52  ;;  %503 = vmatmul.f32.gmra.mxu3 %v4746_v54 }
  0x60   : > { %730 = vmatmul.f32.gmra.mxu0 %v4984_v18  ;;  %771 = vmatmul.f32.gmra.mxu1 %v4987_v19  ;;  %v5132_v36 = vsel %vm589_vm0, %v610_v16, %v611_v17  ;;  %v563_v16 = vld [vmem:[%s4667_s19 + $0xb0] sm:$0x1] }
  0x61   : > { %796 = vmatpush.msra.mxu2 %v3763_v20  ;;  %837 = vmatpush.msra.mxu3 %v3795_v21  ;;  %v613_v20 = vrot.slane %v554_v32, 1  ;;  %v614_v21 = vrot.slane %v4749_v55, 1  ;;  %v621_v32 = vrot.slane %v4871_v29, 1 }
  0x62   : > { %1096 = vmatpush.msra.mxu0 %v3826_v24  ;;  %1137 = vmatpush.msra.mxu1 %v3858_v25  ;;  %v3747_v24 = vld [vmem:[%s7949_s1 + $0x248] sm:$0xff] }
  0x63   : > { %797 = vmatpush.msra.mxu2 %v3761_v26  ;;  %838 = vmatpush.msra.mxu3 %v3793_v27  ;;  %v3779_v25 = vld [vmem:[%s7949_s1 + $0x348] sm:$0xff]  ;;  %v3810_v26 = vld [vmem:[%s7949_s1 + $0x440] sm:$0xff] }
  0x64   : > { %1097 = vmatpush.msra.mxu0 %v3824_v40  ;;  %1138 = vmatpush.msra.mxu1 %v3856_v41  ;;  %v3842_v27 = vld [vmem:[%s7949_s1 + $0x540] sm:$0xff]  ;;  %v3745_v40 = vld [vmem:[%s7949_s1 + $0x238] sm:$0xff] }
  0x65   : > { %798 = vmatpush.msra.mxu2 %v3759_v42  ;;  %839 = vmatpush.msra.mxu3 %v3791_v43  ;;  %v3777_v41 = vld [vmem:[%s7949_s1 + $0x338] sm:$0xff]  ;;  %v3808_v42 = vld [vmem:[%s7949_s1 + $0x430] sm:$0xff] }
  0x66   : > { %1098 = vmatpush.msra.mxu0 %v3822_v44  ;;  %1139 = vmatpush.msra.mxu1 %v3854_v45  ;;  %v3840_v43 = vld [vmem:[%s7949_s1 + $0x530] sm:$0xff]  ;;  %v3743_v44 = vld [vmem:[%s7949_s1 + $0x228] sm:$0xff]  ;;  %v618_v45 = vrot.slane %v558_v39, 1 }
  0x67   : > { %465 = vmatmul.f32.gmra.mxu2 %v4804_v8  ;;  %506 = vmatmul.f32.gmra.mxu3 %v4810_v10  ;;  %v3787_v8 = vld [vmem:[%s7949_s1 + $0x388] sm:$0xff]  ;;  %v606_v10 = vrot.slane %v551_v48, 1  ;;  %v3806_v48 = vld [vmem:[%s7949_s1 + $0x420] sm:$0xff] }
  0x68   : > { %733 = vmatmul.f32.gmra.mxu0 %v5034_v46  ;;  %774 = vmatmul.f32.gmra.mxu1 %v5037_v47  ;;  %v924_v39 = vld [vmem:[%s4667_s19 + $0x8] sm:$0xfc] }
  0x69   : > { %799 = vmatpush.msra.mxu2 %v3757_v50  ;;  %840 = vmatpush.msra.mxu3 %v3789_v51  ;;  %v5082_v4 = vsel %vm589_vm0, %v601_v37, %v606_v10  ;;  %v5135_v37 = vsel %vm589_vm0, %v613_v20, %v614_v21  ;;  %v3741_v50 = vld [vmem:[%s7949_s1 + $0x218] sm:$0xff]  ;;  %v559_v10 = vld [vmem:[%s4667_s19 + $0x90] sm:$0xfe] }
  0x6a   : > { %1099 = vmatpush.msra.mxu0 %v3820_v56  ;;  %1140 = vmatpush.msra.mxu1 %v3852_v57  ;;  %v3773_v51 = vld [vmem:[%s7949_s1 + $0x318] sm:$0xff]  ;;  %v3804_v56 = vld [vmem:[%s7949_s1 + $0x410] sm:$0xff]  ;;  %v620_v6 = vrot.slane %v559_v10, 1 }
  0x6b   : > { %800 = vmatpush.msra.mxu2 %v3755_v58  ;;  %841 = vmatpush.msra.mxu3 %v3787_v8  ;;  %v3836_v57 = vld [vmem:[%s7949_s1 + $0x510] sm:$0xff]  ;;  %v5183_v8 = vsel %vm589_vm0, %v614_v21, %v618_v45  ;;  %v3829_v20 = vld [vmem:[%s7949_s1 + $0x4d8] sm:$0xff]  ;;  %v976_v45 = vrot.slane %v4746_v54, 2  ;;  %v927_v54 = vld [vmem:[%s4667_s19 + $0x20] sm:$0x3] }
  0x6c   : > { %1100 = vmatpush.msra.mxu0 %v3818_v60  ;;  %1141 = vmatpush.msra.mxu1 %v3850_v61  ;;  %v3739_v60 = vld [vmem:[%s7949_s1 + $0x208] sm:$0xff]  ;;  %v3861_v21 = vld [vmem:[%s7949_s1 + $0x5d8] sm:$0xff]  ;;  %v3914_v10 = vld [vmem:[%s7949_s1 + $0x6f0] sm:$0xff] }
  0x6d   : > { %801 = vmatpush.msra.mxu2 %v3753_v0  ;;  %842 = vmatpush.msra.mxu3 %v3785_v1  ;;  %v3771_v61 = vld [vmem:[%s7949_s1 + $0x308] sm:$0xff]  ;;  %v3802_v0 = vld [vmem:[%s7949_s1 + $0x400] sm:$0xff] }
  0x6e   : > { %1101 = vmatpush.msra.mxu0 %v3816_v2  ;;  %1142 = vmatpush.msra.mxu1 %v3848_v3  ;;  %v3834_v1 = vld [vmem:[%s7949_s1 + $0x500] sm:$0xff]  ;;  %v3833_v2 = vld [vmem:[%s7949_s1 + $0x4f8] sm:$0xff] }
  0x6f   : > { %468 = vmatmul.f32.gmra.mxu2 %v4868_v28  ;;  %509 = vmatmul.f32.gmra.mxu3 %v4874_v30  ;;  %v3865_v3 = vld [vmem:[%s7949_s1 + $0x5f8] sm:$0xff] }
  0x70   : > { %736 = vmatmul.f32.gmra.mxu0 %v5082_v4  ;;  %777 = vmatmul.f32.gmra.mxu1 %v5085_v5 }
  0x71   : > { %802 = vmatpush.msra.mxu2 %v3751_v34  ;;  %843 = vmatpush.msra.mxu3 %v3783_v7  ;;  %v623_v34 = vrot.slane %v560_v59, 1  ;;  %v624_v7 = vrot.slane %v4877_v31, 1  ;;  %v978_v59 = vrot.slane %v927_v54, 2 }
  0x72   : > { %1102 = vmatpush.msra.mxu0 %v3814_v12  ;;  %1143 = vmatpush.msra.mxu1 %v3846_v13  ;;  %v3831_v12 = vld [vmem:[%s7949_s1 + $0x4e8] sm:$0xff] }
  0x73   : > { %803 = vmatpush.msra.mxu2 %v3749_v14  ;;  %844 = vmatpush.msra.mxu3 %v3781_v15  ;;  %v3863_v13 = vld [vmem:[%s7949_s1 + $0x5e8] sm:$0xff]  ;;  %v5218_v14 = vsel %vm589_vm0, %v620_v6, %v621_v32  ;;  %v5221_v15 = vsel %vm589_vm0, %v623_v34, %v624_v7  ;;  %v929_v34 = vld [vmem:[%s4667_s19 + $0x30] sm:$0xfc] }
  0x74   : > { %1103 = vmatpush.msra.mxu0 %v3812_v22  ;;  %1144 = vmatpush.msra.mxu1 %v3844_v23  ;;  %v3827_v22 = vld [vmem:[%s7949_s1 + $0x4c8] sm:$0xff] }
  0x75   : > { %804 = vmatpush.msra.mxu2 %v3747_v24  ;;  %845 = vmatpush.msra.mxu3 %v3779_v25  ;;  %v3859_v23 = vld [vmem:[%s7949_s1 + $0x5c8] sm:$0xff]  ;;  %v626_v24 = vrot.slane %v563_v16, 1  ;;  %v3813_v16 = vld [vmem:[%s7949_s1 + $0x458] sm:$0xff] }
  0x76   : > { %1104 = vmatpush.msra.mxu0 %v3810_v26  ;;  %1145 = vmatpush.msra.mxu1 %v3842_v27 }
  0x77   : > { %471 = vmatmul.f32.gmra.mxu2 %v4679_v33  ;;  %512 = vmatmul.f32.gmra.mxu3 %v4685_v35  ;;  %v3775_v33 = vld [vmem:[%s7949_s1 + $0x328] sm:$0xff]  ;;  %v616_v35 = vrot.slane %v557_v38, 1  ;;  %v5248_v26 = vsel %vm589_vm0, %v621_v32, %v626_v24  ;;  %v923_v38 = vld [vmem:[%s4667_s19] sm:$0xfc] }
  0x78   : > { %739 = vmatmul.f32.gmra.mxu0 %v5132_v36  ;;  %780 = vmatmul.f32.gmra.mxu1 %v5135_v37  ;;  %v3904_v24 = vld [vmem:[%s7949_s1 + $0x6a0] sm:$0xff] }
  0x79   : > { %805 = vmatpush.msra.mxu2 %v3745_v40  ;;  %846 = vmatpush.msra.mxu3 %v3777_v41  ;;  %v5180_v58 = vsel %vm589_vm0, %v611_v17, %v616_v35  ;;  %v564_v17 = vld [vmem:[%s4667_s19 + $0xb8] sm:$0x1]  ;;  %v3823_v40 = vld [vmem:[%s7949_s1 + $0x4a8] sm:$0xff]  ;;  %v975_v35 = vrot.slane %v924_v39, 2 }
  0x7a   : > { %1105 = vmatpush.msra.mxu0 %v3808_v42  ;;  %1146 = vmatpush.msra.mxu1 %v3840_v43  ;;  %v628_v25 = vrot.slane %v564_v17, 1  ;;  %v3855_v41 = vld [vmem:[%s7949_s1 + $0x5a8] sm:$0xff]  ;;  %v3821_v42 = vld [vmem:[%s7949_s1 + $0x498] sm:$0xff] }
  0x7b   : > { %806 = vmatpush.msra.mxu2 %v3743_v44  ;;  %847 = vmatpush.msra.mxu3 %v3775_v33  ;;  %v3853_v43 = vld [vmem:[%s7949_s1 + $0x598] sm:$0xff]  ;;  %v972_v44 = vrot.slane %v923_v38, 2  ;;  %v973_v33 = vrot.slane %v4740_v52, 2  ;;  %v5283_v52 = vsel %vm971_vm1, %v975_v35, %v976_v45  ;;  %v933_v38 = vld [vmem:[%s4667_s19 + $0x50] sm:$0x3] }
  0x7c   : > { %1106 = vmatpush.msra.mxu0 %v3806_v48  ;;  %1147 = vmatpush.msra.mxu1 %v3838_v49  ;;  %v5251_v27 = vsel %vm589_vm0, %v624_v7, %v628_v25  ;;  %v3819_v48 = vld [vmem:[%s7949_s1 + $0x488] sm:$0xff]  ;;  %v930_v7 = vld [vmem:[%s4667_s19 + $0x38] sm:$0xfc]  ;;  %v934_v39 = vld [vmem:[%s4667_s19 + $0x58] sm:$0x3] }
  0x7d   : > { %807 = vmatpush.msra.mxu2 %v3741_v50  ;;  %848 = vmatpush.msra.mxu3 %v3773_v51  ;;  %v3851_v49 = vld [vmem:[%s7949_s1 + $0x588] sm:$0xff]  ;;  %v5280_v50 = vsel %vm971_vm1, %v972_v44, %v973_v33  ;;  %v5322_v6 = vsel %vm971_vm1, %v973_v33, %v978_v59  ;;  %v3845_v17 = vld [vmem:[%s7949_s1 + $0x558] sm:$0xff]  ;;  %v990_v33 = vrot.slane %v934_v39, 2  ;;  %v3898_v35 = vld [vmem:[%s7949_s1 + $0x670] sm:$0xff] }
  0x7e   : > { %1107 = vmatpush.msra.mxu0 %v3804_v56  ;;  %1148 = vmatpush.msra.mxu1 %v3836_v57  ;;  %v928_v51 = vld [vmem:[%s4667_s19 + $0x28] sm:$0x3]  ;;  %v3817_v56 = vld [vmem:[%s7949_s1 + $0x478] sm:$0xff]  ;;  %v936_v59 = vld [vmem:[%s4667_s19 + $0x68] sm:$0xfc] }
  0x7f   : > { %474 = vmatmul.f32.gmra.mxu2 %v4743_v53  ;;  %515 = vmatmul.f32.gmra.mxu3 %v4749_v55  ;;  %v3849_v57 = vld [vmem:[%s7949_s1 + $0x578] sm:$0xff]  ;;  %v3843_v25 = vld [vmem:[%s7949_s1 + $0x548] sm:$0xff]  ;;  %v3918_v39 = vld [vmem:[%s7949_s1 + $0x710] sm:$0xff] }
  0x80   : > { %742 = vmatmul.f32.gmra.mxu0 %v5180_v58  ;;  %783 = vmatmul.f32.gmra.mxu1 %v5183_v8  ;;  %v3809_v44 = vld [vmem:[%s7949_s1 + $0x438] sm:$0xff] }
  0x81   : > { %808 = vmatpush.msra.mxu2 %v3739_v60  ;;  %849 = vmatpush.msra.mxu3 %v3771_v61  ;;  %v3912_v60 = vld [vmem:[%s7949_s1 + $0x6e0] sm:$0xff] }
  0x82   : > { %1108 = vmatpush.msra.mxu0 %v3802_v0  ;;  %1149 = vmatpush.msra.mxu1 %v3834_v1  ;;  %v3944_v61 = vld [vmem:[%s7949_s1 + $0x7e0] sm:$0xff]  ;;  %v3815_v0 = vld [vmem:[%s7949_s1 + $0x468] sm:$0xff] }
  0x83   : > { %1175 = vmatpush.msrb.mxu2 %v3833_v2  ;;  %1216 = vmatpush.msrb.mxu3 %v3865_v3  ;;  %v3847_v1 = vld [vmem:[%s7949_s1 + $0x568] sm:$0xff]  ;;  %v3910_v2 = vld [vmem:[%s7949_s1 + $0x6d0] sm:$0xff] }
  0x84   : > { %1390 = vmatpush.msrb.mxu0 %v3914_v10  ;;  %v3942_v3 = vld [vmem:[%s7949_s1 + $0x7d0] sm:$0xff]  ;;  %v935_v10 = vld [vmem:[%s4667_s19 + $0x60] sm:$0xfc] }
  0x85   : > { %1176 = vmatpush.msrb.mxu2 %v3831_v12  ;;  %1217 = vmatpush.msrb.mxu3 %v3863_v13  ;;  %v3908_v12 = vld [vmem:[%s7949_s1 + $0x6c0] sm:$0xff] }
  0x86   : > { %1391 = vmatpush.msrb.mxu0 %v3912_v60  ;;  %v3940_v13 = vld [vmem:[%s7949_s1 + $0x7c0] sm:$0xff]  ;;  %v3894_v60 = vld [vmem:[%s7949_s1 + $0x650] sm:$0xff] }
  0x87   : > { %477 = vmatmul.f32.gmra.mxu2 %v4807_v9  ;;  %518 = vmatmul.f32.gmra.mxu3 %v4813_v11  ;;  %v3825_v9 = vld [vmem:[%s7949_s1 + $0x4b8] sm:$0xff] }
  0x88   : > { %745 = vmatmul.f32.gmra.mxu0 %v5218_v14  ;;  %786 = vmatmul.f32.gmra.mxu1 %v5221_v15  ;;  %v3857_v11 = vld [vmem:[%s7949_s1 + $0x5b8] sm:$0xff] }
  0x89   : > { %1177 = vmatpush.msrb.mxu2 %v3829_v20  ;;  %1218 = vmatpush.msrb.mxu3 %v3861_v21  ;;  %v3906_v20 = vld [vmem:[%s7949_s1 + $0x6b0] sm:$0xff]  ;;  %v982_v21 = vrot.slane %v929_v34, 2 }
  0x8a   : > { %1392 = vmatpush.msrb.mxu0 %v3910_v2  ;;  %v995_v2 = vrot.slane %v936_v59, 2 }
  0x8b   : > { %1178 = vmatpush.msrb.mxu2 %v3827_v22  ;;  %1219 = vmatpush.msrb.mxu3 %v3859_v23  ;;  %v986_v22 = vrot.slane %v4874_v30, 2  ;;  %v3938_v23 = vld [vmem:[%s7949_s1 + $0x7b0] sm:$0xff]  ;;  %v3811_v30 = vld [vmem:[%s7949_s1 + $0x448] sm:$0xff] }
  0x8c   : > { %1393 = vmatpush.msrb.mxu0 %v3908_v12  ;;  %v3924_v12 = vld [vmem:[%s7949_s1 + $0x740] sm:$0xff] }
  0x8d   : > { %1179 = vmatpush.msrb.mxu2 %v3825_v9  ;;  %1220 = vmatpush.msrb.mxu3 %v3857_v11 }
  0x8e   : > { %1394 = vmatpush.msrb.mxu0 %v3906_v20  ;;  %v939_v20 = vld [vmem:[%s4667_s19 + $0x80] sm:$0x3] }
  0x8f   : > { %480 = vmatmul.f32.gmra.mxu2 %v4871_v29  ;;  %521 = vmatmul.f32.gmra.mxu3 %v4877_v31 }
  0x90   : > { %748 = vmatmul.f32.gmra.mxu0 %v5248_v26  ;;  %789 = vmatmul.f32.gmra.mxu1 %v5251_v27 }
  0x91   : > { %1180 = vmatpush.msrb.mxu2 %v3823_v40  ;;  %1221 = vmatpush.msrb.mxu3 %v3855_v41  ;;  %v3902_v40 = vld [vmem:[%s7949_s1 + $0x690] sm:$0xff] }
  0x92   : > { %1395 = vmatpush.msrb.mxu0 %v3904_v24  ;;  %v3934_v41 = vld [vmem:[%s7949_s1 + $0x790] sm:$0xff]  ;;  %v3888_v24 = vld [vmem:[%s7949_s1 + $0x620] sm:$0xff] }
  0x93   : > { %1181 = vmatpush.msrb.mxu2 %v3821_v42  ;;  %1222 = vmatpush.msrb.mxu3 %v3853_v43  ;;  %v3900_v42 = vld [vmem:[%s7949_s1 + $0x680] sm:$0xff] }
  0x94   : > { %v3932_v43 = vld [vmem:[%s7949_s1 + $0x780] sm:$0xff]  ;;  %1396 = vmatpush.msrb.mxu0 %v3902_v40  ;;  %v3913_v40 = vld [vmem:[%s7949_s1 + $0x6e8] sm:$0xff] }
  0x95   : > { %1182 = vmatpush.msrb.mxu2 %v3819_v48  ;;  %1223 = vmatpush.msrb.mxu3 %v3851_v49  ;;  %v3807_v48 = vld [vmem:[%s7949_s1 + $0x428] sm:$0xff] }
  0x96   : > { %v3839_v49 = vld [vmem:[%s7949_s1 + $0x528] sm:$0xff]  ;;  %1397 = vmatpush.msrb.mxu0 %v3900_v42 }
  0x97   : > { %809 = vmatmul.f32.vlgmr.msra.gmra.mxu2 %v4936_v62  ;;  %850 = vmatmul.f32.vlgmr.msra.gmra.mxu3 %v4939_v63  ;;  %v980_v62 = vrot.slane %v928_v51, 2  ;;  %v3946_v63 = vld [vmem:[%s7949_s1 + $0x7f0] sm:$0xff]  ;;  %v5411_v51 = vsel %vm971_vm1, %v986_v22, %v990_v33  ;;  %v942_v33 = vld [vmem:[%s4667_s19 + $0x98] sm:$0xfc] }
  0x98   : > { %1109 = vmatmul.f32.vlgmr.msra.gmra.mxu0 %v5280_v50  ;;  %1150 = vmatmul.f32.vlgmr.msra.gmra.mxu1 %v5283_v52 }
  0x99   : > { %1183 = vmatpush.msrb.mxu2 %v3817_v56  ;;  %1224 = vmatpush.msrb.mxu3 %v3849_v57  ;;  %v5325_v32 = vsel %vm971_vm1, %v976_v45, %v980_v62  ;;  %v3930_v45 = vld [vmem:[%s7949_s1 + $0x770] sm:$0xff]  ;;  %v3896_v62 = vld [vmem:[%s7949_s1 + $0x660] sm:$0xff] }
  0x9a   : > { %1431 = vmatpush.msrb.mxu1 %v3946_v63  ;;  %1398 = vmatpush.msrb.mxu0 %v3898_v35  ;;  %v3928_v63 = vld [vmem:[%s7949_s1 + $0x760] sm:$0xff] }
  0x9b   : > { %1184 = vmatpush.msrb.mxu2 %v3815_v0  ;;  %1225 = vmatpush.msrb.mxu3 %v3847_v1  ;;  %v3805_v0 = vld [vmem:[%s7949_s1 + $0x418] sm:$0xff]  ;;  %v993_v1 = vrot.slane %v4743_v53, 2  ;;  %v3803_v53 = vld [vmem:[%s7949_s1 + $0x408] sm:$0xff]  ;;  %v3884_v35 = vld [vmem:[%s7949_s1 + $0x600] sm:$0xff] }
  0x9c   : > { %1432 = vmatpush.msrb.mxu1 %v3944_v61  ;;  %v3926_v61 = vld [vmem:[%s7949_s1 + $0x750] sm:$0xff]  ;;  %1399 = vmatpush.msrb.mxu0 %v3896_v62  ;;  %v1005_v62 = vrot.slane %v942_v33, 2 }
  0x9d   : > { %1185 = vmatpush.msrb.mxu2 %v3813_v16  ;;  %1226 = vmatpush.msrb.mxu3 %v3845_v17 }
  0x9e   : > { %1433 = vmatpush.msrb.mxu1 %v3942_v3  ;;  %v996_v3 = vrot.slane %v4749_v55, 2  ;;  %1400 = vmatpush.msrb.mxu0 %v3894_v60  ;;  %v3909_v60 = vld [vmem:[%s7949_s1 + $0x6c8] sm:$0xff] }
  0x9f   : > { %812 = vmatmul.f32.gmra.mxu2 %v4984_v18  ;;  %853 = vmatmul.f32.gmra.mxu3 %v4987_v19  ;;  %v983_v18 = vrot.slane %v4868_v28, 2  ;;  %v985_v19 = vrot.slane %v930_v7, 2  ;;  %v3936_v28 = vld [vmem:[%s7949_s1 + $0x7a0] sm:$0xff] }
  0xa0   : > { %1112 = vmatmul.f32.gmra.mxu0 %v5322_v6  ;;  %1153 = vmatmul.f32.gmra.mxu1 %v5325_v32  ;;  %v3892_v7 = vld [vmem:[%s7949_s1 + $0x640] sm:$0xff]  ;;  %v5463_v17 = vsel %vm971_vm1, %v995_v2, %v996_v3 }
  0xa1   : > { %1434 = vmatpush.msrb.mxu1 %v3940_v13  ;;  %1186 = vmatpush.msrb.mxu2 %v3811_v30  ;;  %v5366_v9 = vsel %vm971_vm1, %v982_v21, %v983_v18  ;;  %v5369_v11 = vsel %vm971_vm1, %v985_v19, %v986_v22  ;;  %v3835_v13 = vld [vmem:[%s7949_s1 + $0x508] sm:$0xff]  ;;  %v3922_v19 = vld [vmem:[%s7949_s1 + $0x730] sm:$0xff]  ;;  %v998_v30 = vrot.slane %v939_v20, 2 }
  0xa2   : > { %1227 = vmatpush.msrb.mxu3 %v3843_v25  ;;  %1401 = vmatpush.msrb.mxu0 %v3892_v7  ;;  %v940_v21 = vld [vmem:[%s4667_s19 + $0x88] sm:$0x3]  ;;  %v3939_v7 = vld [vmem:[%s7949_s1 + $0x7b8] sm:$0xff] }
  0xa3   : > { %1435 = vmatpush.msrb.mxu1 %v3938_v23  ;;  %1187 = vmatpush.msrb.mxu2 %v3809_v44  ;;  %v1000_v25 = vrot.slane %v940_v21, 2  ;;  %v3937_v20 = vld [vmem:[%s7949_s1 + $0x7a8] sm:$0xff] }
  0xa5   : > { %1436 = vmatpush.msrb.mxu1 %v3936_v28  ;;  %1188 = vmatpush.msrb.mxu2 %v3807_v48  ;;  %v3920_v28 = vld [vmem:[%s7949_s1 + $0x720] sm:$0xff]  ;;  %v5511_v44 = vsel %vm971_vm1, %v996_v3, %v1000_v25  ;;  %v3911_v48 = vld [vmem:[%s7949_s1 + $0x6d8] sm:$0xff] }
  0xa6   : > { %v3907_v3 = vld [vmem:[%s7949_s1 + $0x6b8] sm:$0xff] }
  0xa7   : > { %815 = vmatmul.f32.gmra.mxu2 %v5034_v46  ;;  %856 = vmatmul.f32.gmra.mxu3 %v5037_v47  ;;  %v3841_v46 = vld [vmem:[%s7949_s1 + $0x538] sm:$0xff]  ;;  %v988_v47 = vrot.slane %v933_v38, 2  ;;  %v3886_v38 = vld [vmem:[%s7949_s1 + $0x610] sm:$0xff] }
  0xa8   : > { %1115 = vmatmul.f32.gmra.mxu0 %v5366_v9  ;;  %1156 = vmatmul.f32.gmra.mxu1 %v5369_v11 }
  0xa9   : > { %1437 = vmatpush.msrb.mxu1 %v3934_v41  ;;  %1228 = vmatpush.msrb.mxu3 %v3841_v46  ;;  %v5408_v54 = vsel %vm971_vm1, %v983_v18, %v988_v47  ;;  %v3890_v18 = vld [vmem:[%s7949_s1 + $0x630] sm:$0xff]  ;;  %v3945_v41 = vld [vmem:[%s7949_s1 + $0x7e8] sm:$0xff] }
  0xaa   : > { %1189 = vmatpush.msrb.mxu2 %v3805_v0  ;;  %1402 = vmatpush.msrb.mxu0 %v3890_v18  ;;  %v941_v47 = vld [vmem:[%s4667_s19 + $0x90] sm:$0xfc] }
  0xab   : > { %1438 = vmatpush.msrb.mxu1 %v3932_v43  ;;  %1229 = vmatpush.msrb.mxu3 %v3839_v49  ;;  %v5508_v43 = vsel %vm971_vm1, %v993_v1, %v998_v30  ;;  %v3943_v49 = vld [vmem:[%s7949_s1 + $0x7d8] sm:$0xff] }
  0xac   : > { %v5413_v56 = vpop.f32.mrf.mxu0  ;;  %1190 = vmatpush.msrb.mxu2 %v3803_v53  ;;  %1403 = vmatpush.msrb.mxu0 %v3888_v24  ;;  %v3903_v24 = vld [vmem:[%s7949_s1 + $0x698] sm:$0xff] }
  0xad   : > { %v5415_v57 = vpop.f32.mrf.mxu1  ;;  %1439 = vmatpush.msrb.mxu1 %v3930_v45  ;;  %v3916_v45 = vld [vmem:[%s7949_s1 + $0x700] sm:$0xff] }
  0xae   : > { %1404 = vmatpush.msrb.mxu0 %v3886_v38  ;;  %v5604_v38 = vld [vmem:[%s4667_s19 + $0x30] sm:$0xff] }
  0xaf   : > { %818 = vmatmul.f32.gmra.mxu2 %v5082_v4  ;;  %859 = vmatmul.f32.gmra.mxu3 %v5085_v5  ;;  %v3837_v4 = vld [vmem:[%s7949_s1 + $0x518] sm:$0xff]  ;;  %v992_v5 = vrot.slane %v935_v10, 2 }
  0xb0   : > { %1118 = vmatmul.f32.gmra.mxu0 %v5408_v54  ;;  %1159 = vmatmul.f32.gmra.mxu1 %v5411_v51 }
  0xb1   : > { %1440 = vmatpush.msrb.mxu1 %v3928_v63  ;;  %1230 = vmatpush.msrb.mxu3 %v3837_v4  ;;  %v5460_v16 = vsel %vm971_vm1, %v992_v5, %v993_v1  ;;  %v1006_v63 = vrot.slane %v4877_v31, 2  ;;  %v945_v4 = vld [vmem:[%s4667_s19 + $0xb0] sm:$0x3]  ;;  %v946_v5 = vld [vmem:[%s4667_s19 + $0xb8] sm:$0x3] }
  0xb2   : > { %v5443_v34 = vpop.f32.mrf.mxu2  ;;  %1405 = vmatpush.msrb.mxu0 %v3884_v35  ;;  %v1010_v53 = vrot.slane %v946_v5, 2  ;;  %v4000_v35 = vld [vmem:[%s7949_s1 + $0x8e0] sm:$0xff] }
  0xb3   : > { %7955 = vst [vmem:[#allocation3_spill] sm:$0xff] %v5443_v34  ;;  %v5454_v55 = vpop.f32.mrf.mxu3  ;;  %1441 = vmatpush.msrb.mxu1 %v3926_v61  ;;  %1231 = vmatpush.msrb.mxu3 %v3835_v13  ;;  %v3941_v61 = vld [vmem:[%s7949_s1 + $0x7c8] sm:$0xff]  ;;  %v4028_v5 = vld [vmem:[%s7949_s1 + $0x9c0] sm:$0xff] }
  0xb4   : > { %7956 = vst [vmem:[#allocation4_spill] sm:$0xff] %v5454_v55  ;;  %v3905_v13 = vld [vmem:[%s7949_s1 + $0x6a8] sm:$0xff]  ;;  %v5579_v18 = vsel %vm971_vm1, %v1006_v63, %v1010_v53  ;;  %v3992_v53 = vld [vmem:[%s7949_s1 + $0x8a0] sm:$0xff]  ;;  %v4082_v55 = vld [vmem:[%s7949_s1 + $0xab0] sm:$0xff] }
  0xb5   : > { %1442 = vmatpush.msrb.mxu1 %v3924_v12  ;;  %v1008_v12 = vrot.slane %v945_v4, 2  ;;  %v3996_v4 = vld [vmem:[%s7949_s1 + $0x8c0] sm:$0xff] }
  0xb6   : > { %v5475_v22 = vpop.f32.mrf.mxu0 }
  0xb7   : > { %821 = vmatmul.f32.gmra.mxu2 %v5132_v36  ;;  %862 = vmatmul.f32.gmra.mxu3 %v5135_v37  ;;  %v5477_v23 = vpop.f32.mrf.mxu1  ;;  %v3915_v36 = vld [vmem:[%s7949_s1 + $0x6f8] sm:$0xff] }
  0xb8   : > { %1121 = vmatmul.f32.gmra.mxu0 %v5460_v16  ;;  %1162 = vmatmul.f32.gmra.mxu1 %v5463_v17  ;;  %v3947_v37 = vld [vmem:[%s7949_s1 + $0x7f8] sm:$0xff] }
  0xb9   : > { %1443 = vmatpush.msrb.mxu1 %v3922_v19  ;;  %1472 = vmatpush.msra.mxu2 %v3915_v36 }
  0xba   : > { %1513 = vmatpush.msra.mxu3 %v3947_v37  ;;  %v3933_v37 = vld [vmem:[%s7949_s1 + $0x788] sm:$0xff] }
  0xbb   : > { %1444 = vmatpush.msrb.mxu1 %v3920_v28  ;;  %1473 = vmatpush.msra.mxu2 %v3913_v40  ;;  %v3935_v28 = vld [vmem:[%s7949_s1 + $0x798] sm:$0xff] }
  0xbc   : > { %v5505_v42 = vpop.f32.mrf.mxu2  ;;  %1514 = vmatpush.msra.mxu3 %v3945_v41  ;;  %v3899_v40 = vld [vmem:[%s7949_s1 + $0x678] sm:$0xff] }
  0xbd   : > { %7957 = vst [vmem:[#allocation5_spill] sm:$0xff] %v5505_v42  ;;  %v5513_v46 = vpop.f32.mrf.mxu3  ;;  %1445 = vmatpush.msrb.mxu1 %v3918_v39  ;;  %1474 = vmatpush.msra.mxu2 %v3911_v48  ;;  %v5607_v39 = vld [vmem:[%s4667_s19 + $0x38] sm:$0xff] }
  0xbe   : > { %7958 = vst [vmem:[#allocation6_spill] sm:$0xff] %v5513_v46  ;;  %1515 = vmatpush.msra.mxu3 %v3943_v49  ;;  %v3931_v41 = vld [vmem:[%s7949_s1 + $0x778] sm:$0xff]  ;;  %v3897_v49 = vld [vmem:[%s7949_s1 + $0x668] sm:$0xff]  ;;  %v3954_v46 = vld [vmem:[%s4667_s19 + $0x60] sm:$0xfe] }
  0xbf   : > { %824 = vmatmul.f32.gmra.mxu2 %v5180_v58  ;;  %865 = vmatmul.f32.gmra.mxu3 %v5183_v8  ;;  %v1002_v58 = vrot.slane %v941_v47, 2  ;;  %v1003_v8 = vrot.slane %v4871_v29, 2  ;;  %v5549_v29 = vsel %vm971_vm1, %v1005_v62, %v1006_v63  ;;  %v4002_v47 = vld [vmem:[%s7949_s1 + $0x8f0] sm:$0xff] }
  0xc0   : > { %1124 = vmatmul.f32.gmra.mxu0 %v5508_v43  ;;  %1165 = vmatmul.f32.gmra.mxu1 %v5511_v44  ;;  %v5533_v10 = vpop.f32.mrf.mxu0  ;;  %v4030_v62 = vld [vmem:[%s7949_s1 + $0x9d0] sm:$0xff] }
  0xc1   : > { %7959 = vst [vmem:[#allocation7_spill] sm:$0xff] %v5533_v10  ;;  %v5535_v59 = vpop.f32.mrf.mxu1  ;;  %1446 = vmatpush.msrb.mxu1 %v3916_v45  ;;  %1475 = vmatpush.msra.mxu2 %v3909_v60  ;;  %v5546_v0 = vsel %vm971_vm1, %v1002_v58, %v1003_v8  ;;  %v5576_v21 = vsel %vm971_vm1, %v1003_v8, %v1008_v12  ;;  %v4032_v45 = vld [vmem:[%s7949_s1 + $0x9e0] sm:$0xff]  ;;  %v3929_v58 = vld [vmem:[%s7949_s1 + $0x768] sm:$0xff]  ;;  %v3998_v8 = vld [vmem:[%s7949_s1 + $0x8d0] sm:$0xff] }
  0xc2   : > { %7960 = vst [vmem:[#allocation8_spill] sm:$0xff] %v5535_v59  ;;  %1516 = vmatpush.msra.mxu3 %v3941_v61  ;;  %1771 = vmatpush.msra.mxu0 %v4002_v47  ;;  %v5650_v61 = vld [vmem:[%s4667_s19 + $0x40] sm:$0xff]  ;;  %v4216_v59 = vld [vmem:[%s4667_s19 + $0xb0] sm:$0x1] }
  0xc3   : > { %1476 = vmatpush.msra.mxu2 %v3907_v3  ;;  %v3927_v3 = vld [vmem:[%s7949_s1 + $0x758] sm:$0xff]  ;;  %v3988_v47 = vld [vmem:[%s7949_s1 + $0x880] sm:$0xff] }
  0xc4   : > { %1517 = vmatpush.msra.mxu3 %v3939_v7  ;;  %1772 = vmatpush.msra.mxu0 %v4000_v35  ;;  %v3994_v7 = vld [vmem:[%s7949_s1 + $0x8b0] sm:$0xff] }
  0xc5   : > { %1477 = vmatpush.msra.mxu2 %v3905_v13  ;;  %v4024_v13 = vld [vmem:[%s7949_s1 + $0x9a0] sm:$0xff]  ;;  %v3986_v35 = vld [vmem:[%s7949_s1 + $0x870] sm:$0xff] }
  0xc6   : > { %v396_v31 = vpop.f32.mrf.mxu2  ;;  %1518 = vmatpush.msra.mxu3 %v3937_v20  ;;  %1773 = vmatpush.msra.mxu0 %v3998_v8  ;;  %v3921_v8 = vld [vmem:[%s7949_s1 + $0x728] sm:$0xff] }
  0xc7   : > { %827 = vmatmul.f32.gmra.mxu2 %v5218_v14  ;;  %868 = vmatmul.f32.gmra.mxu3 %v5221_v15  ;;  %v437_v1 = vpop.f32.mrf.mxu3 }
  0xc8   : > { %1127 = vmatmul.f32.gmra.mxu0 %v5546_v0  ;;  %1168 = vmatmul.f32.gmra.mxu1 %v5549_v29  ;;  %v5557_v2 = vadd.f32 %v437_v1, %v396_v31  ;;  %v5653_v31 = vld [vmem:[%s4667_s19 + $0x48] sm:$0xff]  ;;  %v3895_v1 = vld [vmem:[%s7949_s1 + $0x658] sm:$0xff] }
  0xc9   : > { %1478 = vmatpush.msra.mxu2 %v3903_v24  ;;  %1519 = vmatpush.msra.mxu3 %v3935_v28  ;;  %v3925_v24 = vld [vmem:[%s7949_s1 + $0x748] sm:$0xff] }
  0xca   : > { %7961 = vst [vmem:[#allocation9_spill] sm:$0xff] %v5557_v2  ;;  %v5565_v14 = vpop.f32.mrf.mxu0  ;;  %1774 = vmatpush.msra.mxu0 %v3996_v4 }
  0xcb   : > { %7962 = vst [vmem:[#allocation10_spill] sm:$0xff] %v5565_v14  ;;  %v5567_v15 = vpop.f32.mrf.mxu1  ;;  %1520 = vmatpush.msra.mxu3 %v3933_v37  ;;  %v5699_v37 = vld [vmem:[%s4667_s19 + $0x68] sm:$0xff]  ;;  %v4164_v14 = vld [vmem:[%s7949_s1 + $0xcb0] sm:$0xff] }
  0xcc   : > { %7963 = vst [vmem:[#allocation11_spill] sm:$0xff] %v5567_v15  ;;  %1775 = vmatpush.msra.mxu0 %v3994_v7  ;;  %v4016_v7 = vld [vmem:[%s7949_s1 + $0x960] sm:$0xff]  ;;  %v3960_v15 = vld [vmem:[%s4667_s19 + $0x90] sm:$0xfe] }
  0xcd   : > { %1521 = vmatpush.msra.mxu3 %v3931_v41  ;;  %v4022_v41 = vld [vmem:[%s7949_s1 + $0x990] sm:$0xff] }
  0xce   : > { %1776 = vmatpush.msra.mxu0 %v3992_v53 }
  0xcf   : > { %830 = vmatmul.f32.gmra.mxu2 %v5248_v26  ;;  %871 = vmatmul.f32.gmra.mxu3 %v5251_v27  ;;  %v3901_v27 = vld [vmem:[%s7949_s1 + $0x688] sm:$0xff] }
  0xd0   : > { %1130 = vmatmul.f32.gmra.mxu0 %v5576_v21  ;;  %1171 = vmatmul.f32.gmra.mxu1 %v5579_v18  ;;  %v399_v19 = vpop.f32.mrf.mxu2 }
  0xd1   : > { %v440_v36 = vpop.f32.mrf.mxu3  ;;  %1479 = vmatpush.msra.mxu2 %v3901_v27  ;;  %1522 = vmatpush.msra.mxu3 %v3929_v58  ;;  %v5696_v27 = vld [vmem:[%s4667_s19 + $0x60] sm:$0xff]  ;;  %v3889_v58 = vld [vmem:[%s7949_s1 + $0x628] sm:$0xff] }
  0xd2   : > { %v5591_v26 = vadd.f32 %v440_v36, %v399_v19  ;;  %v3893_v19 = vld [vmem:[%s7949_s1 + $0x648] sm:$0xff] }
  0xd3   : > { %1480 = vmatpush.msra.mxu2 %v3899_v40  ;;  %1523 = vmatpush.msra.mxu3 %v3927_v3  ;;  %v3990_v40 = vld [vmem:[%s7949_s1 + $0x890] sm:$0xff]  ;;  %v3984_v3 = vld [vmem:[%s7949_s1 + $0x860] sm:$0xff] }
  0xd4   : > { %7964 = vst [vmem:[#allocation12_spill] sm:$0xff] %v5591_v26  ;;  %1777 = vmatpush.msra.mxu0 %v3990_v40  ;;  %v3885_v40 = vld [vmem:[%s7949_s1 + $0x608] sm:$0xff] }
  0xd5   : > { %v5599_v30 = vpop.f32.mrf.mxu0  ;;  %v5601_v25 = vpop.f32.mrf.mxu1  ;;  %1481 = vmatpush.msra.mxu2 %v3897_v49  ;;  %1524 = vmatpush.msra.mxu3 %v3925_v24 }
  0xd6   : > { %1778 = vmatpush.msra.mxu0 %v3988_v47 }
  0xd7   : > { %1191 = vmatmul.f32.vlgmr.msrb.gmra.mxu2 %v5280_v50  ;;  %1232 = vmatmul.f32.vlgmr.msrb.gmra.mxu3 %v5283_v52  ;;  %v4034_v50 = vld [vmem:[%s7949_s1 + $0x9f0] sm:$0xff] }
  0xd8   : > { %1406 = vmatmul.f32.vlgmr.msrb.gmra.mxu0 %v5604_v38  ;;  %1447 = vmatmul.f32.vlgmr.msrb.gmra.mxu1 %v5607_v39 }
  0xd9   : > { %1812 = vmatpush.msra.mxu1 %v4034_v50  ;;  %1482 = vmatpush.msra.mxu2 %v3895_v1  ;;  %v4020_v50 = vld [vmem:[%s7949_s1 + $0x980] sm:$0xff]  ;;  %v5745_v1 = vld [vmem:[%s4667_s19 + $0x78] sm:$0xff] }
  0xda   : > { %v460_v52 = vpop.f32.mrf.mxu2  ;;  %v501_v33 = vpop.f32.mrf.mxu3  ;;  %1779 = vmatpush.msra.mxu0 %v3986_v35  ;;  %v3976_v35 = vld [vmem:[%s7949_s1 + $0x820] sm:$0xff]  ;;  %v1664_v42 = vrot.slane %v5745_v1, 1 }
  0xdb   : > { %v5631_v48 = vadd.f32 %v501_v33, %v460_v52  ;;  %1813 = vmatpush.msra.mxu1 %v4032_v45  ;;  %1483 = vmatpush.msra.mxu2 %v3893_v19  ;;  %v3891_v52 = vld [vmem:[%s7949_s1 + $0x638] sm:$0xff]  ;;  %v4018_v45 = vld [vmem:[%s7949_s1 + $0x970] sm:$0xff]  ;;  %v4012_v19 = vld [vmem:[%s7949_s1 + $0x940] sm:$0xff] }
  0xdc   : > { %1780 = vmatpush.msra.mxu0 %v3984_v3  ;;  %v3974_v3 = vld [vmem:[%s7949_s1 + $0x810] sm:$0xff] }
  0xdd   : > { %v5645_v63 = vpop.f32.mrf.mxu0  ;;  %v5647_v60 = vpop.f32.mrf.mxu1  ;;  %1814 = vmatpush.msra.mxu1 %v4030_v62  ;;  %1484 = vmatpush.msra.mxu2 %v3891_v52  ;;  %v5788_v52 = vld [vmem:[%s4667_s19 + $0x90] sm:$0xff] }
  0xdf   : > { %1194 = vmatmul.f32.gmra.mxu2 %v5322_v6  ;;  %1235 = vmatmul.f32.gmra.mxu3 %v5325_v32  ;;  %v4026_v6 = vld [vmem:[%s7949_s1 + $0x9b0] sm:$0xff] }
  0xe0   : > { %1409 = vmatmul.f32.gmra.mxu0 %v5650_v61  ;;  %1450 = vmatmul.f32.gmra.mxu1 %v5653_v31 }
  0xe1   : > { %1815 = vmatpush.msra.mxu1 %v4028_v5  ;;  %1485 = vmatpush.msra.mxu2 %v3889_v58  ;;  %v5742_v5 = vld [vmem:[%s4667_s19 + $0x70] sm:$0xff]  ;;  %v4003_v58 = vld [vmem:[%s7949_s1 + $0x8f8] sm:$0xff] }
  0xe2   : > { %v463_v32 = vpop.f32.mrf.mxu2  ;;  %v504_v12 = vpop.f32.mrf.mxu3 }
  0xe3   : > { %v5683_v20 = vadd.f32 %v504_v12, %v463_v32  ;;  %1816 = vmatpush.msra.mxu1 %v4026_v6  ;;  %v3982_v6 = vld [vmem:[%s7949_s1 + $0x850] sm:$0xff]  ;;  %v3887_v12 = vld [vmem:[%s7949_s1 + $0x618] sm:$0xff] }
  0xe4   : > { %v4014_v32 = vld [vmem:[%s7949_s1 + $0x950] sm:$0xff]  ;;  %1486 = vmatpush.msra.mxu2 %v3887_v12  ;;  %1781 = vmatpush.msra.mxu0 %v3982_v6 }
  0xe5   : > { %v5691_v28 = vpop.f32.mrf.mxu0  ;;  %v5693_v36 = vpop.f32.mrf.mxu1  ;;  %1817 = vmatpush.msra.mxu1 %v4024_v13  ;;  %v3980_v13 = vld [vmem:[%s7949_s1 + $0x840] sm:$0xff] }
  0xe6   : > { %7965 = vst [vmem:[#allocation13_spill] sm:$0xff] %v5691_v28  ;;  %1487 = vmatpush.msra.mxu2 %v3885_v40  ;;  %1782 = vmatpush.msra.mxu0 %v3980_v13  ;;  %v4033_v13 = vld [vmem:[%s7949_s1 + $0x9e8] sm:$0xff]  ;;  %v4004_v40 = vld [vmem:[%s7949_s1 + $0x900] sm:$0xff] }
  0xe7   : > { %7966 = vst [vmem:[#allocation14_spill] sm:$0xff] %v5693_v36  ;;  %1197 = vmatmul.f32.gmra.mxu2 %v5366_v9  ;;  %1238 = vmatmul.f32.gmra.mxu3 %v5369_v11  ;;  %v3923_v9 = vld [vmem:[%s7949_s1 + $0x738] sm:$0xff] }
  0xe8   : > { %1412 = vmatmul.f32.gmra.mxu0 %v5696_v27  ;;  %1453 = vmatmul.f32.gmra.mxu1 %v5699_v37 }
  0xe9   : > { %1818 = vmatpush.msra.mxu1 %v4022_v41  ;;  %1525 = vmatpush.msra.mxu3 %v3923_v9  ;;  %v3917_v41 = vld [vmem:[%s7949_s1 + $0x708] sm:$0xff]  ;;  %v5791_v9 = vld [vmem:[%s4667_s19 + $0x98] sm:$0xff] }
  0xea   : > { %v466_v11 = vpop.f32.mrf.mxu2  ;;  %v507_v33 = vpop.f32.mrf.mxu3  ;;  %1853 = vmatpush.msrb.mxu2 %v4003_v58 }
  0xeb   : > { %v5729_v49 = vadd.f32 %v507_v33, %v466_v11  ;;  %1819 = vmatpush.msra.mxu1 %v4020_v50  ;;  %1526 = vmatpush.msra.mxu3 %v3921_v8  ;;  %v3978_v11 = vld [vmem:[%s7949_s1 + $0x830] sm:$0xff] }
  0xec   : > { %v4010_v33 = vld [vmem:[%s7949_s1 + $0x930] sm:$0xff]  ;;  %1783 = vmatpush.msra.mxu0 %v3978_v11  ;;  %v4031_v11 = vld [vmem:[%s7949_s1 + $0x9d8] sm:$0xff] }
  0xed   : > { %v5737_v62 = vpop.f32.mrf.mxu0  ;;  %v5739_v4 = vpop.f32.mrf.mxu1  ;;  %1820 = vmatpush.msra.mxu1 %v4018_v45  ;;  %v4008_v45 = vld [vmem:[%s7949_s1 + $0x920] sm:$0xff] }
  0xee   : > { %7967 = vst [vmem:[#allocation15_spill] sm:$0xff] %v5737_v62  ;;  %1784 = vmatpush.msra.mxu0 %v3976_v35 }
  0xef   : > { %7968 = vst [vmem:[#allocation16_spill] sm:$0xff] %v5739_v4  ;;  %1200 = vmatmul.f32.gmra.mxu2 %v5408_v54  ;;  %1241 = vmatmul.f32.gmra.mxu3 %v5411_v51  ;;  %v3919_v54 = vld [vmem:[%s7949_s1 + $0x718] sm:$0xff] }
  0xf0   : > { %1415 = vmatmul.f32.gmra.mxu0 %v5742_v5  ;;  %1456 = vmatmul.f32.gmra.mxu1 %v5745_v1 }
  0xf1   : > { %1821 = vmatpush.msra.mxu1 %v4016_v7  ;;  %1527 = vmatpush.msra.mxu3 %v3919_v54  ;;  %v4006_v7 = vld [vmem:[%s7949_s1 + $0x910] sm:$0xff] }
  0xf2   : > { %v469_v51 = vpop.f32.mrf.mxu2  ;;  %v510_v53 = vpop.f32.mrf.mxu3  ;;  %1785 = vmatpush.msra.mxu0 %v3974_v3  ;;  %v3995_v3 = vld [vmem:[%s7949_s1 + $0x8b8] sm:$0xff] }
  0xf3   : > { %v5775_v24 = vadd.f32 %v510_v53, %v469_v51  ;;  %1822 = vmatpush.msra.mxu1 %v4014_v32  ;;  %1528 = vmatpush.msra.mxu3 %v3917_v41  ;;  %v5824_v32 = vld [vmem:[%s4667_s19 + $0xa0] sm:$0xff]  ;;  %v5831_v51 = vld [vmem:[%s4667_s19 + $0xa8] sm:$0xff]  ;;  %v3999_v41 = vld [vmem:[%s7949_s1 + $0x8d8] sm:$0xff] }
  0xf4   : > { %v4001_v53 = vld [vmem:[%s7949_s1 + $0x8e8] sm:$0xff] }
  0xf5   : > { %v5783_v47 = vpop.f32.mrf.mxu0  ;;  %v5785_v50 = vpop.f32.mrf.mxu1  ;;  %1823 = vmatpush.msra.mxu1 %v4012_v19  ;;  %v3972_v19 = vld [vmem:[%s7949_s1 + $0x800] sm:$0xff]  ;;  %1854 = vmatpush.msrb.mxu2 %v4001_v53 }
  0xf6   : > { %7969 = vst [vmem:[#allocation17_spill] sm:$0xff] %v5783_v47  ;;  %1786 = vmatpush.msra.mxu0 %v3972_v19  ;;  %v4108_v47 = vld [vmem:[%s7949_s1 + $0xb80] sm:$0xff] }
  0xf7   : > { %7970 = vst [vmem:[#allocation18_spill] sm:$0xff] %v5785_v50  ;;  %1203 = vmatmul.f32.gmra.mxu2 %v5460_v16  ;;  %1244 = vmatmul.f32.gmra.mxu3 %v5463_v17  ;;  %v4035_v16 = vld [vmem:[%s7949_s1 + $0x9f8] sm:$0xff]  ;;  %v3958_v50 = vld [vmem:[%s4667_s19 + $0x80] sm:$0x1] }
  0xf8   : > { %1418 = vmatmul.f32.gmra.mxu0 %v5788_v52  ;;  %1459 = vmatmul.f32.gmra.mxu1 %v5791_v9 }
  0xf9   : > { %1824 = vmatpush.msra.mxu1 %v4010_v33  ;;  %1894 = vmatpush.msrb.mxu3 %v4035_v16  ;;  %v5865_v16 = vld [vmem:[%s4667_s19 + $0xc8] sm:$0xff] }
  0xfa   : > { %v472_v17 = vpop.f32.mrf.mxu2  ;;  %v513_v8 = vpop.f32.mrf.mxu3  ;;  %1855 = vmatpush.msrb.mxu2 %v3999_v41  ;;  %v5893_v41 = vld [vmem:[%s4667_s19 + $0xd8] sm:$0xff] }
  0xfb   : > { %v5821_v6 = vadd.f32 %v513_v8, %v472_v17  ;;  %1825 = vmatpush.msra.mxu1 %v4008_v45  ;;  %1895 = vmatpush.msrb.mxu3 %v4033_v13  ;;  %v3997_v17 = vld [vmem:[%s7949_s1 + $0x8c8] sm:$0xff] }
  0xfc   : > { %v4029_v8 = vld [vmem:[%s7949_s1 + $0x9c8] sm:$0xff]  ;;  %1856 = vmatpush.msrb.mxu2 %v3997_v17  ;;  %v3949_v17 = vld [vmem:[%s4667_s19 + $0x38] sm:$0xfe] }
  0xfd   : > { %v5826_v12 = vpop.f32.mrf.mxu0  ;;  %v5828_v54 = vpop.f32.mrf.mxu1  ;;  %1826 = vmatpush.msra.mxu1 %v4006_v7  ;;  %1896 = vmatpush.msrb.mxu3 %v4031_v11  ;;  %v4027_v7 = vld [vmem:[%s7949_s1 + $0x9b8] sm:$0xff]  ;;  %v3993_v11 = vld [vmem:[%s7949_s1 + $0x8a8] sm:$0xff] }
  0xfe   : > { %7971 = vst [vmem:[#allocation19_spill] sm:$0xff] %v5826_v12  ;;  %1857 = vmatpush.msrb.mxu2 %v3995_v3  ;;  %v4023_v3 = vld [vmem:[%s7949_s1 + $0x998] sm:$0xff] }
  0xff   : > { %7972 = vst [vmem:[#allocation20_spill] sm:$0xff] %v5828_v54  ;;  %1206 = vmatmul.f32.gmra.mxu2 %v5508_v43  ;;  %1247 = vmatmul.f32.gmra.mxu3 %v5511_v44  ;;  %v5858_v44 = vld [vmem:[%s4667_s19 + $0xc0] sm:$0xff] }
 0x100   : > { %1421 = vmatmul.f32.gmra.mxu0 %v5824_v32  ;;  %1462 = vmatmul.f32.gmra.mxu1 %v5831_v51 }
 0x101   : > { %1827 = vmatpush.msra.mxu1 %v4004_v40  ;;  %1897 = vmatpush.msrb.mxu3 %v4029_v8  ;;  %v3991_v8 = vld [vmem:[%s7949_s1 + $0x898] sm:$0xff] }
 0x102   : > { %v475_v33 = vpop.f32.mrf.mxu2  ;;  %v516_v35 = vpop.f32.mrf.mxu3  ;;  %1858 = vmatpush.msrb.mxu2 %v3993_v11 }
 0x103   : > { %v5855_v43 = vadd.f32 %v516_v35, %v475_v33  ;;  %1898 = vmatpush.msrb.mxu3 %v4027_v7  ;;  %v4025_v33 = vld [vmem:[%s7949_s1 + $0x9a8] sm:$0xff]  ;;  %v3948_v35 = vld [vmem:[%s4667_s19 + $0x30] sm:$0xfe] }
 0x104   : > { %v1650_v7 = vrot.slane %v3948_v35, 1  ;;  %1859 = vmatpush.msrb.mxu2 %v3991_v8  ;;  %v4021_v8 = vld [vmem:[%s7949_s1 + $0x988] sm:$0xff] }
 0x105   : > { %v5860_v45 = vpop.f32.mrf.mxu0  ;;  %v5862_v58 = vpop.f32.mrf.mxu1  ;;  %1899 = vmatpush.msrb.mxu3 %v4025_v33 }
 0x106   : > { %7973 = vst [vmem:[#allocation21_spill] sm:$0xff] %v5860_v45 }
 0x107   : > { %7974 = vst [vmem:[#allocation22_spill] sm:$0xff] %v5862_v58  ;;  %1209 = vmatmul.f32.gmra.mxu2 %v5546_v0  ;;  %1250 = vmatmul.f32.gmra.mxu3 %v5549_v29  ;;  %v5886_v29 = vld [vmem:[%s4667_s19 + $0xd0] sm:$0xff]  ;;  %v4088_v58 = vld [vmem:[%s7949_s1 + $0xae0] sm:$0xff] }
 0x108   : > { %1424 = vmatmul.f32.gmra.mxu0 %v5858_v44  ;;  %1465 = vmatmul.f32.gmra.mxu1 %v5865_v16 }
 0x109   : > { %1900 = vmatpush.msrb.mxu3 %v4023_v3  ;;  %v3952_v3 = vld [vmem:[%s4667_s19 + $0x50] sm:$0x1] }
 0x10a   : > { %v478_v53 = vpop.f32.mrf.mxu2  ;;  %v519_v0 = vpop.f32.mrf.mxu3 }
 0x10b   : > { %v5883_v13 = vadd.f32 %v519_v0, %v478_v53  ;;  %v1651_v53 = vrot.slane %v5650_v61, 1  ;;  %1901 = vmatpush.msrb.mxu3 %v4021_v8 }
 0x10d   : > { %v5888_v19 = vpop.f32.mrf.mxu0  ;;  %v5890_v40 = vpop.f32.mrf.mxu1 }
 0x10e   : > { %7975 = vst [vmem:[#allocation23_spill] sm:$0xff] %v5888_v19  ;;  %v5922_v19 = vsel %vm589_vm0, %v1650_v7, %v1651_v53  ;;  %v3987_v7 = vld [vmem:[%s7949_s1 + $0x878] sm:$0xff] }
 0x10f   : > { %7976 = vst [vmem:[#allocation24_spill] sm:$0xff] %v5890_v40  ;;  %1212 = vmatmul.f32.gmra.mxu2 %v5576_v21  ;;  %1253 = vmatmul.f32.gmra.mxu3 %v5579_v18  ;;  %v1653_v21 = vrot.slane %v3949_v17, 1  ;;  %v1654_v18 = vrot.slane %v5653_v31, 1  ;;  %v3989_v17 = vld [vmem:[%s7949_s1 + $0x888] sm:$0xff] }
 0x110   : > { %1427 = vmatmul.f32.gmra.mxu0 %v5886_v29  ;;  %1468 = vmatmul.f32.gmra.mxu1 %v5893_v41 }
 0x111   : > { %v5925_v35 = vsel %vm589_vm0, %v1653_v21, %v1654_v18  ;;  %1860 = vmatpush.msrb.mxu2 %v3989_v17  ;;  %v4019_v21 = vld [vmem:[%s7949_s1 + $0x978] sm:$0xff]  ;;  %v1656_v17 = vrot.slane %v3952_v3, 1  ;;  %v4120_v3 = vld [vmem:[%s7949_s1 + $0xbe0] sm:$0xff] }
 0x112   : > { %v481_v0 = vpop.f32.mrf.mxu2  ;;  %v522_v11 = vpop.f32.mrf.mxu3  ;;  %1902 = vmatpush.msrb.mxu3 %v4019_v21 }
 0x113   : > { %v5915_v33 = vadd.f32 %v522_v11, %v481_v0  ;;  %v3953_v0 = vld [vmem:[%s4667_s19 + $0x58] sm:$0x1]  ;;  %v4090_v11 = vld [vmem:[%s7949_s1 + $0xaf0] sm:$0xff]  ;;  %1861 = vmatpush.msrb.mxu2 %v3987_v7 }
 0x114   : > { %2152 = vmatpush.msrb.mxu0 %v4090_v11  ;;  %v5965_v11 = vsel %vm589_vm0, %v1651_v53, %v1656_v17  ;;  %v4086_v53 = vld [vmem:[%s7949_s1 + $0xad0] sm:$0xff]  ;;  %v4084_v17 = vld [vmem:[%s7949_s1 + $0xac0] sm:$0xff] }
 0x115   : > { %v5917_v26 = vpop.f32.mrf.mxu0  ;;  %v5919_v40 = vpop.f32.mrf.mxu1 }
 0x116   : > { %2153 = vmatpush.msrb.mxu0 %v4088_v58  ;;  %v3955_v58 = vld [vmem:[%s4667_s19 + $0x68] sm:$0xfe] }
 0x117   : > { %1488 = vmatmul.f32.vlgmr.msra.gmra.mxu2 %v5604_v38  ;;  %1529 = vmatmul.f32.vlgmr.msra.gmra.mxu3 %v5607_v39  ;;  %v1658_v38 = vrot.slane %v3953_v0, 1  ;;  %v4122_v39 = vld [vmem:[%s7949_s1 + $0xbf0] sm:$0xff] }
 0x118   : > { %1787 = vmatmul.f32.vlgmr.msra.gmra.mxu0 %v5922_v19  ;;  %1828 = vmatmul.f32.vlgmr.msra.gmra.mxu1 %v5925_v35 }
 0x119   : > { %2193 = vmatpush.msrb.mxu1 %v4122_v39  ;;  %v5968_v39 = vsel %vm589_vm0, %v1654_v18, %v1658_v38  ;;  %v4118_v18 = vld [vmem:[%s7949_s1 + $0xbd0] sm:$0xff]  ;;  %v4116_v38 = vld [vmem:[%s7949_s1 + $0xbc0] sm:$0xff]  ;;  %2154 = vmatpush.msrb.mxu0 %v4086_v53 }
 0x11a   : > { %v810_v8 = vpop.f32.mrf.mxu2  ;;  %v851_v2 = vpop.f32.mrf.mxu3 }
 0x11b   : > { %v852_v0 = vadd.f32 %v851_v2, %v810_v8  ;;  %2194 = vmatpush.msrb.mxu1 %v4120_v3  ;;  %v3985_v2 = vld [vmem:[%s7949_s1 + $0x868] sm:$0xff]  ;;  %v3983_v8 = vld [vmem:[%s7949_s1 + $0x858] sm:$0xff]  ;;  %2155 = vmatpush.msrb.mxu0 %v4084_v17  ;;  %v4112_v17 = vld [vmem:[%s7949_s1 + $0xba0] sm:$0xff] }
 0x11c   : > { %1862 = vmatpush.msrb.mxu2 %v3985_v2  ;;  %v4015_v3 = vld [vmem:[%s7949_s1 + $0x958] sm:$0xff]  ;;  %v1661_v2 = vrot.slane %v5742_v5, 1 }
 0x11d   : > { %v5958_v7 = vadd.f32 %v852_v0, %v5631_v48  ;;  %v5960_v21 = vpop.f32.mrf.mxu0  ;;  %v5962_v45 = vpop.f32.mrf.mxu1  ;;  %v4017_v48 = vld [vmem:[%s7949_s1 + $0x968] sm:$0xff]  ;;  %v1660_v0 = vrot.slane %v3954_v46, 1  ;;  %2195 = vmatpush.msrb.mxu1 %v4118_v18  ;;  %v4114_v46 = vld [vmem:[%s7949_s1 + $0xbb0] sm:$0xff]  ;;  %2156 = vmatpush.msrb.mxu0 %v4082_v55 }
 0x11e   : > { %1903 = vmatpush.msrb.mxu3 %v4017_v48  ;;  %v1663_v48 = vrot.slane %v3955_v58, 1  ;;  %1863 = vmatpush.msrb.mxu2 %v3983_v8  ;;  %v4078_v55 = vld [vmem:[%s7949_s1 + $0xa90] sm:$0xff] }
 0x11f   : > { %1491 = vmatmul.f32.gmra.mxu2 %v5650_v61  ;;  %1532 = vmatmul.f32.gmra.mxu3 %v5653_v31  ;;  %v6016_v8 = vsel %vm589_vm0, %v1660_v0, %v1661_v2  ;;  %v3979_v0 = vld [vmem:[%s7949_s1 + $0x838] sm:$0xff] }
 0x120   : > { %1790 = vmatmul.f32.gmra.mxu0 %v5965_v11  ;;  %1831 = vmatmul.f32.gmra.mxu1 %v5968_v39 }
 0x121   : > { %1904 = vmatpush.msrb.mxu3 %v4015_v3  ;;  %2196 = vmatpush.msrb.mxu1 %v4116_v38  ;;  %v6019_v3 = vsel %vm589_vm0, %v1663_v48, %v1664_v42  ;;  %v4110_v38 = vld [vmem:[%s7949_s1 + $0xb90] sm:$0xff] }
 0x122   : > { %v813_v54 = vpop.f32.mrf.mxu2  ;;  %v854_v12 = vpop.f32.mrf.mxu3 }
 0x123   : > { %v855_v34 = vadd.f32 %v854_v12, %v813_v54  ;;  %2197 = vmatpush.msrb.mxu1 %v4114_v46  ;;  %v3981_v12 = vld [vmem:[%s7949_s1 + $0x848] sm:$0xff]  ;;  %v4080_v54 = vld [vmem:[%s7949_s1 + $0xaa0] sm:$0xff] }
 0x124   : > { %1864 = vmatpush.msrb.mxu2 %v3981_v12  ;;  %2157 = vmatpush.msrb.mxu0 %v4080_v54 }
 0x125   : > { %v6009_v58 = vadd.f32 %v855_v34, %v5683_v20  ;;  %v6011_v53 = vpop.f32.mrf.mxu0  ;;  %v6013_v18 = vpop.f32.mrf.mxu1  ;;  %v4013_v34 = vld [vmem:[%s7949_s1 + $0x948] sm:$0xff]  ;;  %2198 = vmatpush.msrb.mxu1 %v4112_v17 }
 0x126   : > { %7977 = vst [vmem:[#allocation25_spill] sm:$0xff] %v6011_v53  ;;  %v3959_v20 = vld [vmem:[%s4667_s19 + $0x88] sm:$0x1]  ;;  %1905 = vmatpush.msrb.mxu3 %v4013_v34  ;;  %v4076_v34 = vld [vmem:[%s7949_s1 + $0xa80] sm:$0xff]  ;;  %1865 = vmatpush.msrb.mxu2 %v3979_v0  ;;  %v3975_v0 = vld [vmem:[%s7949_s1 + $0x818] sm:$0xff] }
 0x127   : > { %7978 = vst [vmem:[#allocation26_spill] sm:$0xff] %v6013_v18  ;;  %1494 = vmatmul.f32.gmra.mxu2 %v5696_v27  ;;  %1535 = vmatmul.f32.gmra.mxu3 %v5699_v37  ;;  %v4011_v27 = vld [vmem:[%s7949_s1 + $0x938] sm:$0xff]  ;;  %v1666_v37 = vrot.slane %v3958_v50, 1  ;;  %v1668_v48 = vrot.slane %v3959_v20, 1  ;;  %v4046_v53 = vld [vmem:[%s4667_s19 + $0x80] sm:$0x3] }
 0x128   : > { %1793 = vmatmul.f32.gmra.mxu0 %v6016_v8  ;;  %1834 = vmatmul.f32.gmra.mxu1 %v6019_v3 }
 0x129   : > { %1906 = vmatpush.msrb.mxu3 %v4011_v27  ;;  %2158 = vmatpush.msrb.mxu0 %v4078_v55  ;;  %v6065_v17 = vsel %vm589_vm0, %v1661_v2, %v1666_v37  ;;  %v6068_v62 = vsel %vm589_vm0, %v1664_v42, %v1668_v48  ;;  %v3977_v55 = vld [vmem:[%s7949_s1 + $0x828] sm:$0xff]  ;;  %v4074_v2 = vld [vmem:[%s7949_s1 + $0xa70] sm:$0xff]  ;;  %v1671_v27 = vrot.slane %v5824_v32, 1  ;;  %v1674_v48 = vrot.slane %v5831_v51, 1 }
 0x12a   : > { %v816_v46 = vpop.f32.mrf.mxu2  ;;  %v857_v12 = vpop.f32.mrf.mxu3  ;;  %2199 = vmatpush.msrb.mxu1 %v4110_v38  ;;  %v4106_v42 = vld [vmem:[%s7949_s1 + $0xb70] sm:$0xff]  ;;  %1866 = vmatpush.msrb.mxu2 %v3977_v55  ;;  %v4104_v38 = vld [vmem:[%s7949_s1 + $0xb60] sm:$0xff] }
 0x12b   : > { %v858_v4 = vadd.f32 %v857_v12, %v816_v46  ;;  %2159 = vmatpush.msrb.mxu0 %v4076_v34  ;;  %v4070_v34 = vld [vmem:[%s7949_s1 + $0xa50] sm:$0xff] }
 0x12c   : > { %2200 = vmatpush.msrb.mxu1 %v4108_v47  ;;  %v4072_v47 = vld [vmem:[%s7949_s1 + $0xa60] sm:$0xff]  ;;  %v4102_v55 = vld [vmem:[%s7949_s1 + $0xb50] sm:$0xff]  ;;  %1867 = vmatpush.msrb.mxu2 %v3975_v0 }
 0x12d   : > { %v6058_v50 = vadd.f32 %v858_v4, %v5729_v49  ;;  %v6060_v20 = vpop.f32.mrf.mxu0  ;;  %v6062_v54 = vpop.f32.mrf.mxu1  ;;  %v4009_v49 = vld [vmem:[%s7949_s1 + $0x928] sm:$0xff]  ;;  %v3961_v4 = vld [vmem:[%s4667_s19 + $0x98] sm:$0xfe]  ;;  %2160 = vmatpush.msrb.mxu0 %v4074_v2  ;;  %v4068_v0 = vld [vmem:[%s7949_s1 + $0xa40] sm:$0xff] }
 0x12e   : > { %7979 = vst [vmem:[#allocation27_spill] sm:$0xff] %v6060_v20  ;;  %1907 = vmatpush.msrb.mxu3 %v4009_v49  ;;  %v1673_v37 = vrot.slane %v3961_v4, 1  ;;  %2201 = vmatpush.msrb.mxu1 %v4106_v42  ;;  %v3964_v20 = vld [vmem:[%s4667_s19 + $0xb0] sm:$0x1] }
 0x12f   : > { %7980 = vst [vmem:[#allocation28_spill] sm:$0xff] %v6062_v54  ;;  %1497 = vmatmul.f32.gmra.mxu2 %v5742_v5  ;;  %1538 = vmatmul.f32.gmra.mxu3 %v5745_v1  ;;  %v4007_v5 = vld [vmem:[%s7949_s1 + $0x918] sm:$0xff]  ;;  %v1670_v1 = vrot.slane %v3960_v15, 1 }
 0x130   : > { %1796 = vmatmul.f32.gmra.mxu0 %v6065_v17  ;;  %1837 = vmatmul.f32.gmra.mxu1 %v6068_v62  ;;  %v6119_v54 = vsel %vm589_vm0, %v1673_v37, %v1674_v48  ;;  %v4098_v37 = vld [vmem:[%s7949_s1 + $0xb30] sm:$0xff] }
 0x131   : > { %1908 = vmatpush.msrb.mxu3 %v4007_v5  ;;  %2161 = vmatpush.msrb.mxu0 %v4072_v47  ;;  %v6116_v42 = vsel %vm589_vm0, %v1670_v1, %v1671_v27  ;;  %v3973_v47 = vld [vmem:[%s7949_s1 + $0x808] sm:$0xff]  ;;  %v4100_v5 = vld [vmem:[%s7949_s1 + $0xb40] sm:$0xff]  ;;  %v4066_v1 = vld [vmem:[%s7949_s1 + $0xa30] sm:$0xff] }
 0x132   : > { %v819_v46 = vpop.f32.mrf.mxu2  ;;  %v860_v12 = vpop.f32.mrf.mxu3  ;;  %2202 = vmatpush.msrb.mxu1 %v4104_v38  ;;  %v3965_v38 = vld [vmem:[%s4667_s19 + $0xb8] sm:$0x1]  ;;  %1868 = vmatpush.msrb.mxu2 %v3973_v47  ;;  %v4096_v47 = vld [vmem:[%s7949_s1 + $0xb20] sm:$0xff] }
 0x133   : > { %v861_v15 = vadd.f32 %v860_v12, %v819_v46  ;;  %2162 = vmatpush.msrb.mxu0 %v4070_v34  ;;  %v4091_v46 = vld [vmem:[%s7949_s1 + $0xaf8] sm:$0xff]  ;;  %v1678_v12 = vrot.slane %v3965_v38, 1 }
 0x134   : > { %2203 = vmatpush.msrb.mxu1 %v4102_v55  ;;  %2234 = vmatpush.msra.mxu2 %v4091_v46  ;;  %v4060_v46 = vld [vmem:[%s7949_s1 + $0xa00] sm:$0xff] }
 0x135   : > { %v6109_v49 = vadd.f32 %v861_v15, %v5775_v24  ;;  %v6111_v4 = vpop.f32.mrf.mxu0  ;;  %v6113_v2 = vpop.f32.mrf.mxu1  ;;  %v4005_v24 = vld [vmem:[%s7949_s1 + $0x908] sm:$0xff]  ;;  %2163 = vmatpush.msrb.mxu0 %v4068_v0  ;;  %v4064_v15 = vld [vmem:[%s7949_s1 + $0xa20] sm:$0xff] }
 0x136   : > { %7981 = vst [vmem:[#allocation29_spill] sm:$0xff] %v6111_v4  ;;  %1909 = vmatpush.msrb.mxu3 %v4005_v24  ;;  %2204 = vmatpush.msrb.mxu1 %v4100_v5  ;;  %v3966_v4 = vld [vmem:[%s4667_s19 + $0xc0] sm:$0xfe] }
 0x137   : > { %7982 = vst [vmem:[#allocation30_spill] sm:$0xff] %v6113_v2  ;;  %1500 = vmatmul.f32.gmra.mxu2 %v5788_v52  ;;  %1541 = vmatmul.f32.gmra.mxu3 %v5791_v9  ;;  %v4123_v52 = vld [vmem:[%s7949_s1 + $0xbf8] sm:$0xff]  ;;  %v1676_v9 = vrot.slane %v3964_v20, 1  ;;  %v6168_v2 = vsel %vm589_vm0, %v1674_v48, %v1678_v12  ;;  %v4094_v48 = vld [vmem:[%s7949_s1 + $0xb10] sm:$0xff]  ;;  %v1680_v12 = vrot.slane %v3966_v4, 1 }
 0x138   : > { %1799 = vmatmul.f32.gmra.mxu0 %v6116_v42  ;;  %1840 = vmatmul.f32.gmra.mxu1 %v6119_v54 }
 0x139   : > { %2275 = vmatpush.msra.mxu3 %v4123_v52  ;;  %2164 = vmatpush.msrb.mxu0 %v4066_v1  ;;  %v6165_v5 = vsel %vm589_vm0, %v1671_v27, %v1676_v9  ;;  %v4089_v1 = vld [vmem:[%s7949_s1 + $0xae8] sm:$0xff]  ;;  %v4062_v27 = vld [vmem:[%s7949_s1 + $0xa10] sm:$0xff]  ;;  %v4092_v52 = vld [vmem:[%s7949_s1 + $0xb00] sm:$0xff] }
 0x13a   : > { %v822_v34 = vpop.f32.mrf.mxu2  ;;  %v863_v55 = vpop.f32.mrf.mxu3  ;;  %2205 = vmatpush.msrb.mxu1 %v4098_v37  ;;  %v3967_v37 = vld [vmem:[%s4667_s19 + $0xc8] sm:$0xfe]  ;;  %2235 = vmatpush.msra.mxu2 %v4089_v1  ;;  %v4087_v9 = vld [vmem:[%s7949_s1 + $0xad8] sm:$0xff] }
 0x13b   : > { %v864_v24 = vadd.f32 %v863_v55, %v822_v34  ;;  %2165 = vmatpush.msrb.mxu0 %v4064_v15  ;;  %v1681_v34 = vrot.slane %v5886_v29, 1  ;;  %v1683_v55 = vrot.slane %v3967_v37, 1  ;;  %v1684_v15 = vrot.slane %v5893_v41, 1 }
 0x13c   : > { %2206 = vmatpush.msrb.mxu1 %v4096_v47  ;;  %2236 = vmatpush.msra.mxu2 %v4087_v9  ;;  %v4083_v9 = vld [vmem:[%s7949_s1 + $0xab8] sm:$0xff] }
 0x13d   : > { %v6158_v20 = vadd.f32 %v864_v24, %v5821_v6  ;;  %v6160_v38 = vpop.f32.mrf.mxu0  ;;  %v6162_v0 = vpop.f32.mrf.mxu1  ;;  %v4121_v6 = vld [vmem:[%s7949_s1 + $0xbe8] sm:$0xff]  ;;  %2166 = vmatpush.msrb.mxu0 %v4062_v27  ;;  %v6210_v37 = vsel %vm589_vm0, %v1680_v12, %v1681_v34  ;;  %v6213_v27 = vsel %vm589_vm0, %v1683_v55, %v1684_v15 }
 0x13e   : > { %7983 = vst [vmem:[#allocation31_spill] sm:$0xff] %v6160_v38  ;;  %2276 = vmatpush.msra.mxu3 %v4121_v6  ;;  %2207 = vmatpush.msrb.mxu1 %v4094_v48  ;;  %v4085_v48 = vld [vmem:[%s7949_s1 + $0xac8] sm:$0xff] }
 0x13f   : > { %7984 = vst [vmem:[#allocation32_spill] sm:$0xff] %v6162_v0  ;;  %1503 = vmatmul.f32.gmra.mxu2 %v5824_v32  ;;  %1544 = vmatmul.f32.gmra.mxu3 %v5831_v51  ;;  %v4119_v51 = vld [vmem:[%s7949_s1 + $0xbd8] sm:$0xff] }
 0x140   : > { %1802 = vmatmul.f32.gmra.mxu0 %v6165_v5  ;;  %1843 = vmatmul.f32.gmra.mxu1 %v6168_v2 }
 0x141   : > { %2277 = vmatpush.msra.mxu3 %v4119_v51  ;;  %2167 = vmatpush.msrb.mxu0 %v4060_v46  ;;  %v4117_v46 = vld [vmem:[%s7949_s1 + $0xbc8] sm:$0xff]  ;;  %v4115_v51 = vld [vmem:[%s7949_s1 + $0xbb8] sm:$0xff] }
 0x142   : > { %v825_v47 = vpop.f32.mrf.mxu2  ;;  %v866_v24 = vpop.f32.mrf.mxu3  ;;  %2208 = vmatpush.msrb.mxu1 %v4092_v52  ;;  %v3971_v52 = vld [vmem:[%s4667_s19 + $0xe8] sm:$0x1]  ;;  %2237 = vmatpush.msra.mxu2 %v4085_v48 }
 0x143   : > { %v867_v1 = vadd.f32 %v866_v24, %v825_v47  ;;  %2278 = vmatpush.msra.mxu3 %v4117_v46  ;;  %v1688_v55 = vrot.slane %v3971_v52, 1  ;;  %v4113_v52 = vld [vmem:[%s7949_s1 + $0xba8] sm:$0xff] }
 0x144   : > { %2238 = vmatpush.msra.mxu2 %v4083_v9  ;;  %v4037_v9 = vld [vmem:[%s4667_s19 + $0x38] sm:$0xfc] }
 0x145   : > { %v6203_v6 = vadd.f32 %v867_v1, %v5855_v43  ;;  %v6205_v4 = vpop.f32.mrf.mxu0  ;;  %v6207_v0 = vpop.f32.mrf.mxu1  ;;  %v3970_v43 = vld [vmem:[%s4667_s19 + $0xe0] sm:$0x1]  ;;  %2279 = vmatpush.msra.mxu3 %v4115_v51 }
 0x146   : > { %7985 = vst [vmem:[#allocation33_spill] sm:$0xff] %v6205_v4  ;;  %v1686_v12 = vrot.slane %v3970_v43, 1  ;;  %v4081_v43 = vld [vmem:[%s7949_s1 + $0xaa8] sm:$0xff] }
 0x147   : > { %7986 = vst [vmem:[#allocation34_spill] sm:$0xff] %v6207_v0  ;;  %1506 = vmatmul.f32.gmra.mxu2 %v5858_v44  ;;  %1547 = vmatmul.f32.gmra.mxu3 %v5865_v16  ;;  %v6244_v0 = vsel %vm589_vm0, %v1684_v15, %v1688_v55  ;;  %v4111_v15 = vld [vmem:[%s7949_s1 + $0xb98] sm:$0xff]  ;;  %v4043_v4 = vld [vmem:[%s4667_s19 + $0x68] sm:$0xfc] }
 0x148   : > { %1805 = vmatmul.f32.gmra.mxu0 %v6210_v37  ;;  %1846 = vmatmul.f32.gmra.mxu1 %v6213_v27  ;;  %v6241_v46 = vsel %vm589_vm0, %v1681_v34, %v1686_v12  ;;  %v4079_v34 = vld [vmem:[%s7949_s1 + $0xa98] sm:$0xff]  ;;  %v2032_v12 = vrot.slane %v5650_v61, 2 }
 0x149   : > { %2239 = vmatpush.msra.mxu2 %v4081_v43  ;;  %2280 = vmatpush.msra.mxu3 %v4113_v52 }
 0x14a   : > { %v828_v44 = vpop.f32.mrf.mxu2  ;;  %v869_v16 = vpop.f32.mrf.mxu3 }
 0x14b   : > { %v870_v47 = vadd.f32 %v869_v16, %v828_v44  ;;  %2240 = vmatpush.msra.mxu2 %v4079_v34  ;;  %2281 = vmatpush.msra.mxu3 %v4111_v15  ;;  %v4041_v34 = vld [vmem:[%s4667_s19 + $0x58] sm:$0x3] }
 0x14c   : > { %v4075_v15 = vld [vmem:[%s7949_s1 + $0xa78] sm:$0xff] }
 0x14d   : > { %v6234_v24 = vadd.f32 %v870_v47, %v5883_v13  ;;  %v6236_v1 = vpop.f32.mrf.mxu0  ;;  %v6238_v48 = vpop.f32.mrf.mxu1  ;;  %v4036_v13 = vld [vmem:[%s4667_s19 + $0x30] sm:$0xfc] }
 0x14e   : > { %7987 = vst [vmem:[#allocation35_spill] sm:$0xff] %v6236_v1  ;;  %v2031_v51 = vrot.slane %v4036_v13, 2 }
 0x14f   : > { %7988 = vst [vmem:[#allocation36_spill] sm:$0xff] %v6238_v48  ;;  %1509 = vmatmul.f32.gmra.mxu2 %v5886_v29  ;;  %1550 = vmatmul.f32.gmra.mxu3 %v5893_v41  ;;  %v2034_v29 = vrot.slane %v4037_v9, 2  ;;  %v2035_v41 = vrot.slane %v5653_v31, 2  ;;  %v4077_v31 = vld [vmem:[%s7949_s1 + $0xa88] sm:$0xff] }
 0x150   : > { %1808 = vmatmul.f32.gmra.mxu0 %v6241_v46  ;;  %1849 = vmatmul.f32.gmra.mxu1 %v6244_v0  ;;  %v6274_v13 = vsel %vm971_vm1, %v2031_v51, %v2032_v12  ;;  %v4109_v9 = vld [vmem:[%s7949_s1 + $0xb88] sm:$0xff]  ;;  %v4107_v51 = vld [vmem:[%s7949_s1 + $0xb78] sm:$0xff] }
 0x151   : > { %v6277_v61 = vsel %vm971_vm1, %v2034_v29, %v2035_v41  ;;  %2241 = vmatpush.msra.mxu2 %v4077_v31  ;;  %2282 = vmatpush.msra.mxu3 %v4109_v9  ;;  %v4170_v31 = vld [vmem:[%s7949_s1 + $0xce0] sm:$0xff] }
 0x152   : > { %v831_v55 = vpop.f32.mrf.mxu2  ;;  %v872_v44 = vpop.f32.mrf.mxu3  ;;  %v4202_v9 = vld [vmem:[%s7949_s1 + $0xde0] sm:$0xff] }
 0x153   : > { %v873_v16 = vadd.f32 %v872_v44, %v831_v55  ;;  %2242 = vmatpush.msra.mxu2 %v4075_v15  ;;  %2283 = vmatpush.msra.mxu3 %v4107_v51  ;;  %v4204_v55 = vld [vmem:[%s7949_s1 + $0xdf0] sm:$0xff] }
 0x154   : > { %2490 = vmatpush.msra.mxu1 %v4204_v55  ;;  %v6311_v15 = vld [vmem:[%s4667_s19 + $0x70] sm:$0xff] }
 0x155   : > { %v6267_v47 = vadd.f32 %v873_v16, %v5915_v33  ;;  %v6269_v43 = vpop.f32.mrf.mxu0  ;;  %v6271_v52 = vpop.f32.mrf.mxu1  ;;  %v4040_v33 = vld [vmem:[%s4667_s19 + $0x50] sm:$0x3] }
 0x156   : > { %v2037_v29 = vrot.slane %v4040_v33, 2  ;;  %2491 = vmatpush.msra.mxu1 %v4202_v9  ;;  %v2042_v9 = vrot.slane %v6311_v15, 2 }
 0x157   : > { %1869 = vmatmul.f32.vlgmr.msrb.gmra.mxu2 %v5922_v19  ;;  %1910 = vmatmul.f32.vlgmr.msrb.gmra.mxu3 %v5925_v35  ;;  %v4172_v19 = vld [vmem:[%s7949_s1 + $0xcf0] sm:$0xff]  ;;  %v2039_v35 = vrot.slane %v4041_v34, 2  ;;  %v4042_v34 = vld [vmem:[%s4667_s19 + $0x60] sm:$0xfc] }
 0x158   : > { %2168 = vmatmul.f32.vlgmr.msrb.gmra.mxu0 %v6274_v13  ;;  %2209 = vmatmul.f32.vlgmr.msrb.gmra.mxu1 %v6277_v61  ;;  %v6321_v48 = vsel %vm971_vm1, %v2032_v12, %v2037_v29  ;;  %v4168_v12 = vld [vmem:[%s7949_s1 + $0xcd0] sm:$0xff]  ;;  %v4166_v29 = vld [vmem:[%s7949_s1 + $0xcc0] sm:$0xff] }
 0x159   : > { %2449 = vmatpush.msra.mxu0 %v4172_v19  ;;  %v6324_v1 = vsel %vm971_vm1, %v2035_v41, %v2039_v35  ;;  %v4200_v41 = vld [vmem:[%s7949_s1 + $0xdd0] sm:$0xff]  ;;  %v4198_v35 = vld [vmem:[%s7949_s1 + $0xdc0] sm:$0xff] }
 0x15a   : > { %v1192_v44 = vpop.f32.mrf.mxu2  ;;  %v1233_v16 = vpop.f32.mrf.mxu3  ;;  %2492 = vmatpush.msra.mxu1 %v4200_v41 }
 0x15b   : > { %v1234_v33 = vadd.f32 %v1233_v16, %v1192_v44  ;;  %2450 = vmatpush.msra.mxu0 %v4170_v31  ;;  %v4073_v44 = vld [vmem:[%s7949_s1 + $0xa68] sm:$0xff]  ;;  %v6334_v16 = vld [vmem:[%s4667_s19 + $0x78] sm:$0xff] }
 0x15c   : > { %2243 = vmatpush.msra.mxu2 %v4073_v44  ;;  %v4071_v31 = vld [vmem:[%s7949_s1 + $0xa58] sm:$0xff]  ;;  %v2045_v44 = vrot.slane %v6334_v16, 2  ;;  %2493 = vmatpush.msra.mxu1 %v4198_v35  ;;  %v4194_v35 = vld [vmem:[%s7949_s1 + $0xda0] sm:$0xff] }
 0x15d   : > { %v6314_v51 = vadd.f32 %v1234_v33, %v5958_v7  ;;  %v6316_v19 = vpop.f32.mrf.mxu0  ;;  %v6318_v55 = vpop.f32.mrf.mxu1  ;;  %v4105_v7 = vld [vmem:[%s7949_s1 + $0xb68] sm:$0xff]  ;;  %v2044_v33 = vrot.slane %v4043_v4, 2  ;;  %2451 = vmatpush.msra.mxu0 %v4168_v12 }
 0x15e   : > { %7989 = vst [vmem:[#allocation37_spill] sm:$0xff] %v6318_v55  ;;  %2284 = vmatpush.msra.mxu3 %v4105_v7  ;;  %2244 = vmatpush.msra.mxu2 %v4071_v31 }
 0x15f   : > { %1872 = vmatmul.f32.gmra.mxu2 %v5965_v11  ;;  %1913 = vmatmul.f32.gmra.mxu3 %v5968_v39  ;;  %v4103_v11 = vld [vmem:[%s7949_s1 + $0xb58] sm:$0xff]  ;;  %v2041_v39 = vrot.slane %v4042_v34, 2  ;;  %v4196_v34 = vld [vmem:[%s7949_s1 + $0xdb0] sm:$0xff] }
 0x160   : > { %2171 = vmatmul.f32.gmra.mxu0 %v6321_v48  ;;  %2212 = vmatmul.f32.gmra.mxu1 %v6324_v1 }
 0x161   : > { %2285 = vmatpush.msra.mxu3 %v4103_v11  ;;  %2452 = vmatpush.msra.mxu0 %v4166_v29  ;;  %v6374_v31 = vsel %vm971_vm1, %v2041_v39, %v2042_v9  ;;  %v6377_v11 = vsel %vm971_vm1, %v2044_v33, %v2045_v44  ;;  %v4162_v29 = vld [vmem:[%s7949_s1 + $0xca0] sm:$0xff]  ;;  %v4192_v39 = vld [vmem:[%s7949_s1 + $0xd90] sm:$0xff]  ;;  %v4067_v33 = vld [vmem:[%s7949_s1 + $0xa38] sm:$0xff] }
 0x162   : > { %v1195_v7 = vpop.f32.mrf.mxu2  ;;  %v1236_v38 = vpop.f32.mrf.mxu3  ;;  %2494 = vmatpush.msra.mxu1 %v4196_v34 }
 0x163   : > { %v1237_v18 = vadd.f32 %v1236_v38, %v1195_v7  ;;  %2453 = vmatpush.msra.mxu0 %v4164_v14  ;;  %v4069_v38 = vld [vmem:[%s7949_s1 + $0xa48] sm:$0xff]  ;;  %v4160_v14 = vld [vmem:[%s7949_s1 + $0xc90] sm:$0xff] }
 0x164   : > { %2245 = vmatpush.msra.mxu2 %v4069_v38  ;;  %2495 = vmatpush.msra.mxu1 %v4194_v35 }
 0x165   : > { %v6367_v4 = vadd.f32 %v1237_v18, %v6009_v58  ;;  %v6369_v12 = vpop.f32.mrf.mxu0  ;;  %v6371_v41 = vpop.f32.mrf.mxu1  ;;  %v4101_v58 = vld [vmem:[%s7949_s1 + $0xb48] sm:$0xff]  ;;  %2454 = vmatpush.msra.mxu0 %v4162_v29 }
 0x166   : > { %7990 = vst [vmem:[#allocation38_spill] sm:$0xff] %v6369_v12  ;;  %v4047_v18 = vld [vmem:[%s4667_s19 + $0x88] sm:$0x3]  ;;  %2286 = vmatpush.msra.mxu3 %v4101_v58  ;;  %v4158_v58 = vld [vmem:[%s7949_s1 + $0xc80] sm:$0xff]  ;;  %2246 = vmatpush.msra.mxu2 %v4067_v33  ;;  %v4049_v33 = vld [vmem:[%s4667_s19 + $0x98] sm:$0xfc] }
 0x167   : > { %7991 = vst [vmem:[#allocation39_spill] sm:$0xff] %v6371_v41  ;;  %1875 = vmatmul.f32.gmra.mxu2 %v6016_v8  ;;  %1916 = vmatmul.f32.gmra.mxu3 %v6019_v3  ;;  %v4099_v8 = vld [vmem:[%s7949_s1 + $0xb38] sm:$0xff]  ;;  %v2047_v3 = vrot.slane %v4046_v53, 2  ;;  %v2049_v7 = vrot.slane %v4047_v18, 2  ;;  %v4190_v41 = vld [vmem:[%s7949_s1 + $0xd80] sm:$0xff] }
 0x168   : > { %2174 = vmatmul.f32.gmra.mxu0 %v6374_v31  ;;  %2215 = vmatmul.f32.gmra.mxu1 %v6377_v11  ;;  %v4048_v53 = vld [vmem:[%s4667_s19 + $0x90] sm:$0xfc] }
 0x169   : > { %2287 = vmatpush.msra.mxu3 %v4099_v8  ;;  %2455 = vmatpush.msra.mxu0 %v4160_v14  ;;  %v6424_v36 = vsel %vm971_vm1, %v2042_v9, %v2047_v3  ;;  %v6427_v28 = vsel %vm971_vm1, %v2045_v44, %v2049_v7  ;;  %v4065_v14 = vld [vmem:[%s7949_s1 + $0xa28] sm:$0xff]  ;;  %v4156_v9 = vld [vmem:[%s7949_s1 + $0xc70] sm:$0xff]  ;;  %v4063_v8 = vld [vmem:[%s7949_s1 + $0xa18] sm:$0xff]  ;;  %v2052_v3 = vrot.slane %v5824_v32, 2  ;;  %v2054_v7 = vrot.slane %v4049_v33, 2 }
 0x16a   : > { %v1198_v34 = vpop.f32.mrf.mxu2  ;;  %v1239_v38 = vpop.f32.mrf.mxu3  ;;  %2496 = vmatpush.msra.mxu1 %v4192_v39  ;;  %v4188_v44 = vld [vmem:[%s7949_s1 + $0xd70] sm:$0xff]  ;;  %2247 = vmatpush.msra.mxu2 %v4065_v14  ;;  %v4186_v39 = vld [vmem:[%s7949_s1 + $0xd60] sm:$0xff] }
 0x16b   : > { %v1240_v12 = vadd.f32 %v1239_v38, %v1198_v34  ;;  %2456 = vmatpush.msra.mxu0 %v4158_v58  ;;  %v4152_v14 = vld [vmem:[%s7949_s1 + $0xc50] sm:$0xff] }
 0x16c   : > { %2497 = vmatpush.msra.mxu1 %v4190_v41  ;;  %v4154_v41 = vld [vmem:[%s7949_s1 + $0xc60] sm:$0xff]  ;;  %2248 = vmatpush.msra.mxu2 %v4063_v8 }
 0x16d   : > { %v6417_v18 = vadd.f32 %v1240_v12, %v6058_v50  ;;  %v6419_v29 = vpop.f32.mrf.mxu0  ;;  %v6421_v35 = vpop.f32.mrf.mxu1  ;;  %v4097_v50 = vld [vmem:[%s7949_s1 + $0xb28] sm:$0xff]  ;;  %2457 = vmatpush.msra.mxu0 %v4156_v9  ;;  %v4150_v8 = vld [vmem:[%s7949_s1 + $0xc40] sm:$0xff] }
 0x16e   : > { %7992 = vst [vmem:[#allocation40_spill] sm:$0xff] %v6419_v29  ;;  %v6437_v12 = vld [vmem:[%s4667_s19 + $0xa8] sm:$0xff]  ;;  %2288 = vmatpush.msra.mxu3 %v4097_v50  ;;  %2498 = vmatpush.msra.mxu1 %v4188_v44  ;;  %v4184_v50 = vld [vmem:[%s7949_s1 + $0xd50] sm:$0xff] }
 0x16f   : > { %7993 = vst [vmem:[#allocation41_spill] sm:$0xff] %v6421_v35  ;;  %1878 = vmatmul.f32.gmra.mxu2 %v6065_v17  ;;  %1919 = vmatmul.f32.gmra.mxu3 %v6068_v62  ;;  %v4095_v62 = vld [vmem:[%s7949_s1 + $0xb18] sm:$0xff]  ;;  %v2051_v17 = vrot.slane %v4048_v53, 2  ;;  %v2055_v34 = vrot.slane %v6437_v12, 2  ;;  %v4052_v29 = vld [vmem:[%s4667_s19 + $0xb0] sm:$0x3] }
 0x170   : > { %2177 = vmatmul.f32.gmra.mxu0 %v6424_v36  ;;  %2218 = vmatmul.f32.gmra.mxu1 %v6427_v28 }
 0x171   : > { %2289 = vmatpush.msra.mxu3 %v4095_v62  ;;  %2458 = vmatpush.msra.mxu0 %v4154_v41  ;;  %v6477_v44 = vsel %vm971_vm1, %v2051_v17, %v2052_v3  ;;  %v6480_v35 = vsel %vm971_vm1, %v2054_v7, %v2055_v34  ;;  %v4061_v41 = vld [vmem:[%s7949_s1 + $0xa08] sm:$0xff]  ;;  %v4182_v62 = vld [vmem:[%s7949_s1 + $0xd40] sm:$0xff]  ;;  %v4148_v17 = vld [vmem:[%s7949_s1 + $0xc30] sm:$0xff] }
 0x172   : > { %v1201_v38 = vpop.f32.mrf.mxu2  ;;  %v1242_v58 = vpop.f32.mrf.mxu3  ;;  %2499 = vmatpush.msra.mxu1 %v4186_v39  ;;  %v4053_v39 = vld [vmem:[%s4667_s19 + $0xb8] sm:$0x3]  ;;  %2249 = vmatpush.msra.mxu2 %v4061_v41  ;;  %v4180_v7 = vld [vmem:[%s7949_s1 + $0xd30] sm:$0xff]  ;;  %v4178_v41 = vld [vmem:[%s7949_s1 + $0xd20] sm:$0xff] }
 0x173   : > { %v1243_v32 = vadd.f32 %v1242_v58, %v1201_v38  ;;  %2459 = vmatpush.msra.mxu0 %v4152_v14  ;;  %v4173_v38 = vld [vmem:[%s7949_s1 + $0xcf8] sm:$0xff]  ;;  %v2059_v58 = vrot.slane %v4053_v39, 2  ;;  %v6520_v39 = vld [vmem:[%s4667_s19 + $0xd0] sm:$0xff] }
 0x174   : > { %2500 = vmatpush.msra.mxu1 %v4184_v50  ;;  %2531 = vmatpush.msrb.mxu2 %v4173_v38 }
 0x175   : > { %v6470_v53 = vadd.f32 %v1243_v32, %v6109_v49  ;;  %v6472_v33 = vpop.f32.mrf.mxu0  ;;  %v6474_v9 = vpop.f32.mrf.mxu1  ;;  %v4093_v49 = vld [vmem:[%s7949_s1 + $0xb08] sm:$0xff]  ;;  %2460 = vmatpush.msra.mxu0 %v4150_v8  ;;  %v4146_v32 = vld [vmem:[%s7949_s1 + $0xc20] sm:$0xff]  ;;  %v6533_v38 = vsel %vm971_vm1, %v2055_v34, %v2059_v58  ;;  %v4176_v34 = vld [vmem:[%s7949_s1 + $0xd10] sm:$0xff] }
 0x176   : > { %7994 = vst [vmem:[#allocation42_spill] sm:$0xff] %v6472_v33  ;;  %2290 = vmatpush.msra.mxu3 %v4093_v49  ;;  %2501 = vmatpush.msra.mxu1 %v4182_v62  ;;  %v4174_v58 = vld [vmem:[%s7949_s1 + $0xd00] sm:$0xff] }
 0x177   : > { %7995 = vst [vmem:[#allocation43_spill] sm:$0xff] %v6474_v9  ;;  %1881 = vmatmul.f32.gmra.mxu2 %v6116_v42  ;;  %1922 = vmatmul.f32.gmra.mxu3 %v6119_v54  ;;  %v4205_v54 = vld [vmem:[%s7949_s1 + $0xdf8] sm:$0xff]  ;;  %v2057_v42 = vrot.slane %v4052_v29, 2  ;;  %v4054_v29 = vld [vmem:[%s4667_s19 + $0xc0] sm:$0xfc] }
 0x178   : > { %2180 = vmatmul.f32.gmra.mxu0 %v6477_v44  ;;  %2221 = vmatmul.f32.gmra.mxu1 %v6480_v35 }
 0x179   : > { %2572 = vmatpush.msrb.mxu3 %v4205_v54  ;;  %2461 = vmatpush.msra.mxu0 %v4148_v17  ;;  %v6530_v33 = vsel %vm971_vm1, %v2052_v3, %v2057_v42  ;;  %v4055_v54 = vld [vmem:[%s4667_s19 + $0xc8] sm:$0xfc]  ;;  %v4144_v3 = vld [vmem:[%s7949_s1 + $0xc10] sm:$0xff]  ;;  %v4142_v42 = vld [vmem:[%s7949_s1 + $0xc00] sm:$0xff] }
 0x17a   : > { %v1204_v14 = vpop.f32.mrf.mxu2  ;;  %v1245_v50 = vpop.f32.mrf.mxu3  ;;  %2502 = vmatpush.msra.mxu1 %v4180_v7  ;;  %v4171_v17 = vld [vmem:[%s7949_s1 + $0xce8] sm:$0xff]  ;;  %v6543_v7 = vld [vmem:[%s4667_s19 + $0xd8] sm:$0xff] }
 0x17b   : > { %v1246_v49 = vadd.f32 %v1245_v50, %v1204_v14  ;;  %2462 = vmatpush.msra.mxu0 %v4146_v32  ;;  %2532 = vmatpush.msrb.mxu2 %v4171_v17  ;;  %v4169_v14 = vld [vmem:[%s7949_s1 + $0xcd8] sm:$0xff]  ;;  %v2062_v50 = vrot.slane %v6520_v39, 2  ;;  %v2064_v32 = vrot.slane %v4055_v54, 2 }
 0x17c   : > { %2503 = vmatpush.msra.mxu1 %v4178_v41  ;;  %v2065_v41 = vrot.slane %v6543_v7, 2 }
 0x17d   : > { %v6523_v8 = vadd.f32 %v1246_v49, %v6158_v20  ;;  %v6525_v62 = vpop.f32.mrf.mxu0  ;;  %v6527_v9 = vpop.f32.mrf.mxu1  ;;  %v4203_v20 = vld [vmem:[%s7949_s1 + $0xde8] sm:$0xff]  ;;  %2463 = vmatpush.msra.mxu0 %v4144_v3  ;;  %2533 = vmatpush.msrb.mxu2 %v4169_v14  ;;  %v4165_v14 = vld [vmem:[%s7949_s1 + $0xcb8] sm:$0xff] }
 0x17e   : > { %7996 = vst [vmem:[#allocation44_spill] sm:$0xff] %v6525_v62  ;;  %2573 = vmatpush.msrb.mxu3 %v4203_v20  ;;  %2504 = vmatpush.msra.mxu1 %v4176_v34  ;;  %v6580_v3 = vsel %vm971_vm1, %v2064_v32, %v2065_v41  ;;  %v4167_v34 = vld [vmem:[%s7949_s1 + $0xcc8] sm:$0xff] }
 0x17f   : > { %7997 = vst [vmem:[#allocation45_spill] sm:$0xff] %v6527_v9  ;;  %1884 = vmatmul.f32.gmra.mxu2 %v6165_v5  ;;  %1925 = vmatmul.f32.gmra.mxu3 %v6168_v2  ;;  %v4201_v2 = vld [vmem:[%s7949_s1 + $0xdd8] sm:$0xff]  ;;  %v2061_v5 = vrot.slane %v4054_v29, 2 }
 0x180   : > { %2183 = vmatmul.f32.gmra.mxu0 %v6530_v33  ;;  %2224 = vmatmul.f32.gmra.mxu1 %v6533_v38 }
 0x181   : > { %2574 = vmatpush.msrb.mxu3 %v4201_v2  ;;  %2464 = vmatpush.msra.mxu0 %v4142_v42  ;;  %v6577_v54 = vsel %vm971_vm1, %v2061_v5, %v2062_v50  ;;  %v4199_v42 = vld [vmem:[%s7949_s1 + $0xdc8] sm:$0xff]  ;;  %v4197_v2 = vld [vmem:[%s7949_s1 + $0xdb8] sm:$0xff] }
 0x182   : > { %v1207_v49 = vpop.f32.mrf.mxu2  ;;  %v1248_v17 = vpop.f32.mrf.mxu3  ;;  %2505 = vmatpush.msra.mxu1 %v4174_v58  ;;  %v4059_v58 = vld [vmem:[%s4667_s19 + $0xe8] sm:$0x3]  ;;  %2534 = vmatpush.msrb.mxu2 %v4167_v34 }
 0x183   : > { %v1249_v20 = vadd.f32 %v1248_v17, %v1207_v49  ;;  %2575 = vmatpush.msrb.mxu3 %v4199_v42  ;;  %v2069_v32 = vrot.slane %v4059_v58, 2 }
 0x184   : > { %2535 = vmatpush.msrb.mxu2 %v4165_v14 }
 0x185   : > { %v6570_v9 = vadd.f32 %v1249_v20, %v6203_v6  ;;  %v6572_v29 = vpop.f32.mrf.mxu0  ;;  %v6574_v62 = vpop.f32.mrf.mxu1  ;;  %v4058_v6 = vld [vmem:[%s4667_s19 + $0xe0] sm:$0x3]  ;;  %2576 = vmatpush.msrb.mxu3 %v4197_v2 }
 0x186   : > { %7998 = vst [vmem:[#allocation46_spill] sm:$0xff] %v6572_v29  ;;  %v2067_v5 = vrot.slane %v4058_v6, 2  ;;  %v4163_v6 = vld [vmem:[%s7949_s1 + $0xca8] sm:$0xff]  ;;  %v6766_v29 = vld [vmem:[%s4667_s19 + $0xa0] sm:$0xff] }
 0x187   : > { %7999 = vst [vmem:[#allocation47_spill] sm:$0xff] %v6574_v62  ;;  %1887 = vmatmul.f32.gmra.mxu2 %v6210_v37  ;;  %1928 = vmatmul.f32.gmra.mxu3 %v6213_v27  ;;  %v6611_v62 = vsel %vm971_vm1, %v2065_v41, %v2069_v32  ;;  %v4193_v41 = vld [vmem:[%s7949_s1 + $0xd98] sm:$0xff] }
 0x188   : > { %2186 = vmatmul.f32.gmra.mxu0 %v6577_v54  ;;  %2227 = vmatmul.f32.gmra.mxu1 %v6580_v3  ;;  %v6608_v42 = vsel %vm971_vm1, %v2062_v50, %v2067_v5  ;;  %v4161_v50 = vld [vmem:[%s7949_s1 + $0xc98] sm:$0xff] }
 0x189   : > { %2536 = vmatpush.msrb.mxu2 %v4163_v6  ;;  %v4189_v6 = vld [vmem:[%s7949_s1 + $0xd78] sm:$0xff] }
 0x18a   : > { %v1210_v49 = vpop.f32.mrf.mxu2  ;;  %v1251_v37 = vpop.f32.mrf.mxu3 }
 0x18b   : > { %v1252_v17 = vadd.f32 %v1251_v37, %v1210_v49  ;;  %2537 = vmatpush.msrb.mxu2 %v4161_v50  ;;  %v6640_v49 = vld [vmem:[%s4667_s19 + $0x68] sm:$0xff] }
 0x18c   : > { %v4159_v37 = vld [vmem:[%s7949_s1 + $0xc88] sm:$0xff] }
 0x18d   : > { %v6601_v27 = vadd.f32 %v1252_v17, %v6234_v24  ;;  %v6603_v20 = vpop.f32.mrf.mxu0  ;;  %v6605_v34 = vpop.f32.mrf.mxu1  ;;  %v4195_v24 = vld [vmem:[%s7949_s1 + $0xda8] sm:$0xff]  ;;  %2538 = vmatpush.msrb.mxu2 %v4159_v37 }
 0x18e   : > { %8000 = vst [vmem:[#allocation48_spill] sm:$0xff] %v6603_v20  ;;  %2577 = vmatpush.msrb.mxu3 %v4195_v24  ;;  %v4191_v17 = vld [vmem:[%s7949_s1 + $0xd88] sm:$0xff]  ;;  %v4260_v24 = vld [vmem:[%s7949_s1 + $0xef0] sm:$0xff] }
 0x18f   : > { %8001 = vst [vmem:[#allocation49_spill] sm:$0xff] %v6605_v34  ;;  %1890 = vmatmul.f32.gmra.mxu2 %v6241_v46  ;;  %1931 = vmatmul.f32.gmra.mxu3 %v6244_v0  ;;  %v6630_v46 = vld [vmem:[%s4667_s19 + $0x60] sm:$0xff]  ;;  %v4151_v34 = vld [vmem:[%s7949_s1 + $0xc48] sm:$0xff] }
 0x190   : > { %2189 = vmatmul.f32.gmra.mxu0 %v6608_v42  ;;  %2230 = vmatmul.f32.gmra.mxu1 %v6611_v62 }
 0x191   : > { %2578 = vmatpush.msrb.mxu3 %v4193_v41  ;;  %2830 = vmatpush.msrb.mxu0 %v4260_v24  ;;  %v4258_v41 = vld [vmem:[%s7949_s1 + $0xee0] sm:$0xff]  ;;  %v4256_v24 = vld [vmem:[%s7949_s1 + $0xed0] sm:$0xff] }
 0x192   : > { %v1213_v58 = vpop.f32.mrf.mxu2  ;;  %v1254_v14 = vpop.f32.mrf.mxu3 }
 0x193   : > { %v1255_v2 = vadd.f32 %v1254_v14, %v1213_v58  ;;  %2579 = vmatpush.msrb.mxu3 %v4191_v17  ;;  %v4290_v58 = vld [vmem:[%s7949_s1 + $0xfe0] sm:$0xff]  ;;  %2831 = vmatpush.msrb.mxu0 %v4258_v41 }
 0x195   : > { %v6633_v0 = vadd.f32 %v1255_v2, %v6267_v47  ;;  %v6635_v5 = vpop.f32.mrf.mxu0  ;;  %v6637_v32 = vpop.f32.mrf.mxu1  ;;  %v4157_v47 = vld [vmem:[%s7949_s1 + $0xc78] sm:$0xff]  ;;  %2580 = vmatpush.msrb.mxu3 %v4189_v6  ;;  %v4187_v6 = vld [vmem:[%s7949_s1 + $0xd68] sm:$0xff]  ;;  %2832 = vmatpush.msrb.mxu0 %v4256_v24 }
 0x196   : > { %2539 = vmatpush.msrb.mxu2 %v4157_v47  ;;  %v4155_v47 = vld [vmem:[%s7949_s1 + $0xc68] sm:$0xff] }
 0x197   : > { %2250 = vmatmul.f32.vlgmr.msra.gmra.mxu2 %v6274_v13  ;;  %2291 = vmatmul.f32.vlgmr.msra.gmra.mxu3 %v6277_v61  ;;  %v4292_v13 = vld [vmem:[%s7949_s1 + $0xff0] sm:$0xff] }
 0x198   : > { %2465 = vmatmul.f32.vlgmr.msra.gmra.mxu0 %v6630_v46  ;;  %2506 = vmatmul.f32.vlgmr.msra.gmra.mxu1 %v6640_v49 }
 0x199   : > { %2871 = vmatpush.msrb.mxu1 %v4292_v13  ;;  %2540 = vmatpush.msrb.mxu2 %v4155_v47  ;;  %v4254_v13 = vld [vmem:[%s7949_s1 + $0xec0] sm:$0xff] }
 0x19a   : > { %v1489_v61 = vpop.f32.mrf.mxu2  ;;  %v1530_v50 = vpop.f32.mrf.mxu3  ;;  %2581 = vmatpush.msrb.mxu3 %v4187_v6  ;;  %2833 = vmatpush.msrb.mxu0 %v4254_v13  ;;  %v6712_v6 = vld [vmem:[%s4667_s19 + $0x90] sm:$0xff]  ;;  %v4183_v13 = vld [vmem:[%s7949_s1 + $0xd48] sm:$0xff] }
 0x19b   : > { %v1531_v14 = vadd.f32 %v1530_v50, %v1489_v61  ;;  %2872 = vmatpush.msrb.mxu1 %v4290_v58  ;;  %v4286_v61 = vld [vmem:[%s7949_s1 + $0xfc0] sm:$0xff]  ;;  %v4153_v50 = vld [vmem:[%s7949_s1 + $0xc58] sm:$0xff]  ;;  %v4252_v58 = vld [vmem:[%s7949_s1 + $0xeb0] sm:$0xff] }
 0x19c   : > { %2541 = vmatpush.msrb.mxu2 %v4153_v50  ;;  %2834 = vmatpush.msrb.mxu0 %v4252_v58 }
 0x19d   : > { %v6671_v2 = vadd.f32 %v1531_v14, %v6314_v51  ;;  %v6673_v37 = vpop.f32.mrf.mxu0  ;;  %v6675_v17 = vpop.f32.mrf.mxu1  ;;  %v4288_v51 = vld [vmem:[%s7949_s1 + $0xfd0] sm:$0xff] }
 0x19e   : > { %8002 = vst [vmem:[#allocation50_spill] sm:$0xff] %v6673_v37  ;;  %2873 = vmatpush.msrb.mxu1 %v4288_v51  ;;  %v4284_v14 = vld [vmem:[%s7949_s1 + $0xfb0] sm:$0xff]  ;;  %2542 = vmatpush.msrb.mxu2 %v4151_v34  ;;  %v4149_v34 = vld [vmem:[%s7949_s1 + $0xc38] sm:$0xff] }
 0x19f   : > { %8003 = vst [vmem:[#allocation51_spill] sm:$0xff] %v6675_v17  ;;  %2253 = vmatmul.f32.gmra.mxu2 %v6321_v48  ;;  %2294 = vmatmul.f32.gmra.mxu3 %v6324_v1  ;;  %v4185_v1 = vld [vmem:[%s7949_s1 + $0xd58] sm:$0xff]  ;;  %v4218_v17 = vld [vmem:[%s4667_s19 + $0xc0] sm:$0xfe] }
 0x1a0   : > { %2468 = vmatmul.f32.gmra.mxu0 %v6311_v15  ;;  %2509 = vmatmul.f32.gmra.mxu1 %v6334_v16 }
 0x1a1   : > { %2582 = vmatpush.msrb.mxu3 %v4185_v1  ;;  %2874 = vmatpush.msrb.mxu1 %v4286_v61  ;;  %v6722_v1 = vld [vmem:[%s4667_s19 + $0x98] sm:$0xff]  ;;  %v4282_v61 = vld [vmem:[%s7949_s1 + $0xfa0] sm:$0xff] }
 0x1a2   : > { %v1492_v48 = vpop.f32.mrf.mxu2  ;;  %v1533_v41 = vpop.f32.mrf.mxu3  ;;  %2543 = vmatpush.msrb.mxu2 %v4149_v34  ;;  %v4242_v34 = vld [vmem:[%s7949_s1 + $0xe60] sm:$0xff] }
 0x1a3   : > { %v1534_v47 = vadd.f32 %v1533_v41, %v1492_v48  ;;  %2875 = vmatpush.msrb.mxu1 %v4284_v14  ;;  %2583 = vmatpush.msrb.mxu3 %v4183_v13  ;;  %v4248_v48 = vld [vmem:[%s7949_s1 + $0xe90] sm:$0xff]  ;;  %v4246_v14 = vld [vmem:[%s7949_s1 + $0xe80] sm:$0xff] }
 0x1a4   : > { %v4280_v41 = vld [vmem:[%s7949_s1 + $0xf90] sm:$0xff] }
 0x1a5   : > { %v6715_v24 = vadd.f32 %v1534_v47, %v6367_v4  ;;  %v6717_v51 = vpop.f32.mrf.mxu0  ;;  %v6719_v50 = vpop.f32.mrf.mxu1  ;;  %v4250_v4 = vld [vmem:[%s7949_s1 + $0xea0] sm:$0xff]  ;;  %2876 = vmatpush.msrb.mxu1 %v4282_v61 }
 0x1a6   : > { %8004 = vst [vmem:[#allocation52_spill] sm:$0xff] %v6717_v51  ;;  %2835 = vmatpush.msrb.mxu0 %v4250_v4  ;;  %v4278_v47 = vld [vmem:[%s7949_s1 + $0xf80] sm:$0xff] }
 0x1a7   : > { %8005 = vst [vmem:[#allocation53_spill] sm:$0xff] %v6719_v50  ;;  %2256 = vmatmul.f32.gmra.mxu2 %v6374_v31  ;;  %2297 = vmatmul.f32.gmra.mxu3 %v6377_v11  ;;  %v4181_v31 = vld [vmem:[%s7949_s1 + $0xd38] sm:$0xff]  ;;  %v4147_v50 = vld [vmem:[%s7949_s1 + $0xc28] sm:$0xff] }
 0x1a8   : > { %2471 = vmatmul.f32.gmra.mxu0 %v6712_v6  ;;  %2512 = vmatmul.f32.gmra.mxu1 %v6722_v1 }
 0x1a9   : > { %2584 = vmatpush.msrb.mxu3 %v4181_v31  ;;  %2836 = vmatpush.msrb.mxu0 %v4248_v48  ;;  %v4179_v48 = vld [vmem:[%s7949_s1 + $0xd28] sm:$0xff]  ;;  %v4274_v31 = vld [vmem:[%s7949_s1 + $0xf60] sm:$0xff] }
 0x1aa   : > { %v1495_v11 = vpop.f32.mrf.mxu2  ;;  %v1536_v58 = vpop.f32.mrf.mxu3  ;;  %2877 = vmatpush.msrb.mxu1 %v4280_v41  ;;  %v4276_v41 = vld [vmem:[%s7949_s1 + $0xf70] sm:$0xff]  ;;  %2544 = vmatpush.msrb.mxu2 %v4147_v50  ;;  %v4145_v50 = vld [vmem:[%s7949_s1 + $0xc18] sm:$0xff] }
 0x1ab   : > { %v1537_v13 = vadd.f32 %v1536_v58, %v1495_v11  ;;  %2837 = vmatpush.msrb.mxu0 %v4246_v14  ;;  %2585 = vmatpush.msrb.mxu3 %v4179_v48  ;;  %v4240_v58 = vld [vmem:[%s7949_s1 + $0xe50] sm:$0xff] }
 0x1ac   : > { %2878 = vmatpush.msrb.mxu1 %v4278_v47  ;;  %v4272_v14 = vld [vmem:[%s7949_s1 + $0xf50] sm:$0xff]  ;;  %2545 = vmatpush.msrb.mxu2 %v4145_v50  ;;  %v4143_v50 = vld [vmem:[%s7949_s1 + $0xc08] sm:$0xff] }
 0x1ad   : > { %v6759_v20 = vadd.f32 %v1537_v13, %v6417_v18  ;;  %v6761_v4 = vpop.f32.mrf.mxu0  ;;  %v6763_v61 = vpop.f32.mrf.mxu1  ;;  %v4244_v18 = vld [vmem:[%s7949_s1 + $0xe70] sm:$0xff]  ;;  %v6803_v13 = vld [vmem:[%s4667_s19 + $0xc0] sm:$0xff] }
 0x1ae   : > { %8006 = vst [vmem:[#allocation54_spill] sm:$0xff] %v6761_v4  ;;  %2838 = vmatpush.msrb.mxu0 %v4244_v18  ;;  %2879 = vmatpush.msrb.mxu1 %v4276_v41  ;;  %v4212_v4 = vld [vmem:[%s4667_s19 + $0x90] sm:$0xfe] }
 0x1af   : > { %8007 = vst [vmem:[#allocation55_spill] sm:$0xff] %v6763_v61  ;;  %2259 = vmatmul.f32.gmra.mxu2 %v6424_v36  ;;  %2300 = vmatmul.f32.gmra.mxu3 %v6427_v28  ;;  %v4177_v28 = vld [vmem:[%s7949_s1 + $0xd18] sm:$0xff]  ;;  %v6813_v61 = vld [vmem:[%s4667_s19 + $0xc8] sm:$0xff] }
 0x1b0   : > { %2474 = vmatmul.f32.gmra.mxu0 %v6766_v29  ;;  %2515 = vmatmul.f32.gmra.mxu1 %v6437_v12 }
 0x1b1   : > { %2586 = vmatpush.msrb.mxu3 %v4177_v28  ;;  %2839 = vmatpush.msrb.mxu0 %v4242_v34  ;;  %v4175_v34 = vld [vmem:[%s7949_s1 + $0xd08] sm:$0xff]  ;;  %v4236_v28 = vld [vmem:[%s7949_s1 + $0xe30] sm:$0xff] }
 0x1b2   : > { %v1498_v36 = vpop.f32.mrf.mxu2  ;;  %v1539_v11 = vpop.f32.mrf.mxu3  ;;  %2880 = vmatpush.msrb.mxu1 %v4274_v31  ;;  %v4270_v31 = vld [vmem:[%s7949_s1 + $0xf40] sm:$0xff]  ;;  %2546 = vmatpush.msrb.mxu2 %v4143_v50 }
 0x1b3   : > { %v1540_v47 = vadd.f32 %v1539_v11, %v1498_v36  ;;  %2840 = vmatpush.msrb.mxu0 %v4240_v58  ;;  %2587 = vmatpush.msrb.mxu3 %v4175_v34  ;;  %v4268_v36 = vld [vmem:[%s7949_s1 + $0xf30] sm:$0xff]  ;;  %v4261_v11 = vld [vmem:[%s7949_s1 + $0xef8] sm:$0xff] }
 0x1b4   : > { %2881 = vmatpush.msrb.mxu1 %v4272_v14  ;;  %v4234_v14 = vld [vmem:[%s7949_s1 + $0xe20] sm:$0xff]  ;;  %2912 = vmatpush.msra.mxu2 %v4261_v11  ;;  %v4291_v11 = vld [vmem:[%s7949_s1 + $0xfe8] sm:$0xff] }
 0x1b5   : > { %v6806_v48 = vadd.f32 %v1540_v47, %v6470_v53  ;;  %v6808_v18 = vpop.f32.mrf.mxu0  ;;  %v6810_v41 = vpop.f32.mrf.mxu1  ;;  %v4238_v53 = vld [vmem:[%s7949_s1 + $0xe40] sm:$0xff] }
 0x1b6   : > { %8008 = vst [vmem:[#allocation56_spill] sm:$0xff] %v6808_v18  ;;  %2841 = vmatpush.msrb.mxu0 %v4238_v53  ;;  %2882 = vmatpush.msrb.mxu1 %v4270_v31  ;;  %v4266_v47 = vld [vmem:[%s7949_s1 + $0xf20] sm:$0xff] }
 0x1b7   : > { %8009 = vst [vmem:[#allocation57_spill] sm:$0xff] %v6810_v41  ;;  %2262 = vmatmul.f32.gmra.mxu2 %v6477_v44  ;;  %2303 = vmatmul.f32.gmra.mxu3 %v6480_v35  ;;  %v4293_v35 = vld [vmem:[%s7949_s1 + $0xff8] sm:$0xff]  ;;  %v4259_v41 = vld [vmem:[%s7949_s1 + $0xee8] sm:$0xff] }
 0x1b8   : > { %2477 = vmatmul.f32.gmra.mxu0 %v6803_v13  ;;  %2518 = vmatmul.f32.gmra.mxu1 %v6813_v61 }
 0x1b9   : > { %2953 = vmatpush.msra.mxu3 %v4293_v35  ;;  %2842 = vmatpush.msrb.mxu0 %v4236_v28  ;;  %v4232_v28 = vld [vmem:[%s7949_s1 + $0xe10] sm:$0xff]  ;;  %v4262_v35 = vld [vmem:[%s7949_s1 + $0xf00] sm:$0xff] }
 0x1ba   : > { %v1501_v44 = vpop.f32.mrf.mxu2  ;;  %v1542_v58 = vpop.f32.mrf.mxu3  ;;  %2883 = vmatpush.msrb.mxu1 %v4268_v36  ;;  %2913 = vmatpush.msra.mxu2 %v4259_v41  ;;  %v4230_v36 = vld [vmem:[%s7949_s1 + $0xe00] sm:$0xff] }
 0x1bb   : > { %v1543_v50 = vadd.f32 %v1542_v58, %v1501_v44  ;;  %2843 = vmatpush.msrb.mxu0 %v4234_v14  ;;  %2954 = vmatpush.msra.mxu3 %v4291_v11  ;;  %v6885_v14 = vld [vmem:[%s4667_s19 + $0xf0] sm:$0xff] }
 0x1bc   : > { %2884 = vmatpush.msrb.mxu1 %v4266_v47 }
 0x1bd   : > { %v6850_v34 = vadd.f32 %v1543_v50, %v6523_v8  ;;  %v6852_v53 = vpop.f32.mrf.mxu0  ;;  %v6854_v31 = vpop.f32.mrf.mxu1  ;;  %v4264_v8 = vld [vmem:[%s7949_s1 + $0xf10] sm:$0xff]  ;;  %2844 = vmatpush.msrb.mxu0 %v4232_v28  ;;  %v4255_v28 = vld [vmem:[%s7949_s1 + $0xec8] sm:$0xff] }
 0x1be   : > { %8010 = vst [vmem:[#allocation58_spill] sm:$0xff] %v6852_v53  ;;  %2885 = vmatpush.msrb.mxu1 %v4264_v8  ;;  %v4287_v8 = vld [vmem:[%s7949_s1 + $0xfc8] sm:$0xff] }
 0x1bf   : > { %8011 = vst [vmem:[#allocation59_spill] sm:$0xff] %v6854_v31  ;;  %2265 = vmatmul.f32.gmra.mxu2 %v6530_v33  ;;  %2306 = vmatmul.f32.gmra.mxu3 %v6533_v38  ;;  %v4257_v33 = vld [vmem:[%s7949_s1 + $0xed8] sm:$0xff] }
 0x1c0   : > { %2480 = vmatmul.f32.gmra.mxu0 %v6520_v39  ;;  %2521 = vmatmul.f32.gmra.mxu1 %v6543_v7  ;;  %v4289_v38 = vld [vmem:[%s7949_s1 + $0xfd8] sm:$0xff] }
 0x1c1   : > { %2914 = vmatpush.msra.mxu2 %v4257_v33  ;;  %2955 = vmatpush.msra.mxu3 %v4289_v38  ;;  %v6895_v31 = vld [vmem:[%s4667_s19 + $0xf8] sm:$0xff] }
 0x1c2   : > { %v1504_v41 = vpop.f32.mrf.mxu2  ;;  %v1545_v44 = vpop.f32.mrf.mxu3  ;;  %2845 = vmatpush.msrb.mxu0 %v4230_v36  ;;  %2886 = vmatpush.msrb.mxu1 %v4262_v35  ;;  %v4285_v36 = vld [vmem:[%s7949_s1 + $0xfb8] sm:$0xff] }
 0x1c3   : > { %v1546_v58 = vadd.f32 %v1545_v44, %v1504_v41  ;;  %2915 = vmatpush.msra.mxu2 %v4255_v28  ;;  %2956 = vmatpush.msra.mxu3 %v4287_v8  ;;  %v4251_v28 = vld [vmem:[%s7949_s1 + $0xea8] sm:$0xff] }
 0x1c4   : > { %v4283_v8 = vld [vmem:[%s7949_s1 + $0xfa8] sm:$0xff] }
 0x1c5   : > { %v6888_v47 = vadd.f32 %v1546_v58, %v6570_v9  ;;  %v6890_v50 = vpop.f32.mrf.mxu0  ;;  %v6892_v11 = vpop.f32.mrf.mxu1  ;;  %v4253_v9 = vld [vmem:[%s7949_s1 + $0xeb8] sm:$0xff]  ;;  %2957 = vmatpush.msra.mxu3 %v4285_v36  ;;  %v6924_v58 = vld [vmem:[%s4667_s19 + $0x108] sm:$0xff] }
 0x1c6   : > { %8012 = vst [vmem:[#allocation60_spill] sm:$0xff] %v6890_v50  ;;  %2916 = vmatpush.msra.mxu2 %v4253_v9  ;;  %v4206_v9 = vld [vmem:[%s4667_s19 + $0x60] sm:$0xfe]  ;;  %v4207_v36 = vld [vmem:[%s4667_s19 + $0x68] sm:$0xfe] }
 0x1c7   : > { %8013 = vst [vmem:[#allocation61_spill] sm:$0xff] %v6892_v11  ;;  %2268 = vmatmul.f32.gmra.mxu2 %v6577_v54  ;;  %2309 = vmatmul.f32.gmra.mxu3 %v6580_v3  ;;  %v6914_v3 = vld [vmem:[%s4667_s19 + $0x100] sm:$0xff] }
 0x1c8   : > { %2483 = vmatmul.f32.gmra.mxu0 %v6885_v14  ;;  %2524 = vmatmul.f32.gmra.mxu1 %v6895_v31 }
 0x1c9   : > { %2917 = vmatpush.msra.mxu2 %v4251_v28  ;;  %2958 = vmatpush.msra.mxu3 %v4283_v8 }
 0x1ca   : > { %v1507_v35 = vpop.f32.mrf.mxu2  ;;  %v1548_v54 = vpop.f32.mrf.mxu3 }
 0x1cb   : > { %v1549_v33 = vadd.f32 %v1548_v54, %v1507_v35  ;;  %v4281_v35 = vld [vmem:[%s7949_s1 + $0xf98] sm:$0xff]  ;;  %v2709_v54 = vrot.slane %v4206_v9, 1 }
 0x1cc   : > { %2959 = vmatpush.msra.mxu3 %v4281_v35  ;;  %v4245_v35 = vld [vmem:[%s7949_s1 + $0xe78] sm:$0xff] }
 0x1cd   : > { %v6917_v38 = vadd.f32 %v1549_v33, %v6601_v27  ;;  %v6919_v41 = vpop.f32.mrf.mxu0  ;;  %v6921_v44 = vpop.f32.mrf.mxu1  ;;  %v4249_v27 = vld [vmem:[%s7949_s1 + $0xe98] sm:$0xff]  ;;  %v2710_v33 = vrot.slane %v6311_v15, 1 }
 0x1ce   : > { %8014 = vst [vmem:[#allocation62_spill] sm:$0xff] %v6919_v41  ;;  %2918 = vmatpush.msra.mxu2 %v4249_v27  ;;  %v4279_v27 = vld [vmem:[%s7949_s1 + $0xf88] sm:$0xff] }
 0x1cf   : > { %8015 = vst [vmem:[#allocation63_spill] sm:$0xff] %v6921_v44  ;;  %2271 = vmatmul.f32.gmra.mxu2 %v6608_v42  ;;  %2312 = vmatmul.f32.gmra.mxu3 %v6611_v62  ;;  %v2712_v42 = vrot.slane %v4207_v36, 1  ;;  %v2713_v62 = vrot.slane %v6334_v16, 1  ;;  %v6954_v9 = vsel %vm589_vm0, %v2709_v54, %v2710_v33  ;;  %v4247_v36 = vld [vmem:[%s7949_s1 + $0xe88] sm:$0xff]  ;;  %v4277_v54 = vld [vmem:[%s7949_s1 + $0xf78] sm:$0xff] }
 0x1d0   : > { %2486 = vmatmul.f32.gmra.mxu0 %v6914_v3  ;;  %2527 = vmatmul.f32.gmra.mxu1 %v6924_v58 }
 0x1d1   : > { %v6957_v53 = vsel %vm589_vm0, %v2712_v42, %v2713_v62  ;;  %2919 = vmatpush.msra.mxu2 %v4247_v36  ;;  %2960 = vmatpush.msra.mxu3 %v4279_v27  ;;  %v4348_v42 = vld [vmem:[%s7949_s1 + $0x10f0] sm:$0xff]  ;;  %v4346_v27 = vld [vmem:[%s7949_s1 + $0x10e0] sm:$0xff] }
 0x1d2   : > { %v1510_v28 = vpop.f32.mrf.mxu2  ;;  %v1551_v8 = vpop.f32.mrf.mxu3  ;;  %3211 = vmatpush.msra.mxu0 %v4348_v42 }
 0x1d3   : > { %v1552_v44 = vadd.f32 %v1551_v8, %v1510_v28  ;;  %2920 = vmatpush.msra.mxu2 %v4245_v35  ;;  %2961 = vmatpush.msra.mxu3 %v4277_v54 }
 0x1d4   : > { %3212 = vmatpush.msra.mxu0 %v4346_v27  ;;  %v4241_v27 = vld [vmem:[%s7949_s1 + $0xe58] sm:$0xff] }
 0x1d5   : > { %v6947_v41 = vadd.f32 %v1552_v44, %v6633_v0  ;;  %v6949_v11 = vpop.f32.mrf.mxu0  ;;  %v6951_v50 = vpop.f32.mrf.mxu1  ;;  %v4210_v0 = vld [vmem:[%s4667_s19 + $0x80] sm:$0x1]  ;;  %v4211_v44 = vld [vmem:[%s4667_s19 + $0x88] sm:$0x1] }
 0x1d6   : > { %v2715_v28 = vrot.slane %v4210_v0, 1  ;;  %v4378_v0 = vld [vmem:[%s7949_s1 + $0x11e0] sm:$0xff] }
 0x1d7   : > { %2547 = vmatmul.f32.vlgmr.msrb.gmra.mxu2 %v6630_v46  ;;  %2588 = vmatmul.f32.vlgmr.msrb.gmra.mxu3 %v6640_v49  ;;  %v2717_v46 = vrot.slane %v4211_v44, 1  ;;  %v4380_v49 = vld [vmem:[%s7949_s1 + $0x11f0] sm:$0xff] }
 0x1d8   : > { %2846 = vmatmul.f32.vlgmr.msrb.gmra.mxu0 %v6954_v9  ;;  %2887 = vmatmul.f32.vlgmr.msrb.gmra.mxu1 %v6957_v53  ;;  %v6997_v42 = vsel %vm589_vm0, %v2710_v33, %v2715_v28  ;;  %v4344_v33 = vld [vmem:[%s7949_s1 + $0x10d0] sm:$0xff]  ;;  %v4342_v28 = vld [vmem:[%s7949_s1 + $0x10c0] sm:$0xff] }
 0x1d9   : > { %3252 = vmatpush.msra.mxu1 %v4380_v49  ;;  %v7000_v49 = vsel %vm589_vm0, %v2713_v62, %v2717_v46  ;;  %v4376_v62 = vld [vmem:[%s7949_s1 + $0x11d0] sm:$0xff]  ;;  %v4374_v46 = vld [vmem:[%s7949_s1 + $0x11c0] sm:$0xff]  ;;  %3213 = vmatpush.msra.mxu0 %v4344_v33 }
 0x1da   : > { %v1870_v8 = vpop.f32.mrf.mxu2  ;;  %v1911_v36 = vpop.f32.mrf.mxu3 }
 0x1db   : > { %v1912_v44 = vadd.f32 %v1911_v36, %v1870_v8  ;;  %3253 = vmatpush.msra.mxu1 %v4378_v0  ;;  %v4243_v8 = vld [vmem:[%s7949_s1 + $0xe68] sm:$0xff]  ;;  %v4213_v36 = vld [vmem:[%s4667_s19 + $0x98] sm:$0xfe]  ;;  %v2720_v0 = vrot.slane %v6766_v29, 1  ;;  %3214 = vmatpush.msra.mxu0 %v4342_v28  ;;  %v4338_v28 = vld [vmem:[%s7949_s1 + $0x10a0] sm:$0xff] }
 0x1dc   : > { %2921 = vmatpush.msra.mxu2 %v4243_v8  ;;  %v2723_v8 = vrot.slane %v6437_v12, 1 }
 0x1dd   : > { %v6990_v35 = vadd.f32 %v1912_v44, %v6671_v2  ;;  %v6992_v54 = vpop.f32.mrf.mxu0  ;;  %v6994_v18 = vpop.f32.mrf.mxu1  ;;  %v4275_v2 = vld [vmem:[%s7949_s1 + $0xf68] sm:$0xff]  ;;  %v2722_v44 = vrot.slane %v4213_v36, 1  ;;  %3254 = vmatpush.msra.mxu1 %v4376_v62 }
 0x1de   : > { %8016 = vst [vmem:[#allocation64_spill] sm:$0xff] %v6992_v54  ;;  %2962 = vmatpush.msra.mxu3 %v4275_v2  ;;  %2922 = vmatpush.msra.mxu2 %v4241_v27 }
 0x1df   : > { %8017 = vst [vmem:[#allocation65_spill] sm:$0xff] %v6994_v18  ;;  %2550 = vmatmul.f32.gmra.mxu2 %v6311_v15  ;;  %2591 = vmatmul.f32.gmra.mxu3 %v6334_v16  ;;  %v4273_v15 = vld [vmem:[%s7949_s1 + $0xf58] sm:$0xff]  ;;  %v2719_v16 = vrot.slane %v4212_v4, 1  ;;  %v4340_v18 = vld [vmem:[%s7949_s1 + $0x10b0] sm:$0xff] }
 0x1e0   : > { %2849 = vmatmul.f32.gmra.mxu0 %v6997_v42  ;;  %2890 = vmatmul.f32.gmra.mxu1 %v7000_v49  ;;  %v4372_v4 = vld [vmem:[%s7949_s1 + $0x11b0] sm:$0xff] }
 0x1e1   : > { %2963 = vmatpush.msra.mxu3 %v4273_v15  ;;  %3255 = vmatpush.msra.mxu1 %v4374_v46  ;;  %v7048_v27 = vsel %vm589_vm0, %v2719_v16, %v2720_v0  ;;  %v7051_v15 = vsel %vm589_vm0, %v2722_v44, %v2723_v8  ;;  %v4370_v46 = vld [vmem:[%s7949_s1 + $0x11a0] sm:$0xff]  ;;  %v4368_v16 = vld [vmem:[%s7949_s1 + $0x1190] sm:$0xff]  ;;  %v4237_v44 = vld [vmem:[%s7949_s1 + $0xe38] sm:$0xff] }
 0x1e2   : > { %v1873_v2 = vpop.f32.mrf.mxu2  ;;  %v1914_v51 = vpop.f32.mrf.mxu3  ;;  %3215 = vmatpush.msra.mxu0 %v4340_v18  ;;  %v4336_v18 = vld [vmem:[%s7949_s1 + $0x1090] sm:$0xff] }
 0x1e3   : > { %v1915_v54 = vadd.f32 %v1914_v51, %v1873_v2  ;;  %3256 = vmatpush.msra.mxu1 %v4372_v4  ;;  %v4239_v51 = vld [vmem:[%s7949_s1 + $0xe48] sm:$0xff] }
 0x1e4   : > { %2923 = vmatpush.msra.mxu2 %v4239_v51  ;;  %3216 = vmatpush.msra.mxu0 %v4338_v28 }
 0x1e5   : > { %v7041_v36 = vadd.f32 %v1915_v54, %v6715_v24  ;;  %v7043_v33 = vpop.f32.mrf.mxu0  ;;  %v7045_v62 = vpop.f32.mrf.mxu1  ;;  %v4271_v24 = vld [vmem:[%s7949_s1 + $0xf48] sm:$0xff]  ;;  %v4217_v54 = vld [vmem:[%s4667_s19 + $0xb8] sm:$0x1]  ;;  %3257 = vmatpush.msra.mxu1 %v4370_v46 }
 0x1e6   : > { %8018 = vst [vmem:[#allocation66_spill] sm:$0xff] %v7043_v33  ;;  %2964 = vmatpush.msra.mxu3 %v4271_v24  ;;  %v2727_v2 = vrot.slane %v4217_v54, 1  ;;  %v4334_v24 = vld [vmem:[%s7949_s1 + $0x1080] sm:$0xff]  ;;  %2924 = vmatpush.msra.mxu2 %v4237_v44  ;;  %v4233_v44 = vld [vmem:[%s7949_s1 + $0xe18] sm:$0xff] }
 0x1e7   : > { %8019 = vst [vmem:[#allocation67_spill] sm:$0xff] %v7045_v62  ;;  %2553 = vmatmul.f32.gmra.mxu2 %v6712_v6  ;;  %2594 = vmatmul.f32.gmra.mxu3 %v6722_v1  ;;  %v4269_v6 = vld [vmem:[%s7949_s1 + $0xf38] sm:$0xff]  ;;  %v2725_v1 = vrot.slane %v4216_v59, 1  ;;  %v4366_v62 = vld [vmem:[%s7949_s1 + $0x1180] sm:$0xff] }
 0x1e8   : > { %2852 = vmatmul.f32.gmra.mxu0 %v7048_v27  ;;  %2893 = vmatmul.f32.gmra.mxu1 %v7051_v15  ;;  %v7100_v10 = vsel %vm589_vm0, %v2723_v8, %v2727_v2  ;;  %v4364_v8 = vld [vmem:[%s7949_s1 + $0x1170] sm:$0xff]  ;;  %v2733_v2 = vrot.slane %v6543_v7, 1 }
 0x1e9   : > { %2965 = vmatpush.msra.mxu3 %v4269_v6  ;;  %3217 = vmatpush.msra.mxu0 %v4336_v18  ;;  %v7097_v46 = vsel %vm589_vm0, %v2720_v0, %v2725_v1  ;;  %v4235_v18 = vld [vmem:[%s7949_s1 + $0xe28] sm:$0xff]  ;;  %v4332_v0 = vld [vmem:[%s7949_s1 + $0x1070] sm:$0xff]  ;;  %v2730_v6 = vrot.slane %v6520_v39, 1 }
 0x1ea   : > { %v1876_v4 = vpop.f32.mrf.mxu2  ;;  %v1917_v51 = vpop.f32.mrf.mxu3  ;;  %3258 = vmatpush.msra.mxu1 %v4368_v16  ;;  %2925 = vmatpush.msra.mxu2 %v4235_v18  ;;  %v4362_v16 = vld [vmem:[%s7949_s1 + $0x1160] sm:$0xff]  ;;  %v4360_v18 = vld [vmem:[%s7949_s1 + $0x1150] sm:$0xff] }
 0x1eb   : > { %v1918_v33 = vadd.f32 %v1917_v51, %v1876_v4  ;;  %3218 = vmatpush.msra.mxu0 %v4334_v24  ;;  %v4328_v24 = vld [vmem:[%s7949_s1 + $0x1050] sm:$0xff] }
 0x1ec   : > { %3259 = vmatpush.msra.mxu1 %v4366_v62  ;;  %v4330_v62 = vld [vmem:[%s7949_s1 + $0x1060] sm:$0xff]  ;;  %2926 = vmatpush.msra.mxu2 %v4233_v44 }
 0x1ed   : > { %v7090_v59 = vadd.f32 %v1918_v33, %v6759_v20  ;;  %v7092_v54 = vpop.f32.mrf.mxu0  ;;  %v7094_v28 = vpop.f32.mrf.mxu1  ;;  %v4267_v20 = vld [vmem:[%s7949_s1 + $0xf28] sm:$0xff]  ;;  %3219 = vmatpush.msra.mxu0 %v4332_v0  ;;  %v4326_v44 = vld [vmem:[%s7949_s1 + $0x1040] sm:$0xff] }
 0x1ee   : > { %8020 = vst [vmem:[#allocation68_spill] sm:$0xff] %v7092_v54  ;;  %v4219_v33 = vld [vmem:[%s4667_s19 + $0xc8] sm:$0xfe]  ;;  %2966 = vmatpush.msra.mxu3 %v4267_v20  ;;  %3260 = vmatpush.msra.mxu1 %v4364_v8  ;;  %v4222_v54 = vld [vmem:[%s4667_s19 + $0xe0] sm:$0x1] }
 0x1ef   : > { %8021 = vst [vmem:[#allocation69_spill] sm:$0xff] %v7094_v28  ;;  %2556 = vmatmul.f32.gmra.mxu2 %v6766_v29  ;;  %2597 = vmatmul.f32.gmra.mxu3 %v6437_v12  ;;  %v4265_v12 = vld [vmem:[%s7949_s1 + $0xf18] sm:$0xff]  ;;  %v2729_v29 = vrot.slane %v4218_v17, 1  ;;  %v2732_v1 = vrot.slane %v4219_v33, 1 }
 0x1f0   : > { %2855 = vmatmul.f32.gmra.mxu0 %v7097_v46  ;;  %2896 = vmatmul.f32.gmra.mxu1 %v7100_v10 }
 0x1f1   : > { %2967 = vmatpush.msra.mxu3 %v4265_v12  ;;  %3220 = vmatpush.msra.mxu0 %v4330_v62  ;;  %v7148_v8 = vsel %vm589_vm0, %v2729_v29, %v2730_v6  ;;  %v7151_v28 = vsel %vm589_vm0, %v2732_v1, %v2733_v2  ;;  %v4231_v62 = vld [vmem:[%s7949_s1 + $0xe08] sm:$0xff]  ;;  %v4358_v12 = vld [vmem:[%s7949_s1 + $0x1140] sm:$0xff]  ;;  %v4324_v29 = vld [vmem:[%s7949_s1 + $0x1030] sm:$0xff] }
 0x1f2   : > { %v1879_v4 = vpop.f32.mrf.mxu2  ;;  %v1920_v51 = vpop.f32.mrf.mxu3  ;;  %3261 = vmatpush.msra.mxu1 %v4362_v16  ;;  %v4223_v16 = vld [vmem:[%s4667_s19 + $0xe8] sm:$0x1]  ;;  %2927 = vmatpush.msra.mxu2 %v4231_v62  ;;  %v4356_v1 = vld [vmem:[%s7949_s1 + $0x1130] sm:$0xff]  ;;  %v4354_v62 = vld [vmem:[%s7949_s1 + $0x1120] sm:$0xff] }
 0x1f3   : > { %v1921_v17 = vadd.f32 %v1920_v51, %v1879_v4  ;;  %3221 = vmatpush.msra.mxu0 %v4328_v24  ;;  %v4349_v4 = vld [vmem:[%s7949_s1 + $0x10f8] sm:$0xff]  ;;  %v2737_v51 = vrot.slane %v4223_v16, 1 }
 0x1f4   : > { %3262 = vmatpush.msra.mxu1 %v4360_v18  ;;  %3293 = vmatpush.msrb.mxu2 %v4349_v4  ;;  %v4318_v4 = vld [vmem:[%s7949_s1 + $0x1000] sm:$0xff] }
 0x1f5   : > { %v7141_v20 = vadd.f32 %v1921_v17, %v6806_v48  ;;  %v7143_v33 = vpop.f32.mrf.mxu0  ;;  %v7145_v0 = vpop.f32.mrf.mxu1  ;;  %v4263_v48 = vld [vmem:[%s7949_s1 + $0xf08] sm:$0xff]  ;;  %3222 = vmatpush.msra.mxu0 %v4326_v44  ;;  %v4322_v17 = vld [vmem:[%s7949_s1 + $0x1020] sm:$0xff] }
 0x1f6   : > { %8022 = vst [vmem:[#allocation70_spill] sm:$0xff] %v7143_v33  ;;  %2968 = vmatpush.msra.mxu3 %v4263_v48  ;;  %3263 = vmatpush.msra.mxu1 %v4358_v12  ;;  %v4224_v33 = vld [vmem:[%s4667_s19 + $0xf0] sm:$0xfe] }
 0x1f7   : > { %8023 = vst [vmem:[#allocation71_spill] sm:$0xff] %v7145_v0  ;;  %2559 = vmatmul.f32.gmra.mxu2 %v6803_v13  ;;  %2600 = vmatmul.f32.gmra.mxu3 %v6813_v61  ;;  %v4381_v61 = vld [vmem:[%s7949_s1 + $0x11f8] sm:$0xff]  ;;  %v2735_v13 = vrot.slane %v4222_v54, 1  ;;  %v7200_v0 = vsel %vm589_vm0, %v2733_v2, %v2737_v51  ;;  %v4352_v2 = vld [vmem:[%s7949_s1 + $0x1110] sm:$0xff]  ;;  %v2740_v51 = vrot.slane %v6914_v3, 1 }
 0x1f8   : > { %2858 = vmatmul.f32.gmra.mxu0 %v7148_v8  ;;  %2899 = vmatmul.f32.gmra.mxu1 %v7151_v28 }
 0x1f9   : > { %3334 = vmatpush.msrb.mxu3 %v4381_v61  ;;  %3223 = vmatpush.msra.mxu0 %v4324_v29  ;;  %v7197_v12 = vsel %vm589_vm0, %v2730_v6, %v2735_v13  ;;  %v4347_v29 = vld [vmem:[%s7949_s1 + $0x10e8] sm:$0xff]  ;;  %v4320_v6 = vld [vmem:[%s7949_s1 + $0x1010] sm:$0xff]  ;;  %v4350_v61 = vld [vmem:[%s7949_s1 + $0x1100] sm:$0xff] }
 0x1fa   : > { %v1882_v24 = vpop.f32.mrf.mxu2  ;;  %v1923_v18 = vpop.f32.mrf.mxu3  ;;  %3264 = vmatpush.msra.mxu1 %v4356_v1  ;;  %v4225_v1 = vld [vmem:[%s4667_s19 + $0xf8] sm:$0xfe]  ;;  %3294 = vmatpush.msrb.mxu2 %v4347_v29 }
 0x1fb   : > { %v1924_v48 = vadd.f32 %v1923_v18, %v1882_v24  ;;  %3224 = vmatpush.msra.mxu0 %v4322_v17  ;;  %v4345_v13 = vld [vmem:[%s7949_s1 + $0x10d8] sm:$0xff]  ;;  %v2742_v24 = vrot.slane %v4225_v1, 1  ;;  %v2743_v18 = vrot.slane %v6924_v58, 1 }
 0x1fc   : > { %3265 = vmatpush.msra.mxu1 %v4354_v62  ;;  %3295 = vmatpush.msrb.mxu2 %v4345_v13  ;;  %v4341_v13 = vld [vmem:[%s7949_s1 + $0x10b8] sm:$0xff] }
 0x1fd   : > { %v7190_v54 = vadd.f32 %v1924_v48, %v6850_v34  ;;  %v7192_v16 = vpop.f32.mrf.mxu0  ;;  %v7194_v44 = vpop.f32.mrf.mxu1  ;;  %v4379_v34 = vld [vmem:[%s7949_s1 + $0x11e8] sm:$0xff]  ;;  %3225 = vmatpush.msra.mxu0 %v4320_v6  ;;  %v7245_v6 = vsel %vm589_vm0, %v2742_v24, %v2743_v18 }
 0x1fe   : > { %8024 = vst [vmem:[#allocation72_spill] sm:$0xff] %v7192_v16  ;;  %3335 = vmatpush.msrb.mxu3 %v4379_v34  ;;  %3266 = vmatpush.msra.mxu1 %v4352_v2  ;;  %v4343_v2 = vld [vmem:[%s7949_s1 + $0x10c8] sm:$0xff] }
 0x1ff   : > { %8025 = vst [vmem:[#allocation73_spill] sm:$0xff] %v7194_v44  ;;  %2562 = vmatmul.f32.gmra.mxu2 %v6520_v39  ;;  %2603 = vmatmul.f32.gmra.mxu3 %v6543_v7  ;;  %v4377_v39 = vld [vmem:[%s7949_s1 + $0x11d8] sm:$0xff]  ;;  %v2739_v7 = vrot.slane %v4224_v33, 1 }
 0x200   : > { %2861 = vmatmul.f32.gmra.mxu0 %v7197_v12  ;;  %2902 = vmatmul.f32.gmra.mxu1 %v7200_v0 }
 0x201   : > { %3336 = vmatpush.msrb.mxu3 %v4377_v39  ;;  %3226 = vmatpush.msra.mxu0 %v4318_v4  ;;  %v7242_v1 = vsel %vm589_vm0, %v2739_v7, %v2740_v51  ;;  %v4375_v4 = vld [vmem:[%s7949_s1 + $0x11c8] sm:$0xff]  ;;  %v4373_v39 = vld [vmem:[%s7949_s1 + $0x11b8] sm:$0xff] }
 0x202   : > { %v1885_v17 = vpop.f32.mrf.mxu2  ;;  %v1926_v62 = vpop.f32.mrf.mxu3  ;;  %3267 = vmatpush.msra.mxu1 %v4350_v61  ;;  %v4229_v61 = vld [vmem:[%s4667_s19 + $0x118] sm:$0x1]  ;;  %3296 = vmatpush.msrb.mxu2 %v4343_v2 }
 0x203   : > { %v1927_v48 = vadd.f32 %v1926_v62, %v1885_v17  ;;  %3337 = vmatpush.msrb.mxu3 %v4375_v4  ;;  %v2747_v24 = vrot.slane %v4229_v61, 1  ;;  %v4294_v61 = vld [vmem:[%s4667_s19 + $0x60] sm:$0xfc] }
 0x204   : > { %3297 = vmatpush.msrb.mxu2 %v4341_v13  ;;  %v4339_v13 = vld [vmem:[%s7949_s1 + $0x10a8] sm:$0xff] }
 0x205   : > { %v7235_v29 = vadd.f32 %v1927_v48, %v6888_v47  ;;  %v7237_v33 = vpop.f32.mrf.mxu0  ;;  %v7239_v34 = vpop.f32.mrf.mxu1  ;;  %v4228_v47 = vld [vmem:[%s4667_s19 + $0x110] sm:$0x1]  ;;  %3338 = vmatpush.msrb.mxu3 %v4373_v39 }
 0x206   : > { %8026 = vst [vmem:[#allocation74_spill] sm:$0xff] %v7237_v33  ;;  %v2745_v7 = vrot.slane %v4228_v47, 1  ;;  %v7276_v47 = vsel %vm589_vm0, %v2743_v18, %v2747_v24  ;;  %v4296_v39 = vld [vmem:[%s4667_s19 + $0x70] sm:$0xff]  ;;  %3298 = vmatpush.msrb.mxu2 %v4339_v13  ;;  %v4369_v18 = vld [vmem:[%s7949_s1 + $0x1198] sm:$0xff] }
 0x207   : > { %8027 = vst [vmem:[#allocation75_spill] sm:$0xff] %v7239_v34  ;;  %2565 = vmatmul.f32.gmra.mxu2 %v6885_v14  ;;  %2606 = vmatmul.f32.gmra.mxu3 %v6895_v31  ;;  %v3091_v24 = vrot.slane %v4296_v39, 2  ;;  %v4335_v39 = vld [vmem:[%s7949_s1 + $0x1088] sm:$0xff] }
 0x208   : > { %2864 = vmatmul.f32.gmra.mxu0 %v7242_v1  ;;  %2905 = vmatmul.f32.gmra.mxu1 %v7245_v6  ;;  %v7273_v4 = vsel %vm589_vm0, %v2740_v51, %v2745_v7  ;;  %v4337_v51 = vld [vmem:[%s7949_s1 + $0x1098] sm:$0xff]  ;;  %v3090_v7 = vrot.slane %v4294_v61, 2 }
 0x209   : > { %3299 = vmatpush.msrb.mxu2 %v4337_v51 }
 0x20a   : > { %v1888_v31 = vpop.f32.mrf.mxu2  ;;  %v1929_v14 = vpop.f32.mrf.mxu3  ;;  %v7306_v16 = vsel %vm971_vm1, %v3090_v7, %v3091_v24 }
 0x20b   : > { %v1930_v17 = vadd.f32 %v1929_v14, %v1888_v31  ;;  %v4295_v31 = vld [vmem:[%s4667_s19 + $0x68] sm:$0xfc]  ;;  %v4297_v14 = vld [vmem:[%s4667_s19 + $0x78] sm:$0xff]  ;;  %3300 = vmatpush.msrb.mxu2 %v4335_v39 }
 0x20c   : > { %v3094_v13 = vrot.slane %v4297_v14, 2  ;;  %v4365_v14 = vld [vmem:[%s7949_s1 + $0x1178] sm:$0xff] }
 0x20d   : > { %v7266_v62 = vadd.f32 %v1930_v17, %v6917_v38  ;;  %v7268_v48 = vpop.f32.mrf.mxu0  ;;  %v7270_v2 = vpop.f32.mrf.mxu1  ;;  %v4371_v38 = vld [vmem:[%s7949_s1 + $0x11a8] sm:$0xff]  ;;  %v3093_v17 = vrot.slane %v4295_v31, 2  ;;  %v4333_v31 = vld [vmem:[%s7949_s1 + $0x1078] sm:$0xff] }
 0x20e   : > { %8028 = vst [vmem:[#allocation76_spill] sm:$0xff] %v7268_v48  ;;  %3339 = vmatpush.msrb.mxu3 %v4371_v38  ;;  %3301 = vmatpush.msrb.mxu2 %v4333_v31  ;;  %v4331_v31 = vld [vmem:[%s7949_s1 + $0x1068] sm:$0xff] }
 0x20f   : > { %8029 = vst [vmem:[#allocation77_spill] sm:$0xff] %v7270_v2  ;;  %2568 = vmatmul.f32.gmra.mxu2 %v6914_v3  ;;  %2609 = vmatmul.f32.gmra.mxu3 %v6924_v58  ;;  %v7309_v61 = vsel %vm971_vm1, %v3093_v17, %v3094_v13 }
 0x210   : > { %2867 = vmatmul.f32.gmra.mxu0 %v7273_v4  ;;  %2908 = vmatmul.f32.gmra.mxu1 %v7276_v47 }
 0x211   : > { %3340 = vmatpush.msrb.mxu3 %v4369_v18  ;;  %3302 = vmatpush.msrb.mxu2 %v4331_v31 }
 0x212   : > { %v1891_v38 = vpop.f32.mrf.mxu2  ;;  %v1932_v2 = vpop.f32.mrf.mxu3 }
 0x213   : > { %v1933_v48 = vadd.f32 %v1932_v2, %v1891_v38  ;;  %v4367_v2 = vld [vmem:[%s7949_s1 + $0x1188] sm:$0xff] }
 0x214   : > { %3341 = vmatpush.msrb.mxu3 %v4367_v2 }
 0x215   : > { %v7299_v34 = vadd.f32 %v1933_v48, %v6947_v41  ;;  %v7301_v33 = vpop.f32.mrf.mxu0  ;;  %v7303_v44 = vpop.f32.mrf.mxu1  ;;  %v4298_v41 = vld [vmem:[%s4667_s19 + $0x80] sm:$0x3]  ;;  %v4299_v48 = vld [vmem:[%s4667_s19 + $0x88] sm:$0x3] }
 0x216   : > { %v3096_v51 = vrot.slane %v4298_v41, 2  ;;  %v3098_v18 = vrot.slane %v4299_v48, 2  ;;  %3342 = vmatpush.msrb.mxu3 %v4365_v14  ;;  %v4300_v48 = vld [vmem:[%s4667_s19 + $0x90] sm:$0xfc]  ;;  %v4302_v14 = vld [vmem:[%s4667_s19 + $0xa0] sm:$0xff] }
 0x217   : > { %2928 = vmatmul.f32.vlgmr.msra.gmra.mxu2 %v6954_v9  ;;  %2969 = vmatmul.f32.vlgmr.msra.gmra.mxu3 %v6957_v53 }
 0x218   : > { %3227 = vmatmul.f32.vlgmr.msra.gmra.mxu0 %v7306_v16  ;;  %3268 = vmatmul.f32.vlgmr.msra.gmra.mxu1 %v7309_v61  ;;  %v7337_v2 = vsel %vm971_vm1, %v3091_v24, %v3096_v51  ;;  %v7340_v41 = vsel %vm971_vm1, %v3094_v13, %v3098_v18  ;;  %v4329_v24 = vld [vmem:[%s7949_s1 + $0x1058] sm:$0xff]  ;;  %v3100_v51 = vrot.slane %v4300_v48, 2  ;;  %v3101_v18 = vrot.slane %v4302_v14, 2  ;;  %v4327_v14 = vld [vmem:[%s7949_s1 + $0x1048] sm:$0xff] }
 0x219   : > { %v4361_v13 = vld [vmem:[%s7949_s1 + $0x1158] sm:$0xff]  ;;  %3303 = vmatpush.msrb.mxu2 %v4329_v24 }
 0x21a   : > { %v2251_v53 = vpop.f32.mrf.mxu2  ;;  %v2292_v9 = vpop.f32.mrf.mxu3  ;;  %v7370_v55 = vsel %vm971_vm1, %v3100_v51, %v3101_v18  ;;  %v4325_v24 = vld [vmem:[%s7949_s1 + $0x1038] sm:$0xff] }
 0x21b   : > { %v2293_v7 = vadd.f32 %v2292_v9, %v2251_v53  ;;  %v4301_v53 = vld [vmem:[%s4667_s19 + $0x98] sm:$0xfc]  ;;  %v4303_v9 = vld [vmem:[%s4667_s19 + $0xa8] sm:$0xff]  ;;  %3304 = vmatpush.msrb.mxu2 %v4327_v14 }
 0x21d   : > { %v7330_v17 = vadd.f32 %v2293_v7, %v6990_v35  ;;  %v7332_v38 = vpop.f32.mrf.mxu0  ;;  %v7334_v39 = vpop.f32.mrf.mxu1  ;;  %v4363_v35 = vld [vmem:[%s7949_s1 + $0x1168] sm:$0xff]  ;;  %v3103_v7 = vrot.slane %v4301_v53, 2  ;;  %3305 = vmatpush.msrb.mxu2 %v4325_v24 }
 0x21e   : > { %8030 = vst [vmem:[#allocation78_spill] sm:$0xff] %v7332_v38  ;;  %3343 = vmatpush.msrb.mxu3 %v4363_v35  ;;  %v4359_v53 = vld [vmem:[%s7949_s1 + $0x1148] sm:$0xff] }
 0x21f   : > { %8031 = vst [vmem:[#allocation79_spill] sm:$0xff] %v7334_v39  ;;  %2931 = vmatmul.f32.gmra.mxu2 %v6997_v42  ;;  %2972 = vmatmul.f32.gmra.mxu3 %v7000_v49  ;;  %v3104_v42 = vrot.slane %v4303_v9, 2  ;;  %v4305_v9 = vld [vmem:[%s4667_s19 + $0xb8] sm:$0x3]  ;;  %v4323_v24 = vld [vmem:[%s7949_s1 + $0x1028] sm:$0xff] }
 0x220   : > { %3230 = vmatmul.f32.gmra.mxu0 %v7337_v2  ;;  %3271 = vmatmul.f32.gmra.mxu1 %v7340_v41 }
 0x221   : > { %3344 = vmatpush.msrb.mxu3 %v4361_v13  ;;  %v7373_v48 = vsel %vm971_vm1, %v3103_v7, %v3104_v42  ;;  %v4357_v13 = vld [vmem:[%s7949_s1 + $0x1138] sm:$0xff]  ;;  %v3108_v7 = vrot.slane %v4305_v9, 2  ;;  %v4306_v9 = vld [vmem:[%s4667_s19 + $0xc0] sm:$0xfc]  ;;  %3306 = vmatpush.msrb.mxu2 %v4323_v24 }
 0x222   : > { %v2254_v49 = vpop.f32.mrf.mxu2  ;;  %v2295_v31 = vpop.f32.mrf.mxu3 }
 0x223   : > { %v2296_v35 = vadd.f32 %v2295_v31, %v2254_v49  ;;  %3345 = vmatpush.msrb.mxu3 %v4359_v53 }
 0x225   : > { %v7363_v39 = vadd.f32 %v2296_v35, %v7041_v36  ;;  %v7365_v38 = vpop.f32.mrf.mxu0  ;;  %v7367_v37 = vpop.f32.mrf.mxu1  ;;  %v4304_v36 = vld [vmem:[%s4667_s19 + $0xb0] sm:$0x3]  ;;  %3346 = vmatpush.msrb.mxu3 %v4357_v13 }
 0x226   : > { %8032 = vst [vmem:[#allocation80_spill] sm:$0xff] %v7365_v38  ;;  %v3106_v51 = vrot.slane %v4304_v36, 2  ;;  %v7404_v36 = vsel %vm971_vm1, %v3104_v42, %v3108_v7  ;;  %v4308_v13 = vld [vmem:[%s4667_s19 + $0xd0] sm:$0xff]  ;;  %v4353_v42 = vld [vmem:[%s7949_s1 + $0x1118] sm:$0xff] }
 0x227   : > { %8033 = vst [vmem:[#allocation81_spill] sm:$0xff] %v7367_v37  ;;  %2934 = vmatmul.f32.gmra.mxu2 %v7048_v27  ;;  %2975 = vmatmul.f32.gmra.mxu3 %v7051_v15  ;;  %v3111_v7 = vrot.slane %v4308_v13, 2  ;;  %v4319_v13 = vld [vmem:[%s7949_s1 + $0x1008] sm:$0xff] }
 0x228   : > { %3233 = vmatmul.f32.gmra.mxu0 %v7370_v55  ;;  %3274 = vmatmul.f32.gmra.mxu1 %v7373_v48  ;;  %v7401_v53 = vsel %vm971_vm1, %v3101_v18, %v3106_v51  ;;  %v4321_v18 = vld [vmem:[%s7949_s1 + $0x1018] sm:$0xff]  ;;  %v3110_v51 = vrot.slane %v4306_v9, 2 }
 0x229   : > { %3307 = vmatpush.msrb.mxu2 %v4321_v18 }
 0x22a   : > { %v2257_v27 = vpop.f32.mrf.mxu2  ;;  %v2298_v15 = vpop.f32.mrf.mxu3  ;;  %v7434_v38 = vsel %vm971_vm1, %v3110_v51, %v3111_v7 }
 0x22b   : > { %v2299_v49 = vadd.f32 %v2298_v15, %v2257_v27  ;;  %v4307_v27 = vld [vmem:[%s4667_s19 + $0xc8] sm:$0xfc]  ;;  %v4309_v15 = vld [vmem:[%s4667_s19 + $0xd8] sm:$0xff]  ;;  %3308 = vmatpush.msrb.mxu2 %v4319_v13 }
 0x22d   : > { %v7394_v31 = vadd.f32 %v2299_v49, %v7090_v59  ;;  %v7396_v35 = vpop.f32.mrf.mxu0  ;;  %v7398_v14 = vpop.f32.mrf.mxu1  ;;  %v4355_v59 = vld [vmem:[%s7949_s1 + $0x1128] sm:$0xff]  ;;  %v3113_v49 = vrot.slane %v4307_v27, 2 }
 0x22e   : > { %8034 = vst [vmem:[#allocation82_spill] sm:$0xff] %v7396_v35  ;;  %3347 = vmatpush.msrb.mxu3 %v4355_v59  ;;  %v4351_v27 = vld [vmem:[%s7949_s1 + $0x1108] sm:$0xff] }
 0x22f   : > { %8035 = vst [vmem:[#allocation83_spill] sm:$0xff] %v7398_v14  ;;  %2937 = vmatmul.f32.gmra.mxu2 %v7097_v46  ;;  %2978 = vmatmul.f32.gmra.mxu3 %v7100_v10  ;;  %v3114_v46 = vrot.slane %v4309_v15, 2  ;;  %v4311_v15 = vld [vmem:[%s4667_s19 + $0xe8] sm:$0x3] }
 0x230   : > { %3236 = vmatmul.f32.gmra.mxu0 %v7401_v53  ;;  %3277 = vmatmul.f32.gmra.mxu1 %v7404_v36 }
 0x231   : > { %3348 = vmatpush.msrb.mxu3 %v4353_v42  ;;  %v7437_v9 = vsel %vm971_vm1, %v3113_v49, %v3114_v46  ;;  %v3118_v42 = vrot.slane %v4311_v15, 2  ;;  %v3124_v15 = vrot.slane %v6924_v58, 2 }
 0x232   : > { %v2260_v10 = vpop.f32.mrf.mxu2  ;;  %v2301_v24 = vpop.f32.mrf.mxu3 }
 0x233   : > { %v2302_v59 = vadd.f32 %v2301_v24, %v2260_v10  ;;  %3349 = vmatpush.msrb.mxu3 %v4351_v27  ;;  %v4312_v27 = vld [vmem:[%s4667_s19 + $0xf0] sm:$0xfc] }
 0x235   : > { %v7427_v14 = vadd.f32 %v2302_v59, %v7141_v20  ;;  %v7429_v35 = vpop.f32.mrf.mxu0  ;;  %v7431_v37 = vpop.f32.mrf.mxu1  ;;  %v4310_v20 = vld [vmem:[%s4667_s19 + $0xe0] sm:$0x3] }
 0x236   : > { %8036 = vst [vmem:[#allocation84_spill] sm:$0xff] %v7431_v37  ;;  %v3116_v18 = vrot.slane %v4310_v20, 2  ;;  %v4313_v37 = vld [vmem:[%s4667_s19 + $0xf8] sm:$0xfc]  ;;  %v3121_v20 = vrot.slane %v6914_v3, 2 }
 0x237   : > { %2940 = vmatmul.f32.gmra.mxu2 %v7148_v8  ;;  %2981 = vmatmul.f32.gmra.mxu3 %v7151_v28  ;;  %v7462_v28 = vsel %vm971_vm1, %v3114_v46, %v3118_v42  ;;  %v4316_v3 = vld [vmem:[%s4667_s19 + $0x110] sm:$0x3] }
 0x238   : > { %3239 = vmatmul.f32.gmra.mxu0 %v7434_v38  ;;  %3280 = vmatmul.f32.gmra.mxu1 %v7437_v9  ;;  %v7459_v8 = vsel %vm971_vm1, %v3111_v7, %v3116_v18  ;;  %v3123_v7 = vrot.slane %v4313_v37, 2  ;;  %v4317_v37 = vld [vmem:[%s4667_s19 + $0x118] sm:$0x3]  ;;  %v3126_v58 = vrot.slane %v4316_v3, 2  ;;  %s3731_s19 = sshll.u32 %s4481_s21, 2 }
 0x239   : > { %p269_p6 = scmp.lt.s32.totalorder %s3731_s19, 15 }
 0x23a   : > { %v2263_v51 = vpop.f32.mrf.mxu2  ;;  %v2304_v49 = vpop.f32.mrf.mxu3 }
 0x23b   : > { %v2305_v10 = vadd.f32 %v2304_v49, %v2263_v51  ;;  %s8132_s19 = smov (!%p269_p6, %s3731_s19), 15 }
 0x23c   : > { %s3732_s30 = sshll.u32 %s8132_s19, 1 }
 0x23d   : > { %v7452_v24 = vadd.f32 %v2305_v10, %v7190_v54  ;;  %v7454_v59 = vpop.f32.mrf.mxu0  ;;  %v7456_v13 = vpop.f32.mrf.mxu1  ;;  %v3120_v54 = vrot.slane %v4312_v27, 2  ;;  %v7483_v10 = vsel %vm971_vm1, %v3123_v7, %v3124_v15  ;;  %s273_s8 = sadd.s32 %s3733_s7, %s3732_s30 }
 0x23e   : > { %s3734_s11 = sshll.u32 %s273_s8, 3 }
 0x23f   : > { %2943 = vmatmul.f32.gmra.mxu2 %v7197_v12  ;;  %2984 = vmatmul.f32.gmra.mxu3 %v7200_v0  ;;  %v7480_v49 = vsel %vm971_vm1, %v3120_v54, %v3121_v20  ;;  %s7923_s14 = scalar_lea.vmem %s7954_s6, %s3734_s11 }
 0x240   : > { %3242 = vmatmul.f32.gmra.mxu0 %v7459_v8  ;;  %3283 = vmatmul.f32.gmra.mxu1 %v7462_v28 }
 0x242   : > { %v2266_v46 = vpop.f32.mrf.mxu2  ;;  %v2307_v18 = vpop.f32.mrf.mxu3 }
 0x243   : > { %v2308_v42 = vadd.f32 %v2307_v18, %v2266_v46 }
 0x245   : > { %v7473_v51 = vadd.f32 %v2308_v42, %v7235_v29  ;;  %v7475_v12 = vpop.f32.mrf.mxu0  ;;  %v7477_v0 = vpop.f32.mrf.mxu1  ;;  %v3128_v29 = vrot.slane %v4317_v37, 2 }
 0x247   : > { %2946 = vmatmul.f32.gmra.mxu2 %v7242_v1  ;;  %2987 = vmatmul.f32.gmra.mxu3 %v7245_v6  ;;  %v7499_v1 = vsel %vm971_vm1, %v3121_v20, %v3126_v58  ;;  %v7502_v6 = vsel %vm971_vm1, %v3124_v15, %v3128_v29 }
 0x248   : > { %3245 = vmatmul.f32.gmra.mxu0 %v7480_v49  ;;  %3286 = vmatmul.f32.gmra.mxu1 %v7483_v10 }
 0x24a   : > { %v2269_v27 = vpop.f32.mrf.mxu2  ;;  %v2310_v46 = vpop.f32.mrf.mxu3 }
 0x24b   : > { %v2311_v18 = vadd.f32 %v2310_v46, %v2269_v27 }
 0x24d   : > { %v7492_v54 = vadd.f32 %v2311_v18, %v7266_v62  ;;  %v7494_v7 = vpop.f32.mrf.mxu0  ;;  %v7496_v42 = vpop.f32.mrf.mxu1 }
 0x24f   : > { %2949 = vmatmul.f32.gmra.mxu2 %v7273_v4  ;;  %2990 = vmatmul.f32.gmra.mxu3 %v7276_v47 }
 0x250   : > { %3248 = vmatmul.f32.gmra.mxu0 %v7499_v1  ;;  %3289 = vmatmul.f32.gmra.mxu1 %v7502_v6 }
 0x252   : > { %v2272_v62 = vpop.f32.mrf.mxu2  ;;  %v2313_v3 = vpop.f32.mrf.mxu3 }
 0x253   : > { %v2314_v37 = vadd.f32 %v2313_v3, %v2272_v62  ;;  %v3512_v3 = vld [vmem:[%s7952_s4 + $0x68] sm:$0xff] }
 0x255   : > { %v7509_v27 = vadd.f32 %v2314_v37, %v7299_v34  ;;  %v7511_v46 = vpop.f32.mrf.mxu0  ;;  %v7513_v20 = vpop.f32.mrf.mxu1 }
 0x257   : > { %3309 = vmatmul.f32.vlgmr.msrb.gmra.mxu2 %v7306_v16  ;;  %3350 = vmatmul.f32.vlgmr.msrb.gmra.mxu3 %v7309_v61  ;;  %v3514_v16 = vld [vmem:[%s7952_s4 + $0x78] sm:$0xff] }
 0x258   : > { %3535 = vmatpush.msrb.mxu0 %v3514_v16  ;;  %v3509_v16 = vld [vmem:[%s7952_s4 + $0x50] sm:$0xff] }
 0x25a   : > { %v2548_v4 = vpop.f32.mrf.mxu2  ;;  %v2589_v47 = vpop.f32.mrf.mxu3 }
 0x25b   : > { %v2590_v15 = vadd.f32 %v2589_v47, %v2548_v4  ;;  %v3511_v4 = vld [vmem:[%s7952_s4 + $0x60] sm:$0xff]  ;;  %v3510_v47 = vld [vmem:[%s7952_s4 + $0x58] sm:$0xff] }
 0x25d   : > { %v7518_v58 = vadd.f32 %v2590_v15, %v7330_v17  ;;  %v7520_v29 = vpop.f32.mrf.mxu0  ;;  %v7522_v18 = vpop.f32.mrf.mxu1  ;;  %v3513_v17 = vld [vmem:[%s7952_s4 + $0x70] sm:$0xff] }
 0x25e   : > { %3536 = vmatpush.msrb.mxu0 %v3513_v17 }
 0x25f   : > { %3312 = vmatmul.f32.gmra.mxu2 %v7337_v2  ;;  %3353 = vmatmul.f32.gmra.mxu3 %v7340_v41 }
 0x260   : > { %3537 = vmatpush.msrb.mxu0 %v3512_v3  ;;  %v3506_v3 = vld [vmem:[%s7952_s4 + $0x38] sm:$0xff] }
 0x262   : > { %v2551_v34 = vpop.f32.mrf.mxu2  ;;  %v2592_v61 = vpop.f32.mrf.mxu3  ;;  %3538 = vmatpush.msrb.mxu0 %v3511_v4 }
 0x263   : > { %v2593_v62 = vadd.f32 %v2592_v61, %v2551_v34 }
 0x264   : > { %3539 = vmatpush.msrb.mxu0 %v3510_v47  ;;  %v3505_v47 = vld [vmem:[%s7952_s4 + $0x30] sm:$0xff] }
 0x265   : > { %v7536_v2 = vadd.f32 %v2593_v62, %v7363_v39  ;;  %v7538_v41 = vpop.f32.mrf.mxu0  ;;  %v7540_v37 = vpop.f32.mrf.mxu1  ;;  %v3507_v62 = vld [vmem:[%s7952_s4 + $0x40] sm:$0xff] }
 0x266   : > { %3540 = vmatpush.msrb.mxu0 %v3509_v16 }
 0x267   : > { %3315 = vmatmul.f32.gmra.mxu2 %v7370_v55  ;;  %3356 = vmatmul.f32.gmra.mxu3 %v7373_v48  ;;  %v3508_v55 = vld [vmem:[%s7952_s4 + $0x48] sm:$0xff] }
 0x268   : > { %3541 = vmatpush.msrb.mxu0 %v3508_v55  ;;  %v3502_v55 = vld [vmem:[%s7952_s4 + $0x18] sm:$0xff] }
 0x26a   : > { %v2554_v39 = vpop.f32.mrf.mxu2  ;;  %v2595_v15 = vpop.f32.mrf.mxu3  ;;  %3542 = vmatpush.msrb.mxu0 %v3507_v62 }
 0x26b   : > { %v2596_v34 = vadd.f32 %v2595_v15, %v2554_v39 }
 0x26c   : > { %3543 = vmatpush.msrb.mxu0 %v3506_v3  ;;  %v3501_v3 = vld [vmem:[%s7952_s4 + $0x10] sm:$0xff] }
 0x26d   : > { %v7557_v48 = vadd.f32 %v2596_v34, %v7394_v31  ;;  %v7559_v61 = vpop.f32.mrf.mxu0  ;;  %v7561_v17 = vpop.f32.mrf.mxu1  ;;  %v3503_v34 = vld [vmem:[%s7952_s4 + $0x20] sm:$0xff] }
 0x26e   : > { %3544 = vmatpush.msrb.mxu0 %v3505_v47 }
 0x26f   : > { %3318 = vmatmul.f32.gmra.mxu2 %v7401_v53  ;;  %3359 = vmatmul.f32.gmra.mxu3 %v7404_v36  ;;  %v3504_v53 = vld [vmem:[%s7952_s4 + $0x28] sm:$0xff] }
 0x270   : > { %3545 = vmatpush.msrb.mxu0 %v3504_v53 }
 0x272   : > { %v2557_v31 = vpop.f32.mrf.mxu2  ;;  %v2598_v4 = vpop.f32.mrf.mxu3  ;;  %3546 = vmatpush.msrb.mxu0 %v3503_v34 }
 0x273   : > { %v2599_v39 = vadd.f32 %v2598_v4, %v2557_v31 }
 0x274   : > { %3547 = vmatpush.msrb.mxu0 %v3502_v55 }
 0x275   : > { %v7578_v36 = vadd.f32 %v2599_v39, %v7427_v14  ;;  %v7580_v15 = vpop.f32.mrf.mxu0  ;;  %v7582_v16 = vpop.f32.mrf.mxu1  ;;  %v3499_v39 = vld [vmem:[%s7952_s4] sm:$0xff] }
 0x276   : > { %3548 = vmatpush.msrb.mxu0 %v3501_v3  ;;  %v420_v3 = vadd.f32 %v5415_v57, %v5413_v56  ;;  %v3530_v56 = vld [vmem:[%s7952_s4 + $0xf8] sm:$0xff]  ;;  %v3529_v57 = vld [vmem:[%s7952_s4 + $0xf0] sm:$0xff] }
 0x277   : > { %3321 = vmatmul.f32.gmra.mxu2 %v7434_v38  ;;  %3362 = vmatmul.f32.gmra.mxu3 %v7437_v9  ;;  %v3500_v38 = vld [vmem:[%s7952_s4 + $0x8] sm:$0xff] }
 0x278   : > { %3549 = vmatpush.msrb.mxu0 %v3500_v38  ;;  %3576 = vmatpush.msrb.mxu1 %v3530_v56 }
 0x27a   : > { %v2560_v14 = vpop.f32.mrf.mxu2  ;;  %v2601_v62 = vpop.f32.mrf.mxu3  ;;  %3550 = vmatpush.msrb.mxu0 %v3499_v39  ;;  %3577 = vmatpush.msrb.mxu1 %v3529_v57 }
 0x27b   : > { %v2602_v31 = vadd.f32 %v2601_v62, %v2560_v14 }
 0x27d   : > { %v7599_v9 = vadd.f32 %v2602_v31, %v7452_v24  ;;  %v7601_v4 = vpop.f32.mrf.mxu0  ;;  %v7603_v47 = vpop.f32.mrf.mxu1  ;;  %v770_v31 = vadd.f32 %v5601_v25, %v5599_v30 }
 0x27f   : > { %3324 = vmatmul.f32.gmra.mxu2 %v7459_v8  ;;  %3365 = vmatmul.f32.gmra.mxu3 %v7462_v28  ;;  %v1152_v8 = vadd.f32 %v5919_v40, %v5917_v26  ;;  %v891_v28 = vadd.f32 %v770_v31, %v420_v3  ;;  %v1830_v26 = vadd.f32 %v6637_v32, %v6635_v5  ;;  %v8040_v3 = vld [vmem:[#allocation7_spill] sm:$0xff]  ;;  %v8041_v31 = vld [vmem:[#allocation8_spill] sm:$0xff] }
 0x280   : > { %v423_v40 = vadd.f32 %v5477_v23, %v5475_v22  ;;  %v1155_v5 = vadd.f32 %v5962_v45, %v5960_v21  ;;  %v2508_v23 = vadd.f32 %v7303_v44, %v7301_v33  ;;  %v3528_v45 = vld [vmem:[%s7952_s4 + $0xe8] sm:$0xff]  ;;  %v3527_v21 = vld [vmem:[%s7952_s4 + $0xe0] sm:$0xff]  ;;  %v8038_v33 = vld [vmem:[#allocation50_spill] sm:$0xff] }
 0x281   : > { %v1273_v25 = vadd.f32 %v1152_v8, %v891_v28  ;;  %3578 = vmatpush.msrb.mxu1 %v3528_v45  ;;  %v426_v8 = vadd.f32 %v8041_v31, %v8040_v3  ;;  %v8042_v28 = vld [vmem:[#allocation13_spill] sm:$0xff]  ;;  %v3526_v3 = vld [vmem:[%s7952_s4 + $0xd8] sm:$0xff] }
 0x282   : > { %v2563_v53 = vpop.f32.mrf.mxu2  ;;  %v2604_v34 = vpop.f32.mrf.mxu3  ;;  %v3525_v31 = vld [vmem:[%s7952_s4 + $0xd0] sm:$0xff] }
 0x283   : > { %v2605_v55 = vadd.f32 %v2604_v34, %v2563_v53  ;;  %v2211_v34 = vadd.f32 %v6951_v50, %v6949_v11  ;;  %3579 = vmatpush.msrb.mxu1 %v3527_v21  ;;  %v8050_v21 = vld [vmem:[#allocation38_spill] sm:$0xff] }
 0x285   : > { %v7611_v24 = vadd.f32 %v2605_v55, %v7473_v51  ;;  %v7613_v14 = vpop.f32.mrf.mxu0  ;;  %v7615_v62 = vpop.f32.mrf.mxu1  ;;  %v1449_v51 = vadd.f32 %v6271_v52, %v6269_v43  ;;  %v773_v43 = vadd.f32 %v5647_v60, %v5645_v63  ;;  %v8037_v60 = vld [vmem:[#allocation37_spill] sm:$0xff]  ;;  %v2889_v55 = vadd.f32 %v7513_v20, %v7511_v46  ;;  %3580 = vmatpush.msrb.mxu1 %v3526_v3 }
 0x286   : > { %v1452_v32 = vadd.f32 %v8037_v60, %v6316_v19  ;;  %v7667_v19 = vld [vmem:[%s7950_s2] sm:$0x3]  ;;  %v8048_v60 = vld [vmem:[#allocation78_spill] sm:$0xff] }
 0x287   : > { %3327 = vmatmul.f32.gmra.mxu2 %v7480_v49  ;;  %3368 = vmatmul.f32.gmra.mxu3 %v7483_v10  ;;  %v1570_v53 = vadd.f32 %v1449_v51, %v1273_v25  ;;  %v893_v63 = vadd.f32 %v773_v43, %v423_v40  ;;  %v8043_v51 = vld [vmem:[#allocation14_spill] sm:$0xff]  ;;  %v7681_v25 = vld [vmem:[%s7951_s3] sm:$0x3]  ;;  %v8045_v40 = vld [vmem:[#allocation65_spill] sm:$0xff] }
 0x288   : > { %3581 = vmatpush.msrb.mxu1 %v3525_v31 }
 0x289   : > { %v1951_v22 = vadd.f32 %v1830_v26, %v1570_v53  ;;  %v8044_v26 = vld [vmem:[#allocation64_spill] sm:$0xff] }
 0x28a   : > { %v2566_v38 = vpop.f32.mrf.mxu2  ;;  %v2607_v39 = vpop.f32.mrf.mxu3  ;;  %v2214_v43 = vadd.f32 %v8045_v40, %v8044_v26  ;;  %v8056_v26 = vld [vmem:[#allocation15_spill] sm:$0xff]  ;;  %v8057_v40 = vld [vmem:[#allocation16_spill] sm:$0xff] }
 0x28b   : > { %v2608_v30 = vadd.f32 %v2607_v39, %v2566_v38  ;;  %v776_v38 = vadd.f32 %v8043_v51, %v8042_v28  ;;  %v8052_v28 = vld [vmem:[#allocation52_spill] sm:$0xff]  ;;  %v8053_v51 = vld [vmem:[#allocation53_spill] sm:$0xff] }
 0x28d   : > { %v7640_v52 = vadd.f32 %v2608_v30, %v7492_v54  ;;  %v7642_v49 = vpop.f32.mrf.mxu0  ;;  %v7644_v10 = vpop.f32.mrf.mxu1  ;;  %v2332_v54 = vadd.f32 %v2211_v34, %v1951_v22  ;;  %v8046_v22 = vld [vmem:[#allocation25_spill] sm:$0xff]  ;;  %v895_v45 = vadd.f32 %v776_v38, %v426_v8  ;;  %v1836_v38 = vadd.f32 %v8053_v51, %v8052_v28 }
 0x28f   : > { %3330 = vmatmul.f32.gmra.mxu2 %v7499_v1  ;;  %3371 = vmatmul.f32.gmra.mxu3 %v7502_v6  ;;  %v1275_v1 = vadd.f32 %v1155_v5, %v893_v63  ;;  %v8039_v6 = vld [vmem:[#allocation51_spill] sm:$0xff]  ;;  %v2629_v20 = vadd.f32 %v2508_v23, %v2332_v54  ;;  %v7686_v5 = vperm.slane %v7667_v19, 0  ;;  %v8047_v23 = vld [vmem:[#allocation26_spill] sm:$0xff] }
 0x290   : > { %v1833_v46 = vadd.f32 %v8039_v6, %v8038_v33  ;;  %v2892_v33 = vadd.f32 %v7522_v18, %v7520_v29 }
 0x291   : > { %v1572_v39 = vadd.f32 %v1452_v32, %v1275_v1  ;;  %v3010_v53 = vadd.f32 %v2889_v55, %v2629_v20  ;;  %v8049_v32 = vld [vmem:[#allocation79_spill] sm:$0xff] }
 0x292   : > { %v2569_v50 = vpop.f32.mrf.mxu2  ;;  %v2610_v11 = vpop.f32.mrf.mxu3  ;;  %v2511_v54 = vadd.f32 %v8049_v32, %v8048_v60  ;;  %v8051_v1 = vld [vmem:[#allocation39_spill] sm:$0xff] }
 0x293   : > { %v2611_v44 = vadd.f32 %v2610_v11, %v2569_v50  ;;  %v1953_v63 = vadd.f32 %v1833_v46, %v1572_v39  ;;  %v7693_v11 = vperm.slane %v7681_v25, 0  ;;  %v8054_v39 = vld [vmem:[#allocation10_spill] sm:$0xff] }
 0x295   : > { %v7676_v56 = vadd.f32 %v2611_v44, %v7509_v27  ;;  %v3228_v57 = vpop.f32.mrf.mxu0  ;;  %v3269_v30 = vpop.f32.mrf.mxu1  ;;  %v1158_v27 = vadd.f32 %v8047_v23, %v8046_v22  ;;  %v1455_v44 = vadd.f32 %v8051_v1, %v8050_v21  ;;  %v2334_v55 = vadd.f32 %v2214_v43, %v1953_v63  ;;  %v8058_v23 = vld [vmem:[#allocation66_spill] sm:$0xff]  ;;  %v8059_v63 = vld [vmem:[#allocation67_spill] sm:$0xff] }
 0x296   : > { %v3270_v34 = vadd.f32 %v3269_v30, %v3228_v57  ;;  %v8055_v57 = vld [vmem:[#allocation11_spill] sm:$0xff]  ;;  %v779_v43 = vadd.f32 %v8057_v40, %v8056_v26  ;;  %v8066_v40 = vld [vmem:[#allocation54_spill] sm:$0xff] }
 0x297   : > { %v1277_v8 = vadd.f32 %v1158_v27, %v895_v45  ;;  %v2631_v29 = vadd.f32 %v2511_v54, %v2334_v55  ;;  %v429_v30 = vadd.f32 %v8055_v57, %v8054_v39  ;;  %v2217_v27 = vadd.f32 %v8059_v63, %v8058_v23  ;;  %v8060_v45 = vld [vmem:[#allocation27_spill] sm:$0xff]  ;;  %v8061_v54 = vld [vmem:[#allocation28_spill] sm:$0xff] }
 0x298   : > { %v3391_v50 = vadd.f32 %v3270_v34, %v3010_v53  ;;  %v1161_v21 = vadd.f32 %v8061_v54, %v8060_v45  ;;  %v8062_v55 = vld [vmem:[#allocation80_spill] sm:$0xff]  ;;  %v2895_v57 = vadd.f32 %v7540_v37, %v7538_v41 }
 0x299   : > { %v1574_v53 = vadd.f32 %v1455_v44, %v1277_v8  ;;  %v3012_v60 = vadd.f32 %v2892_v33, %v2631_v29  ;;  %v897_v51 = vadd.f32 %v779_v43, %v429_v30  ;;  %v8064_v44 = vld [vmem:[#allocation40_spill] sm:$0xff]  ;;  %v8065_v8 = vld [vmem:[#allocation41_spill] sm:$0xff]  ;;  %v3523_v30 = vld [vmem:[%s7952_s4 + $0xc0] sm:$0xff] }
 0x29a   : > { %v3445_v6 = vmul.f32 %v7686_v5, %v3391_v50  ;;  %v7700_v20 = vpop.f32.mrf.mxu2  ;;  %v7702_v46 = vpop.f32.mrf.mxu3  ;;  %v1458_v39 = vadd.f32 %v8065_v8, %v8064_v44  ;;  %v8067_v43 = vld [vmem:[#allocation55_spill] sm:$0xff] }
 0x29b   : > { %v1955_v1 = vadd.f32 %v1836_v38, %v1574_v53  ;;  %v3524_v38 = vld [vmem:[%s7952_s4 + $0xc8] sm:$0xff]  ;;  %v1279_v26 = vadd.f32 %v1161_v21, %v897_v51  ;;  %v1839_v53 = vadd.f32 %v8067_v43, %v8066_v40  ;;  %v8074_v51 = vld [vmem:[#allocation29_spill] sm:$0xff]  ;;  %v8079_v40 = vld [vmem:[#allocation43_spill] sm:$0xff] }
 0x29c   : > { %v3467_v18 = vadd.f32 %v7693_v11, %v3445_v6  ;;  %v8063_v6 = vld [vmem:[#allocation81_spill] sm:$0xff]  ;;  %3582 = vmatpush.msrb.mxu1 %v3524_v38 }
 0x29d   : > { %v3231_v34 = vpop.f32.mrf.mxu0  ;;  %v3272_v22 = vpop.f32.mrf.mxu1  ;;  %v2514_v3 = vadd.f32 %v8063_v6, %v8062_v55  ;;  %v2336_v31 = vadd.f32 %v2217_v27, %v1955_v1  ;;  %v1576_v63 = vadd.f32 %v1458_v39, %v1279_v26  ;;  %v8072_v55 = vld [vmem:[#allocation3_spill] sm:$0xff]  ;;  %v8073_v6 = vld [vmem:[#allocation4_spill] sm:$0xff] }
 0x29e   : > { %v3483_v32 = vmax.f32 %v3467_v18, 0.0  ;;  %v3273_v50 = vadd.f32 %v3272_v22, %v3231_v34  ;;  %v8068_v34 = vld [vmem:[#allocation17_spill] sm:$0xff]  ;;  %v8069_v22 = vld [vmem:[#allocation18_spill] sm:$0xff]  ;;  %3583 = vmatpush.msrb.mxu1 %v3523_v30 }
 0x29f   : > { %v2633_v41 = vadd.f32 %v2514_v3, %v2336_v31  ;;  %v782_v23 = vadd.f32 %v8069_v22, %v8068_v34  ;;  %v8075_v3 = vld [vmem:[#allocation30_spill] sm:$0xff]  ;;  %v1957_v8 = vadd.f32 %v1839_v53, %v1576_v63 }
 0x2a0   : > { %v3393_v28 = vadd.f32 %v3273_v50, %v3012_v60  ;;  %3551 = vmatmul.f32.vlgmr.msrb.gmra.mxu0 %v3483_v32  ;;  %v8070_v32 = vld [vmem:[#allocation68_spill] sm:$0xff]  ;;  %v8071_v50 = vld [vmem:[#allocation69_spill] sm:$0xff]  ;;  %v1164_v44 = vadd.f32 %v8075_v3, %v8074_v51  ;;  %v8076_v31 = vld [vmem:[#allocation82_spill] sm:$0xff] }
 0x2a1   : > { %v2220_v45 = vadd.f32 %v8071_v50, %v8070_v32  ;;  %v3014_v54 = vadd.f32 %v2895_v57, %v2633_v41  ;;  %v8078_v30 = vld [vmem:[#allocation42_spill] sm:$0xff]  ;;  %v2898_v57 = vadd.f32 %v7561_v17, %v7559_v61  ;;  %v8082_v50 = vld [vmem:[#allocation19_spill] sm:$0xff] }
 0x2a2   : > { %v3447_v33 = vmul.f32 %v7686_v5, %v3393_v28  ;;  %v7728_v29 = vpop.f32.mrf.mxu2  ;;  %v7730_v18 = vpop.f32.mrf.mxu3  ;;  %v432_v28 = vadd.f32 %v8073_v6, %v8072_v55  ;;  %v1461_v43 = vadd.f32 %v8079_v40, %v8078_v30  ;;  %v3522_v53 = vld [vmem:[%s7952_s4 + $0xb8] sm:$0xff] }
 0x2a3   : > { %v2338_v34 = vadd.f32 %v2220_v45, %v1957_v8  ;;  %3584 = vmatpush.msrb.mxu1 %v3522_v53  ;;  %v8083_v45 = vld [vmem:[#allocation20_spill] sm:$0xff]  ;;  %v8084_v6 = vld [vmem:[#allocation70_spill] sm:$0xff] }
 0x2a4   : > { %v3469_v37 = vadd.f32 %v7693_v11, %v3447_v33  ;;  %v8077_v33 = vld [vmem:[#allocation83_spill] sm:$0xff]  ;;  %v899_v26 = vadd.f32 %v782_v23, %v432_v28  ;;  %v3521_v23 = vld [vmem:[%s7952_s4 + $0xb0] sm:$0xff] }
 0x2a5   : > { %v3234_v27 = vpop.f32.mrf.mxu0  ;;  %v3275_v60 = vpop.f32.mrf.mxu1  ;;  %v2517_v38 = vadd.f32 %v8077_v33, %v8076_v31  ;;  %3585 = vmatpush.msrb.mxu1 %v3521_v23  ;;  %v8085_v28 = vld [vmem:[#allocation71_spill] sm:$0xff]  ;;  %v8086_v31 = vld [vmem:[#allocation5_spill] sm:$0xff]  ;;  %v8087_v33 = vld [vmem:[#allocation6_spill] sm:$0xff] }
 0x2a6   : > { %v3276_v1 = vadd.f32 %v3275_v60, %v3234_v27  ;;  %v3485_v21 = vmax.f32 %v3469_v37, 0.0  ;;  %v1281_v63 = vadd.f32 %v1164_v44, %v899_v26  ;;  %v8080_v27 = vld [vmem:[#allocation56_spill] sm:$0xff]  ;;  %v8081_v60 = vld [vmem:[#allocation57_spill] sm:$0xff]  ;;  %v2223_v51 = vadd.f32 %v8085_v28, %v8084_v6  ;;  %v8088_v26 = vld [vmem:[#allocation31_spill] sm:$0xff] }
 0x2a7   : > { %v1842_v32 = vadd.f32 %v8081_v60, %v8080_v27  ;;  %v2635_v61 = vadd.f32 %v2517_v38, %v2338_v34  ;;  %v8089_v38 = vld [vmem:[#allocation32_spill] sm:$0xff]  ;;  %v8096_v6 = vld [vmem:[#allocation22_spill] sm:$0xff] }
 0x2a8   : > { %v3395_v39 = vadd.f32 %v3276_v1, %v3014_v54  ;;  %3554 = vmatmul.f32.gmra.mxu0 %v3485_v21  ;;  %v785_v54 = vadd.f32 %v8083_v45, %v8082_v50  ;;  %v1578_v1 = vadd.f32 %v1461_v43, %v1281_v63  ;;  %v1167_v30 = vadd.f32 %v8089_v38, %v8088_v26  ;;  %v8090_v34 = vld [vmem:[#allocation84_spill] sm:$0xff]  ;;  %v8092_v63 = vld [vmem:[#allocation45_spill] sm:$0xff] }
 0x2a9   : > { %v3016_v3 = vadd.f32 %v2898_v57, %v2635_v61  ;;  %v8091_v23 = vld [vmem:[#allocation44_spill] sm:$0xff]  ;;  %v2901_v57 = vadd.f32 %v7582_v16, %v7580_v15 }
 0x2aa   : > { %v3449_v41 = vmul.f32 %v7686_v5, %v3395_v39  ;;  %v7756_v37 = vpop.f32.mrf.mxu2  ;;  %v7758_v22 = vpop.f32.mrf.mxu3  ;;  %v435_v39 = vadd.f32 %v8087_v33, %v8086_v31  ;;  %v1959_v40 = vadd.f32 %v1842_v32, %v1578_v1  ;;  %v1464_v27 = vadd.f32 %v8092_v63, %v8091_v23  ;;  %v3519_v32 = vld [vmem:[%s7952_s4 + $0xa0] sm:$0xff]  ;;  %v8097_v31 = vld [vmem:[#allocation72_spill] sm:$0xff]  ;;  %v8098_v33 = vld [vmem:[#allocation73_spill] sm:$0xff] }
 0x2ab   : > { %v8094_v1 = vld [vmem:[#allocation59_spill] sm:$0xff]  ;;  %v3517_v63 = vld [vmem:[%s7952_s4 + $0x90] sm:$0xff] }
 0x2ac   : > { %v3471_v17 = vadd.f32 %v7693_v11, %v3449_v41  ;;  %v2520_v41 = vadd.f32 %v8090_v34, %v7429_v35  ;;  %v901_v53 = vadd.f32 %v785_v54, %v435_v39  ;;  %v2340_v60 = vadd.f32 %v2223_v51, %v1959_v40  ;;  %v3520_v35 = vld [vmem:[%s7952_s4 + $0xa8] sm:$0xff]  ;;  %v8093_v54 = vld [vmem:[#allocation58_spill] sm:$0xff]  ;;  %v8099_v40 = vld [vmem:[#allocation33_spill] sm:$0xff] }
 0x2ad   : > { %v3237_v21 = vpop.f32.mrf.mxu0  ;;  %v3278_v55 = vpop.f32.mrf.mxu1  ;;  %3586 = vmatpush.msrb.mxu1 %v3520_v35  ;;  %v2226_v39 = vadd.f32 %v8098_v33, %v8097_v31  ;;  %v8100_v34 = vld [vmem:[#allocation34_spill] sm:$0xff] }
 0x2ae   : > { %v3279_v8 = vadd.f32 %v3278_v55, %v3237_v21  ;;  %v3487_v44 = vmax.f32 %v3471_v17, 0.0  ;;  %v1283_v45 = vadd.f32 %v1167_v30, %v901_v53  ;;  %v1845_v21 = vadd.f32 %v8094_v1, %v8093_v54  ;;  %v8095_v55 = vld [vmem:[#allocation21_spill] sm:$0xff] }
 0x2af   : > { %v2637_v15 = vadd.f32 %v2520_v41, %v2340_v60  ;;  %v788_v28 = vadd.f32 %v8096_v6, %v8095_v55  ;;  %3587 = vmatpush.msrb.mxu1 %v3519_v32  ;;  %v1170_v41 = vadd.f32 %v8100_v34, %v8099_v40  ;;  %v2523_v53 = vadd.f32 %v7456_v13, %v7454_v59  ;;  %v8111_v40 = vld [vmem:[#allocation36_spill] sm:$0xff] }
 0x2b0   : > { %v3397_v43 = vadd.f32 %v3279_v8, %v3016_v3  ;;  %3557 = vmatmul.f32.gmra.mxu0 %v3487_v44  ;;  %v1580_v51 = vadd.f32 %v1464_v27, %v1283_v45  ;;  %v3518_v44 = vld [vmem:[%s7952_s4 + $0x98] sm:$0xff]  ;;  %v8101_v27 = vld [vmem:[#allocation9_spill] sm:$0xff]  ;;  %v2904_v45 = vadd.f32 %v7603_v47, %v7601_v4  ;;  %v8109_v47 = vld [vmem:[#allocation75_spill] sm:$0xff] }
 0x2b1   : > { %v3018_v26 = vadd.f32 %v2901_v57, %v2637_v15  ;;  %3588 = vmatpush.msrb.mxu1 %v3518_v44  ;;  %v903_v60 = vadd.f32 %v788_v28, %v8101_v27  ;;  %v8103_v57 = vld [vmem:[#allocation47_spill] sm:$0xff]  ;;  %v8105_v15 = vld [vmem:[#allocation61_spill] sm:$0xff]  ;;  %v8108_v4 = vld [vmem:[#allocation74_spill] sm:$0xff] }
 0x2b2   : > { %v3451_v61 = vmul.f32 %v7686_v5, %v3397_v43  ;;  %v7784_v17 = vpop.f32.mrf.mxu2  ;;  %v7786_v50 = vpop.f32.mrf.mxu3  ;;  %v1961_v43 = vadd.f32 %v1845_v21, %v1580_v51  ;;  %v8104_v21 = vld [vmem:[#allocation60_spill] sm:$0xff]  ;;  %v8106_v28 = vld [vmem:[#allocation23_spill] sm:$0xff]  ;;  %v2229_v33 = vadd.f32 %v8109_v47, %v8108_v4 }
 0x2b3   : > { %3589 = vmatpush.msrb.mxu1 %v3517_v63  ;;  %v1285_v13 = vadd.f32 %v1170_v41, %v903_v60  ;;  %v8107_v51 = vld [vmem:[#allocation24_spill] sm:$0xff]  ;;  %v8114_v60 = vld [vmem:[#allocation49_spill] sm:$0xff] }
 0x2b4   : > { %v3473_v16 = vadd.f32 %v7693_v11, %v3451_v61  ;;  %v8102_v61 = vld [vmem:[#allocation46_spill] sm:$0xff]  ;;  %v2342_v32 = vadd.f32 %v2226_v39, %v1961_v43  ;;  %v2526_v43 = vadd.f32 %v7477_v0, %v7475_v12  ;;  %v8113_v27 = vld [vmem:[#allocation48_spill] sm:$0xff] }
 0x2b5   : > { %v3240_v3 = vpop.f32.mrf.mxu0  ;;  %v3281_v8 = vpop.f32.mrf.mxu1  ;;  %v1467_v35 = vadd.f32 %v8103_v57, %v8102_v61  ;;  %v1470_v61 = vadd.f32 %v8114_v60, %v8113_v27  ;;  %v3516_v12 = vld [vmem:[%s7952_s4 + $0x88] sm:$0xff] }
 0x2b6   : > { %v3282_v38 = vadd.f32 %v3281_v8, %v3240_v3  ;;  %v3489_v30 = vmax.f32 %v3473_v16, 0.0  ;;  %v1848_v16 = vadd.f32 %v8105_v15, %v8104_v21  ;;  %v2639_v55 = vadd.f32 %v2523_v53, %v2342_v32  ;;  %3590 = vmatpush.msrb.mxu1 %v3516_v12  ;;  %v8115_v21 = vld [vmem:[#allocation62_spill] sm:$0xff]  ;;  %v8116_v15 = vld [vmem:[#allocation63_spill] sm:$0xff] }
 0x2b7   : > { %v791_v3 = vadd.f32 %v8107_v51, %v8106_v28  ;;  %v1582_v8 = vadd.f32 %v1467_v35, %v1285_v13  ;;  %v2907_v35 = vadd.f32 %v7615_v62, %v7613_v14  ;;  %v3515_v13 = vld [vmem:[%s7952_s4 + $0x80] sm:$0xff]  ;;  %v8117_v51 = vld [vmem:[#allocation76_spill] sm:$0xff] }
 0x2b8   : > { %v3399_v23 = vadd.f32 %v3282_v38, %v3018_v26  ;;  %3560 = vmatmul.f32.gmra.mxu0 %v3489_v30  ;;  %v3020_v39 = vadd.f32 %v2904_v45, %v2639_v55  ;;  %v8110_v30 = vld [vmem:[#allocation35_spill] sm:$0xff]  ;;  %3591 = vmatpush.msrb.mxu1 %v3515_v13 }
 0x2b9   : > { %v1173_v34 = vadd.f32 %v8111_v40, %v8110_v30  ;;  %v1963_v41 = vadd.f32 %v1848_v16, %v1582_v8  ;;  %v1851_v16 = vadd.f32 %v8116_v15, %v8115_v21  ;;  %v7873_v21 = vperm.slane %v7667_v19, 1 }
 0x2ba   : > { %v3453_v54 = vmul.f32 %v7686_v5, %v3399_v23  ;;  %v7817_v1 = vpop.f32.mrf.mxu2  ;;  %v7819_v59 = vpop.f32.mrf.mxu3  ;;  %v8112_v23 = vld [vmem:[#allocation12_spill] sm:$0xff]  ;;  %v7876_v15 = vperm.slane %v7681_v25, 1  ;;  %v2977_v19 = vadd.f32 %v7758_v22, %v7756_v37 }
 0x2bb   : > { %v905_v63 = vadd.f32 %v791_v3, %v8112_v23  ;;  %v2344_v57 = vadd.f32 %v2229_v33, %v1963_v41  ;;  %v8118_v3 = vld [vmem:[#allocation77_spill] sm:$0xff]  ;;  %v2529_v33 = vadd.f32 %v7496_v42, %v7494_v7 }
 0x2bc   : > { %v3475_v6 = vadd.f32 %v7693_v11, %v3453_v54  ;;  %v2232_v8 = vadd.f32 %v8118_v3, %v8117_v51  ;;  %v3015_v51 = vadd.f32 %v2977_v19, %v7557_v48  ;;  %v2983_v48 = vadd.f32 %v7819_v59, %v7817_v1 }
 0x2bd   : > { %v3243_v44 = vpop.f32.mrf.mxu0  ;;  %v3284_v31 = vpop.f32.mrf.mxu1  ;;  %v1287_v0 = vadd.f32 %v1173_v34, %v905_v63  ;;  %v2641_v14 = vadd.f32 %v2526_v43, %v2344_v57 }
 0x2be   : > { %v3285_v26 = vadd.f32 %v3284_v31, %v3243_v44  ;;  %v3491_v38 = vmax.f32 %v3475_v6, 0.0 }
 0x2bf   : > { %v1584_v55 = vadd.f32 %v1470_v61, %v1287_v0  ;;  %v3022_v44 = vadd.f32 %v2907_v35, %v2641_v14  ;;  %v2971_v35 = vadd.f32 %v7702_v46, %v7700_v20 }
 0x2c0   : > { %v3401_v53 = vadd.f32 %v3285_v26, %v3020_v39  ;;  %3563 = vmatmul.f32.gmra.mxu0 %v3491_v38  ;;  %v2910_v38 = vadd.f32 %v7644_v10, %v7642_v49 }
 0x2c1   : > { %v1965_v47 = vadd.f32 %v1851_v16, %v1584_v55  ;;  %v3011_v0 = vadd.f32 %v2971_v35, %v7518_v58 }
 0x2c2   : > { %v3455_v32 = vmul.f32 %v7686_v5, %v3401_v53  ;;  %v7838_v45 = vpop.f32.mrf.mxu2  ;;  %v7840_v54 = vpop.f32.mrf.mxu3 }
 0x2c3   : > { %v2346_v26 = vadd.f32 %v2232_v8, %v1965_v47 }
 0x2c4   : > { %v3477_v62 = vadd.f32 %v7693_v11, %v3455_v32 }
 0x2c5   : > { %v3246_v6 = vpop.f32.mrf.mxu0  ;;  %v3287_v28 = vpop.f32.mrf.mxu1  ;;  %v2643_v41 = vadd.f32 %v2529_v33, %v2346_v26 }
 0x2c6   : > { %v3288_v31 = vadd.f32 %v3287_v28, %v3246_v6  ;;  %v3493_v4 = vmax.f32 %v3477_v62, 0.0 }
 0x2c7   : > { %v3024_v63 = vadd.f32 %v2910_v38, %v2643_v41  ;;  %v3019_v41 = vadd.f32 %v2983_v48, %v7599_v9 }
 0x2c8   : > { %v3403_v39 = vadd.f32 %v3288_v31, %v3022_v44  ;;  %3566 = vmatmul.f32.gmra.mxu0 %v3493_v4 }
 0x2ca   : > { %v3457_v30 = vmul.f32 %v7686_v5, %v3403_v39  ;;  %v7858_v40 = vpop.f32.mrf.mxu2  ;;  %v7860_v34 = vpop.f32.mrf.mxu3 }
 0x2cb   : > { %v2989_v9 = vadd.f32 %v7860_v34, %v7858_v40 }
 0x2cc   : > { %v3479_v43 = vadd.f32 %v7693_v11, %v3457_v30 }
 0x2cd   : > { %v3249_v53 = vpop.f32.mrf.mxu0  ;;  %v3290_v23 = vpop.f32.mrf.mxu1 }
 0x2ce   : > { %v3291_v27 = vadd.f32 %v3290_v23, %v3249_v53  ;;  %v3495_v7 = vmax.f32 %v3479_v43, 0.0 }
 0x2d0   : > { %v3405_v42 = vadd.f32 %v3291_v27, %v3024_v63  ;;  %3569 = vmatmul.f32.gmra.mxu0 %v3495_v7 }
 0x2d2   : > { %v3459_v60 = vmul.f32 %v7686_v5, %v3405_v42  ;;  %v7864_v61 = vpop.f32.mrf.mxu2  ;;  %v7866_v49 = vpop.f32.mrf.mxu3 }
 0x2d4   : > { %v3481_v10 = vadd.f32 %v7693_v11, %v3459_v60  ;;  %v2974_v11 = vadd.f32 %v7730_v18, %v7728_v29 }
 0x2d6   : > { %v3497_v57 = vmax.f32 %v3481_v10, 0.0  ;;  %v3013_v62 = vadd.f32 %v2974_v11, %v7536_v2  ;;  %v2980_v2 = vadd.f32 %v7786_v50, %v7784_v17 }
 0x2d8   : > { %3572 = vmatmul.f32.gmra.mxu0 %v3497_v57  ;;  %v3017_v47 = vadd.f32 %v2980_v2, %v7578_v36  ;;  %v2986_v36 = vadd.f32 %v7840_v54, %v7838_v45 }
 0x2da   : > { %v3310_v32 = vpop.f32.mrf.mxu2  ;;  %v3351_v12 = vpop.f32.mrf.mxu3  ;;  %v3021_v7 = vadd.f32 %v2986_v36, %v7611_v24  ;;  %v2992_v24 = vadd.f32 %v7866_v49, %v7864_v61 }
 0x2db   : > { %v3352_v13 = vadd.f32 %v3351_v12, %v3310_v32  ;;  %v3023_v32 = vadd.f32 %v2989_v9, %v7640_v52 }
 0x2dd   : > { %v3392_v5 = vadd.f32 %v3352_v13, %v3011_v0 }
 0x2df   : > { %v3446_v16 = vmul.f32 %v7873_v21, %v3392_v5 }
 0x2e1   : > { %v3468_v20 = vadd.f32 %v7876_v15, %v3446_v16  ;;  %v3025_v16 = vadd.f32 %v2992_v24, %v7676_v56  ;;  %v4458_v56 = vld [vmem:[%s7953_s5] ss:$0 sm:$0xff] }
 0x2e2   : > { %v3313_v46 = vpop.f32.mrf.mxu2  ;;  %v3354_v14 = vpop.f32.mrf.mxu3 }
 0x2e3   : > { %v3484_v58 = vmax.f32 %v3468_v20, 0.0  ;;  %v3355_v55 = vadd.f32 %v3354_v14, %v3313_v46 }
 0x2e5   : > { %v3394_v6 = vadd.f32 %v3355_v55, %v3013_v62  ;;  %3592 = vmatmul.f32.vlgmr.msrb.gmra.mxu1 %v3484_v58 }
 0x2e7   : > { %v3448_v25 = vmul.f32 %v7873_v21, %v3394_v6 }
 0x2e9   : > { %v3470_v28 = vadd.f32 %v7876_v15, %v3448_v25 }
 0x2ea   : > { %v3316_v29 = vpop.f32.mrf.mxu2  ;;  %v3357_v18 = vpop.f32.mrf.mxu3 }
 0x2eb   : > { %v3358_v3 = vadd.f32 %v3357_v18, %v3316_v29  ;;  %v3486_v8 = vmax.f32 %v3470_v28, 0.0 }
 0x2ed   : > { %v3396_v44 = vadd.f32 %v3358_v3, %v3015_v51  ;;  %3595 = vmatmul.f32.gmra.mxu1 %v3486_v8 }
 0x2ef   : > { %v3450_v31 = vmul.f32 %v7873_v21, %v3396_v44 }
 0x2f1   : > { %v3472_v4 = vadd.f32 %v7876_v15, %v3450_v31 }
 0x2f2   : > { %v3319_v37 = vpop.f32.mrf.mxu2  ;;  %v3360_v22 = vpop.f32.mrf.mxu3 }
 0x2f3   : > { %v3361_v33 = vadd.f32 %v3360_v22, %v3319_v37  ;;  %v3488_v39 = vmax.f32 %v3472_v4, 0.0 }
 0x2f5   : > { %v3398_v26 = vadd.f32 %v3361_v33, %v3017_v47  ;;  %3598 = vmatmul.f32.gmra.mxu1 %v3488_v39 }
 0x2f7   : > { %v3452_v38 = vmul.f32 %v7873_v21, %v3398_v26 }
 0x2f9   : > { %v3474_v30 = vadd.f32 %v7876_v15, %v3452_v38 }
 0x2fa   : > { %v3322_v17 = vpop.f32.mrf.mxu2  ;;  %v3363_v50 = vpop.f32.mrf.mxu3 }
 0x2fb   : > { %v3364_v43 = vadd.f32 %v3363_v50, %v3322_v17  ;;  %v3490_v53 = vmax.f32 %v3474_v30, 0.0 }
 0x2fd   : > { %v3400_v23 = vadd.f32 %v3364_v43, %v3019_v41  ;;  %3601 = vmatmul.f32.gmra.mxu1 %v3490_v53 }
 0x2ff   : > { %v3454_v63 = vmul.f32 %v7873_v21, %v3400_v23 }
 0x301   : > { %v3476_v27 = vadd.f32 %v7876_v15, %v3454_v63 }
 0x302   : > { %v3325_v1 = vpop.f32.mrf.mxu2  ;;  %v3366_v59 = vpop.f32.mrf.mxu3 }
 0x303   : > { %v3367_v42 = vadd.f32 %v3366_v59, %v3325_v1  ;;  %v3492_v60 = vmax.f32 %v3476_v27, 0.0 }
 0x305   : > { %v3402_v10 = vadd.f32 %v3367_v42, %v3021_v7  ;;  %3604 = vmatmul.f32.gmra.mxu1 %v3492_v60 }
 0x307   : > { %v3456_v57 = vmul.f32 %v7873_v21, %v3402_v10 }
 0x309   : > { %v3478_v35 = vadd.f32 %v7876_v15, %v3456_v57 }
 0x30a   : > { %v3328_v45 = vpop.f32.mrf.mxu2  ;;  %v3369_v54 = vpop.f32.mrf.mxu3 }
 0x30b   : > { %v3370_v12 = vadd.f32 %v3369_v54, %v3328_v45  ;;  %v3494_v0 = vmax.f32 %v3478_v35, 0.0 }
 0x30d   : > { %v3404_v13 = vadd.f32 %v3370_v12, %v3023_v32  ;;  %3607 = vmatmul.f32.gmra.mxu1 %v3494_v0 }
 0x30f   : > { %v3458_v5 = vmul.f32 %v7873_v21, %v3404_v13 }
 0x311   : > { %v3480_v40 = vadd.f32 %v7876_v15, %v3458_v5 }
 0x312   : > { %v3331_v34 = vpop.f32.mrf.mxu2  ;;  %v3372_v11 = vpop.f32.mrf.mxu3 }
 0x313   : > { %v3373_v20 = vadd.f32 %v3372_v11, %v3331_v34  ;;  %v3496_v46 = vmax.f32 %v3480_v40, 0.0 }
 0x315   : > { %v3406_v52 = vadd.f32 %v3373_v20, %v3025_v16  ;;  %3610 = vmatmul.f32.gmra.mxu1 %v3496_v46 }
 0x317   : > { %v3460_v14 = vmul.f32 %v7873_v21, %v3406_v52 }
 0x319   : > { %v3482_v62 = vadd.f32 %v7876_v15, %v3460_v14 }
 0x31b   : > { %v3498_v58 = vmax.f32 %v3482_v62, 0.0 }
 0x31d   : > { %3613 = vmatmul.f32.gmra.mxu1 %v3498_v58  ;;  %v3552_v61 = vpop.f32.mrf.mxu0 }
 0x31e   : > { %v3553_v55 = vadd.f32 %v4458_v56, %v3552_v61 }
 0x325   : > { %v3555_v49 = vpop.f32.mrf.mxu0 }
 0x326   : > { %v3556_v19 = vadd.f32 %v4458_v56, %v3555_v49 }
 0x32d   : > { %v3558_v6 = vpop.f32.mrf.mxu0 }
 0x32e   : > { %v3559_v18 = vadd.f32 %v4458_v56, %v3558_v6 }
 0x335   : > { %v3561_v29 = vpop.f32.mrf.mxu0 }
 0x336   : > { %v3562_v44 = vadd.f32 %v4458_v56, %v3561_v29 }
 0x33d   : > { %v3564_v8 = vpop.f32.mrf.mxu0 }
 0x33e   : > { %v3565_v4 = vadd.f32 %v4458_v56, %v3564_v8 }
 0x345   : > { %v3567_v37 = vpop.f32.mrf.mxu0 }
 0x346   : > { %v3568_v33 = vadd.f32 %v4458_v56, %v3567_v37 }
 0x34d   : > { %v3570_v48 = vpop.f32.mrf.mxu0 }
 0x34e   : > { %v3571_v38 = vadd.f32 %v4458_v56, %v3570_v48 }
 0x355   : > { %v3573_v50 = vpop.f32.mrf.mxu0 }
 0x356   : > { %v3574_v41 = vadd.f32 %v4458_v56, %v3573_v50 }
 0x362   : > { %v3593_v21 = vpop.f32.mrf.mxu1 }
 0x363   : > { %v3594_v15 = vadd.f32 %v3593_v21, %v3553_v55 }
 0x365   : > { %3617 = vst [vmem:[%s7923_s14] sm:$0xff] %v3594_v15 }
 0x36a   : > { %v3596_v25 = vpop.f32.mrf.mxu1 }
 0x36b   : > { %v3597_v28 = vadd.f32 %v3596_v25, %v3556_v19 }
 0x36d   : > { %3618 = vst [vmem:[%s7923_s14 + $0x8] sm:$0xff] %v3597_v28 }
 0x372   : > { %v3599_v51 = vpop.f32.mrf.mxu1 }
 0x373   : > { %v3600_v3 = vadd.f32 %v3599_v51, %v3559_v18 }
 0x375   : > { %3619 = vst [vmem:[%s7923_s14 + $0x10] sm:$0xff] %v3600_v3 }
 0x37a   : > { %v3602_v2 = vpop.f32.mrf.mxu1 }
 0x37b   : > { %v3603_v31 = vadd.f32 %v3602_v2, %v3562_v44 }
 0x37d   : > { %3620 = vst [vmem:[%s7923_s14 + $0x18] sm:$0xff] %v3603_v31 }
 0x382   : > { %v3605_v22 = vpop.f32.mrf.mxu1 }
 0x383   : > { %v3606_v47 = vadd.f32 %v3605_v22, %v3565_v4 }
 0x385   : > { %3621 = vst [vmem:[%s7923_s14 + $0x20] sm:$0xff] %v3606_v47 }
 0x38a   : > { %v3608_v39 = vpop.f32.mrf.mxu1 }
 0x38b   : > { %v3609_v26 = vadd.f32 %v3608_v39, %v3568_v33 }
 0x38d   : > { %3622 = vst [vmem:[%s7923_s14 + $0x28] sm:$0xff] %v3609_v26 }
 0x392   : > { %v3611_v30 = vpop.f32.mrf.mxu1 }
 0x393   : > { %v3612_v17 = vadd.f32 %v3611_v30, %v3571_v38 }
 0x395   : > { %3623 = vst [vmem:[%s7923_s14 + $0x30] sm:$0xff] %v3612_v17 }
 0x39a   : > { %v3614_v43 = vpop.f32.mrf.mxu1 }
 0x39b   : > { %v3615_v53 = vadd.f32 %v3614_v43, %v3574_v41 }
 0x39d   : > { %3624 = vst [vmem:[%s7923_s14 + $0x38] sm:$0xff] %v3615_v53 }
 0x39e PF: > { %s16_s25 = sadd.s32 1, %s4497_s25   ;;  %s8119_s21 = smov %s4489_s23 }
 0x39f   : > { %p13_p7 = scmp.ge.s32.totalorder %s16_s25, 10   ;;  %s8120_s22 = smov %s4493_s24 }
 0x3a0   : > { %s8121_s23 = smov %s8124_s26  ;;  %s8122_s24 = smov %s8128_s27 }
 0x3a1   :  { %15 = sbr.rel (!%p13_p7) target bundleno = 3 (0x3), region = 85 }

</bundles_post_ra>
